<compile_context>
chip_gen: v6e
topology: v6e:2x2x1
jax: 0.10.0
libtpu: 0.0.40
codegen_flags: <defaults>
</compile_context>

<pallas_src>
import functools

import jax
import jax.numpy as jnp
from jax import lax
from jax.experimental import pallas as pl
from jax.experimental.pallas import tpu as pltpu


# ---------------------------------------------------------------------------
# Dense + bias + ReLU (fused, single block)
# ---------------------------------------------------------------------------
def _dense_relu_kernel(x_ref, w_ref, b_ref, o_ref):
    acc = jnp.dot(x_ref[...], w_ref[...], preferred_element_type=jnp.float32)
    o_ref[...] = jnp.maximum(acc + b_ref[...], 0.0).astype(o_ref.dtype)


def dense_relu(x, w, b):
    batch, din = x.shape
    dout = w.shape[1]
    return pl.pallas_call(
        _dense_relu_kernel,
        out_shape=jax.ShapeDtypeStruct((batch, dout), x.dtype),
        grid_spec=pltpu.PrefetchScalarGridSpec(
            num_scalar_prefetch=0,
            grid=(1,),
            in_specs=[
                pl.BlockSpec((batch, din), lambda i: (0, 0)),
                pl.BlockSpec((din, dout), lambda i: (0, 0)),
                pl.BlockSpec((1, dout), lambda i: (0, 0)),
            ],
            out_specs=pl.BlockSpec((batch, dout), lambda i: (0, 0)),
        ),
        compiler_params=pltpu.CompilerParams(
            dimension_semantics=("arbitrary",)),
    )(x, w, b.reshape(1, dout))


# ---------------------------------------------------------------------------
# ConvTranspose2d(k=5, s=2, p=2, output_padding=1) via parity decomposition.
#
# For output (oh, ow) = (2i+pr, 2j+pc) the transposed conv reduces to a 3x3-tap
# stride-1 convolution on the un-dilated, 1-padded input:
#     y[2i+pr, 2j+pc, co] = b[co] +
#         sum_{dh,dw in {-1,0,1}} xp[i+dh+1, j+dw+1, :] @ W[:, co, kh(pr,dh), kw(pc,dw)]
# with kh = 2-2dh (pr=0) / 3-2dh (pr=1)  (out-of-range k -> zero weight).
# The 4 parity groups are accumulated as 4*C2 output channels of ONE (9-tap)
# accumulation and interleaved in-kernel before the store.
# ---------------------------------------------------------------------------
def _convt_px_kernel(x_ref, w_ref, b_ref, o_ref, xp_ref, *,
                     hin, win, cin, c2, hb, relu,
                     clamp_lo, clamp_hi, clamp_from):
    r = pl.program_id(1)

    # Zero-padded (+1 each spatial side) input tile, built once per grid step
    # in VMEM scratch (replaces the old lax.pad HBM round trip).
    xp_ref[...] = jnp.zeros(xp_ref.shape, xp_ref.dtype)
    xp_ref[1:hin + 1, 1:win + 1, :] = x_ref[0]

    row0 = r * hb                              # first input row of this split
    acc = jnp.zeros((hb * win, 4 * c2), jnp.float32)

    # 9 taps, statically unrolled: each is a (hb*win, Cin) x (Cin, 4*C2) MXU
    # matmul accumulated in f32.  Channel order of the 4*C2 columns is
    # (row_parity, col_parity, co).
    for a in range(3):            # dh = a - 1
        for bw in range(3):       # dw = bw - 1
            tap = xp_ref[pl.ds(row0 + a, hb), bw:bw + win, :]
            acc = acc + jnp.dot(tap.reshape(hb * win, cin),
                                w_ref[a * 3 + bw],
                                preferred_element_type=jnp.float32)

    acc = acc + b_ref[...]
    if relu:
        acc = jnp.maximum(acc, 0.0)
    if clamp_lo is not None:
        # Clamp only the logvar half of each parity block (co >= clamp_from).
        col = lax.broadcasted_iota(jnp.int32, acc.shape, 1)
        acc = jnp.where((col % c2) >= clamp_from,
                        jnp.clip(acc, clamp_lo, clamp_hi), acc)

    # Pixel shuffle.  Column order (pc, co) already matches the flattened
    # output row layout, so only the row-parity interleave is needed; all
    # reshapes keep the minor (lane) dims untouched.
    even = acc[:, :2 * c2].reshape(hb, win, 2 * c2)     # output rows 2i
    odd = acc[:, 2 * c2:].reshape(hb, win, 2 * c2)      # output rows 2i+1
    inter = jnp.concatenate([even[:, None], odd[:, None]], axis=1)
    o_ref[0] = inter.reshape(2 * hb, win, 2 * c2).astype(o_ref.dtype)


def convt_pixelshuffle(x_nhwc, wbig, bbig, *, relu, clamp=None,
                       row_splits=None):
    """Fused ConvTranspose2d(k=5,s=2,p=2,op=1) [+ReLU / partial clamp].

    x_nhwc : (B, H, W, Cin)
    wbig   : (9, Cin, 4*C2) prepared tap weights (channel order pr, pc, co)
    bbig   : (1, 4*C2)
    returns: (B, 2H, 2W, C2)   NHWC
    """
    bsz, hin, win, cin = x_nhwc.shape
    c2 = wbig.shape[2] // 4
    if row_splits is None:
        row_splits = 2 if (hin >= 8 and hin % 2 == 0) else 1
    hb = hin // row_splits

    kern = functools.partial(
        _convt_px_kernel, hin=hin, win=win, cin=cin, c2=c2, hb=hb, relu=relu,
        clamp_lo=None if clamp is None else float(clamp[0]),
        clamp_hi=None if clamp is None else float(clamp[1]),
        clamp_from=0 if clamp is None else int(clamp[2]))

    out = pl.pallas_call(
        kern,
        out_shape=jax.ShapeDtypeStruct((bsz, 2 * hin, win, 2 * c2),
                                       x_nhwc.dtype),
        grid_spec=pltpu.PrefetchScalarGridSpec(
            num_scalar_prefetch=0,
            grid=(bsz, row_splits),
            in_specs=[
                pl.BlockSpec((1, hin, win, cin), lambda b, r: (b, 0, 0, 0)),
                pl.BlockSpec((9, cin, 4 * c2), lambda b, r: (0, 0, 0)),
                pl.BlockSpec((1, 4 * c2), lambda b, r: (0, 0)),
            ],
            out_specs=pl.BlockSpec((1, 2 * hb, win, 2 * c2),
                                   lambda b, r: (b, r, 0, 0)),
            scratch_shapes=[
                pltpu.VMEM((hin + 2, win + 2, cin), x_nhwc.dtype)],
        ),
        compiler_params=pltpu.CompilerParams(
            dimension_semantics=("parallel", "parallel")),
    )(x_nhwc, wbig, bbig)

    # Memory-order-preserving (free) reshape to NHWC at doubled resolution.
    return out.reshape(bsz, 2 * hin, 2 * win, c2)


# ---------------------------------------------------------------------------
# One-time parameter preparation (done at setup, NOT in the forward path)
# ---------------------------------------------------------------------------
def _prep_convt_weight(w, b):
    """PyTorch ConvTranspose2d weight (Cin, Cout, 5, 5) -> (9, Cin, 4*Cout)."""
    cin, cout = w.shape[0], w.shape[1]
    wext = jnp.pad(w, ((0, 0), (0, 0), (0, 1), (0, 1)))   # index 5 == zero tap
    ksel = jnp.array([[4, 2, 0], [5, 3, 1]], dtype=jnp.int32)  # [parity, d+1]
    g = wext[:, :, ksel, :]          # (cin, cout, 2, 3, 6)   dims (ci,co,pr,a,kw)
    g = g[:, :, :, :, ksel]          # (cin, cout, 2, 3, 2, 3) dims (ci,co,pr,a,pc,bw)
    g = g.transpose(3, 5, 0, 2, 4, 1)            # (a, bw, ci, pr, pc, co)
    wbig = g.reshape(9, cin, 4 * cout)
    bbig = jnp.tile(b, 4).reshape(1, 4 * cout)
    return wbig, bbig


def prepare_params(raw):
    """Convert PyTorch-layout params to kernel-ready layout (run once)."""
    din, d16h = raw["dense_w"].shape
    hidden = d16h // 16
    prep = {}
    # Permute dense columns so the output is already (4, 4, hidden) NHWC.
    prep["dense_w"] = (raw["dense_w"].reshape(din, hidden, 4, 4)
                       .transpose(0, 2, 3, 1).reshape(din, 16 * hidden))
    prep["dense_b"] = (raw["dense_b"].reshape(hidden, 4, 4)
                       .transpose(1, 2, 0).reshape(16 * hidden))
    for i in range(3):
        prep[f"conv{i}_w"], prep[f"conv{i}_b"] = _prep_convt_weight(
            raw[f"conv{i}_w"], raw[f"conv{i}_b"])
    # Fuse mean / logvar heads along Cout.
    head_w = jnp.concatenate([raw["mean_w"], raw["logvar_w"]], axis=1)
    head_b = jnp.concatenate([raw["mean_b"], raw["logvar_b"]])
    prep["head_w"], prep["head_b"] = _prep_convt_weight(head_w, head_b)
    return prep


# ---------------------------------------------------------------------------
# Full Decoder forward (Pallas): 5 pallas_calls, free reshapes in between.
# ---------------------------------------------------------------------------
@jax.jit
def decoder_forward(x, prep):
    bsz = x.shape[0]
    hidden = prep["dense_w"].shape[1] // 16
    cimg = prep["head_w"].shape[2] // 8        # head channels = 4 * (2*cimg)

    h = dense_relu(x, prep["dense_w"], prep["dense_b"])    # (B, 16*hidden)
    feat = h.reshape(bsz, 4, 4, hidden)                    # NHWC, free reshape

    for i in range(3):                                     # shared trunk
        feat = convt_pixelshuffle(feat, prep[f"conv{i}_w"],
                                  prep[f"conv{i}_b"], relu=True)

    heads = convt_pixelshuffle(feat, prep["head_w"], prep["head_b"],
                               relu=False, clamp=(-10.0, 10.0, cimg))

    # Final channel split + NCHW layout to match the PyTorch module output.
    mean = heads[..., :cimg].transpose(0, 3, 1, 2)
    logvar = heads[..., cimg:].transpose(0, 3, 1, 2)
    return mean, logvar


# ---------------------------------------------------------------------------
# Pure-JAX reference (independent formulation via lax.conv_general_dilated)
# ---------------------------------------------------------------------------
def _conv_transpose_ref(x_nchw, w, b):
    out = lax.conv_general_dilated(
        x_nchw,
        jnp.flip(w, (2, 3)).transpose(1, 0, 2, 3),     # OIHW, flipped
        window_strides=(1, 1),
        padding=((2, 3), (2, 3)),
        lhs_dilation=(2, 2),
        dimension_numbers=("NCHW", "OIHW", "NCHW"),
        precision=lax.Precision.HIGHEST,
    )
    return out + b.reshape(1, -1, 1, 1)


def decoder_ref(x, params):
    bsz = x.shape[0]
    hidden = params["dense_w"].shape[1] // 16
    h = jnp.maximum(
        jnp.dot(x, params["dense_w"], precision=lax.Precision.HIGHEST)
        + params["dense_b"], 0.0)
    feat = h.reshape(bsz, hidden, 4, 4)
    for i in range(3):
        feat = jnp.maximum(
            _conv_transpose_ref(feat, params[f"conv{i}_w"],
                                params[f"conv{i}_b"]), 0.0)
    mean = _conv_transpose_ref(feat, params["mean_w"], params["mean_b"])
    logvar = jnp.clip(
        _conv_transpose_ref(feat, params["logvar_w"], params["logvar_b"]),
        -10.0, 10.0)
    return mean, logvar


# ---------------------------------------------------------------------------
if __name__ == "__main__":
    key = jax.random.PRNGKey(0)
    keys = jax.random.split(key, 16)

    batch = 2
    input_dimension = 32
    hidden_dimension = 32                 # small test size (module default 128)
    out_channels = 3                      # output_shape = (3, 64, 64)

    def init_w(k, shape, fan_in):
        return jax.random.normal(k, shape, dtype=jnp.float32) / jnp.sqrt(float(fan_in))

    # Raw params in PyTorch layout (dense_w stored as (din, dout) for x @ W).
    raw = {}
    raw["dense_w"] = init_w(keys[0], (input_dimension, hidden_dimension * 16),
                            input_dimension)
    raw["dense_b"] = 0.1 * jax.random.normal(keys[1], (hidden_dimension * 16,),
                                             dtype=jnp.float32)

    chans = [hidden_dimension, hidden_dimension // 2,
             hidden_dimension // 4, hidden_dimension // 8]
    ki = 2
    for i in range(3):
        cin, cout = chans[i], chans[i + 1]
        raw[f"conv{i}_w"] = init_w(keys[ki], (cin, cout, 5, 5), cin * 25); ki += 1
        raw[f"conv{i}_b"] = 0.1 * jax.random.normal(keys[ki], (cout,),
                                                    dtype=jnp.float32); ki += 1
    for name in ("mean", "logvar"):
        raw[f"{name}_w"] = init_w(keys[ki], (chans[3], out_channels, 5, 5),
                                  chans[3] * 25); ki += 1
        raw[f"{name}_b"] = 0.1 * jax.random.normal(keys[ki], (out_channels,),
                                                   dtype=jnp.float32); ki += 1

    x = jax.random.normal(keys[ki], (batch, input_dimension), dtype=jnp.float32)

    prep = prepare_params(raw)            # one-time weight re-layout

    mean, logvar = decoder_forward(x, prep)
    mean = jax.block_until_ready(mean)
    logvar = jax.block_until_ready(logvar)

    assert mean.shape == (batch, out_channels, 64, 64), mean.shape
    assert logvar.shape == (batch, out_channels, 64, 64), logvar.shape

    mean_ref, logvar_ref = decoder_ref(x, raw)
    assert jnp.allclose(mean, mean_ref, atol=2e-3, rtol=2e-3), \
        "mean mismatch vs reference"
    assert jnp.allclose(logvar, logvar_ref, atol=2e-3, rtol=2e-3), \
        "logvar mismatch vs reference"

    print("KERNEL_OK")
</pallas_src>

<mosaic_0001>
module attributes {stable_mosaic.version = 11 : i64} {
  func.func @_convt_px_kernel(%arg0: i32, %arg1: i32, %arg2: memref<1x4x4x32xf32, #tpu.memory_space<vmem>>, %arg3: memref<9x32x64xf32, #tpu.memory_space<vmem>>, %arg4: memref<1x64xf32, #tpu.memory_space<vmem>>, %arg5: memref<1x8x4x32xf32, #tpu.memory_space<vmem>>, %arg6: memref<6x6x32xf32, #tpu.memory_space<vmem>>) attributes {dimension_semantics = [#tpu.dimension_semantics<parallel>, #tpu.dimension_semantics<parallel>], iteration_bounds = array<i64: 2, 1>, scalar_prefetch = 0 : i64, scratch_operands = 1 : i64, tpu.core_type = #tpu.core_type<tc>, window_params = [{transform_indices = @transform_0, window_bounds = array<i64: 1, 4, 4, 32>}, {pipeline_mode = #tpu.pipeline_mode<synchronous>, transform_indices = @transform_1, window_bounds = array<i64: 9, 32, 64>}, {pipeline_mode = #tpu.pipeline_mode<synchronous>, transform_indices = @transform_2, window_bounds = array<i64: 1, 64>}, {transform_indices = @transform_3, window_bounds = array<i64: 1, 8, 4, 32>}]} {
    %cst = arith.constant 0.000000e+00 : f32
    %0 = vector.broadcast %cst : f32 to vector<6x6x32xf32>
    %c0 = arith.constant 0 : index
    %c0_0 = arith.constant 0 : index
    %c0_1 = arith.constant 0 : index
    %1 = vector.load %arg6[%c0, %c0_0, %c0_1] : memref<6x6x32xf32, #tpu.memory_space<vmem>>, vector<6x6x32xf32>
    tpu.vector_store %arg6[%c0, %c0_0, %c0_1], %0 {strides = array<i32>} : memref<6x6x32xf32, #tpu.memory_space<vmem>>, vector<6x6x32xf32>,
    %c0_2 = arith.constant 0 : index
    %c0_3 = arith.constant 0 : index
    %c0_4 = arith.constant 0 : index
    %c0_5 = arith.constant 0 : index
    %2 = vector.load %arg2[%c0_2, %c0_3, %c0_4, %c0_5] : memref<1x4x4x32xf32, #tpu.memory_space<vmem>>, vector<1x4x4x32xf32>
    %3 = vector.shape_cast %2 : vector<1x4x4x32xf32> to vector<4x4x32xf32>
    %c1 = arith.constant 1 : index
    %c1_6 = arith.constant 1 : index
    %c0_7 = arith.constant 0 : index
    %4 = vector.load %arg6[%c1, %c1_6, %c0_7] : memref<6x6x32xf32, #tpu.memory_space<vmem>>, vector<4x4x32xf32>
    tpu.vector_store %arg6[%c1, %c1_6, %c0_7], %3 {strides = array<i32>} : memref<6x6x32xf32, #tpu.memory_space<vmem>>, vector<4x4x32xf32>,
    %c4_i32 = arith.constant 4 : i32
    %5 = arith.muli %arg1, %c4_i32 : i32
    %cst_8 = arith.constant 0.000000e+00 : f32
    %6 = vector.broadcast %cst_8 : f32 to vector<16x64xf32>
    %c0_i32 = arith.constant 0 : i32
    %7 = arith.addi %5, %c0_i32 : i32
    %8 = arith.index_cast %7 : i32 to index
    %c0_9 = arith.constant 0 : index
    %c0_10 = arith.constant 0 : index
    %9 = vector.load %arg6[%8, %c0_9, %c0_10] : memref<6x6x32xf32, #tpu.memory_space<vmem>>, vector<4x4x32xf32>
    %10 = vector.shape_cast %9 : vector<4x4x32xf32> to vector<16x32xf32>
    %c0_11 = arith.constant 0 : index
    %c0_12 = arith.constant 0 : index
    %c0_13 = arith.constant 0 : index
    %11 = vector.load %arg3[%c0_11, %c0_12, %c0_13] : memref<9x32x64xf32, #tpu.memory_space<vmem>>, vector<1x32x64xf32>
    %12 = vector.shape_cast %11 : vector<1x32x64xf32> to vector<32x64xf32>
    %cst_14 = arith.constant dense<0.000000e+00> : vector<16x64xf32>
    %13 = tpu.matmul %10, %12, %cst_14 {dimension_numbers = #tpu.dot_dimension_numbers<[1], [0], [0], [1], [0, 0, 1, 1], [], []>} : vector<16x32xf32>, vector<32x64xf32>, vector<16x64xf32> -> vector<16x64xf32>
    %14 = arith.addf %6, %13 : vector<16x64xf32>
    %c0_i32_15 = arith.constant 0 : i32
    %15 = arith.addi %5, %c0_i32_15 : i32
    %16 = arith.index_cast %15 : i32 to index
    %c1_16 = arith.constant 1 : index
    %c0_17 = arith.constant 0 : index
    %17 = vector.load %arg6[%16, %c1_16, %c0_17] : memref<6x6x32xf32, #tpu.memory_space<vmem>>, vector<4x4x32xf32>
    %18 = vector.shape_cast %17 : vector<4x4x32xf32> to vector<16x32xf32>
    %c1_18 = arith.constant 1 : index
    %c0_19 = arith.constant 0 : index
    %c0_20 = arith.constant 0 : index
    %19 = vector.load %arg3[%c1_18, %c0_19, %c0_20] : memref<9x32x64xf32, #tpu.memory_space<vmem>>, vector<1x32x64xf32>
    %20 = vector.shape_cast %19 : vector<1x32x64xf32> to vector<32x64xf32>
    %cst_21 = arith.constant dense<0.000000e+00> : vector<16x64xf32>
    %21 = tpu.matmul %18, %20, %cst_21 {dimension_numbers = #tpu.dot_dimension_numbers<[1], [0], [0], [1], [0, 0, 1, 1], [], []>} : vector<16x32xf32>, vector<32x64xf32>, vector<16x64xf32> -> vector<16x64xf32>
    %22 = arith.addf %14, %21 : vector<16x64xf32>
    %c0_i32_22 = arith.constant 0 : i32
    %23 = arith.addi %5, %c0_i32_22 : i32
    %24 = arith.index_cast %23 : i32 to index
    %c2 = arith.constant 2 : index
    %c0_23 = arith.constant 0 : index
    %25 = vector.load %arg6[%24, %c2, %c0_23] : memref<6x6x32xf32, #tpu.memory_space<vmem>>, vector<4x4x32xf32>
    %26 = vector.shape_cast %25 : vector<4x4x32xf32> to vector<16x32xf32>
    %c2_24 = arith.constant 2 : index
    %c0_25 = arith.constant 0 : index
    %c0_26 = arith.constant 0 : index
    %27 = vector.load %arg3[%c2_24, %c0_25, %c0_26] : memref<9x32x64xf32, #tpu.memory_space<vmem>>, vector<1x32x64xf32>
    %28 = vector.shape_cast %27 : vector<1x32x64xf32> to vector<32x64xf32>
    %cst_27 = arith.constant dense<0.000000e+00> : vector<16x64xf32>
    %29 = tpu.matmul %26, %28, %cst_27 {dimension_numbers = #tpu.dot_dimension_numbers<[1], [0], [0], [1], [0, 0, 1, 1], [], []>} : vector<16x32xf32>, vector<32x64xf32>, vector<16x64xf32> -> vector<16x64xf32>
    %30 = arith.addf %22, %29 : vector<16x64xf32>
    %c1_i32 = arith.constant 1 : i32
    %31 = arith.addi %5, %c1_i32 : i32
    %32 = arith.index_cast %31 : i32 to index
    %c0_28 = arith.constant 0 : index
    %c0_29 = arith.constant 0 : index
    %33 = vector.load %arg6[%32, %c0_28, %c0_29] : memref<6x6x32xf32, #tpu.memory_space<vmem>>, vector<4x4x32xf32>
    %34 = vector.shape_cast %33 : vector<4x4x32xf32> to vector<16x32xf32>
    %c3 = arith.constant 3 : index
    %c0_30 = arith.constant 0 : index
    %c0_31 = arith.constant 0 : index
    %35 = vector.load %arg3[%c3, %c0_30, %c0_31] : memref<9x32x64xf32, #tpu.memory_space<vmem>>, vector<1x32x64xf32>
    %36 = vector.shape_cast %35 : vector<1x32x64xf32> to vector<32x64xf32>
    %cst_32 = arith.constant dense<0.000000e+00> : vector<16x64xf32>
    %37 = tpu.matmul %34, %36, %cst_32 {dimension_numbers = #tpu.dot_dimension_numbers<[1], [0], [0], [1], [0, 0, 1, 1], [], []>} : vector<16x32xf32>, vector<32x64xf32>, vector<16x64xf32> -> vector<16x64xf32>
    %38 = arith.addf %30, %37 : vector<16x64xf32>
    %c1_i32_33 = arith.constant 1 : i32
    %39 = arith.addi %5, %c1_i32_33 : i32
    %40 = arith.index_cast %39 : i32 to index
    %c1_34 = arith.constant 1 : index
    %c0_35 = arith.constant 0 : index
    %41 = vector.load %arg6[%40, %c1_34, %c0_35] : memref<6x6x32xf32, #tpu.memory_space<vmem>>, vector<4x4x32xf32>
    %42 = vector.shape_cast %41 : vector<4x4x32xf32> to vector<16x32xf32>
    %c4 = arith.constant 4 : index
    %c0_36 = arith.constant 0 : index
    %c0_37 = arith.constant 0 : index
    %43 = vector.load %arg3[%c4, %c0_36, %c0_37] : memref<9x32x64xf32, #tpu.memory_space<vmem>>, vector<1x32x64xf32>
    %44 = vector.shape_cast %43 : vector<1x32x64xf32> to vector<32x64xf32>
    %cst_38 = arith.constant dense<0.000000e+00> : vector<16x64xf32>
    %45 = tpu.matmul %42, %44, %cst_38 {dimension_numbers = #tpu.dot_dimension_numbers<[1], [0], [0], [1], [0, 0, 1, 1], [], []>} : vector<16x32xf32>, vector<32x64xf32>, vector<16x64xf32> -> vector<16x64xf32>
    %46 = arith.addf %38, %45 : vector<16x64xf32>
    %c1_i32_39 = arith.constant 1 : i32
    %47 = arith.addi %5, %c1_i32_39 : i32
    %48 = arith.index_cast %47 : i32 to index
    %c2_40 = arith.constant 2 : index
    %c0_41 = arith.constant 0 : index
    %49 = vector.load %arg6[%48, %c2_40, %c0_41] : memref<6x6x32xf32, #tpu.memory_space<vmem>>, vector<4x4x32xf32>
    %50 = vector.shape_cast %49 : vector<4x4x32xf32> to vector<16x32xf32>
    %c5 = arith.constant 5 : index
    %c0_42 = arith.constant 0 : index
    %c0_43 = arith.constant 0 : index
    %51 = vector.load %arg3[%c5, %c0_42, %c0_43] : memref<9x32x64xf32, #tpu.memory_space<vmem>>, vector<1x32x64xf32>
    %52 = vector.shape_cast %51 : vector<1x32x64xf32> to vector<32x64xf32>
    %cst_44 = arith.constant dense<0.000000e+00> : vector<16x64xf32>
    %53 = tpu.matmul %50, %52, %cst_44 {dimension_numbers = #tpu.dot_dimension_numbers<[1], [0], [0], [1], [0, 0, 1, 1], [], []>} : vector<16x32xf32>, vector<32x64xf32>, vector<16x64xf32> -> vector<16x64xf32>
    %54 = arith.addf %46, %53 : vector<16x64xf32>
    %c2_i32 = arith.constant 2 : i32
    %55 = arith.addi %5, %c2_i32 : i32
    %56 = arith.index_cast %55 : i32 to index
    %c0_45 = arith.constant 0 : index
    %c0_46 = arith.constant 0 : index
    %57 = vector.load %arg6[%56, %c0_45, %c0_46] : memref<6x6x32xf32, #tpu.memory_space<vmem>>, vector<4x4x32xf32>
    %58 = vector.shape_cast %57 : vector<4x4x32xf32> to vector<16x32xf32>
    %c6 = arith.constant 6 : index
    %c0_47 = arith.constant 0 : index
    %c0_48 = arith.constant 0 : index
    %59 = vector.load %arg3[%c6, %c0_47, %c0_48] : memref<9x32x64xf32, #tpu.memory_space<vmem>>, vector<1x32x64xf32>
    %60 = vector.shape_cast %59 : vector<1x32x64xf32> to vector<32x64xf32>
    %cst_49 = arith.constant dense<0.000000e+00> : vector<16x64xf32>
    %61 = tpu.matmul %58, %60, %cst_49 {dimension_numbers = #tpu.dot_dimension_numbers<[1], [0], [0], [1], [0, 0, 1, 1], [], []>} : vector<16x32xf32>, vector<32x64xf32>, vector<16x64xf32> -> vector<16x64xf32>
    %62 = arith.addf %54, %61 : vector<16x64xf32>
    %c2_i32_50 = arith.constant 2 : i32
    %63 = arith.addi %5, %c2_i32_50 : i32
    %64 = arith.index_cast %63 : i32 to index
    %c1_51 = arith.constant 1 : index
    %c0_52 = arith.constant 0 : index
    %65 = vector.load %arg6[%64, %c1_51, %c0_52] : memref<6x6x32xf32, #tpu.memory_space<vmem>>, vector<4x4x32xf32>
    %66 = vector.shape_cast %65 : vector<4x4x32xf32> to vector<16x32xf32>
    %c7 = arith.constant 7 : index
    %c0_53 = arith.constant 0 : index
    %c0_54 = arith.constant 0 : index
    %67 = vector.load %arg3[%c7, %c0_53, %c0_54] : memref<9x32x64xf32, #tpu.memory_space<vmem>>, vector<1x32x64xf32>
    %68 = vector.shape_cast %67 : vector<1x32x64xf32> to vector<32x64xf32>
    %cst_55 = arith.constant dense<0.000000e+00> : vector<16x64xf32>
    %69 = tpu.matmul %66, %68, %cst_55 {dimension_numbers = #tpu.dot_dimension_numbers<[1], [0], [0], [1], [0, 0, 1, 1], [], []>} : vector<16x32xf32>, vector<32x64xf32>, vector<16x64xf32> -> vector<16x64xf32>
    %70 = arith.addf %62, %69 : vector<16x64xf32>
    %c2_i32_56 = arith.constant 2 : i32
    %71 = arith.addi %5, %c2_i32_56 : i32
    %72 = arith.index_cast %71 : i32 to index
    %c2_57 = arith.constant 2 : index
    %c0_58 = arith.constant 0 : index
    %73 = vector.load %arg6[%72, %c2_57, %c0_58] : memref<6x6x32xf32, #tpu.memory_space<vmem>>, vector<4x4x32xf32>
    %74 = vector.shape_cast %73 : vector<4x4x32xf32> to vector<16x32xf32>
    %c8 = arith.constant 8 : index
    %c0_59 = arith.constant 0 : index
    %c0_60 = arith.constant 0 : index
    %75 = vector.load %arg3[%c8, %c0_59, %c0_60] : memref<9x32x64xf32, #tpu.memory_space<vmem>>, vector<1x32x64xf32>
    %76 = vector.shape_cast %75 : vector<1x32x64xf32> to vector<32x64xf32>
    %cst_61 = arith.constant dense<0.000000e+00> : vector<16x64xf32>
    %77 = tpu.matmul %74, %76, %cst_61 {dimension_numbers = #tpu.dot_dimension_numbers<[1], [0], [0], [1], [0, 0, 1, 1], [], []>} : vector<16x32xf32>, vector<32x64xf32>, vector<16x64xf32> -> vector<16x64xf32>
    %78 = arith.addf %70, %77 : vector<16x64xf32>
    %c0_62 = arith.constant 0 : index
    %c0_63 = arith.constant 0 : index
    %79 = vector.load %arg4[%c0_62, %c0_63] : memref<1x64xf32, #tpu.memory_space<vmem>>, vector<1x64xf32>
    %80 = vector.broadcast %79 : vector<1x64xf32> to vector<16x64xf32>
    %81 = arith.addf %78, %80 : vector<16x64xf32>
    %cst_64 = arith.constant 0.000000e+00 : f32
    %82 = vector.broadcast %cst_64 : f32 to vector<16x64xf32>
    %83 = arith.maximumf %81, %82 : vector<16x64xf32>
    %84 = vector.extract_strided_slice %83 {offsets = [0, 0], sizes = [16, 32], strides = [1, 1]} : vector<16x64xf32> to vector<16x32xf32>
    %85 = vector.shape_cast %84 : vector<16x32xf32> to vector<4x4x32xf32>
    %86 = vector.extract_strided_slice %83 {offsets = [0, 32], sizes = [16, 32], strides = [1, 1]} : vector<16x64xf32> to vector<16x32xf32>
    %87 = vector.shape_cast %86 : vector<16x32xf32> to vector<4x4x32xf32>
    %88 = vector.shape_cast %85 : vector<4x4x32xf32> to vector<4x1x4x32xf32>
    %89 = vector.shape_cast %87 : vector<4x4x32xf32> to vector<4x1x4x32xf32>
    %90 = tpu.concatenate %88, %89 in 1 : vector<4x1x4x32xf32>, vector<4x1x4x32xf32> -> vector<4x2x4x32xf32>
    %91 = vector.shape_cast %90 : vector<4x2x4x32xf32> to vector<8x4x32xf32>
    %c0_65 = arith.constant 0 : index
    %c0_66 = arith.constant 0 : index
    %c0_67 = arith.constant 0 : index
    %c0_68 = arith.constant 0 : index
    %92 = vector.load %arg5[%c0_65, %c0_66, %c0_67, %c0_68] : memref<1x8x4x32xf32, #tpu.memory_space<vmem>>, vector<1x8x4x32xf32>
    %93 = vector.shape_cast %92 : vector<1x8x4x32xf32> to vector<8x4x32xf32>
    %94 = vector.shape_cast %91 : vector<8x4x32xf32> to vector<1x8x4x32xf32>
    tpu.vector_store %arg5[%c0_65, %c0_66, %c0_67, %c0_68], %94 {strides = array<i32>} : memref<1x8x4x32xf32, #tpu.memory_space<vmem>>, vector<1x8x4x32xf32>,
    return
  }
  func.func @transform_0(%arg0: i32, %arg1: i32) -> (i32, i32, i32, i32) {
    %c0_i32 = arith.constant 0 : i32
    %c0_i32_0 = arith.constant 0 : i32
    %c0_i32_1 = arith.constant 0 : i32
    %c0_i32_2 = arith.constant 0 : i32
    return %arg0, %c0_i32, %c0_i32_0, %c0_i32_1 : i32, i32, i32, i32
  }
  func.func @transform_1(%arg0: i32, %arg1: i32) -> (i32, i32, i32) {
    %c0_i32 = arith.constant 0 : i32
    %c0_i32_0 = arith.constant 0 : i32
    %c0_i32_1 = arith.constant 0 : i32
    %c0_i32_2 = arith.constant 0 : i32
    return %c0_i32, %c0_i32_0, %c0_i32_1 : i32, i32, i32
  }
  func.func @transform_2(%arg0: i32, %arg1: i32) -> (i32, i32) {
    %c0_i32 = arith.constant 0 : i32
    %c0_i32_0 = arith.constant 0 : i32
    %c0_i32_1 = arith.constant 0 : i32
    return %c0_i32, %c0_i32_0 : i32, i32
  }
  func.func @transform_3(%arg0: i32, %arg1: i32) -> (i32, i32, i32, i32) {
    %c0_i32 = arith.constant 0 : i32
    %c0_i32_0 = arith.constant 0 : i32
    %c0_i32_1 = arith.constant 0 : i32
    return %arg0, %arg1, %c0_i32, %c0_i32_0 : i32, i32, i32, i32
  }
}

module attributes {stable_mosaic.version = 11 : i64} {
  func.func @_dense_relu_kernel(%arg0: i32, %arg1: memref<2x32xf32, #tpu.memory_space<vmem>>, %arg2: memref<32x512xf32, #tpu.memory_space<vmem>>, %arg3: memref<1x512xf32, #tpu.memory_space<vmem>>, %arg4: memref<2x512xf32, #tpu.memory_space<vmem>>) attributes {dimension_semantics = [#tpu.dimension_semantics<arbitrary>], iteration_bounds = array<i64: 1>, scalar_prefetch = 0 : i64, scratch_operands = 0 : i64, tpu.core_type = #tpu.core_type<tc>, window_params = [{pipeline_mode = #tpu.pipeline_mode<synchronous>, transform_indices = @transform_0, window_bounds = array<i64: 2, 32>}, {pipeline_mode = #tpu.pipeline_mode<synchronous>, transform_indices = @transform_1, window_bounds = array<i64: 32, 512>}, {pipeline_mode = #tpu.pipeline_mode<synchronous>, transform_indices = @transform_2, window_bounds = array<i64: 1, 512>}, {pipeline_mode = #tpu.pipeline_mode<synchronous>, transform_indices = @transform_3, window_bounds = array<i64: 2, 512>}]} {
    %c0 = arith.constant 0 : index
    %c0_0 = arith.constant 0 : index
    %0 = vector.load %arg1[%c0, %c0_0] : memref<2x32xf32, #tpu.memory_space<vmem>>, vector<2x32xf32>
    %c0_1 = arith.constant 0 : index
    %c0_2 = arith.constant 0 : index
    %1 = vector.load %arg2[%c0_1, %c0_2] : memref<32x512xf32, #tpu.memory_space<vmem>>, vector<32x512xf32>
    %cst = arith.constant dense<0.000000e+00> : vector<2x512xf32>
    %2 = tpu.matmul %0, %1, %cst {dimension_numbers = #tpu.dot_dimension_numbers<[1], [0], [0], [1], [0, 0, 1, 1], [], []>} : vector<2x32xf32>, vector<32x512xf32>, vector<2x512xf32> -> vector<2x512xf32>
    %c0_3 = arith.constant 0 : index
    %c0_4 = arith.constant 0 : index
    %3 = vector.load %arg3[%c0_3, %c0_4] : memref<1x512xf32, #tpu.memory_space<vmem>>, vector<1x512xf32>
    %4 = vector.broadcast %3 : vector<1x512xf32> to vector<2x512xf32>
    %5 = arith.addf %2, %4 : vector<2x512xf32>
    %cst_5 = arith.constant 0.000000e+00 : f32
    %6 = vector.broadcast %cst_5 : f32 to vector<2x512xf32>
    %7 = arith.maximumf %5, %6 : vector<2x512xf32>
    %c0_6 = arith.constant 0 : index
    %c0_7 = arith.constant 0 : index
    %8 = vector.load %arg4[%c0_6, %c0_7] : memref<2x512xf32, #tpu.memory_space<vmem>>, vector<2x512xf32>
    tpu.vector_store %arg4[%c0_6, %c0_7], %7 {strides = array<i32>} : memref<2x512xf32, #tpu.memory_space<vmem>>, vector<2x512xf32>,
    return
  }
  func.func @transform_0(%arg0: i32) -> (i32, i32) {
    %c0_i32 = arith.constant 0 : i32
    %c0_i32_0 = arith.constant 0 : i32
    %c0_i32_1 = arith.constant 0 : i32
    return %c0_i32, %c0_i32_0 : i32, i32
  }
  func.func @transform_1(%arg0: i32) -> (i32, i32) {
    %c0_i32 = arith.constant 0 : i32
    %c0_i32_0 = arith.constant 0 : i32
    %c0_i32_1 = arith.constant 0 : i32
    return %c0_i32, %c0_i32_0 : i32, i32
  }
  func.func @transform_2(%arg0: i32) -> (i32, i32) {
    %c0_i32 = arith.constant 0 : i32
    %c0_i32_0 = arith.constant 0 : i32
    %c0_i32_1 = arith.constant 0 : i32
    return %c0_i32, %c0_i32_0 : i32, i32
  }
  func.func @transform_3(%arg0: i32) -> (i32, i32) {
    %c0_i32 = arith.constant 0 : i32
    %c0_i32_0 = arith.constant 0 : i32
    %c0_i32_1 = arith.constant 0 : i32
    return %c0_i32, %c0_i32_0 : i32, i32
  }
}

module attributes {stable_mosaic.version = 11 : i64} {
  func.func @_convt_px_kernel(%arg0: i32, %arg1: i32, %arg2: memref<1x8x8x16xf32, #tpu.memory_space<vmem>>, %arg3: memref<9x16x32xf32, #tpu.memory_space<vmem>>, %arg4: memref<1x32xf32, #tpu.memory_space<vmem>>, %arg5: memref<1x8x8x16xf32, #tpu.memory_space<vmem>>, %arg6: memref<10x10x16xf32, #tpu.memory_space<vmem>>) attributes {dimension_semantics = [#tpu.dimension_semantics<parallel>, #tpu.dimension_semantics<parallel>], iteration_bounds = array<i64: 2, 2>, scalar_prefetch = 0 : i64, scratch_operands = 1 : i64, tpu.core_type = #tpu.core_type<tc>, window_params = [{transform_indices = @transform_0, window_bounds = array<i64: 1, 8, 8, 16>}, {pipeline_mode = #tpu.pipeline_mode<synchronous>, transform_indices = @transform_1, window_bounds = array<i64: 9, 16, 32>}, {pipeline_mode = #tpu.pipeline_mode<synchronous>, transform_indices = @transform_2, window_bounds = array<i64: 1, 32>}, {transform_indices = @transform_3, window_bounds = array<i64: 1, 8, 8, 16>}]} {
    %cst = arith.constant 0.000000e+00 : f32
    %0 = vector.broadcast %cst : f32 to vector<10x10x16xf32>
    %c0 = arith.constant 0 : index
    %c0_0 = arith.constant 0 : index
    %c0_1 = arith.constant 0 : index
    %1 = vector.load %arg6[%c0, %c0_0, %c0_1] : memref<10x10x16xf32, #tpu.memory_space<vmem>>, vector<10x10x16xf32>
    tpu.vector_store %arg6[%c0, %c0_0, %c0_1], %0 {strides = array<i32>} : memref<10x10x16xf32, #tpu.memory_space<vmem>>, vector<10x10x16xf32>,
    %c0_2 = arith.constant 0 : index
    %c0_3 = arith.constant 0 : index
    %c0_4 = arith.constant 0 : index
    %c0_5 = arith.constant 0 : index
    %2 = vector.load %arg2[%c0_2, %c0_3, %c0_4, %c0_5] : memref<1x8x8x16xf32, #tpu.memory_space<vmem>>, vector<1x8x8x16xf32>
    %3 = vector.shape_cast %2 : vector<1x8x8x16xf32> to vector<8x8x16xf32>
    %c1 = arith.constant 1 : index
    %c1_6 = arith.constant 1 : index
    %c0_7 = arith.constant 0 : index
    %4 = vector.load %arg6[%c1, %c1_6, %c0_7] : memref<10x10x16xf32, #tpu.memory_space<vmem>>, vector<8x8x16xf32>
    tpu.vector_store %arg6[%c1, %c1_6, %c0_7], %3 {strides = array<i32>} : memref<10x10x16xf32, #tpu.memory_space<vmem>>, vector<8x8x16xf32>,
    %c4_i32 = arith.constant 4 : i32
    %5 = arith.muli %arg1, %c4_i32 : i32
    %cst_8 = arith.constant 0.000000e+00 : f32
    %6 = vector.broadcast %cst_8 : f32 to vector<32x32xf32>
    %c0_i32 = arith.constant 0 : i32
    %7 = arith.addi %5, %c0_i32 : i32
    %8 = arith.index_cast %7 : i32 to index
    %c0_9 = arith.constant 0 : index
    %c0_10 = arith.constant 0 : index
    %9 = vector.load %arg6[%8, %c0_9, %c0_10] : memref<10x10x16xf32, #tpu.memory_space<vmem>>, vector<4x8x16xf32>
    %10 = vector.shape_cast %9 : vector<4x8x16xf32> to vector<32x16xf32>
    %c0_11 = arith.constant 0 : index
    %c0_12 = arith.constant 0 : index
    %c0_13 = arith.constant 0 : index
    %11 = vector.load %arg3[%c0_11, %c0_12, %c0_13] : memref<9x16x32xf32, #tpu.memory_space<vmem>>, vector<1x16x32xf32>
    %12 = vector.shape_cast %11 : vector<1x16x32xf32> to vector<16x32xf32>
    %cst_14 = arith.constant dense<0.000000e+00> : vector<32x32xf32>
    %13 = tpu.matmul %10, %12, %cst_14 {dimension_numbers = #tpu.dot_dimension_numbers<[1], [0], [0], [1], [0, 0, 1, 1], [], []>} : vector<32x16xf32>, vector<16x32xf32>, vector<32x32xf32> -> vector<32x32xf32>
    %14 = arith.addf %6, %13 : vector<32x32xf32>
    %c0_i32_15 = arith.constant 0 : i32
    %15 = arith.addi %5, %c0_i32_15 : i32
    %16 = arith.index_cast %15 : i32 to index
    %c1_16 = arith.constant 1 : index
    %c0_17 = arith.constant 0 : index
    %17 = vector.load %arg6[%16, %c1_16, %c0_17] : memref<10x10x16xf32, #tpu.memory_space<vmem>>, vector<4x8x16xf32>
    %18 = vector.shape_cast %17 : vector<4x8x16xf32> to vector<32x16xf32>
    %c1_18 = arith.constant 1 : index
    %c0_19 = arith.constant 0 : index
    %c0_20 = arith.constant 0 : index
    %19 = vector.load %arg3[%c1_18, %c0_19, %c0_20] : memref<9x16x32xf32, #tpu.memory_space<vmem>>, vector<1x16x32xf32>
    %20 = vector.shape_cast %19 : vector<1x16x32xf32> to vector<16x32xf32>
    %cst_21 = arith.constant dense<0.000000e+00> : vector<32x32xf32>
    %21 = tpu.matmul %18, %20, %cst_21 {dimension_numbers = #tpu.dot_dimension_numbers<[1], [0], [0], [1], [0, 0, 1, 1], [], []>} : vector<32x16xf32>, vector<16x32xf32>, vector<32x32xf32> -> vector<32x32xf32>
    %22 = arith.addf %14, %21 : vector<32x32xf32>
    %c0_i32_22 = arith.constant 0 : i32
    %23 = arith.addi %5, %c0_i32_22 : i32
    %24 = arith.index_cast %23 : i32 to index
    %c2 = arith.constant 2 : index
    %c0_23 = arith.constant 0 : index
    %25 = vector.load %arg6[%24, %c2, %c0_23] : memref<10x10x16xf32, #tpu.memory_space<vmem>>, vector<4x8x16xf32>
    %26 = vector.shape_cast %25 : vector<4x8x16xf32> to vector<32x16xf32>
    %c2_24 = arith.constant 2 : index
    %c0_25 = arith.constant 0 : index
    %c0_26 = arith.constant 0 : index
    %27 = vector.load %arg3[%c2_24, %c0_25, %c0_26] : memref<9x16x32xf32, #tpu.memory_space<vmem>>, vector<1x16x32xf32>
    %28 = vector.shape_cast %27 : vector<1x16x32xf32> to vector<16x32xf32>
    %cst_27 = arith.constant dense<0.000000e+00> : vector<32x32xf32>
    %29 = tpu.matmul %26, %28, %cst_27 {dimension_numbers = #tpu.dot_dimension_numbers<[1], [0], [0], [1], [0, 0, 1, 1], [], []>} : vector<32x16xf32>, vector<16x32xf32>, vector<32x32xf32> -> vector<32x32xf32>
    %30 = arith.addf %22, %29 : vector<32x32xf32>
    %c1_i32 = arith.constant 1 : i32
    %31 = arith.addi %5, %c1_i32 : i32
    %32 = arith.index_cast %31 : i32 to index
    %c0_28 = arith.constant 0 : index
    %c0_29 = arith.constant 0 : index
    %33 = vector.load %arg6[%32, %c0_28, %c0_29] : memref<10x10x16xf32, #tpu.memory_space<vmem>>, vector<4x8x16xf32>
    %34 = vector.shape_cast %33 : vector<4x8x16xf32> to vector<32x16xf32>
    %c3 = arith.constant 3 : index
    %c0_30 = arith.constant 0 : index
    %c0_31 = arith.constant 0 : index
    %35 = vector.load %arg3[%c3, %c0_30, %c0_31] : memref<9x16x32xf32, #tpu.memory_space<vmem>>, vector<1x16x32xf32>
    %36 = vector.shape_cast %35 : vector<1x16x32xf32> to vector<16x32xf32>
    %cst_32 = arith.constant dense<0.000000e+00> : vector<32x32xf32>
    %37 = tpu.matmul %34, %36, %cst_32 {dimension_numbers = #tpu.dot_dimension_numbers<[1], [0], [0], [1], [0, 0, 1, 1], [], []>} : vector<32x16xf32>, vector<16x32xf32>, vector<32x32xf32> -> vector<32x32xf32>
    %38 = arith.addf %30, %37 : vector<32x32xf32>
    %c1_i32_33 = arith.constant 1 : i32
    %39 = arith.addi %5, %c1_i32_33 : i32
    %40 = arith.index_cast %39 : i32 to index
    %c1_34 = arith.constant 1 : index
    %c0_35 = arith.constant 0 : index
    %41 = vector.load %arg6[%40, %c1_34, %c0_35] : memref<10x10x16xf32, #tpu.memory_space<vmem>>, vector<4x8x16xf32>
    %42 = vector.shape_cast %41 : vector<4x8x16xf32> to vector<32x16xf32>
    %c4 = arith.constant 4 : index
    %c0_36 = arith.constant 0 : index
    %c0_37 = arith.constant 0 : index
    %43 = vector.load %arg3[%c4, %c0_36, %c0_37] : memref<9x16x32xf32, #tpu.memory_space<vmem>>, vector<1x16x32xf32>
    %44 = vector.shape_cast %43 : vector<1x16x32xf32> to vector<16x32xf32>
    %cst_38 = arith.constant dense<0.000000e+00> : vector<32x32xf32>
    %45 = tpu.matmul %42, %44, %cst_38 {dimension_numbers = #tpu.dot_dimension_numbers<[1], [0], [0], [1], [0, 0, 1, 1], [], []>} : vector<32x16xf32>, vector<16x32xf32>, vector<32x32xf32> -> vector<32x32xf32>
    %46 = arith.addf %38, %45 : vector<32x32xf32>
    %c1_i32_39 = arith.constant 1 : i32
    %47 = arith.addi %5, %c1_i32_39 : i32
    %48 = arith.index_cast %47 : i32 to index
    %c2_40 = arith.constant 2 : index
    %c0_41 = arith.constant 0 : index
    %49 = vector.load %arg6[%48, %c2_40, %c0_41] : memref<10x10x16xf32, #tpu.memory_space<vmem>>, vector<4x8x16xf32>
    %50 = vector.shape_cast %49 : vector<4x8x16xf32> to vector<32x16xf32>
    %c5 = arith.constant 5 : index
    %c0_42 = arith.constant 0 : index
    %c0_43 = arith.constant 0 : index
    %51 = vector.load %arg3[%c5, %c0_42, %c0_43] : memref<9x16x32xf32, #tpu.memory_space<vmem>>, vector<1x16x32xf32>
    %52 = vector.shape_cast %51 : vector<1x16x32xf32> to vector<16x32xf32>
    %cst_44 = arith.constant dense<0.000000e+00> : vector<32x32xf32>
    %53 = tpu.matmul %50, %52, %cst_44 {dimension_numbers = #tpu.dot_dimension_numbers<[1], [0], [0], [1], [0, 0, 1, 1], [], []>} : vector<32x16xf32>, vector<16x32xf32>, vector<32x32xf32> -> vector<32x32xf32>
    %54 = arith.addf %46, %53 : vector<32x32xf32>
    %c2_i32 = arith.constant 2 : i32
    %55 = arith.addi %5, %c2_i32 : i32
    %56 = arith.index_cast %55 : i32 to index
    %c0_45 = arith.constant 0 : index
    %c0_46 = arith.constant 0 : index
    %57 = vector.load %arg6[%56, %c0_45, %c0_46] : memref<10x10x16xf32, #tpu.memory_space<vmem>>, vector<4x8x16xf32>
    %58 = vector.shape_cast %57 : vector<4x8x16xf32> to vector<32x16xf32>
    %c6 = arith.constant 6 : index
    %c0_47 = arith.constant 0 : index
    %c0_48 = arith.constant 0 : index
    %59 = vector.load %arg3[%c6, %c0_47, %c0_48] : memref<9x16x32xf32, #tpu.memory_space<vmem>>, vector<1x16x32xf32>
    %60 = vector.shape_cast %59 : vector<1x16x32xf32> to vector<16x32xf32>
    %cst_49 = arith.constant dense<0.000000e+00> : vector<32x32xf32>
    %61 = tpu.matmul %58, %60, %cst_49 {dimension_numbers = #tpu.dot_dimension_numbers<[1], [0], [0], [1], [0, 0, 1, 1], [], []>} : vector<32x16xf32>, vector<16x32xf32>, vector<32x32xf32> -> vector<32x32xf32>
    %62 = arith.addf %54, %61 : vector<32x32xf32>
    %c2_i32_50 = arith.constant 2 : i32
    %63 = arith.addi %5, %c2_i32_50 : i32
    %64 = arith.index_cast %63 : i32 to index
    %c1_51 = arith.constant 1 : index
    %c0_52 = arith.constant 0 : index
    %65 = vector.load %arg6[%64, %c1_51, %c0_52] : memref<10x10x16xf32, #tpu.memory_space<vmem>>, vector<4x8x16xf32>
    %66 = vector.shape_cast %65 : vector<4x8x16xf32> to vector<32x16xf32>
    %c7 = arith.constant 7 : index
    %c0_53 = arith.constant 0 : index
    %c0_54 = arith.constant 0 : index
    %67 = vector.load %arg3[%c7, %c0_53, %c0_54] : memref<9x16x32xf32, #tpu.memory_space<vmem>>, vector<1x16x32xf32>
    %68 = vector.shape_cast %67 : vector<1x16x32xf32> to vector<16x32xf32>
    %cst_55 = arith.constant dense<0.000000e+00> : vector<32x32xf32>
    %69 = tpu.matmul %66, %68, %cst_55 {dimension_numbers = #tpu.dot_dimension_numbers<[1], [0], [0], [1], [0, 0, 1, 1], [], []>} : vector<32x16xf32>, vector<16x32xf32>, vector<32x32xf32> -> vector<32x32xf32>
    %70 = arith.addf %62, %69 : vector<32x32xf32>
    %c2_i32_56 = arith.constant 2 : i32
    %71 = arith.addi %5, %c2_i32_56 : i32
    %72 = arith.index_cast %71 : i32 to index
    %c2_57 = arith.constant 2 : index
    %c0_58 = arith.constant 0 : index
    %73 = vector.load %arg6[%72, %c2_57, %c0_58] : memref<10x10x16xf32, #tpu.memory_space<vmem>>, vector<4x8x16xf32>
    %74 = vector.shape_cast %73 : vector<4x8x16xf32> to vector<32x16xf32>
    %c8 = arith.constant 8 : index
    %c0_59 = arith.constant 0 : index
    %c0_60 = arith.constant 0 : index
    %75 = vector.load %arg3[%c8, %c0_59, %c0_60] : memref<9x16x32xf32, #tpu.memory_space<vmem>>, vector<1x16x32xf32>
    %76 = vector.shape_cast %75 : vector<1x16x32xf32> to vector<16x32xf32>
    %cst_61 = arith.constant dense<0.000000e+00> : vector<32x32xf32>
    %77 = tpu.matmul %74, %76, %cst_61 {dimension_numbers = #tpu.dot_dimension_numbers<[1], [0], [0], [1], [0, 0, 1, 1], [], []>} : vector<32x16xf32>, vector<16x32xf32>, vector<32x32xf32> -> vector<32x32xf32>
    %78 = arith.addf %70, %77 : vector<32x32xf32>
    %c0_62 = arith.constant 0 : index
    %c0_63 = arith.constant 0 : index
    %79 = vector.load %arg4[%c0_62, %c0_63] : memref<1x32xf32, #tpu.memory_space<vmem>>, vector<1x32xf32>
    %80 = vector.broadcast %79 : vector<1x32xf32> to vector<32x32xf32>
    %81 = arith.addf %78, %80 : vector<32x32xf32>
    %cst_64 = arith.constant 0.000000e+00 : f32
    %82 = vector.broadcast %cst_64 : f32 to vector<32x32xf32>
    %83 = arith.maximumf %81, %82 : vector<32x32xf32>
    %84 = vector.extract_strided_slice %83 {offsets = [0, 0], sizes = [32, 16], strides = [1, 1]} : vector<32x32xf32> to vector<32x16xf32>
    %85 = vector.shape_cast %84 : vector<32x16xf32> to vector<4x8x16xf32>
    %86 = vector.extract_strided_slice %83 {offsets = [0, 16], sizes = [32, 16], strides = [1, 1]} : vector<32x32xf32> to vector<32x16xf32>
    %87 = vector.shape_cast %86 : vector<32x16xf32> to vector<4x8x16xf32>
    %88 = vector.shape_cast %85 : vector<4x8x16xf32> to vector<4x1x8x16xf32>
    %89 = vector.shape_cast %87 : vector<4x8x16xf32> to vector<4x1x8x16xf32>
    %90 = tpu.concatenate %88, %89 in 1 : vector<4x1x8x16xf32>, vector<4x1x8x16xf32> -> vector<4x2x8x16xf32>
    %91 = vector.shape_cast %90 : vector<4x2x8x16xf32> to vector<8x8x16xf32>
    %c0_65 = arith.constant 0 : index
    %c0_66 = arith.constant 0 : index
    %c0_67 = arith.constant 0 : index
    %c0_68 = arith.constant 0 : index
    %92 = vector.load %arg5[%c0_65, %c0_66, %c0_67, %c0_68] : memref<1x8x8x16xf32, #tpu.memory_space<vmem>>, vector<1x8x8x16xf32>
    %93 = vector.shape_cast %92 : vector<1x8x8x16xf32> to vector<8x8x16xf32>
    %94 = vector.shape_cast %91 : vector<8x8x16xf32> to vector<1x8x8x16xf32>
    tpu.vector_store %arg5[%c0_65, %c0_66, %c0_67, %c0_68], %94 {strides = array<i32>} : memref<1x8x8x16xf32, #tpu.memory_space<vmem>>, vector<1x8x8x16xf32>,
    return
  }
  func.func @transform_0(%arg0: i32, %arg1: i32) -> (i32, i32, i32, i32) {
    %c0_i32 = arith.constant 0 : i32
    %c0_i32_0 = arith.constant 0 : i32
    %c0_i32_1 = arith.constant 0 : i32
    %c0_i32_2 = arith.constant 0 : i32
    return %arg0, %c0_i32, %c0_i32_0, %c0_i32_1 : i32, i32, i32, i32
  }
  func.func @transform_1(%arg0: i32, %arg1: i32) -> (i32, i32, i32) {
    %c0_i32 = arith.constant 0 : i32
    %c0_i32_0 = arith.constant 0 : i32
    %c0_i32_1 = arith.constant 0 : i32
    %c0_i32_2 = arith.constant 0 : i32
    return %c0_i32, %c0_i32_0, %c0_i32_1 : i32, i32, i32
  }
  func.func @transform_2(%arg0: i32, %arg1: i32) -> (i32, i32) {
    %c0_i32 = arith.constant 0 : i32
    %c0_i32_0 = arith.constant 0 : i32
    %c0_i32_1 = arith.constant 0 : i32
    return %c0_i32, %c0_i32_0 : i32, i32
  }
  func.func @transform_3(%arg0: i32, %arg1: i32) -> (i32, i32, i32, i32) {
    %c0_i32 = arith.constant 0 : i32
    %c0_i32_0 = arith.constant 0 : i32
    %c0_i32_1 = arith.constant 0 : i32
    return %arg0, %arg1, %c0_i32, %c0_i32_0 : i32, i32, i32, i32
  }
}

module attributes {stable_mosaic.version = 11 : i64} {
  func.func @_convt_px_kernel(%arg0: i32, %arg1: i32, %arg2: memref<1x16x16x8xf32, #tpu.memory_space<vmem>>, %arg3: memref<9x8x16xf32, #tpu.memory_space<vmem>>, %arg4: memref<1x16xf32, #tpu.memory_space<vmem>>, %arg5: memref<1x16x16x8xf32, #tpu.memory_space<vmem>>, %arg6: memref<18x18x8xf32, #tpu.memory_space<vmem>>) attributes {dimension_semantics = [#tpu.dimension_semantics<parallel>, #tpu.dimension_semantics<parallel>], iteration_bounds = array<i64: 2, 2>, scalar_prefetch = 0 : i64, scratch_operands = 1 : i64, tpu.core_type = #tpu.core_type<tc>, window_params = [{transform_indices = @transform_0, window_bounds = array<i64: 1, 16, 16, 8>}, {pipeline_mode = #tpu.pipeline_mode<synchronous>, transform_indices = @transform_1, window_bounds = array<i64: 9, 8, 16>}, {pipeline_mode = #tpu.pipeline_mode<synchronous>, transform_indices = @transform_2, window_bounds = array<i64: 1, 16>}, {transform_indices = @transform_3, window_bounds = array<i64: 1, 16, 16, 8>}]} {
    %cst = arith.constant 0.000000e+00 : f32
    %0 = vector.broadcast %cst : f32 to vector<18x18x8xf32>
    %c0 = arith.constant 0 : index
    %c0_0 = arith.constant 0 : index
    %c0_1 = arith.constant 0 : index
    %1 = vector.load %arg6[%c0, %c0_0, %c0_1] : memref<18x18x8xf32, #tpu.memory_space<vmem>>, vector<18x18x8xf32>
    tpu.vector_store %arg6[%c0, %c0_0, %c0_1], %0 {strides = array<i32>} : memref<18x18x8xf32, #tpu.memory_space<vmem>>, vector<18x18x8xf32>,
    %c0_2 = arith.constant 0 : index
    %c0_3 = arith.constant 0 : index
    %c0_4 = arith.constant 0 : index
    %c0_5 = arith.constant 0 : index
    %2 = vector.load %arg2[%c0_2, %c0_3, %c0_4, %c0_5] : memref<1x16x16x8xf32, #tpu.memory_space<vmem>>, vector<1x16x16x8xf32>
    %3 = vector.shape_cast %2 : vector<1x16x16x8xf32> to vector<16x16x8xf32>
    %c1 = arith.constant 1 : index
    %c1_6 = arith.constant 1 : index
    %c0_7 = arith.constant 0 : index
    %4 = vector.load %arg6[%c1, %c1_6, %c0_7] : memref<18x18x8xf32, #tpu.memory_space<vmem>>, vector<16x16x8xf32>
    tpu.vector_store %arg6[%c1, %c1_6, %c0_7], %3 {strides = array<i32>} : memref<18x18x8xf32, #tpu.memory_space<vmem>>, vector<16x16x8xf32>,
    %c8_i32 = arith.constant 8 : i32
    %5 = arith.muli %arg1, %c8_i32 : i32
    %cst_8 = arith.constant 0.000000e+00 : f32
    %6 = vector.broadcast %cst_8 : f32 to vector<128x16xf32>
    %c0_i32 = arith.constant 0 : i32
    %7 = arith.addi %5, %c0_i32 : i32
    %8 = arith.index_cast %7 : i32 to index
    %c0_9 = arith.constant 0 : index
    %c0_10 = arith.constant 0 : index
    %9 = vector.load %arg6[%8, %c0_9, %c0_10] : memref<18x18x8xf32, #tpu.memory_space<vmem>>, vector<8x16x8xf32>
    %10 = vector.shape_cast %9 : vector<8x16x8xf32> to vector<128x8xf32>
    %c0_11 = arith.constant 0 : index
    %c0_12 = arith.constant 0 : index
    %c0_13 = arith.constant 0 : index
    %11 = vector.load %arg3[%c0_11, %c0_12, %c0_13] : memref<9x8x16xf32, #tpu.memory_space<vmem>>, vector<1x8x16xf32>
    %12 = vector.shape_cast %11 : vector<1x8x16xf32> to vector<8x16xf32>
    %cst_14 = arith.constant dense<0.000000e+00> : vector<128x16xf32>
    %13 = tpu.matmul %10, %12, %cst_14 {dimension_numbers = #tpu.dot_dimension_numbers<[1], [0], [0], [1], [0, 0, 1, 1], [], []>} : vector<128x8xf32>, vector<8x16xf32>, vector<128x16xf32> -> vector<128x16xf32>
    %14 = arith.addf %6, %13 : vector<128x16xf32>
    %c0_i32_15 = arith.constant 0 : i32
    %15 = arith.addi %5, %c0_i32_15 : i32
    %16 = arith.index_cast %15 : i32 to index
    %c1_16 = arith.constant 1 : index
    %c0_17 = arith.constant 0 : index
    %17 = vector.load %arg6[%16, %c1_16, %c0_17] : memref<18x18x8xf32, #tpu.memory_space<vmem>>, vector<8x16x8xf32>
    %18 = vector.shape_cast %17 : vector<8x16x8xf32> to vector<128x8xf32>
    %c1_18 = arith.constant 1 : index
    %c0_19 = arith.constant 0 : index
    %c0_20 = arith.constant 0 : index
    %19 = vector.load %arg3[%c1_18, %c0_19, %c0_20] : memref<9x8x16xf32, #tpu.memory_space<vmem>>, vector<1x8x16xf32>
    %20 = vector.shape_cast %19 : vector<1x8x16xf32> to vector<8x16xf32>
    %cst_21 = arith.constant dense<0.000000e+00> : vector<128x16xf32>
    %21 = tpu.matmul %18, %20, %cst_21 {dimension_numbers = #tpu.dot_dimension_numbers<[1], [0], [0], [1], [0, 0, 1, 1], [], []>} : vector<128x8xf32>, vector<8x16xf32>, vector<128x16xf32> -> vector<128x16xf32>
    %22 = arith.addf %14, %21 : vector<128x16xf32>
    %c0_i32_22 = arith.constant 0 : i32
    %23 = arith.addi %5, %c0_i32_22 : i32
    %24 = arith.index_cast %23 : i32 to index
    %c2 = arith.constant 2 : index
    %c0_23 = arith.constant 0 : index
    %25 = vector.load %arg6[%24, %c2, %c0_23] : memref<18x18x8xf32, #tpu.memory_space<vmem>>, vector<8x16x8xf32>
    %26 = vector.shape_cast %25 : vector<8x16x8xf32> to vector<128x8xf32>
    %c2_24 = arith.constant 2 : index
    %c0_25 = arith.constant 0 : index
    %c0_26 = arith.constant 0 : index
    %27 = vector.load %arg3[%c2_24, %c0_25, %c0_26] : memref<9x8x16xf32, #tpu.memory_space<vmem>>, vector<1x8x16xf32>
    %28 = vector.shape_cast %27 : vector<1x8x16xf32> to vector<8x16xf32>
    %cst_27 = arith.constant dense<0.000000e+00> : vector<128x16xf32>
    %29 = tpu.matmul %26, %28, %cst_27 {dimension_numbers = #tpu.dot_dimension_numbers<[1], [0], [0], [1], [0, 0, 1, 1], [], []>} : vector<128x8xf32>, vector<8x16xf32>, vector<128x16xf32> -> vector<128x16xf32>
    %30 = arith.addf %22, %29 : vector<128x16xf32>
    %c1_i32 = arith.constant 1 : i32
    %31 = arith.addi %5, %c1_i32 : i32
    %32 = arith.index_cast %31 : i32 to index
    %c0_28 = arith.constant 0 : index
    %c0_29 = arith.constant 0 : index
    %33 = vector.load %arg6[%32, %c0_28, %c0_29] : memref<18x18x8xf32, #tpu.memory_space<vmem>>, vector<8x16x8xf32>
    %34 = vector.shape_cast %33 : vector<8x16x8xf32> to vector<128x8xf32>
    %c3 = arith.constant 3 : index
    %c0_30 = arith.constant 0 : index
    %c0_31 = arith.constant 0 : index
    %35 = vector.load %arg3[%c3, %c0_30, %c0_31] : memref<9x8x16xf32, #tpu.memory_space<vmem>>, vector<1x8x16xf32>
    %36 = vector.shape_cast %35 : vector<1x8x16xf32> to vector<8x16xf32>
    %cst_32 = arith.constant dense<0.000000e+00> : vector<128x16xf32>
    %37 = tpu.matmul %34, %36, %cst_32 {dimension_numbers = #tpu.dot_dimension_numbers<[1], [0], [0], [1], [0, 0, 1, 1], [], []>} : vector<128x8xf32>, vector<8x16xf32>, vector<128x16xf32> -> vector<128x16xf32>
    %38 = arith.addf %30, %37 : vector<128x16xf32>
    %c1_i32_33 = arith.constant 1 : i32
    %39 = arith.addi %5, %c1_i32_33 : i32
    %40 = arith.index_cast %39 : i32 to index
    %c1_34 = arith.constant 1 : index
    %c0_35 = arith.constant 0 : index
    %41 = vector.load %arg6[%40, %c1_34, %c0_35] : memref<18x18x8xf32, #tpu.memory_space<vmem>>, vector<8x16x8xf32>
    %42 = vector.shape_cast %41 : vector<8x16x8xf32> to vector<128x8xf32>
    %c4 = arith.constant 4 : index
    %c0_36 = arith.constant 0 : index
    %c0_37 = arith.constant 0 : index
    %43 = vector.load %arg3[%c4, %c0_36, %c0_37] : memref<9x8x16xf32, #tpu.memory_space<vmem>>, vector<1x8x16xf32>
    %44 = vector.shape_cast %43 : vector<1x8x16xf32> to vector<8x16xf32>
    %cst_38 = arith.constant dense<0.000000e+00> : vector<128x16xf32>
    %45 = tpu.matmul %42, %44, %cst_38 {dimension_numbers = #tpu.dot_dimension_numbers<[1], [0], [0], [1], [0, 0, 1, 1], [], []>} : vector<128x8xf32>, vector<8x16xf32>, vector<128x16xf32> -> vector<128x16xf32>
    %46 = arith.addf %38, %45 : vector<128x16xf32>
    %c1_i32_39 = arith.constant 1 : i32
    %47 = arith.addi %5, %c1_i32_39 : i32
    %48 = arith.index_cast %47 : i32 to index
    %c2_40 = arith.constant 2 : index
    %c0_41 = arith.constant 0 : index
    %49 = vector.load %arg6[%48, %c2_40, %c0_41] : memref<18x18x8xf32, #tpu.memory_space<vmem>>, vector<8x16x8xf32>
    %50 = vector.shape_cast %49 : vector<8x16x8xf32> to vector<128x8xf32>
    %c5 = arith.constant 5 : index
    %c0_42 = arith.constant 0 : index
    %c0_43 = arith.constant 0 : index
    %51 = vector.load %arg3[%c5, %c0_42, %c0_43] : memref<9x8x16xf32, #tpu.memory_space<vmem>>, vector<1x8x16xf32>
    %52 = vector.shape_cast %51 : vector<1x8x16xf32> to vector<8x16xf32>
    %cst_44 = arith.constant dense<0.000000e+00> : vector<128x16xf32>
    %53 = tpu.matmul %50, %52, %cst_44 {dimension_numbers = #tpu.dot_dimension_numbers<[1], [0], [0], [1], [0, 0, 1, 1], [], []>} : vector<128x8xf32>, vector<8x16xf32>, vector<128x16xf32> -> vector<128x16xf32>
    %54 = arith.addf %46, %53 : vector<128x16xf32>
    %c2_i32 = arith.constant 2 : i32
    %55 = arith.addi %5, %c2_i32 : i32
    %56 = arith.index_cast %55 : i32 to index
    %c0_45 = arith.constant 0 : index
    %c0_46 = arith.constant 0 : index
    %57 = vector.load %arg6[%56, %c0_45, %c0_46] : memref<18x18x8xf32, #tpu.memory_space<vmem>>, vector<8x16x8xf32>
    %58 = vector.shape_cast %57 : vector<8x16x8xf32> to vector<128x8xf32>
    %c6 = arith.constant 6 : index
    %c0_47 = arith.constant 0 : index
    %c0_48 = arith.constant 0 : index
    %59 = vector.load %arg3[%c6, %c0_47, %c0_48] : memref<9x8x16xf32, #tpu.memory_space<vmem>>, vector<1x8x16xf32>
    %60 = vector.shape_cast %59 : vector<1x8x16xf32> to vector<8x16xf32>
    %cst_49 = arith.constant dense<0.000000e+00> : vector<128x16xf32>
    %61 = tpu.matmul %58, %60, %cst_49 {dimension_numbers = #tpu.dot_dimension_numbers<[1], [0], [0], [1], [0, 0, 1, 1], [], []>} : vector<128x8xf32>, vector<8x16xf32>, vector<128x16xf32> -> vector<128x16xf32>
    %62 = arith.addf %54, %61 : vector<128x16xf32>
    %c2_i32_50 = arith.constant 2 : i32
    %63 = arith.addi %5, %c2_i32_50 : i32
    %64 = arith.index_cast %63 : i32 to index
    %c1_51 = arith.constant 1 : index
    %c0_52 = arith.constant 0 : index
    %65 = vector.load %arg6[%64, %c1_51, %c0_52] : memref<18x18x8xf32, #tpu.memory_space<vmem>>, vector<8x16x8xf32>
    %66 = vector.shape_cast %65 : vector<8x16x8xf32> to vector<128x8xf32>
    %c7 = arith.constant 7 : index
    %c0_53 = arith.constant 0 : index
    %c0_54 = arith.constant 0 : index
    %67 = vector.load %arg3[%c7, %c0_53, %c0_54] : memref<9x8x16xf32, #tpu.memory_space<vmem>>, vector<1x8x16xf32>
    %68 = vector.shape_cast %67 : vector<1x8x16xf32> to vector<8x16xf32>
    %cst_55 = arith.constant dense<0.000000e+00> : vector<128x16xf32>
    %69 = tpu.matmul %66, %68, %cst_55 {dimension_numbers = #tpu.dot_dimension_numbers<[1], [0], [0], [1], [0, 0, 1, 1], [], []>} : vector<128x8xf32>, vector<8x16xf32>, vector<128x16xf32> -> vector<128x16xf32>
    %70 = arith.addf %62, %69 : vector<128x16xf32>
    %c2_i32_56 = arith.constant 2 : i32
    %71 = arith.addi %5, %c2_i32_56 : i32
    %72 = arith.index_cast %71 : i32 to index
    %c2_57 = arith.constant 2 : index
    %c0_58 = arith.constant 0 : index
    %73 = vector.load %arg6[%72, %c2_57, %c0_58] : memref<18x18x8xf32, #tpu.memory_space<vmem>>, vector<8x16x8xf32>
    %74 = vector.shape_cast %73 : vector<8x16x8xf32> to vector<128x8xf32>
    %c8 = arith.constant 8 : index
    %c0_59 = arith.constant 0 : index
    %c0_60 = arith.constant 0 : index
    %75 = vector.load %arg3[%c8, %c0_59, %c0_60] : memref<9x8x16xf32, #tpu.memory_space<vmem>>, vector<1x8x16xf32>
    %76 = vector.shape_cast %75 : vector<1x8x16xf32> to vector<8x16xf32>
    %cst_61 = arith.constant dense<0.000000e+00> : vector<128x16xf32>
    %77 = tpu.matmul %74, %76, %cst_61 {dimension_numbers = #tpu.dot_dimension_numbers<[1], [0], [0], [1], [0, 0, 1, 1], [], []>} : vector<128x8xf32>, vector<8x16xf32>, vector<128x16xf32> -> vector<128x16xf32>
    %78 = arith.addf %70, %77 : vector<128x16xf32>
    %c0_62 = arith.constant 0 : index
    %c0_63 = arith.constant 0 : index
    %79 = vector.load %arg4[%c0_62, %c0_63] : memref<1x16xf32, #tpu.memory_space<vmem>>, vector<1x16xf32>
    %80 = vector.broadcast %79 : vector<1x16xf32> to vector<128x16xf32>
    %81 = arith.addf %78, %80 : vector<128x16xf32>
    %cst_64 = arith.constant 0.000000e+00 : f32
    %82 = vector.broadcast %cst_64 : f32 to vector<128x16xf32>
    %83 = arith.maximumf %81, %82 : vector<128x16xf32>
    %84 = vector.extract_strided_slice %83 {offsets = [0, 0], sizes = [128, 8], strides = [1, 1]} : vector<128x16xf32> to vector<128x8xf32>
    %85 = vector.shape_cast %84 : vector<128x8xf32> to vector<8x16x8xf32>
    %86 = vector.extract_strided_slice %83 {offsets = [0, 8], sizes = [128, 8], strides = [1, 1]} : vector<128x16xf32> to vector<128x8xf32>
    %87 = vector.shape_cast %86 : vector<128x8xf32> to vector<8x16x8xf32>
    %88 = vector.shape_cast %85 : vector<8x16x8xf32> to vector<8x1x16x8xf32>
    %89 = vector.shape_cast %87 : vector<8x16x8xf32> to vector<8x1x16x8xf32>
    %90 = tpu.concatenate %88, %89 in 1 : vector<8x1x16x8xf32>, vector<8x1x16x8xf32> -> vector<8x2x16x8xf32>
    %91 = vector.shape_cast %90 : vector<8x2x16x8xf32> to vector<16x16x8xf32>
    %c0_65 = arith.constant 0 : index
    %c0_66 = arith.constant 0 : index
    %c0_67 = arith.constant 0 : index
    %c0_68 = arith.constant 0 : index
    %92 = vector.load %arg5[%c0_65, %c0_66, %c0_67, %c0_68] : memref<1x16x16x8xf32, #tpu.memory_space<vmem>>, vector<1x16x16x8xf32>
    %93 = vector.shape_cast %92 : vector<1x16x16x8xf32> to vector<16x16x8xf32>
    %94 = vector.shape_cast %91 : vector<16x16x8xf32> to vector<1x16x16x8xf32>
    tpu.vector_store %arg5[%c0_65, %c0_66, %c0_67, %c0_68], %94 {strides = array<i32>} : memref<1x16x16x8xf32, #tpu.memory_space<vmem>>, vector<1x16x16x8xf32>,
    return
  }
  func.func @transform_0(%arg0: i32, %arg1: i32) -> (i32, i32, i32, i32) {
    %c0_i32 = arith.constant 0 : i32
    %c0_i32_0 = arith.constant 0 : i32
    %c0_i32_1 = arith.constant 0 : i32
    %c0_i32_2 = arith.constant 0 : i32
    return %arg0, %c0_i32, %c0_i32_0, %c0_i32_1 : i32, i32, i32, i32
  }
  func.func @transform_1(%arg0: i32, %arg1: i32) -> (i32, i32, i32) {
    %c0_i32 = arith.constant 0 : i32
    %c0_i32_0 = arith.constant 0 : i32
    %c0_i32_1 = arith.constant 0 : i32
    %c0_i32_2 = arith.constant 0 : i32
    return %c0_i32, %c0_i32_0, %c0_i32_1 : i32, i32, i32
  }
  func.func @transform_2(%arg0: i32, %arg1: i32) -> (i32, i32) {
    %c0_i32 = arith.constant 0 : i32
    %c0_i32_0 = arith.constant 0 : i32
    %c0_i32_1 = arith.constant 0 : i32
    return %c0_i32, %c0_i32_0 : i32, i32
  }
  func.func @transform_3(%arg0: i32, %arg1: i32) -> (i32, i32, i32, i32) {
    %c0_i32 = arith.constant 0 : i32
    %c0_i32_0 = arith.constant 0 : i32
    %c0_i32_1 = arith.constant 0 : i32
    return %arg0, %arg1, %c0_i32, %c0_i32_0 : i32, i32, i32, i32
  }
}

module attributes {stable_mosaic.version = 11 : i64} {
  func.func @_convt_px_kernel(%arg0: i32, %arg1: i32, %arg2: memref<1x32x32x4xf32, #tpu.memory_space<vmem>>, %arg3: memref<9x4x24xf32, #tpu.memory_space<vmem>>, %arg4: memref<1x24xf32, #tpu.memory_space<vmem>>, %arg5: memref<1x32x32x12xf32, #tpu.memory_space<vmem>>, %arg6: memref<34x34x4xf32, #tpu.memory_space<vmem>>) attributes {dimension_semantics = [#tpu.dimension_semantics<parallel>, #tpu.dimension_semantics<parallel>], iteration_bounds = array<i64: 2, 2>, scalar_prefetch = 0 : i64, scratch_operands = 1 : i64, tpu.core_type = #tpu.core_type<tc>, window_params = [{transform_indices = @transform_0, window_bounds = array<i64: 1, 32, 32, 4>}, {pipeline_mode = #tpu.pipeline_mode<synchronous>, transform_indices = @transform_1, window_bounds = array<i64: 9, 4, 24>}, {pipeline_mode = #tpu.pipeline_mode<synchronous>, transform_indices = @transform_2, window_bounds = array<i64: 1, 24>}, {transform_indices = @transform_3, window_bounds = array<i64: 1, 32, 32, 12>}]} {
    %cst = arith.constant 0.000000e+00 : f32
    %0 = vector.broadcast %cst : f32 to vector<34x34x4xf32>
    %c0 = arith.constant 0 : index
    %c0_0 = arith.constant 0 : index
    %c0_1 = arith.constant 0 : index
    %1 = vector.load %arg6[%c0, %c0_0, %c0_1] : memref<34x34x4xf32, #tpu.memory_space<vmem>>, vector<34x34x4xf32>
    tpu.vector_store %arg6[%c0, %c0_0, %c0_1], %0 {strides = array<i32>} : memref<34x34x4xf32, #tpu.memory_space<vmem>>, vector<34x34x4xf32>,
    %c0_2 = arith.constant 0 : index
    %c0_3 = arith.constant 0 : index
    %c0_4 = arith.constant 0 : index
    %c0_5 = arith.constant 0 : index
    %2 = vector.load %arg2[%c0_2, %c0_3, %c0_4, %c0_5] : memref<1x32x32x4xf32, #tpu.memory_space<vmem>>, vector<1x32x32x4xf32>
    %3 = vector.shape_cast %2 : vector<1x32x32x4xf32> to vector<32x32x4xf32>
    %c1 = arith.constant 1 : index
    %c1_6 = arith.constant 1 : index
    %c0_7 = arith.constant 0 : index
    %4 = vector.load %arg6[%c1, %c1_6, %c0_7] : memref<34x34x4xf32, #tpu.memory_space<vmem>>, vector<32x32x4xf32>
    tpu.vector_store %arg6[%c1, %c1_6, %c0_7], %3 {strides = array<i32>} : memref<34x34x4xf32, #tpu.memory_space<vmem>>, vector<32x32x4xf32>,
    %c16_i32 = arith.constant 16 : i32
    %5 = arith.muli %arg1, %c16_i32 : i32
    %cst_8 = arith.constant 0.000000e+00 : f32
    %6 = vector.broadcast %cst_8 : f32 to vector<512x24xf32>
    %c0_i32 = arith.constant 0 : i32
    %7 = arith.addi %5, %c0_i32 : i32
    %8 = arith.index_cast %7 : i32 to index
    %c0_9 = arith.constant 0 : index
    %c0_10 = arith.constant 0 : index
    %9 = vector.load %arg6[%8, %c0_9, %c0_10] : memref<34x34x4xf32, #tpu.memory_space<vmem>>, vector<16x32x4xf32>
    %10 = vector.shape_cast %9 : vector<16x32x4xf32> to vector<512x4xf32>
    %c0_11 = arith.constant 0 : index
    %c0_12 = arith.constant 0 : index
    %c0_13 = arith.constant 0 : index
    %11 = vector.load %arg3[%c0_11, %c0_12, %c0_13] : memref<9x4x24xf32, #tpu.memory_space<vmem>>, vector<1x4x24xf32>
    %12 = vector.shape_cast %11 : vector<1x4x24xf32> to vector<4x24xf32>
    %cst_14 = arith.constant dense<0.000000e+00> : vector<512x24xf32>
    %13 = tpu.matmul %10, %12, %cst_14 {dimension_numbers = #tpu.dot_dimension_numbers<[1], [0], [0], [1], [0, 0, 1, 1], [], []>} : vector<512x4xf32>, vector<4x24xf32>, vector<512x24xf32> -> vector<512x24xf32>
    %14 = arith.addf %6, %13 : vector<512x24xf32>
    %c0_i32_15 = arith.constant 0 : i32
    %15 = arith.addi %5, %c0_i32_15 : i32
    %16 = arith.index_cast %15 : i32 to index
    %c1_16 = arith.constant 1 : index
    %c0_17 = arith.constant 0 : index
    %17 = vector.load %arg6[%16, %c1_16, %c0_17] : memref<34x34x4xf32, #tpu.memory_space<vmem>>, vector<16x32x4xf32>
    %18 = vector.shape_cast %17 : vector<16x32x4xf32> to vector<512x4xf32>
    %c1_18 = arith.constant 1 : index
    %c0_19 = arith.constant 0 : index
    %c0_20 = arith.constant 0 : index
    %19 = vector.load %arg3[%c1_18, %c0_19, %c0_20] : memref<9x4x24xf32, #tpu.memory_space<vmem>>, vector<1x4x24xf32>
    %20 = vector.shape_cast %19 : vector<1x4x24xf32> to vector<4x24xf32>
    %cst_21 = arith.constant dense<0.000000e+00> : vector<512x24xf32>
    %21 = tpu.matmul %18, %20, %cst_21 {dimension_numbers = #tpu.dot_dimension_numbers<[1], [0], [0], [1], [0, 0, 1, 1], [], []>} : vector<512x4xf32>, vector<4x24xf32>, vector<512x24xf32> -> vector<512x24xf32>
    %22 = arith.addf %14, %21 : vector<512x24xf32>
    %c0_i32_22 = arith.constant 0 : i32
    %23 = arith.addi %5, %c0_i32_22 : i32
    %24 = arith.index_cast %23 : i32 to index
    %c2 = arith.constant 2 : index
    %c0_23 = arith.constant 0 : index
    %25 = vector.load %arg6[%24, %c2, %c0_23] : memref<34x34x4xf32, #tpu.memory_space<vmem>>, vector<16x32x4xf32>
    %26 = vector.shape_cast %25 : vector<16x32x4xf32> to vector<512x4xf32>
    %c2_24 = arith.constant 2 : index
    %c0_25 = arith.constant 0 : index
    %c0_26 = arith.constant 0 : index
    %27 = vector.load %arg3[%c2_24, %c0_25, %c0_26] : memref<9x4x24xf32, #tpu.memory_space<vmem>>, vector<1x4x24xf32>
    %28 = vector.shape_cast %27 : vector<1x4x24xf32> to vector<4x24xf32>
    %cst_27 = arith.constant dense<0.000000e+00> : vector<512x24xf32>
    %29 = tpu.matmul %26, %28, %cst_27 {dimension_numbers = #tpu.dot_dimension_numbers<[1], [0], [0], [1], [0, 0, 1, 1], [], []>} : vector<512x4xf32>, vector<4x24xf32>, vector<512x24xf32> -> vector<512x24xf32>
    %30 = arith.addf %22, %29 : vector<512x24xf32>
    %c1_i32 = arith.constant 1 : i32
    %31 = arith.addi %5, %c1_i32 : i32
    %32 = arith.index_cast %31 : i32 to index
    %c0_28 = arith.constant 0 : index
    %c0_29 = arith.constant 0 : index
    %33 = vector.load %arg6[%32, %c0_28, %c0_29] : memref<34x34x4xf32, #tpu.memory_space<vmem>>, vector<16x32x4xf32>
    %34 = vector.shape_cast %33 : vector<16x32x4xf32> to vector<512x4xf32>
    %c3 = arith.constant 3 : index
    %c0_30 = arith.constant 0 : index
    %c0_31 = arith.constant 0 : index
    %35 = vector.load %arg3[%c3, %c0_30, %c0_31] : memref<9x4x24xf32, #tpu.memory_space<vmem>>, vector<1x4x24xf32>
    %36 = vector.shape_cast %35 : vector<1x4x24xf32> to vector<4x24xf32>
    %cst_32 = arith.constant dense<0.000000e+00> : vector<512x24xf32>
    %37 = tpu.matmul %34, %36, %cst_32 {dimension_numbers = #tpu.dot_dimension_numbers<[1], [0], [0], [1], [0, 0, 1, 1], [], []>} : vector<512x4xf32>, vector<4x24xf32>, vector<512x24xf32> -> vector<512x24xf32>
    %38 = arith.addf %30, %37 : vector<512x24xf32>
    %c1_i32_33 = arith.constant 1 : i32
    %39 = arith.addi %5, %c1_i32_33 : i32
    %40 = arith.index_cast %39 : i32 to index
    %c1_34 = arith.constant 1 : index
    %c0_35 = arith.constant 0 : index
    %41 = vector.load %arg6[%40, %c1_34, %c0_35] : memref<34x34x4xf32, #tpu.memory_space<vmem>>, vector<16x32x4xf32>
    %42 = vector.shape_cast %41 : vector<16x32x4xf32> to vector<512x4xf32>
    %c4 = arith.constant 4 : index
    %c0_36 = arith.constant 0 : index
    %c0_37 = arith.constant 0 : index
    %43 = vector.load %arg3[%c4, %c0_36, %c0_37] : memref<9x4x24xf32, #tpu.memory_space<vmem>>, vector<1x4x24xf32>
    %44 = vector.shape_cast %43 : vector<1x4x24xf32> to vector<4x24xf32>
    %cst_38 = arith.constant dense<0.000000e+00> : vector<512x24xf32>
    %45 = tpu.matmul %42, %44, %cst_38 {dimension_numbers = #tpu.dot_dimension_numbers<[1], [0], [0], [1], [0, 0, 1, 1], [], []>} : vector<512x4xf32>, vector<4x24xf32>, vector<512x24xf32> -> vector<512x24xf32>
    %46 = arith.addf %38, %45 : vector<512x24xf32>
    %c1_i32_39 = arith.constant 1 : i32
    %47 = arith.addi %5, %c1_i32_39 : i32
    %48 = arith.index_cast %47 : i32 to index
    %c2_40 = arith.constant 2 : index
    %c0_41 = arith.constant 0 : index
    %49 = vector.load %arg6[%48, %c2_40, %c0_41] : memref<34x34x4xf32, #tpu.memory_space<vmem>>, vector<16x32x4xf32>
    %50 = vector.shape_cast %49 : vector<16x32x4xf32> to vector<512x4xf32>
    %c5 = arith.constant 5 : index
    %c0_42 = arith.constant 0 : index
    %c0_43 = arith.constant 0 : index
    %51 = vector.load %arg3[%c5, %c0_42, %c0_43] : memref<9x4x24xf32, #tpu.memory_space<vmem>>, vector<1x4x24xf32>
    %52 = vector.shape_cast %51 : vector<1x4x24xf32> to vector<4x24xf32>
    %cst_44 = arith.constant dense<0.000000e+00> : vector<512x24xf32>
    %53 = tpu.matmul %50, %52, %cst_44 {dimension_numbers = #tpu.dot_dimension_numbers<[1], [0], [0], [1], [0, 0, 1, 1], [], []>} : vector<512x4xf32>, vector<4x24xf32>, vector<512x24xf32> -> vector<512x24xf32>
    %54 = arith.addf %46, %53 : vector<512x24xf32>
    %c2_i32 = arith.constant 2 : i32
    %55 = arith.addi %5, %c2_i32 : i32
    %56 = arith.index_cast %55 : i32 to index
    %c0_45 = arith.constant 0 : index
    %c0_46 = arith.constant 0 : index
    %57 = vector.load %arg6[%56, %c0_45, %c0_46] : memref<34x34x4xf32, #tpu.memory_space<vmem>>, vector<16x32x4xf32>
    %58 = vector.shape_cast %57 : vector<16x32x4xf32> to vector<512x4xf32>
    %c6 = arith.constant 6 : index
    %c0_47 = arith.constant 0 : index
    %c0_48 = arith.constant 0 : index
    %59 = vector.load %arg3[%c6, %c0_47, %c0_48] : memref<9x4x24xf32, #tpu.memory_space<vmem>>, vector<1x4x24xf32>
    %60 = vector.shape_cast %59 : vector<1x4x24xf32> to vector<4x24xf32>
    %cst_49 = arith.constant dense<0.000000e+00> : vector<512x24xf32>
    %61 = tpu.matmul %58, %60, %cst_49 {dimension_numbers = #tpu.dot_dimension_numbers<[1], [0], [0], [1], [0, 0, 1, 1], [], []>} : vector<512x4xf32>, vector<4x24xf32>, vector<512x24xf32> -> vector<512x24xf32>
    %62 = arith.addf %54, %61 : vector<512x24xf32>
    %c2_i32_50 = arith.constant 2 : i32
    %63 = arith.addi %5, %c2_i32_50 : i32
    %64 = arith.index_cast %63 : i32 to index
    %c1_51 = arith.constant 1 : index
    %c0_52 = arith.constant 0 : index
    %65 = vector.load %arg6[%64, %c1_51, %c0_52] : memref<34x34x4xf32, #tpu.memory_space<vmem>>, vector<16x32x4xf32>
    %66 = vector.shape_cast %65 : vector<16x32x4xf32> to vector<512x4xf32>
    %c7 = arith.constant 7 : index
    %c0_53 = arith.constant 0 : index
    %c0_54 = arith.constant 0 : index
    %67 = vector.load %arg3[%c7, %c0_53, %c0_54] : memref<9x4x24xf32, #tpu.memory_space<vmem>>, vector<1x4x24xf32>
    %68 = vector.shape_cast %67 : vector<1x4x24xf32> to vector<4x24xf32>
    %cst_55 = arith.constant dense<0.000000e+00> : vector<512x24xf32>
    %69 = tpu.matmul %66, %68, %cst_55 {dimension_numbers = #tpu.dot_dimension_numbers<[1], [0], [0], [1], [0, 0, 1, 1], [], []>} : vector<512x4xf32>, vector<4x24xf32>, vector<512x24xf32> -> vector<512x24xf32>
    %70 = arith.addf %62, %69 : vector<512x24xf32>
    %c2_i32_56 = arith.constant 2 : i32
    %71 = arith.addi %5, %c2_i32_56 : i32
    %72 = arith.index_cast %71 : i32 to index
    %c2_57 = arith.constant 2 : index
    %c0_58 = arith.constant 0 : index
    %73 = vector.load %arg6[%72, %c2_57, %c0_58] : memref<34x34x4xf32, #tpu.memory_space<vmem>>, vector<16x32x4xf32>
    %74 = vector.shape_cast %73 : vector<16x32x4xf32> to vector<512x4xf32>
    %c8 = arith.constant 8 : index
    %c0_59 = arith.constant 0 : index
    %c0_60 = arith.constant 0 : index
    %75 = vector.load %arg3[%c8, %c0_59, %c0_60] : memref<9x4x24xf32, #tpu.memory_space<vmem>>, vector<1x4x24xf32>
    %76 = vector.shape_cast %75 : vector<1x4x24xf32> to vector<4x24xf32>
    %cst_61 = arith.constant dense<0.000000e+00> : vector<512x24xf32>
    %77 = tpu.matmul %74, %76, %cst_61 {dimension_numbers = #tpu.dot_dimension_numbers<[1], [0], [0], [1], [0, 0, 1, 1], [], []>} : vector<512x4xf32>, vector<4x24xf32>, vector<512x24xf32> -> vector<512x24xf32>
    %78 = arith.addf %70, %77 : vector<512x24xf32>
    %c0_62 = arith.constant 0 : index
    %c0_63 = arith.constant 0 : index
    %79 = vector.load %arg4[%c0_62, %c0_63] : memref<1x24xf32, #tpu.memory_space<vmem>>, vector<1x24xf32>
    %80 = vector.broadcast %79 : vector<1x24xf32> to vector<512x24xf32>
    %81 = arith.addf %78, %80 : vector<512x24xf32>
    %82 = tpu.iota {dimensions = array<i32: 1>} : vector<512x24xi32>
    %c6_i32 = arith.constant 6 : i32
    %c0_i32_64 = arith.constant 0 : i32
    %83 = arith.cmpi eq, %c6_i32, %c0_i32_64 : i32
    %c1_i32_65 = arith.constant 1 : i32
    %84 = arith.select %83, %c1_i32_65, %c6_i32 : i32
    %85 = vector.broadcast %84 : i32 to vector<512x24xi32>
    %86 = arith.remsi %82, %85 : vector<512x24xi32>
    %c0_i32_66 = arith.constant 0 : i32
    %87 = vector.broadcast %c0_i32_66 : i32 to vector<512x24xi32>
    %88 = arith.cmpi ne, %86, %87 : vector<512x24xi32>
    %c0_i32_67 = arith.constant 0 : i32
    %89 = vector.broadcast %c0_i32_67 : i32 to vector<512x24xi32>
    %90 = arith.cmpi slt, %86, %89 : vector<512x24xi32>
    %c0_i32_68 = arith.constant 0 : i32
    %91 = arith.cmpi slt, %84, %c0_i32_68 : i32
    %92 = vector.broadcast %91 : i1 to vector<512x24xi1>
    %93 = vector.broadcast %92 : vector<512x24xi1> to vector<512x24xi1>
    %94 = arith.xori %90, %93 : vector<512x24xi1>
    %95 = arith.andi %94, %88 : vector<512x24xi1>
    %96 = vector.broadcast %84 : i32 to vector<512x24xi32>
    %97 = arith.addi %86, %96 : vector<512x24xi32>
    %98 = arith.select %95, %97, %86 : vector<512x24xi1>, vector<512x24xi32>
    %c3_i32 = arith.constant 3 : i32
    %99 = vector.broadcast %c3_i32 : i32 to vector<512x24xi32>
    %100 = arith.cmpi sge, %98, %99 : vector<512x24xi32>
    %cst_69 = arith.constant -1.000000e+01 : f32
    %cst_70 = arith.constant 1.000000e+01 : f32
    %101 = vector.broadcast %cst_69 : f32 to vector<512x24xf32>
    %102 = arith.maximumf %101, %81 : vector<512x24xf32>
    %103 = vector.broadcast %cst_70 : f32 to vector<512x24xf32>
    %104 = arith.minimumf %103, %102 : vector<512x24xf32>
    %105 = arith.select %100, %104, %81 : vector<512x24xi1>, vector<512x24xf32>
    %106 = vector.extract_strided_slice %105 {offsets = [0, 0], sizes = [512, 12], strides = [1, 1]} : vector<512x24xf32> to vector<512x12xf32>
    %107 = vector.shape_cast %106 : vector<512x12xf32> to vector<16x32x12xf32>
    %108 = vector.extract_strided_slice %105 {offsets = [0, 12], sizes = [512, 12], strides = [1, 1]} : vector<512x24xf32> to vector<512x12xf32>
    %109 = vector.shape_cast %108 : vector<512x12xf32> to vector<16x32x12xf32>
    %110 = vector.shape_cast %107 : vector<16x32x12xf32> to vector<16x1x32x12xf32>
    %111 = vector.shape_cast %109 : vector<16x32x12xf32> to vector<16x1x32x12xf32>
    %112 = tpu.concatenate %110, %111 in 1 : vector<16x1x32x12xf32>, vector<16x1x32x12xf32> -> vector<16x2x32x12xf32>
    %113 = vector.shape_cast %112 : vector<16x2x32x12xf32> to vector<32x32x12xf32>
    %c0_71 = arith.constant 0 : index
    %c0_72 = arith.constant 0 : index
    %c0_73 = arith.constant 0 : index
    %c0_74 = arith.constant 0 : index
    %114 = vector.load %arg5[%c0_71, %c0_72, %c0_73, %c0_74] : memref<1x32x32x12xf32, #tpu.memory_space<vmem>>, vector<1x32x32x12xf32>
    %115 = vector.shape_cast %114 : vector<1x32x32x12xf32> to vector<32x32x12xf32>
    %116 = vector.shape_cast %113 : vector<32x32x12xf32> to vector<1x32x32x12xf32>
    tpu.vector_store %arg5[%c0_71, %c0_72, %c0_73, %c0_74], %116 {strides = array<i32>} : memref<1x32x32x12xf32, #tpu.memory_space<vmem>>, vector<1x32x32x12xf32>,
    return
  }
  func.func @transform_0(%arg0: i32, %arg1: i32) -> (i32, i32, i32, i32) {
    %c0_i32 = arith.constant 0 : i32
    %c0_i32_0 = arith.constant 0 : i32
    %c0_i32_1 = arith.constant 0 : i32
    %c0_i32_2 = arith.constant 0 : i32
    return %arg0, %c0_i32, %c0_i32_0, %c0_i32_1 : i32, i32, i32, i32
  }
  func.func @transform_1(%arg0: i32, %arg1: i32) -> (i32, i32, i32) {
    %c0_i32 = arith.constant 0 : i32
    %c0_i32_0 = arith.constant 0 : i32
    %c0_i32_1 = arith.constant 0 : i32
    %c0_i32_2 = arith.constant 0 : i32
    return %c0_i32, %c0_i32_0, %c0_i32_1 : i32, i32, i32
  }
  func.func @transform_2(%arg0: i32, %arg1: i32) -> (i32, i32) {
    %c0_i32 = arith.constant 0 : i32
    %c0_i32_0 = arith.constant 0 : i32
    %c0_i32_1 = arith.constant 0 : i32
    return %c0_i32, %c0_i32_0 : i32, i32
  }
  func.func @transform_3(%arg0: i32, %arg1: i32) -> (i32, i32, i32, i32) {
    %c0_i32 = arith.constant 0 : i32
    %c0_i32_0 = arith.constant 0 : i32
    %c0_i32_1 = arith.constant 0 : i32
    return %arg0, %arg1, %c0_i32, %c0_i32_0 : i32, i32, i32, i32
  }
}

</mosaic_0001>

<bundles_post_ra>
// kernel: decoder_forward.5
= control target key start
LH: loop header
LB: loop body
LE: loop exit
PB: predicated region body
PF: predicated region fallthrough
CT: control target
= control target key end

     0   :  { %8 = vsyncpa [#allocation3], 0  ;;  %s381_s0 = inlined_call_operand.hbm [shape: f32[2,32], index: 0, kind: input, shape index: {}]   ;;  %s382_s1 = inlined_call_operand.hbm [shape: f32[32,512], index: 1, kind: input, shape index: {}]   ;;  %s383_s2 = inlined_call_operand.hbm [shape: f32[1,512], index: 2, kind: input, shape index: {}]   ;;  %s384_s3 = inlined_call_operand.vmem [shape: f32[2,512], index: 3, kind: output, shape index: {}]  }
   0x1   :  { %9 = vsyncpa [#allocation5], 0  ;;  %s342_s12 = smov [#allocation4]  }
   0x2   :  { %s25_s13 = sshll.u32 %s342_s12, 4  ;;  %s26_s13 = int_to_ptr.vmem [resolvable:$true] %s25_s13 }
   0x3   :  { %s286_s14 = scalar_lea.vmem %s26_s13, 2048  ;;  %p291_p1 = scmp.lt.s32.totalorder %s26_s13, %s26_s13 }
   0x4   :  { %p287_p0 = scmp.ne.s32.totalorder %s26_s13, %s286_s14  ;;  %p292_p2 = scmp.lt.s32.totalorder %s286_s14, %s286_s14 }
   0x6   :  { %p293_p3 = por %p292_p2, %p291_p1 }
   0x8   :  { %p294_p4 = pnand %p293_p3, %p287_p0 }
   0xa   :  { %297 = shalt.err (!%p294_p4)
}
   0xb   :  { %s343_s15 = smov 512   ;;  %s344_s16 = smov 32  }
   0xc   :  { %31 = dma.hbm_to_vmem [thread:$0]  %s382_s1, 2048, %s26_s13, [#allocation5], %s343_s15, %s343_s15, %s344_s16  }
   0xd   :  { %s345_s19 = smov [#allocation2]   ;;  %s346_s21 = smov [#allocation6]  }
   0xe   :  { %s16_s20 = sshll.u32 %s345_s19, 4  ;;  %s38_s22 = sshll.u32 %s346_s21, 4  ;;  %s17_s20 = int_to_ptr.vmem [resolvable:$true] %s16_s20  ;;  %s39_s22 = int_to_ptr.vmem [resolvable:$true] %s38_s22 }
   0xf   :  { %s306_s23 = scalar_lea.vmem %s17_s20, 32  ;;  %p311_p6 = scmp.lt.s32.totalorder %s17_s20, %s17_s20 }
  0x10   :  { %p307_p5 = scmp.ne.s32.totalorder %s17_s20, %s306_s23  ;;  %p312_p7 = scmp.lt.s32.totalorder %s306_s23, %s306_s23 }
  0x12   :  { %p313_p8 = por %p312_p7, %p311_p6 }
  0x14   :  { %p314_p9 = pnand %p313_p8, %p307_p5 }
  0x16   :  { %317 = shalt.err (!%p314_p9)
}
  0x17   :  { %19 = dma.hbm_to_vmem [thread:$0]  %s381_s0, 32, %s17_s20, [#allocation3]  }
  0x18   :  { %s326_s26 = scalar_lea.vmem %s39_s22, 64  ;;  %p331_p11 = scmp.lt.s32.totalorder %s39_s22, %s39_s22 }
  0x19   :  { %p327_p10 = scmp.ne.s32.totalorder %s39_s22, %s326_s26  ;;  %p332_p12 = scmp.lt.s32.totalorder %s326_s26, %s326_s26 }
  0x1b   :  { %p333_p13 = por %p332_p12, %p331_p11 }
  0x1d   :  { %p334_p0 = pnand %p333_p13, %p327_p10 }
  0x1f   :  { %337 = shalt.err (!%p334_p0)
}
  0x20   :  { %41 = dma.hbm_to_vmem [thread:$0]  %s383_s2, 64, %s39_s22, [#allocation5]  }
  0x21   :  { %338 = dma.done.wait [#allocation3], 32  }
  0x22   :  { %339 = vsyncadd [#allocation3], 4294967264 }
  0x23   :  { %340 = dma.done.wait [#allocation5], 2112  }
  0x24   :  { %341 = vsyncadd [#allocation5], 4294965184  ;;  %v347_v0 = vmov 0.0   ;;  %v65_v1 = vld [vmem:[#allocation4 + $0x68] sm:$0xff]  ;;  %v67_v2 = vld [vmem:[#allocation4 + $0x78] sm:$0xff]  ;;  %vm90_vm0 = vcmask 261120   ;;  %v70_v18 = vlaneseq }
  0x25   :  { %158 = vmatprep.mubr.f32.mxu0 %v347_v0  ;;  %229 = vmatprep.mubr.f32.mxu1 %v347_v0  ;;  %v64_v3 = vld [vmem:[#allocation4 + $0x60] sm:$0xff]  ;;  %v66_v4 = vld [vmem:[#allocation4 + $0x70] sm:$0xff]  ;;  %v61_v5 = vld [vmem:[#allocation4 + $0x48] sm:$0xff]  ;;  %v348_v25 = vmov 1983009808  }
  0x26   :  { %118 = vmatprep.subr.mxu0 %v65_v1  ;;  %189 = vmatprep.subr.mxu1 %v67_v2  ;;  %v63_v6 = vld [vmem:[#allocation4 + $0x58] sm:$0xff]  ;;  %v60_v7 = vld [vmem:[#allocation4 + $0x40] sm:$0xff]  ;;  %v62_v8 = vld [vmem:[#allocation4 + $0x50] sm:$0xff]  ;;  %v71_v19 = vshrl.u32 %v70_v18, 7  ;;  %v247_v26 = vunpack.c.l.s4 %v348_v25 }
  0x27   :  { %119 = vmatpush1.msra.mxu0 %v64_v3  ;;  %190 = vmatpush1.msra.mxu1 %v66_v4  ;;  %v57_v9 = vld [vmem:[#allocation4 + $0x28] sm:$0xff]  ;;  %v59_v10 = vld [vmem:[#allocation4 + $0x38] sm:$0xff]  ;;  %v56_v11 = vld [vmem:[#allocation4 + $0x20] sm:$0xff] }
  0x28   :  { %120 = vmatprep.subr.mxu0 %v61_v5  ;;  %191 = vmatprep.subr.mxu1 %v63_v6  ;;  %v58_v12 = vld [vmem:[#allocation4 + $0x30] sm:$0xff]  ;;  %v53_v13 = vld [vmem:[#allocation4 + $0x8] sm:$0xff]  ;;  %v55_v14 = vld [vmem:[#allocation4 + $0x18] sm:$0xff]  ;;  %v72_v20 = vsub.s32 0, %v71_v19  ;;  %v80_v21 = vsub.s32 2, %v71_v19  ;;  %v76_v23 = vsub.s32 1, %v71_v19  ;;  %v248_v33 = vunpack.c.0.s8 %v247_v26 }
  0x29   :  { %121 = vmatpush1.msra.mxu0 %v60_v7  ;;  %192 = vmatpush1.msra.mxu1 %v62_v8  ;;  %v52_v15 = vld [vmem:[#allocation4] sm:$0xff]  ;;  %v54_v16 = vld [vmem:[#allocation4 + $0x10] sm:$0xff]  ;;  %v51_v17 = vld [vmem:[#allocation2] sm:$0x3]  ;;  %v84_v24 = vsub.s32 3, %v71_v19 }
  0x2a   :  { %122 = vmatprep.subr.mxu0 %v57_v9  ;;  %193 = vmatprep.subr.mxu1 %v59_v10  ;;  %v68_v22 = vld [vmem:[#allocation6] sm:$0xf]  ;;  %v251_v40 = vsub.s32 %v248_v33, %v71_v19 }
  0x2b   :  { %123 = vmatpush1.msra.mxu0 %v56_v11  ;;  %194 = vmatpush1.msra.mxu1 %v58_v12  ;;  %v73_v27 = vrot.slane %v68_v22, %v72_v20  ;;  %v81_v28 = vrot.slane %v68_v22, %v80_v21  ;;  %v77_v29 = vrot.slane %v68_v22, %v76_v23 }
  0x2c   :  { %124 = vmatprep.subr.mxu0 %v53_v13  ;;  %195 = vmatprep.subr.mxu1 %v55_v14  ;;  %v85_v30 = vrot.slane %v68_v22, %v84_v24 }
  0x2d   :  { %125 = vmatpush1.msra.mxu0 %v52_v15  ;;  %196 = vmatpush1.msra.mxu1 %v54_v16 }
  0x2e   :  { %269 = vmatmul.mubr.msk.f32.vlgmr.msra.gmra.mxu0 %vm90_vm0, %v51_v17  ;;  %270 = vmatmul.mubr.msk.f32.vlgmr.msra.gmra.mxu1 %vm90_vm0, %v51_v17 }
  0xee   :  { %v160_v31 = vpop.f32.mrf.mxu0  ;;  %v231_v32 = vpop.f32.mrf.mxu1 }
  0xef   :  { %v161_v34 = vadd.f32 %v160_v31, %v73_v27  ;;  %v232_v35 = vadd.f32 %v231_v32, %v81_v28 }
  0xf0   :  { %v162_v36 = vpop.f32.mrf.mxu0  ;;  %v233_v37 = vpop.f32.mrf.mxu1 }
  0xf1   :  { %v163_v38 = vadd.f32 %v162_v36, %v77_v29  ;;  %v234_v39 = vadd.f32 %v233_v37, %v85_v30  ;;  %v236_v41 = vmax.f32 %v161_v34, 0.0  ;;  %v238_v42 = vmax.f32 %v232_v35, 0.0 }
  0xf3   :  { %v237_v43 = vmax.f32 %v163_v38, 0.0  ;;  %v239_v44 = vmax.f32 %v234_v39, 0.0 }
  0xf5   :  { %v244_v45 = vcombine.low %v236_v41, %v237_v43  ;;  %v245_v46 = vcombine.low %v238_v42, %v239_v44 }
  0xf7   :  { %v252_v47 = vrot.slane %v244_v45, %v251_v40  ;;  %v259_v48 = vrot.slane %v245_v46, %v251_v40 }
  0xf9   :  { %v260_v49 = vcombine.low %v252_v47, %v259_v48 }
  0xfb   :  { %262 = vst [vmem:[%s384_s3] sm:$0xff] %v260_v49 }
  0xfc   :  { %267 = vsyncpa [#allocation3], 1 }
  0xfd   :  { %268 = vsyncpa [#allocation5], 1 }

// kernel: decoder_forward.6
= control target key start
LH: loop header
LB: loop body
LE: loop exit
PB: predicated region body
PF: predicated region fallthrough
CT: control target
= control target key end

     0   :  { %8 = vsyncpa [#allocation4], 0  ;;  %s1764_s0 = inlined_call_operand.vmem [shape: f32[2,4,4,32], index: 0, kind: input, shape index: {}]   ;;  %s1765_s1 = inlined_call_operand.hbm [shape: f32[9,32,64], index: 1, kind: input, shape index: {}]   ;;  %s1766_s2 = inlined_call_operand.hbm [shape: f32[1,64], index: 2, kind: input, shape index: {}]   ;;  %s1767_s3 = inlined_call_operand.vmem [shape: f32[2,8,4,32], index: 3, kind: output, shape index: {}]  }
   0x1   :  { %9 = vsyncpa [#allocation6], 0  ;;  %s1648_s12 = smov 0   ;;  %s1650_s13 = smov 0  }
   0x2   :  { %s1652_s14 = smov 0  }
   0x3 LB: > { %s1258_s15 = sadd.s32 4294967295, %s1620_s14   ;;  %s27_s16 = sadd.s32 1, %s1616_s13  ;;  %s1620_s14 = sphi %s1652_s14, %s15_s14   ;;  %s1616_s13 = sphi %s1650_s13, %s1772_s13   ;;  %s1612_s12 = sphi %s1648_s12, %s1771_s12  }
   0x4   : > { %p29_p0 = scmp.ge.s32.totalorder %s27_s16, 2  ;;  %p1260_p1 = scmp.ge.s32.totalorder %s1620_s14, 1 }
   0x5   : > { %p128_p2 = scmp.lt.s32.totalorder %s1620_s14, 3  ;;  %p1673_p4 = scmp.eq.s32.totalorder %s1258_s15, 0 }
   0x6   : > { %s1774_s16 = smov (%p29_p0, %s27_s16), 0  ;;  %s1622_s19 = smov [#allocation3]  }
   0x7   : > { %p1669_p3 = pnand %p1260_p1, %p128_p2  ;;  %s140_s20 = sshll.u32 %s1622_s19, 4  ;;  %s141_s20 = int_to_ptr.vmem [resolvable:$true] %s140_s20 }
   0x8   : > { %s1623_s22 = smov [#allocation5]   ;;  %s1549_s24 = scalar_lea.vmem %s141_s20, 4608 }
   0x9   : > { %p1479_p5 = pneg %p1669_p3  ;;  %s154_s23 = sshll.u32 %s1623_s22, 4  ;;  %s155_s23 = int_to_ptr.vmem [resolvable:$true] %s154_s23 }
   0xa   : > { %p1550_p8 = scmp.ne.s32.totalorder %s141_s20, %s1549_s24  ;;  %p1557_p11 = scmp.lt.s32.totalorder %s141_s20, %s141_s20 }
   0xb   : > { %p1681_p6 = pnand %p1673_p4, %p1479_p5  ;;  %p1558_p12 = scmp.lt.s32.totalorder %s1549_s24, %s1549_s24 }
   0xd   : > { %p1540_p7 = pneg %p1681_p6  ;;  %p1559_p13 = por %p1558_p12, %p1557_p11 }
   0xf   : > { %p1552_p9 = pnand %p1550_p8, %p1540_p7 }
  0x11   : > { %p1553_p10 = pneg %p1552_p9 }
  0x13   : > { %p1560_p0 = pnand %p1559_p13, %p1553_p10 }
  0x15   : > { %1563 = shalt.err (!%p1560_p0)
}
  0x16   : > { %s1624_s25 = smov 128   ;;  %s1625_s26 = smov 8  }
  0x17   : > { %1482 = dma.hbm_to_vmem [thread:$0]  (!%p1681_p6), %s1765_s1, 4608, %s141_s20, [#allocation4], %s1624_s25, %s1624_s25, %s1625_s26  }
  0x18   : > { %s1575_s29 = scalar_lea.vmem %s155_s23, 16  ;;  %s1582_s30 = scalar_lea.vmem %s155_s23, 32 }
  0x19   : > { %p1576_p1 = scmp.ne.s32.totalorder %s155_s23, %s1575_s29  ;;  %p1583_p8 = scmp.lt.s32.totalorder %s155_s23, %s155_s23 }
  0x1a   : > { %p1584_p9 = scmp.lt.s32.totalorder %s1582_s30, %s1575_s29 }
  0x1b   : > { %p1578_p2 = pnand %p1576_p1, %p1540_p7 }
  0x1c   : > { %p1585_p10 = por %p1584_p9, %p1583_p8 }
  0x1d   : > { %p1579_p5 = pneg %p1578_p2 }
  0x1f   : > { %p1586_p11 = pnand %p1585_p10, %p1579_p5 }
  0x21   : > { %1589 = shalt.err (!%p1586_p11)
}
  0x22   : > { %1485 = dma.hbm_to_vmem [thread:$0]  (!%p1681_p6), %s1766_s2, 16, %s155_s23, [#allocation6]  }
  0x23   : > { %175 = sbr.rel (%p1669_p3) target bundleno = 417 (0x1a1), region = 32 }
  0x28   : > { %1603 = dma.done.wait (%p1673_p4), [#allocation4], 4608  }
  0x29   : > { %1605 = vsyncadd (%p1673_p4), [#allocation4], 4294962688 }
  0x2a   : > { %1607 = dma.done.wait (%p1673_p4), [#allocation6], 16  }
  0x2b   : > { %1609 = vsyncadd (%p1673_p4), [#allocation6], 4294967280  ;;  %p207_p7 = scmp.lt.s32.totalorder %s1612_s12, 1  ;;  %vm222_vm0 = vcmask 259072   ;;  %v1626_v0 = vmov 0.0   ;;  %v258_v1 = vld [vmem:[#allocation3 + $0x38] sm:$0xff] }
  0x2c   : > { %223 = vst.msk [vmem:[#allocation2] sm:$0x3f] %vm222_vm0, %v1626_v0  ;;  %224 = vst.msk [vmem:[#allocation2 + $0x8] sm:$0x3f] %vm222_vm0, %v1626_v0  ;;  %v249_v2 = vld [vmem:[#allocation3 + $0x18] sm:$0xff]  ;;  %v257_v3 = vld [vmem:[#allocation3 + $0x30] sm:$0xff]  ;;  %1372 = vmatprep.subr.mxu0 %v258_v1 }
  0x2d   : > { %225 = vst.msk [vmem:[#allocation2 + $0x10] sm:$0x3f] %vm222_vm0, %v1626_v0  ;;  %226 = vst.msk [vmem:[#allocation2 + $0x18] sm:$0x3f] %vm222_vm0, %v1626_v0  ;;  %s1776_s12 = smov (!%p207_p7, %s1612_s12), 1  ;;  %vm234_vm1 = vcmask 257024   ;;  %1383 = vmatprep.subr.mxu1 %v249_v2  ;;  %1373 = vmatpush3.msra.mxu0 %v258_v1 }
  0x2e   : > { %227 = vst.msk [vmem:[#allocation2 + $0x20] sm:$0x3f] %vm222_vm0, %v1626_v0  ;;  %228 = vst.msk [vmem:[#allocation2 + $0x28] sm:$0x3f] %vm222_vm0, %v1626_v0  ;;  %s1316_s6 = sshll.u32 %s1776_s12, 4  ;;  %v248_v4 = vld [vmem:[#allocation3 + $0x10] sm:$0xff]  ;;  %1384 = vmatpush3.msra.mxu1 %v249_v2  ;;  %1374 = vmatprep.subr.mxu0 %v257_v3 }
  0x2f   : > { %s211_s9 = scalar_lea.vmem %s1764_s0, %s1316_s6  ;;  %v256_v5 = vld [vmem:[#allocation3 + $0x28] sm:$0xff]  ;;  %v255_v7 = vld [vmem:[#allocation3 + $0x20] sm:$0xff]  ;;  %1385 = vmatprep.subr.mxu1 %v248_v4  ;;  %1375 = vmatpush3.msra.mxu0 %v257_v3  ;;  %v438_v13 = vld [vmem:[#allocation3 + $0x58] sm:$0xff]  ;;  %vm265_vm2 = vcmask 261120   ;;  %s1317_s10 = sshll.u32 %s1776_s12, 5 }
  0x30   : > { %v247_v6 = vld [vmem:[#allocation3 + $0x8] sm:$0xff]  ;;  %v229_v8 = vld [vmem:[%s211_s9] sm:$0xf]  ;;  %v232_v9 = vld [vmem:[%s211_s9 + $0xc] sm:$0xf]  ;;  %1386 = vmatpush3.msra.mxu1 %v248_v4  ;;  %1376 = vmatprep.subr.mxu0 %v256_v5  ;;  %s220_s17 = scalar_lea.vmem %s1767_s3, %s1317_s10  ;;  %s1627_s18 = smov 96  }
  0x31   : > { %235 = vst.msk [vmem:[#allocation2 + $0x9] sm:$0xf] %vm234_vm1, %v229_v8  ;;  %v246_v10 = vld [vmem:[#allocation3] sm:$0xff]  ;;  %238 = vst.msk [vmem:[#allocation2 + $0x21] sm:$0xf] %vm234_vm1, %v232_v9  ;;  %1387 = vmatprep.subr.mxu1 %v247_v6  ;;  %1377 = vmatpush3.msra.mxu0 %v256_v5  ;;  %v537_v14 = vld [vmem:[#allocation3 + $0x78] sm:$0xff] }
  0x32   : > { %v230_v11 = vld [vmem:[%s211_s9 + $0x4] sm:$0xf]  ;;  %v231_v12 = vld [vmem:[%s211_s9 + $0x8] sm:$0xf]  ;;  %1388 = vmatpush3.msra.mxu1 %v247_v6  ;;  %1378 = vmatprep.subr.mxu0 %v255_v7  ;;  %v436_v20 = vld [vmem:[#allocation3 + $0x48] sm:$0xff] }
  0x33   : > { %236 = vst.msk [vmem:[#allocation2 + $0x11] sm:$0xf] %vm234_vm1, %v230_v11  ;;  %237 = vst.msk [vmem:[#allocation2 + $0x19] sm:$0xf] %vm234_vm1, %v231_v12  ;;  %1389 = vmatprep.subr.mxu1 %v246_v10  ;;  %1379 = vmatpush3.msra.mxu0 %v255_v7  ;;  %v437_v17 = vld [vmem:[#allocation3 + $0x50] sm:$0xff]  ;;  %v535_v22 = vld [vmem:[#allocation3 + $0x68] sm:$0xff] }
  0x34   : > { %1390 = vmatpush3.msra.mxu1 %v246_v10  ;;  %1394 = vmatprep.subr.mxu0 %v438_v13  ;;  %v536_v21 = vld [vmem:[#allocation3 + $0x70] sm:$0xff]  ;;  %v435_v24 = vld [vmem:[#allocation3 + $0x40] sm:$0xff]  ;;  %v633_v27 = vld [vmem:[#allocation3 + $0x98] sm:$0xff] }
  0x35   : > { %1405 = vmatprep.subr.mxu1 %v537_v14  ;;  %v534_v26 = vld [vmem:[#allocation3 + $0x60] sm:$0xff]  ;;  %v632_v30 = vld [vmem:[#allocation3 + $0x90] sm:$0xff]  ;;  %v729_v31 = vld [vmem:[#allocation3 + $0xb8] sm:$0xff] }
  0x36   : > { %v631_v32 = vld [vmem:[#allocation3 + $0x88] sm:$0xff]  ;;  %v728_v33 = vld [vmem:[#allocation3 + $0xb0] sm:$0xff]  ;;  %v630_v34 = vld [vmem:[#allocation3 + $0x80] sm:$0xff] }
  0x37   : > { %v727_v35 = vld [vmem:[#allocation3 + $0xa8] sm:$0xff]  ;;  %v726_v38 = vld [vmem:[#allocation3 + $0xa0] sm:$0xff]  ;;  %v828_v39 = vld [vmem:[#allocation3 + $0xd8] sm:$0xff] }
  0x38   : > { %v1520_v15 = vld [vmem:[#allocation2 + $0x1] ss:$8 sps:$4 sm:$0xff]   ;;  %v826_v44 = vld [vmem:[#allocation3 + $0xc8] sm:$0xff]  ;;  %v825_v46 = vld [vmem:[#allocation3 + $0xc0] sm:$0xff] }
  0x39   : > { %v1521_v16 = vld [vmem:[#allocation2] ss:$8 sps:$4 sm:$0xff]   ;;  %1380 = vmatprep.mubr.msk.f32.mxu0 %vm265_vm2, %v1520_v15  ;;  %v922_v47 = vld [vmem:[#allocation3 + $0xe8] sm:$0xff]  ;;  %v921_v50 = vld [vmem:[#allocation3 + $0xe0] sm:$0xff] }
  0x3a   : > { %v1522_v18 = vld [vmem:[#allocation2 + $0x11] ss:$8 sps:$4 sm:$0xff]   ;;  %1391 = vmatprep.mubr.msk.f32.mxu1 %vm265_vm2, %v1521_v16  ;;  %v1524_v23 = vld [vmem:[#allocation2 + $0x2] ss:$8 sps:$4 sm:$0xff]  }
  0x3b   : > { %v1523_v19 = vld [vmem:[#allocation2 + $0x10] ss:$8 sps:$4 sm:$0xff]   ;;  %1381 = vmatmul.mubr.msk.f32.vlgmr.msra.gmra.mxu0 %vm265_vm2, %v1522_v18  ;;  %v827_v42 = vld [vmem:[#allocation3 + $0xd0] sm:$0xff]  ;;  %v924_v43 = vld [vmem:[#allocation3 + $0xf8] sm:$0xff] }
  0x3c   : > { %1392 = vmatmul.mubr.msk.f32.vlgmr.msra.gmra.mxu1 %vm265_vm2, %v1523_v19  ;;  %1395 = vmatpush3.msra.mxu0 %v438_v13  ;;  %v1525_v25 = vld [vmem:[#allocation2 + $0x12] ss:$8 sps:$4 sm:$0xff]   ;;  %v923_v45 = vld [vmem:[#allocation3 + $0xf0] sm:$0xff]  ;;  %v1020_v51 = vld [vmem:[#allocation3 + $0x118] sm:$0xff] }
  0x3d   : > { %1396 = vmatprep.subr.mxu0 %v437_v17  ;;  %1406 = vmatpush3.msra.mxu1 %v537_v14  ;;  %v1526_v28 = vld [vmem:[#allocation2 + $0x8] ss:$8 sps:$4 sm:$0xff]   ;;  %v1527_v29 = vld [vmem:[#allocation2 + $0x18] ss:$8 sps:$4 sm:$0xff]  }
  0x3e   : > { %1397 = vmatpush3.msra.mxu0 %v437_v17  ;;  %1407 = vmatprep.subr.mxu1 %v536_v21  ;;  %v1528_v36 = vld [vmem:[#allocation2 + $0x9] ss:$8 sps:$4 sm:$0xff]   ;;  %v1529_v37 = vld [vmem:[#allocation2 + $0x19] ss:$8 sps:$4 sm:$0xff]  }
  0x3f   : > { %1398 = vmatprep.subr.mxu0 %v436_v20  ;;  %1408 = vmatpush3.msra.mxu1 %v536_v21  ;;  %v1530_v40 = vld [vmem:[#allocation2 + $0xa] ss:$8 sps:$4 sm:$0xff]   ;;  %v1531_v41 = vld [vmem:[#allocation2 + $0x1a] ss:$8 sps:$4 sm:$0xff]  }
  0x40   : > { %1399 = vmatpush3.msra.mxu0 %v436_v20  ;;  %1409 = vmatprep.subr.mxu1 %v535_v22  ;;  %v1532_v48 = vld [vmem:[#allocation2 + $0x10] ss:$8 sps:$4 sm:$0xff]   ;;  %v1533_v49 = vld [vmem:[#allocation2 + $0x20] ss:$8 sps:$4 sm:$0xff]  }
  0x41   : > { %1400 = vmatprep.subr.mxu0 %v435_v24  ;;  %1402 = vmatprep.mubr.msk.f32.mxu0 %vm265_vm2, %v1524_v23  ;;  %v1534_v52 = vld [vmem:[#allocation2 + $0x11] ss:$8 sps:$4 sm:$0xff]   ;;  %v1535_v53 = vld [vmem:[#allocation2 + $0x21] ss:$8 sps:$4 sm:$0xff]  }
  0x42   : > { %1401 = vmatpush3.msra.mxu0 %v435_v24  ;;  %1410 = vmatpush3.msra.mxu1 %v535_v22  ;;  %v1019_v54 = vld [vmem:[#allocation3 + $0x110] sm:$0xff]  ;;  %v1536_v55 = vld [vmem:[#allocation2 + $0x12] ss:$8 sps:$4 sm:$0xff]  }
  0x43   : > { %1403 = vmatmul.mubr.msk.f32.vlgmr.msra.gmra.mxu0 %vm265_vm2, %v1525_v25  ;;  %1411 = vmatprep.subr.mxu1 %v534_v26  ;;  %v1018_v56 = vld [vmem:[#allocation3 + $0x108] sm:$0xff]  ;;  %v1017_v57 = vld [vmem:[#allocation3 + $0x100] sm:$0xff]  ;;  %v1537_v58 = vld [vmem:[#allocation2 + $0x22] ss:$8 sps:$4 sm:$0xff]  }
  0x44   : > { %1416 = vmatprep.subr.mxu0 %v633_v27  ;;  %1412 = vmatpush3.msra.mxu1 %v534_v26  ;;  %v1313_v25 = vld [vmem:[#allocation5] ss:$0 sm:$0xff] }
  0x45   : > { %1413 = vmatprep.mubr.msk.f32.mxu1 %vm265_vm2, %v1526_v28  ;;  %1417 = vmatpush3.msra.mxu0 %v633_v27 }
  0x46   : > { %1414 = vmatmul.mubr.msk.f32.vlgmr.msra.gmra.mxu1 %vm265_vm2, %v1527_v29  ;;  %1418 = vmatprep.subr.mxu0 %v632_v30 }
  0x47   : > { %1427 = vmatprep.subr.mxu1 %v729_v31  ;;  %1419 = vmatpush3.msra.mxu0 %v632_v30 }
  0x48   : > { %1428 = vmatpush3.msra.mxu1 %v729_v31  ;;  %1420 = vmatprep.subr.mxu0 %v631_v32 }
  0x49   : > { %1429 = vmatprep.subr.mxu1 %v728_v33  ;;  %1421 = vmatpush3.msra.mxu0 %v631_v32 }
  0x4a   : > { %1430 = vmatpush3.msra.mxu1 %v728_v33  ;;  %1422 = vmatprep.subr.mxu0 %v630_v34 }
  0x4b   : > { %1431 = vmatprep.subr.mxu1 %v727_v35  ;;  %1423 = vmatpush3.msra.mxu0 %v630_v34 }
  0x4c   : > { %1424 = vmatprep.mubr.msk.f32.mxu0 %vm265_vm2, %v1528_v36  ;;  %1432 = vmatpush3.msra.mxu1 %v727_v35 }
  0x4d   : > { %1425 = vmatmul.mubr.msk.f32.vlgmr.msra.gmra.mxu0 %vm265_vm2, %v1529_v37  ;;  %1433 = vmatprep.subr.mxu1 %v726_v38 }
  0x4e   : > { %1438 = vmatprep.subr.mxu0 %v828_v39  ;;  %1434 = vmatpush3.msra.mxu1 %v726_v38 }
  0x4f   : > { %1435 = vmatprep.mubr.msk.f32.mxu1 %vm265_vm2, %v1530_v40  ;;  %1439 = vmatpush3.msra.mxu0 %v828_v39 }
  0x50   : > { %1436 = vmatmul.mubr.msk.f32.vlgmr.msra.gmra.mxu1 %vm265_vm2, %v1531_v41  ;;  %1440 = vmatprep.subr.mxu0 %v827_v42 }
  0x51   : > { %1449 = vmatprep.subr.mxu1 %v924_v43  ;;  %1441 = vmatpush3.msra.mxu0 %v827_v42 }
  0x52   : > { %1450 = vmatpush3.msra.mxu1 %v924_v43  ;;  %1442 = vmatprep.subr.mxu0 %v826_v44 }
  0x53   : > { %1451 = vmatprep.subr.mxu1 %v923_v45  ;;  %1443 = vmatpush3.msra.mxu0 %v826_v44 }
  0x54   : > { %1452 = vmatpush3.msra.mxu1 %v923_v45  ;;  %1444 = vmatprep.subr.mxu0 %v825_v46 }
  0x55   : > { %1453 = vmatprep.subr.mxu1 %v922_v47  ;;  %1445 = vmatpush3.msra.mxu0 %v825_v46 }
  0x56   : > { %1446 = vmatprep.mubr.msk.f32.mxu0 %vm265_vm2, %v1532_v48  ;;  %1454 = vmatpush3.msra.mxu1 %v922_v47 }
  0x57   : > { %1447 = vmatmul.mubr.msk.f32.vlgmr.msra.gmra.mxu0 %vm265_vm2, %v1533_v49  ;;  %1455 = vmatprep.subr.mxu1 %v921_v50 }
  0x58   : > { %1460 = vmatprep.subr.mxu0 %v1020_v51  ;;  %1456 = vmatpush3.msra.mxu1 %v921_v50 }
  0x59   : > { %1457 = vmatprep.mubr.msk.f32.mxu1 %vm265_vm2, %v1534_v52  ;;  %1461 = vmatpush3.msra.mxu0 %v1020_v51 }
  0x5a   : > { %1458 = vmatmul.mubr.msk.f32.vlgmr.msra.gmra.mxu1 %vm265_vm2, %v1535_v53  ;;  %1462 = vmatprep.subr.mxu0 %v1019_v54 }
  0x5b   : > { %1463 = vmatpush3.msra.mxu0 %v1019_v54  ;;  %1468 = vmatprep.mubr.msk.f32.mxu0 %vm265_vm2, %v1536_v55 }
  0x5c   : > { %1464 = vmatprep.subr.mxu0 %v1018_v56 }
  0x5d   : > { %1465 = vmatpush3.msra.mxu0 %v1018_v56 }
  0x5e   : > { %1466 = vmatprep.subr.mxu0 %v1017_v57 }
  0x5f   : > { %1467 = vmatpush3.msra.mxu0 %v1017_v57 }
  0x60   : > { %1469 = vmatmul.mubr.msk.f32.vlgmr.msra.gmra.mxu0 %vm265_vm2, %v1537_v58 }
  0xfb   : > { %v1382_v59 = vpop.f32.mrf.mxu0 }
  0xfc   : > { %v1393_v60 = vpop.f32.mrf.mxu1 }
  0xfd   : > { %v336_v61 = vpop.f32.mrf.mxu0  ;;  %v427_v0 = vadd.f32 %v1393_v60, %v1382_v59 }
  0xfe   : > { %v421_v63 = vpop.f32.mrf.mxu1 }
  0xff   : > { %v422_v3 = vadd.f32 %v421_v63, %v336_v61 }
 0x103   : > { %v1404_v62 = vpop.f32.mrf.mxu0 }
 0x104   : > { %v525_v4 = vadd.f32 %v1404_v62, %v427_v0 }
 0x105   : > { %v515_v1 = vpop.f32.mrf.mxu0 }
 0x106   : > { %v1415_v2 = vpop.f32.mrf.mxu1  ;;  %v524_v6 = vadd.f32 %v515_v1, %v422_v3 }
 0x107   : > { %v624_v8 = vadd.f32 %v1415_v2, %v525_v4 }
 0x108   : > { %v614_v7 = vpop.f32.mrf.mxu1 }
 0x109   : > { %v623_v11 = vadd.f32 %v614_v7, %v524_v6 }
 0x10d   : > { %v1426_v5 = vpop.f32.mrf.mxu0 }
 0x10e   : > { %v720_v12 = vadd.f32 %v1426_v5, %v624_v8 }
 0x10f   : > { %v710_v9 = vpop.f32.mrf.mxu0 }
 0x110   : > { %v1437_v10 = vpop.f32.mrf.mxu1  ;;  %v719_v13 = vadd.f32 %v710_v9, %v623_v11 }
 0x111   : > { %v816_v16 = vadd.f32 %v1437_v10, %v720_v12 }
 0x112   : > { %v806_v15 = vpop.f32.mrf.mxu1 }
 0x113   : > { %v815_v19 = vadd.f32 %v806_v15, %v719_v13 }
 0x117   : > { %v1448_v14 = vpop.f32.mrf.mxu0 }
 0x118   : > { %v915_v20 = vadd.f32 %v1448_v14, %v816_v16 }
 0x119   : > { %v905_v17 = vpop.f32.mrf.mxu0 }
 0x11a   : > { %v1459_v18 = vpop.f32.mrf.mxu1  ;;  %v914_v21 = vadd.f32 %v905_v17, %v815_v19 }
 0x11b   : > { %v1011_v23 = vadd.f32 %v1459_v18, %v915_v20 }
 0x11c   : > { %v1001_v22 = vpop.f32.mrf.mxu1 }
 0x11d   : > { %v1010_v26 = vadd.f32 %v1001_v22, %v914_v21 }
 0x120   : > { %v1470_v24 = vpop.f32.mrf.mxu0 }
 0x121   : > { %v1107_v27 = vadd.f32 %v1470_v24, %v1011_v23 }
 0x122   : > { %v1097_v28 = vpop.f32.mrf.mxu0 }
 0x123   : > { %v1116_v29 = vadd.f32 %v1313_v25, %v1107_v27  ;;  %v1106_v30 = vadd.f32 %v1097_v28, %v1010_v26 }
 0x125   : > { %v1118_v31 = vmax.f32 %v1116_v29, 0.0  ;;  %v1115_v32 = vadd.f32 %v1313_v25, %v1106_v30 }
 0x127   : > { %1141 = vst.msk [vmem:[%s220_s17 + $0x10] sm:$0xf] %vm234_vm1, %v1118_v31  ;;  %v1117_v33 = vmax.f32 %v1115_v32, 0.0  ;;  %1129 = vrot.lane.b32.xlu1 %v1118_v31, %s1627_s18  ;;  %v1122_v34 = vcombine.high %v1118_v31, %v1118_v31 }
 0x129   : > { %1137 = vst.msk [vmem:[%s220_s17] sm:$0xf] %vm234_vm1, %v1117_v33  ;;  %1125 = vrot.lane.b32.xlu0 %v1117_v33, %s1627_s18  ;;  %1143 = vst.msk [vmem:[%s220_s17 + $0x18] sm:$0xf] %vm234_vm1, %v1122_v34  ;;  %v1121_v35 = vcombine.high %v1117_v33, %v1117_v33 }
 0x12b   : > { %1131 = vrot.lane.b32.xlu1 %v1122_v34, %s1627_s18  ;;  %1139 = vst.msk [vmem:[%s220_s17 + $0x8] sm:$0xf] %vm234_vm1, %v1121_v35 }
 0x12d   : > { %1127 = vrot.lane.b32.xlu0 %v1121_v35, %s1627_s18 }
 0x199   : > { %v1130_v36 = vpop.permute.xlu1 %1129 }
 0x19a   : > { %1142 = vst.msk [vmem:[%s220_s17 + $0x14] sm:$0xf] %vm234_vm1, %v1130_v36 }
 0x19b   : > { %v1126_v37 = vpop.permute.xlu0 %1125 }
 0x19c   : > { %1138 = vst.msk [vmem:[%s220_s17 + $0x4] sm:$0xf] %vm234_vm1, %v1126_v37 }
 0x19d   : > { %v1132_v38 = vpop.permute.xlu1 %1131 }
 0x19e   : > { %1144 = vst.msk [vmem:[%s220_s17 + $0x1c] sm:$0xf] %vm234_vm1, %v1132_v38 }
 0x19f   : > { %v1128_v39 = vpop.permute.xlu0 %1127 }
 0x1a0   : > { %1140 = vst.msk [vmem:[%s220_s17 + $0xc] sm:$0xf] %vm234_vm1, %v1128_v39 }
 0x1a1 PF: > { %s15_s14 = sadd.s32 1, %s1620_s14   ;;  %s1771_s12 = smov %s1616_s13 }
 0x1a2   : > { %p12_p3 = scmp.ge.s32.totalorder %s15_s14, 4   ;;  %s1772_s13 = smov %s1774_s16 }
 0x1a4   :  { %14 = sbr.rel (!%p12_p3) target bundleno = 3 (0x3), region = 83 }
 0x1a9   :  { %1175 = vsyncpa [#allocation4], 1 }
 0x1aa   :  { %1177 = vsyncpa [#allocation4 + $0x1], 1 }
 0x1ab   :  { %1178 = vsyncpa [#allocation6], 1 }

// kernel: decoder_forward.7
= control target key start
LH: loop header
LB: loop body
LE: loop exit
PB: predicated region body
PF: predicated region fallthrough
CT: control target
= control target key end

     0   :  { %8 = vsyncpa [#allocation4], 0  ;;  %s2026_s0 = inlined_call_operand.vmem [shape: f32[2,8,8,16], index: 0, kind: input, shape index: {}]   ;;  %s2027_s1 = inlined_call_operand.hbm [shape: f32[9,16,32], index: 1, kind: input, shape index: {}]   ;;  %s2028_s2 = inlined_call_operand.hbm [shape: f32[1,32], index: 2, kind: input, shape index: {}]   ;;  %s2029_s3 = inlined_call_operand.vmem [shape: f32[2,16,8,16], index: 3, kind: output, shape index: {}]  }
   0x1   :  { %9 = vsyncpa [#allocation6], 0  ;;  %s1814_s12 = smov 0   ;;  %s1816_s13 = smov 0  }
   0x2   :  { %s1818_s14 = smov 0   ;;  %s1820_s15 = smov 0  }
   0x3   :  { %s1822_s16 = smov 0  }
   0x4 LB: > { %s1388_s17 = sadd.s32 4294967295, %s1786_s16   ;;  %s24_s18 = sadd.s32 1, %s1778_s14  ;;  %s1786_s16 = sphi %s1822_s16, %s15_s16   ;;  %s1782_s15 = sphi %s1820_s15, %s2036_s15   ;;  %s1778_s14 = sphi %s1818_s14, %s2035_s14   ;;  %s1774_s13 = sphi %s1816_s13, %s2034_s13   ;;  %s1770_s12 = sphi %s1814_s12, %s2033_s12  }
   0x5   : > { %p25_p0 = scmp.ge.s32.totalorder %s24_s18, 2  ;;  %s27_s19 = sadd.s32 1, %s1782_s15 }
   0x6   : > { %p1390_p1 = scmp.ge.s32.totalorder %s1786_s16, 1  ;;  %p128_p2 = scmp.lt.s32.totalorder %s1786_s16, 5 }
   0x7   : > { %s2038_s18 = smov (%p25_p0, %s24_s18), 0  ;;  %s2040_s19 = smov (!%p25_p0, %s27_s19), %s1782_s15 }
   0x8   : > { %p1847_p3 = pnand %p1390_p1, %p128_p2  ;;  %p29_p4 = scmp.ge.s32.totalorder %s2040_s19, 2 }
   0x9   : > { %p1851_p5 = scmp.eq.s32.totalorder %s1388_s17, 0  ;;  %s1788_s22 = smov [#allocation3]  }
   0xa   : > { %p1631_p6 = pneg %p1847_p3  ;;  %s2042_s19 = smov (%p29_p4, %s2040_s19), 0 }
   0xb   : > { %s140_s23 = sshll.u32 %s1788_s22, 4  ;;  %s141_s23 = int_to_ptr.vmem [resolvable:$true] %s140_s23 }
   0xc   : > { %p1861_p7 = pnand %p1851_p5, %p1631_p6  ;;  %s1699_s25 = scalar_lea.vmem %s141_s23, 2304 }
   0xd   : > { %p1700_p9 = scmp.ne.s32.totalorder %s141_s23, %s1699_s25  ;;  %p1707_p12 = scmp.lt.s32.totalorder %s141_s23, %s141_s23 }
   0xe   : > { %p1690_p8 = pneg %p1861_p7  ;;  %p1708_p13 = scmp.lt.s32.totalorder %s1699_s25, %s1699_s25 }
  0x10   : > { %p1702_p10 = pnand %p1700_p9, %p1690_p8  ;;  %p1709_p0 = por %p1708_p13, %p1707_p12 }
  0x12   : > { %p1703_p11 = pneg %p1702_p10 }
  0x14   : > { %p1710_p1 = pnand %p1709_p0, %p1703_p11 }
  0x16   : > { %1713 = shalt.err (!%p1710_p1)
}
  0x17   : > { %s1789_s26 = smov 128   ;;  %s1790_s27 = smov 8  }
  0x18   : > { %1634 = dma.hbm_to_vmem [thread:$0]  (!%p1861_p7), %s2027_s1, 2304, %s141_s23, [#allocation4], %s1789_s26, %s1789_s26, %s1790_s27  }
  0x19   : > { %s1791_s30 = smov [#allocation5]  }
  0x1a   : > { %s154_s4 = sshll.u32 %s1791_s30, 4  ;;  %s155_s4 = int_to_ptr.vmem [resolvable:$true] %s154_s4 }
  0x1b   : > { %s1725_s5 = scalar_lea.vmem %s155_s4, 16  ;;  %s1732_s6 = scalar_lea.vmem %s155_s4, 32 }
  0x1c   : > { %p1726_p2 = scmp.ne.s32.totalorder %s155_s4, %s1725_s5  ;;  %p1733_p9 = scmp.lt.s32.totalorder %s155_s4, %s155_s4 }
  0x1d   : > { %p1734_p10 = scmp.lt.s32.totalorder %s1732_s6, %s1725_s5 }
  0x1e   : > { %p1728_p4 = pnand %p1726_p2, %p1690_p8 }
  0x1f   : > { %p1735_p11 = por %p1734_p10, %p1733_p9 }
  0x20   : > { %p1729_p6 = pneg %p1728_p4 }
  0x22   : > { %p1736_p12 = pnand %p1735_p11, %p1729_p6 }
  0x24   : > { %1739 = shalt.err (!%p1736_p12)
}
  0x25   : > { %1637 = dma.hbm_to_vmem [thread:$0]  (!%p1861_p7), %s2028_s2, 16, %s155_s4, [#allocation6]  }
  0x26   : > { %175 = sbr.rel (%p1847_p3) target bundleno = 426 (0x1aa), region = 32 }
  0x2b   : > { %1761 = dma.done.wait (%p1851_p5), [#allocation4], 2304  }
  0x2c   : > { %1763 = vsyncadd (%p1851_p5), [#allocation4], 4294964992 }
  0x2d   : > { %1765 = dma.done.wait (%p1851_p5), [#allocation6], 16  }
  0x2e   : > { %1767 = vsyncadd (%p1851_p5), [#allocation6], 4294967280  ;;  %p207_p8 = scmp.lt.s32.totalorder %s1774_s13, 1  ;;  %vm222_vm0 = vcmask 130048   ;;  %vm224_vm1 = vcmask 123904   ;;  %v1792_v0 = vmov 0.0  }
  0x2f   : > { %223 = vst.msk [vmem:[#allocation2] sm:$0xff] %vm222_vm0, %v1792_v0  ;;  %226 = vst.msk [vmem:[#allocation2 + $0x10] sm:$0xff] %vm222_vm0, %v1792_v0  ;;  %v276_v1 = vld [vmem:[#allocation3 + $0x18] sm:$0xff]  ;;  %v275_v2 = vld [vmem:[#allocation3 + $0x10] sm:$0xff]  ;;  %s1472_s20 = sshll.u32 %s1770_s12, 6  ;;  %s1399_s22 = sshll.u32 %s1770_s12, 3 }
  0x30   : > { %225 = vst.msk [vmem:[#allocation2 + $0x8] sm:$0x3] %vm224_vm1, %v1792_v0  ;;  %227 = vst.msk [vmem:[#allocation2 + $0x18] sm:$0x3] %vm224_vm1, %v1792_v0  ;;  %s2044_s13 = smov (!%p207_p8, %s1774_s13), 1  ;;  %1619 = vmatprep.subr.mxu1 %v276_v1  ;;  %1529 = vmatprep.subr.mxu0 %v276_v1  ;;  %v269_v11 = vld [vmem:[#allocation3 + $0x8] sm:$0xff] }
  0x31   : > { %228 = vst.msk [vmem:[#allocation2 + $0x20] sm:$0xff] %vm222_vm0, %v1792_v0  ;;  %230 = vst.msk [vmem:[#allocation2 + $0x30] sm:$0xff] %vm222_vm0, %v1792_v0  ;;  %s1471_s9 = sshll.u32 %s2044_s13, 6  ;;  %1621 = vmatpush3.msra.mxu1 %v276_v1  ;;  %1530 = vmatpush3.msra.mxu0 %v276_v1  ;;  %v477_v12 = vld [vmem:[#allocation3 + $0x28] sm:$0xff]  ;;  %s1932_s21 = scalar_lea.vmem [#allocation2], %s1472_s20  ;;  %v268_v17 = vld [vmem:[#allocation3] sm:$0xff] }
  0x32   : > { %229 = vst.msk [vmem:[#allocation2 + $0x28] sm:$0x3] %vm224_vm1, %v1792_v0  ;;  %231 = vst.msk [vmem:[#allocation2 + $0x38] sm:$0x3] %vm224_vm1, %v1792_v0  ;;  %s211_s17 = scalar_lea.vmem %s2026_s0, %s1471_s9  ;;  %1620 = vmatprep.subr.mxu1 %v275_v2  ;;  %1531 = vmatprep.subr.mxu0 %v275_v2  ;;  %v476_v18 = vld [vmem:[#allocation3 + $0x20] sm:$0xff]  ;;  %v588_v21 = vld [vmem:[#allocation3 + $0x38] sm:$0xff] }
  0x33   : > { %232 = vst.msk [vmem:[#allocation2 + $0x40] sm:$0xff] %vm222_vm0, %v1792_v0  ;;  %234 = vst.msk [vmem:[#allocation2 + $0x50] sm:$0xff] %vm222_vm0, %v1792_v0  ;;  %v244_v3 = vld [vmem:[%s211_s17] sm:$0xff]  ;;  %v245_v4 = vld [vmem:[%s211_s17 + $0x8] sm:$0xff]  ;;  %1622 = vmatpush3.msra.mxu1 %v275_v2  ;;  %1532 = vmatpush3.msra.mxu0 %v275_v2  ;;  %p215_p3 = scmp.lt.s32.totalorder %s1399_s22, 15  ;;  %s1400_s12 = sshll.u32 %s2044_s13, 4 }
  0x34   : > { %233 = vst.msk [vmem:[#allocation2 + $0x48] sm:$0x3] %vm224_vm1, %v1792_v0  ;;  %235 = vst.msk [vmem:[#allocation2 + $0x58] sm:$0x3] %vm224_vm1, %v1792_v0  ;;  %v246_v5 = vld [vmem:[%s211_s17 + $0x10] sm:$0xff]  ;;  %v247_v6 = vld [vmem:[%s211_s17 + $0x18] sm:$0xff]  ;;  %1539 = vmatprep.subr.mxu1 %v269_v11  ;;  %1549 = vmatprep.subr.mxu0 %v477_v12 }
  0x35   : > { %236 = vst.msk [vmem:[#allocation2 + $0x60] sm:$0xff] %vm222_vm0, %v1792_v0  ;;  %238 = vst.msk [vmem:[#allocation2 + $0x70] sm:$0xff] %vm222_vm0, %v1792_v0  ;;  %v248_v7 = vld [vmem:[%s211_s17 + $0x20] sm:$0xff]  ;;  %v249_v8 = vld [vmem:[%s211_s17 + $0x28] sm:$0xff]  ;;  %s2046_s22 = smov (!%p215_p3, %s1399_s22), 15  ;;  %s1793_s27 = smov 112  }
  0x36   : > { %237 = vst.msk [vmem:[#allocation2 + $0x68] sm:$0x3] %vm224_vm1, %v1792_v0  ;;  %239 = vst.msk [vmem:[#allocation2 + $0x78] sm:$0x3] %vm224_vm1, %v1792_v0  ;;  %v250_v9 = vld [vmem:[%s211_s17 + $0x30] sm:$0xff]  ;;  %v251_v10 = vld [vmem:[%s211_s17 + $0x38] sm:$0xff]  ;;  %s218_s23 = sadd.s32 %s1400_s12, %s2046_s22 }
  0x37   : > { %240 = vst.msk [vmem:[#allocation2 + $0x80] sm:$0xff] %vm222_vm0, %v1792_v0  ;;  %242 = vst.msk [vmem:[#allocation2 + $0x90] sm:$0xff] %vm222_vm0, %v1792_v0  ;;  %v696_v24 = vld [vmem:[#allocation3 + $0x48] sm:$0xff]  ;;  %v587_v27 = vld [vmem:[#allocation3 + $0x30] sm:$0xff]  ;;  %s1401_s24 = sshll.u32 %s218_s23, 3 }
  0x38   : > { %241 = vst.msk [vmem:[#allocation2 + $0x88] sm:$0x3] %vm224_vm1, %v1792_v0  ;;  %243 = vst.msk [vmem:[#allocation2 + $0x98] sm:$0x3] %vm224_vm1, %v1792_v0  ;;  %v695_v30 = vld [vmem:[#allocation3 + $0x40] sm:$0xff]  ;;  %v804_v31 = vld [vmem:[#allocation3 + $0x58] sm:$0xff]  ;;  %s220_s26 = scalar_lea.vmem %s2029_s3, %s1401_s24 }
  0x39   : > { %253 = vst.msk [vmem:[#allocation2 + $0x11] sm:$0xff] %vm222_vm0, %v244_v3  ;;  %254 = vst.msk [vmem:[#allocation2 + $0x21] sm:$0xff] %vm222_vm0, %v245_v4  ;;  %v915_v32 = vld [vmem:[#allocation3 + $0x68] sm:$0xff]  ;;  %v803_v33 = vld [vmem:[#allocation3 + $0x50] sm:$0xff] }
  0x3a   : > { %255 = vst.msk [vmem:[#allocation2 + $0x31] sm:$0xff] %vm222_vm0, %v246_v5  ;;  %256 = vst.msk [vmem:[#allocation2 + $0x41] sm:$0xff] %vm222_vm0, %v247_v6  ;;  %v914_v36 = vld [vmem:[#allocation3 + $0x60] sm:$0xff]  ;;  %v1023_v37 = vld [vmem:[#allocation3 + $0x78] sm:$0xff] }
  0x3b   : > { %257 = vst.msk [vmem:[#allocation2 + $0x51] sm:$0xff] %vm222_vm0, %v248_v7  ;;  %258 = vst.msk [vmem:[#allocation2 + $0x61] sm:$0xff] %vm222_vm0, %v249_v8  ;;  %v1131_v38 = vld [vmem:[#allocation3 + $0x88] sm:$0xff]  ;;  %v1022_v39 = vld [vmem:[#allocation3 + $0x70] sm:$0xff] }
  0x3c   : > { %259 = vst.msk [vmem:[#allocation2 + $0x71] sm:$0xff] %vm222_vm0, %v250_v9  ;;  %260 = vst.msk [vmem:[#allocation2 + $0x81] sm:$0xff] %vm222_vm0, %v251_v10  ;;  %v1130_v42 = vld [vmem:[#allocation3 + $0x80] sm:$0xff] }
  0x43   : > { %v270_v13 = vld [vmem:[%s1932_s21 + $0x1] sm:$0xff]  ;;  %v271_v15 = vld [vmem:[%s1932_s21 + $0x11] sm:$0xff] }
  0x44   : > { %v1936_v14 = vld [vmem:[%s1932_s21 + $0x21] sm:$0xff]  ;;  %1533 = vmatprep.mubr.msk.f32.mxu0 %vm222_vm0, %v270_v13  ;;  %v1943_v16 = vld [vmem:[%s1932_s21 + $0x31] sm:$0xff] }
  0x45   : > { %1536 = vmatprep.mubr.msk.f32.mxu1 %vm222_vm0, %v1936_v14  ;;  %1534 = vmatmul.mubr.msk.f32.vlgmr.msra.gmra.mxu0 %vm222_vm0, %v271_v15  ;;  %v264_v19 = vld [vmem:[%s1932_s21] sm:$0xff]  ;;  %v265_v22 = vld [vmem:[%s1932_s21 + $0x10] sm:$0xff] }
  0x46   : > { %1537 = vmatmul.mubr.msk.f32.vlgmr.msra.gmra.mxu1 %vm222_vm0, %v1943_v16  ;;  %1550 = vmatpush3.msra.mxu0 %v477_v12  ;;  %v471_v20 = vld [vmem:[%s1932_s21 + $0x2] sm:$0xff]  ;;  %v472_v23 = vld [vmem:[%s1932_s21 + $0x12] sm:$0xff] }
  0x47   : > { %1540 = vmatpush3.msra.mxu1 %v269_v11  ;;  %1551 = vmatprep.subr.mxu0 %v476_v18  ;;  %v266_v25 = vld [vmem:[%s1932_s21 + $0x20] sm:$0xff]  ;;  %v267_v28 = vld [vmem:[%s1932_s21 + $0x30] sm:$0xff] }
  0x48   : > { %1541 = vmatprep.subr.mxu1 %v268_v17  ;;  %1543 = vmatprep.mubr.msk.f32.mxu1 %vm222_vm0, %v264_v19  ;;  %v473_v26 = vld [vmem:[%s1932_s21 + $0x22] sm:$0xff]  ;;  %v474_v29 = vld [vmem:[%s1932_s21 + $0x32] sm:$0xff] }
  0x49   : > { %1542 = vmatpush3.msra.mxu1 %v268_v17  ;;  %1552 = vmatpush3.msra.mxu0 %v476_v18  ;;  %v1421_v34 = vld [vmem:[%s1932_s21 + $0x40] sm:$0xff]  ;;  %v1447_v41 = vld [vmem:[%s1932_s21 + $0x50] sm:$0xff] }
  0x4a   : > { %1553 = vmatprep.mubr.msk.f32.mxu0 %vm222_vm0, %v471_v20  ;;  %1559 = vmatprep.subr.mxu1 %v588_v21  ;;  %v1429_v35 = vld [vmem:[%s1932_s21 + $0x41] sm:$0xff]  ;;  %v1455_v43 = vld [vmem:[%s1932_s21 + $0x51] sm:$0xff] }
  0x4b   : > { %1544 = vmatmul.mubr.msk.f32.vlgmr.msra.gmra.mxu1 %vm222_vm0, %v265_v22  ;;  %1554 = vmatmul.mubr.msk.f32.vlgmr.msra.gmra.mxu0 %vm222_vm0, %v472_v23  ;;  %v1437_v40 = vld [vmem:[%s1932_s21 + $0x42] sm:$0xff]  ;;  %v1463_v44 = vld [vmem:[%s1932_s21 + $0x52] sm:$0xff] }
  0x4c   : > { %1560 = vmatpush3.msra.mxu1 %v588_v21  ;;  %1569 = vmatprep.subr.mxu0 %v696_v24 }
  0x4d   : > { %1546 = vmatprep.mubr.msk.f32.mxu1 %vm222_vm0, %v266_v25  ;;  %1570 = vmatpush3.msra.mxu0 %v696_v24 }
  0x4e   : > { %1556 = vmatprep.mubr.msk.f32.mxu0 %vm222_vm0, %v473_v26  ;;  %1561 = vmatprep.subr.mxu1 %v587_v27 }
  0x4f   : > { %1547 = vmatmul.mubr.msk.f32.gmra.mxu1 %vm222_vm0, %v267_v28  ;;  %1557 = vmatmul.mubr.msk.f32.gmra.mxu0 %vm222_vm0, %v474_v29 }
  0x50   : > { %1562 = vmatpush3.msra.mxu1 %v587_v27  ;;  %1571 = vmatprep.subr.mxu0 %v695_v30 }
  0x51   : > { %1563 = vmatprep.mubr.msk.f32.mxu1 %vm222_vm0, %v265_v22  ;;  %1572 = vmatpush3.msra.mxu0 %v695_v30 }
  0x52   : > { %1573 = vmatprep.mubr.msk.f32.mxu0 %vm222_vm0, %v271_v15  ;;  %1579 = vmatprep.subr.mxu1 %v804_v31 }
  0x53   : > { %1564 = vmatmul.mubr.msk.f32.vlgmr.msra.gmra.mxu1 %vm222_vm0, %v266_v25  ;;  %1574 = vmatmul.mubr.msk.f32.vlgmr.msra.gmra.mxu0 %vm222_vm0, %v1936_v14 }
  0x54   : > { %1580 = vmatpush3.msra.mxu1 %v804_v31  ;;  %1589 = vmatprep.subr.mxu0 %v915_v32 }
  0x55   : > { %1566 = vmatprep.mubr.msk.f32.mxu1 %vm222_vm0, %v267_v28  ;;  %1590 = vmatpush3.msra.mxu0 %v915_v32 }
  0x56   : > { %1576 = vmatprep.mubr.msk.f32.mxu0 %vm222_vm0, %v1943_v16  ;;  %1581 = vmatprep.subr.mxu1 %v803_v33 }
  0x57   : > { %1567 = vmatmul.mubr.msk.f32.gmra.mxu1 %vm222_vm0, %v1421_v34  ;;  %1577 = vmatmul.mubr.msk.f32.gmra.mxu0 %vm222_vm0, %v1429_v35 }
  0x58   : > { %1582 = vmatpush3.msra.mxu1 %v803_v33  ;;  %1591 = vmatprep.subr.mxu0 %v914_v36 }
  0x59   : > { %1583 = vmatprep.mubr.msk.f32.mxu1 %vm222_vm0, %v472_v23  ;;  %1592 = vmatpush3.msra.mxu0 %v914_v36 }
  0x5a   : > { %1593 = vmatprep.mubr.msk.f32.mxu0 %vm222_vm0, %v266_v25  ;;  %1599 = vmatprep.subr.mxu1 %v1023_v37 }
  0x5b   : > { %1584 = vmatmul.mubr.msk.f32.vlgmr.msra.gmra.mxu1 %vm222_vm0, %v473_v26  ;;  %1594 = vmatmul.mubr.msk.f32.vlgmr.msra.gmra.mxu0 %vm222_vm0, %v267_v28 }
  0x5c   : > { %1600 = vmatpush3.msra.mxu1 %v1023_v37  ;;  %1609 = vmatprep.subr.mxu0 %v1131_v38 }
  0x5d   : > { %1586 = vmatprep.mubr.msk.f32.mxu1 %vm222_vm0, %v474_v29  ;;  %1610 = vmatpush3.msra.mxu0 %v1131_v38 }
  0x5e   : > { %1596 = vmatprep.mubr.msk.f32.mxu0 %vm222_vm0, %v1421_v34  ;;  %1601 = vmatprep.subr.mxu1 %v1022_v39  ;;  %v1468_v34 = vld [vmem:[#allocation5] ss:$0 sm:$0xff] }
  0x5f   : > { %1587 = vmatmul.mubr.msk.f32.gmra.mxu1 %vm222_vm0, %v1437_v40  ;;  %1597 = vmatmul.mubr.msk.f32.gmra.mxu0 %vm222_vm0, %v1447_v41 }
  0x60   : > { %1602 = vmatpush3.msra.mxu1 %v1022_v39  ;;  %1611 = vmatprep.subr.mxu0 %v1130_v42 }
  0x61   : > { %1603 = vmatprep.mubr.msk.f32.mxu1 %vm222_vm0, %v1936_v14  ;;  %1612 = vmatpush3.msra.mxu0 %v1130_v42 }
  0x62   : > { %1613 = vmatprep.mubr.msk.f32.mxu0 %vm222_vm0, %v473_v26 }
  0x63   : > { %1604 = vmatmul.mubr.msk.f32.vlgmr.msra.gmra.mxu1 %vm222_vm0, %v1943_v16  ;;  %1614 = vmatmul.mubr.msk.f32.vlgmr.msra.gmra.mxu0 %vm222_vm0, %v474_v29 }
  0x64   : > { %1606 = vmatprep.mubr.msk.f32.mxu1 %vm222_vm0, %v1429_v35  ;;  %1616 = vmatprep.mubr.msk.f32.mxu0 %vm222_vm0, %v1437_v40 }
  0x67   : > { %1607 = vmatmul.mubr.msk.f32.gmra.mxu1 %vm222_vm0, %v1455_v43  ;;  %1617 = vmatmul.mubr.msk.f32.gmra.mxu0 %vm222_vm0, %v1463_v44 }
 0x105   : > { %v1535_v45 = vpop.f32.mrf.mxu0 }
 0x106   : > { %v1538_v46 = vpop.f32.mrf.mxu1 }
 0x107   : > { %v355_v47 = vpop.f32.mrf.mxu0 }
 0x108   : > { %v365_v48 = vpop.f32.mrf.mxu1 }
 0x10b   : > { %v1545_v49 = vpop.f32.mrf.mxu1  ;;  %v1555_v50 = vpop.f32.mrf.mxu0 }
 0x10c   : > { %v458_v56 = vadd.f32 %v1545_v49, %v1535_v45 }
 0x10d   : > { %v452_v51 = vpop.f32.mrf.mxu1  ;;  %v556_v52 = vpop.f32.mrf.mxu0 }
 0x10e   : > { %v453_v59 = vadd.f32 %v452_v51, %v355_v47  ;;  %v576_v62 = vadd.f32 %v1555_v50, %v458_v56 }
 0x10f   : > { %v1548_v53 = vpop.f32.mrf.mxu1  ;;  %v1558_v54 = vpop.f32.mrf.mxu0 }
 0x110   : > { %v468_v63 = vadd.f32 %v1548_v53, %v1538_v46  ;;  %v575_v2 = vadd.f32 %v556_v52, %v453_v59 }
 0x111   : > { %v462_v55 = vpop.f32.mrf.mxu1  ;;  %v566_v57 = vpop.f32.mrf.mxu0 }
 0x112   : > { %v463_v3 = vadd.f32 %v462_v55, %v365_v48  ;;  %v578_v7 = vadd.f32 %v1558_v54, %v468_v63 }
 0x113   : > { %v1565_v58 = vpop.f32.mrf.mxu1  ;;  %v1575_v60 = vpop.f32.mrf.mxu0 }
 0x114   : > { %v687_v4 = vadd.f32 %v1565_v58, %v576_v62  ;;  %v577_v11 = vadd.f32 %v566_v57, %v463_v3 }
 0x115   : > { %v667_v61 = vpop.f32.mrf.mxu1  ;;  %v775_v0 = vpop.f32.mrf.mxu0 }
 0x116   : > { %v686_v8 = vadd.f32 %v667_v61, %v575_v2  ;;  %v795_v12 = vadd.f32 %v1575_v60, %v687_v4 }
 0x117   : > { %v1568_v1 = vpop.f32.mrf.mxu1  ;;  %v1578_v5 = vpop.f32.mrf.mxu0 }
 0x118   : > { %v689_v13 = vadd.f32 %v1568_v1, %v578_v7  ;;  %v794_v16 = vadd.f32 %v775_v0, %v686_v8 }
 0x119   : > { %v677_v6 = vpop.f32.mrf.mxu1  ;;  %v785_v9 = vpop.f32.mrf.mxu0 }
 0x11a   : > { %v688_v17 = vadd.f32 %v677_v6, %v577_v11  ;;  %v797_v21 = vadd.f32 %v1578_v5, %v689_v13 }
 0x11b   : > { %v1585_v10 = vpop.f32.mrf.mxu1  ;;  %v1595_v14 = vpop.f32.mrf.mxu0 }
 0x11c   : > { %v903_v18 = vadd.f32 %v1585_v10, %v795_v12  ;;  %v796_v25 = vadd.f32 %v785_v9, %v688_v17 }
 0x11d   : > { %v883_v15 = vpop.f32.mrf.mxu1  ;;  %v994_v19 = vpop.f32.mrf.mxu0 }
 0x11e   : > { %v902_v22 = vadd.f32 %v883_v15, %v794_v16  ;;  %v1014_v26 = vadd.f32 %v1595_v14, %v903_v18 }
 0x11f   : > { %v1588_v20 = vpop.f32.mrf.mxu1  ;;  %v1598_v23 = vpop.f32.mrf.mxu0 }
 0x120   : > { %v905_v27 = vadd.f32 %v1588_v20, %v797_v21  ;;  %v1013_v30 = vadd.f32 %v994_v19, %v902_v22 }
 0x121   : > { %v893_v24 = vpop.f32.mrf.mxu1  ;;  %v1004_v28 = vpop.f32.mrf.mxu0 }
 0x122   : > { %v904_v31 = vadd.f32 %v893_v24, %v796_v25  ;;  %v1016_v36 = vadd.f32 %v1598_v23, %v905_v27 }
 0x123   : > { %v1605_v29 = vpop.f32.mrf.mxu1  ;;  %v1615_v33 = vpop.f32.mrf.mxu0 }
 0x124   : > { %v1122_v32 = vadd.f32 %v1605_v29, %v1014_v26  ;;  %v1015_v41 = vadd.f32 %v1004_v28, %v904_v31 }
 0x125   : > { %v1102_v35 = vpop.f32.mrf.mxu1  ;;  %v1210_v39 = vpop.f32.mrf.mxu0 }
 0x126   : > { %v1230_v37 = vadd.f32 %v1615_v33, %v1122_v32  ;;  %v1121_v38 = vadd.f32 %v1102_v35, %v1013_v30 }
 0x127   : > { %v1608_v40 = vpop.f32.mrf.mxu1  ;;  %v1618_v45 = vpop.f32.mrf.mxu0 }
 0x128   : > { %v1241_v42 = vadd.f32 %v1468_v34, %v1230_v37  ;;  %v1229_v43 = vadd.f32 %v1210_v39, %v1121_v38  ;;  %v1124_v44 = vadd.f32 %v1608_v40, %v1016_v36 }
 0x129   : > { %v1112_v46 = vpop.f32.mrf.mxu1  ;;  %v1220_v51 = vpop.f32.mrf.mxu0 }
 0x12a   : > { %v1245_v47 = vmax.f32 %v1241_v42, 0.0  ;;  %v1232_v48 = vadd.f32 %v1618_v45, %v1124_v44  ;;  %v1123_v49 = vadd.f32 %v1112_v46, %v1015_v41  ;;  %v1240_v50 = vadd.f32 %v1468_v34, %v1229_v43 }
 0x12c   : > { %1266 = vst.msk [vmem:[%s220_s26 + $0x10] sm:$0xff] %vm222_vm0, %v1245_v47  ;;  %v1243_v52 = vadd.f32 %v1468_v34, %v1232_v48  ;;  %v1231_v53 = vadd.f32 %v1220_v51, %v1123_v49  ;;  %v1244_v54 = vmax.f32 %v1240_v50, 0.0 }
 0x12e   : > { %v1247_v55 = vmax.f32 %v1243_v52, 0.0  ;;  %1252 = vrot.lane.b32.xlu0 %v1244_v54, %s1793_s27  ;;  %1264 = vst.msk [vmem:[%s220_s26] sm:$0xff] %vm222_vm0, %v1244_v54  ;;  %v1242_v56 = vadd.f32 %v1468_v34, %v1231_v53 }
 0x130   : > { %1270 = vst.msk [vmem:[%s220_s26 + $0x30] sm:$0xff] %vm222_vm0, %v1247_v55  ;;  %v1246_v57 = vmax.f32 %v1242_v56, 0.0 }
 0x132   : > { %1256 = vrot.lane.b32.xlu1 %v1246_v57, %s1793_s27  ;;  %1268 = vst.msk [vmem:[%s220_s26 + $0x20] sm:$0xff] %vm222_vm0, %v1246_v57  ;;  %1254 = vrot.lane.b32.xlu0 %v1245_v47, %s1793_s27 }
 0x136   : > { %1258 = vrot.lane.b32.xlu1 %v1247_v55, %s1793_s27 }
 0x1a0   : > { %v1253_v58 = vpop.permute.xlu0 %1252 }
 0x1a1   : > { %1265 = vst.msk [vmem:[%s220_s26 + $0x8] sm:$0xff] %vm222_vm0, %v1253_v58 }
 0x1a4   : > { %v1257_v59 = vpop.permute.xlu1 %1256  ;;  %v1255_v60 = vpop.permute.xlu0 %1254 }
 0x1a5   : > { %1269 = vst.msk [vmem:[%s220_s26 + $0x28] sm:$0xff] %vm222_vm0, %v1257_v59  ;;  %1267 = vst.msk [vmem:[%s220_s26 + $0x18] sm:$0xff] %vm222_vm0, %v1255_v60 }
 0x1a8   : > { %v1259_v61 = vpop.permute.xlu1 %1258 }
 0x1a9   : > { %1271 = vst.msk [vmem:[%s220_s26 + $0x38] sm:$0xff] %vm222_vm0, %v1259_v61 }
 0x1aa PF: > { %s15_s16 = sadd.s32 1, %s1786_s16   ;;  %s2033_s12 = smov %s1778_s14 }
 0x1ab   : > { %p12_p5 = scmp.ge.s32.totalorder %s15_s16, 6   ;;  %s2034_s13 = smov %s1782_s15 }
 0x1ac   : > { %s2035_s14 = smov %s2038_s18  ;;  %s2036_s15 = smov %s2042_s19 }
 0x1ad   :  { %14 = sbr.rel (!%p12_p5) target bundleno = 4 (0x4), region = 83 }
 0x1b2   :  { %1302 = vsyncpa [#allocation4], 1 }
 0x1b3   :  { %1304 = vsyncpa [#allocation4 + $0x1], 1 }
 0x1b4   :  { %1305 = vsyncpa [#allocation6], 1 }

// kernel: decoder_forward.8
= control target key start
LH: loop header
LB: loop body
LE: loop exit
PB: predicated region body
PF: predicated region fallthrough
CT: control target
= control target key end

     0   :  { %8 = vsyncpa [#allocation4], 0  ;;  %s4416_s0 = inlined_call_operand.vmem [shape: f32[2,16,16,8], index: 0, kind: input, shape index: {}]   ;;  %s4417_s1 = inlined_call_operand.hbm [shape: f32[9,8,16], index: 1, kind: input, shape index: {}]   ;;  %s4418_s2 = inlined_call_operand.hbm [shape: f32[1,16], index: 2, kind: input, shape index: {}]   ;;  %s4419_s3 = inlined_call_operand.vmem [shape: f32[2,32,16,8], index: 3, kind: output, shape index: {}]  }
   0x1   :  { %9 = vsyncpa [#allocation6], 0  ;;  %s3466_s12 = smov 0   ;;  %s3468_s13 = smov 0  }
   0x2   :  { %s3470_s14 = smov 0   ;;  %s3472_s15 = smov 0  }
   0x3   :  { %s3474_s16 = smov 0  }
   0x4 LB: > { %s2621_s17 = sadd.s32 4294967295, %s3438_s16   ;;  %s24_s18 = sadd.s32 1, %s3430_s14  ;;  %s3438_s16 = sphi %s3474_s16, %s15_s16   ;;  %s3434_s15 = sphi %s3472_s15, %s4462_s15   ;;  %s3430_s14 = sphi %s3470_s14, %s4461_s14   ;;  %s3426_s13 = sphi %s3468_s13, %s4460_s13   ;;  %s3422_s12 = sphi %s3466_s12, %s4459_s12  }
   0x5   : > { %p25_p0 = scmp.ge.s32.totalorder %s24_s18, 2  ;;  %s27_s19 = sadd.s32 1, %s3434_s15 }
   0x6   : > { %p2623_p1 = scmp.ge.s32.totalorder %s3438_s16, 1  ;;  %p128_p2 = scmp.lt.s32.totalorder %s3438_s16, 5 }
   0x7   : > { %s4464_s18 = smov (%p25_p0, %s24_s18), 0  ;;  %s4466_s19 = smov (!%p25_p0, %s27_s19), %s3434_s15 }
   0x8   : > { %p3499_p3 = pnand %p2623_p1, %p128_p2  ;;  %p29_p4 = scmp.ge.s32.totalorder %s4466_s19, 2 }
   0x9   : > { %p3503_p5 = scmp.eq.s32.totalorder %s2621_s17, 0  ;;  %s3440_s22 = smov [#allocation3]  }
   0xa   : > { %p3283_p6 = pneg %p3499_p3  ;;  %s4468_s19 = smov (%p29_p4, %s4466_s19), 0 }
   0xb   : > { %s140_s23 = sshll.u32 %s3440_s22, 4  ;;  %s141_s23 = int_to_ptr.vmem [resolvable:$true] %s140_s23 }
   0xc   : > { %p3513_p7 = pnand %p3503_p5, %p3283_p6  ;;  %s3351_s25 = scalar_lea.vmem %s141_s23, 1152 }
   0xd   : > { %p3352_p9 = scmp.ne.s32.totalorder %s141_s23, %s3351_s25  ;;  %p3359_p12 = scmp.lt.s32.totalorder %s141_s23, %s141_s23 }
   0xe   : > { %p3342_p8 = pneg %p3513_p7  ;;  %p3360_p13 = scmp.lt.s32.totalorder %s3351_s25, %s3351_s25 }
  0x10   : > { %p3354_p10 = pnand %p3352_p9, %p3342_p8  ;;  %p3361_p0 = por %p3360_p13, %p3359_p12 }
  0x12   : > { %p3355_p11 = pneg %p3354_p10 }
  0x14   : > { %p3362_p1 = pnand %p3361_p0, %p3355_p11 }
  0x16   : > { %3365 = shalt.err (!%p3362_p1)
}
  0x17   : > { %s3441_s26 = smov 128   ;;  %s3442_s27 = smov 8  }
  0x18   : > { %3286 = dma.hbm_to_vmem [thread:$0]  (!%p3513_p7), %s4417_s1, 1152, %s141_s23, [#allocation4], %s3441_s26, %s3441_s26, %s3442_s27  }
  0x19   : > { %s3443_s30 = smov [#allocation5]  }
  0x1a   : > { %s154_s4 = sshll.u32 %s3443_s30, 4  ;;  %s155_s4 = int_to_ptr.vmem [resolvable:$true] %s154_s4 }
  0x1b   : > { %s3377_s5 = scalar_lea.vmem %s155_s4, 16  ;;  %s3384_s6 = scalar_lea.vmem %s155_s4, 32 }
  0x1c   : > { %p3378_p2 = scmp.ne.s32.totalorder %s155_s4, %s3377_s5  ;;  %p3385_p9 = scmp.lt.s32.totalorder %s155_s4, %s155_s4 }
  0x1d   : > { %p3386_p10 = scmp.lt.s32.totalorder %s3384_s6, %s3377_s5 }
  0x1e   : > { %p3380_p4 = pnand %p3378_p2, %p3342_p8 }
  0x1f   : > { %p3387_p11 = por %p3386_p10, %p3385_p9 }
  0x20   : > { %p3381_p6 = pneg %p3380_p4 }
  0x22   : > { %p3388_p12 = pnand %p3387_p11, %p3381_p6 }
  0x24   : > { %3391 = shalt.err (!%p3388_p12)
}
  0x25   : > { %3289 = dma.hbm_to_vmem [thread:$0]  (!%p3513_p7), %s4418_s2, 16, %s155_s4, [#allocation6]  }
  0x26   : > { %175 = sbr.rel (%p3499_p3) target bundleno = 560 (0x230), region = 32 }
  0x2b   : > { %3413 = dma.done.wait (%p3503_p5), [#allocation4], 1152  }
  0x2c   : > { %3415 = vsyncadd (%p3503_p5), [#allocation4], 4294966144 }
  0x2d   : > { %3417 = dma.done.wait (%p3503_p5), [#allocation6], 16  }
  0x2e   : > { %3419 = vsyncadd (%p3503_p5), [#allocation6], 4294967280  ;;  %p208_p8 = scmp.lt.s32.totalorder %s3426_s13, 1  ;;  %vm224_vm0 = vcmask 64512   ;;  %vm227_vm1 = vcmask 58368   ;;  %v3444_v0 = vmov 0.0  }
  0x2f   : > { %225 = vst.msk [vmem:[#allocation2] sm:$0xff] %vm224_vm0, %v3444_v0  ;;  %226 = vst.msk [vmem:[#allocation2 + $0x8] sm:$0xff] %vm224_vm0, %v3444_v0  ;;  %v382_v1 = vld [vmem:[#allocation3 + $0x8] sm:$0xff]  ;;  %s2637_s20 = smul.u32 192, %s3422_s12  ;;  %v364_v34 = vld [vmem:[#allocation3] sm:$0xff]  ;;  %s2632_s22 = sshll.u32 %s3422_s12, 4 }
  0x30   : > { %228 = vst.msk [vmem:[#allocation2 + $0x10] sm:$0x3] %vm227_vm1, %v3444_v0  ;;  %231 = vst.msk [vmem:[#allocation2 + $0x28] sm:$0x3] %vm227_vm1, %v3444_v0  ;;  %s4470_s13 = smov (!%p208_p8, %s3426_s13), 1  ;;  %3273 = vmatprep.subr.mxu1 %v382_v1  ;;  %3039 = vmatprep.subr.mxu0 %v382_v1  ;;  %v786_v35 = vld [vmem:[#allocation3 + $0x10] sm:$0xff] }
  0x31   : > { %229 = vst.msk [vmem:[#allocation2 + $0x18] sm:$0xff] %vm224_vm0, %v3444_v0  ;;  %230 = vst.msk [vmem:[#allocation2 + $0x20] sm:$0xff] %vm224_vm0, %v3444_v0  ;;  %s2885_s9 = sshll.u32 %s4470_s13, 8  ;;  %3274 = vmatpush3.msra.mxu1 %v382_v1  ;;  %3040 = vmatpush3.msra.mxu0 %v382_v1  ;;  %s3676_s21 = scalar_lea.vmem [#allocation2], %s2637_s20  ;;  %v1016_v42 = vld [vmem:[#allocation3 + $0x18] sm:$0xff]  ;;  %v1243_v43 = vld [vmem:[#allocation3 + $0x20] sm:$0xff] }
  0x32   : > { %232 = vst.msk [vmem:[#allocation2 + $0x30] sm:$0xff] %vm224_vm0, %v3444_v0  ;;  %233 = vst.msk [vmem:[#allocation2 + $0x38] sm:$0xff] %vm224_vm0, %v3444_v0  ;;  %s3609_s17 = scalar_lea.vmem %s4416_s0, %s2885_s9  ;;  %3065 = vmatprep.subr.mxu1 %v364_v34  ;;  %3091 = vmatprep.subr.mxu0 %v786_v35  ;;  %v3766_v60 = vld [vmem:[#allocation3 + $0x28] sm:$0xff]  ;;  %v3768_v61 = vld [vmem:[#allocation3 + $0x30] sm:$0xff]  ;;  %p216_p3 = scmp.lt.s32.totalorder %s2632_s22, 31 }
  0x33   : > { %234 = vst.msk [vmem:[#allocation2 + $0x40] sm:$0x3] %vm227_vm1, %v3444_v0  ;;  %237 = vst.msk [vmem:[#allocation2 + $0x58] sm:$0x3] %vm227_vm1, %v3444_v0  ;;  %v280_v2 = vld [vmem:[%s3609_s17] sm:$0xff]  ;;  %v281_v3 = vld [vmem:[%s3609_s17 + $0x8] sm:$0xff] }
  0x34   : > { %235 = vst.msk [vmem:[#allocation2 + $0x48] sm:$0xff] %vm224_vm0, %v3444_v0  ;;  %236 = vst.msk [vmem:[#allocation2 + $0x50] sm:$0xff] %vm224_vm0, %v3444_v0  ;;  %v282_v4 = vld [vmem:[%s3609_s17 + $0x10] sm:$0xff]  ;;  %v283_v5 = vld [vmem:[%s3609_s17 + $0x18] sm:$0xff]  ;;  %s4472_s22 = smov (!%p216_p3, %s2632_s22), 31  ;;  %s2634_s23 = sshll.u32 %s4470_s13, 6 }
  0x35   : > { %238 = vst.msk [vmem:[#allocation2 + $0x60] sm:$0xff] %vm224_vm0, %v3444_v0  ;;  %239 = vst.msk [vmem:[#allocation2 + $0x68] sm:$0xff] %vm224_vm0, %v3444_v0  ;;  %v284_v6 = vld [vmem:[%s3609_s17 + $0x20] sm:$0xff]  ;;  %v285_v7 = vld [vmem:[%s3609_s17 + $0x28] sm:$0xff]  ;;  %s2633_s12 = sshll.u32 %s4472_s22, 1  ;;  %s3445_s28 = smov 120  }
  0x36   : > { %240 = vst.msk [vmem:[#allocation2 + $0x70] sm:$0x3] %vm227_vm1, %v3444_v0  ;;  %243 = vst.msk [vmem:[#allocation2 + $0x88] sm:$0x3] %vm227_vm1, %v3444_v0  ;;  %v286_v8 = vld [vmem:[%s3609_s17 + $0x30] sm:$0xff]  ;;  %v287_v9 = vld [vmem:[%s3609_s17 + $0x38] sm:$0xff]  ;;  %s220_s24 = sadd.s32 %s2634_s23, %s2633_s12 }
  0x37   : > { %241 = vst.msk [vmem:[#allocation2 + $0x78] sm:$0xff] %vm224_vm0, %v3444_v0  ;;  %242 = vst.msk [vmem:[#allocation2 + $0x80] sm:$0xff] %vm224_vm0, %v3444_v0  ;;  %v288_v10 = vld [vmem:[%s3609_s17 + $0x40] sm:$0xff]  ;;  %v289_v11 = vld [vmem:[%s3609_s17 + $0x48] sm:$0xff]  ;;  %s2635_s13 = sshll.u32 %s220_s24, 3 }
  0x38   : > { %244 = vst.msk [vmem:[#allocation2 + $0x90] sm:$0xff] %vm224_vm0, %v3444_v0  ;;  %245 = vst.msk [vmem:[#allocation2 + $0x98] sm:$0xff] %vm224_vm0, %v3444_v0  ;;  %v290_v12 = vld [vmem:[%s3609_s17 + $0x50] sm:$0xff]  ;;  %v291_v13 = vld [vmem:[%s3609_s17 + $0x58] sm:$0xff]  ;;  %s4264_s27 = scalar_lea.vmem %s4419_s3, %s2635_s13 }
  0x39   : > { %246 = vst.msk [vmem:[#allocation2 + $0xa0] sm:$0x3] %vm227_vm1, %v3444_v0  ;;  %249 = vst.msk [vmem:[#allocation2 + $0xb8] sm:$0x3] %vm227_vm1, %v3444_v0  ;;  %v292_v14 = vld [vmem:[%s3609_s17 + $0x60] sm:$0xff]  ;;  %v293_v15 = vld [vmem:[%s3609_s17 + $0x68] sm:$0xff] }
  0x3a   : > { %247 = vst.msk [vmem:[#allocation2 + $0xa8] sm:$0xff] %vm224_vm0, %v3444_v0  ;;  %248 = vst.msk [vmem:[#allocation2 + $0xb0] sm:$0xff] %vm224_vm0, %v3444_v0  ;;  %v294_v16 = vld [vmem:[%s3609_s17 + $0x70] sm:$0xff]  ;;  %v295_v17 = vld [vmem:[%s3609_s17 + $0x78] sm:$0xff] }
  0x3b   : > { %250 = vst.msk [vmem:[#allocation2 + $0xc0] sm:$0xff] %vm224_vm0, %v3444_v0  ;;  %251 = vst.msk [vmem:[#allocation2 + $0xc8] sm:$0xff] %vm224_vm0, %v3444_v0  ;;  %v296_v18 = vld [vmem:[%s3609_s17 + $0x80] sm:$0xff]  ;;  %v297_v19 = vld [vmem:[%s3609_s17 + $0x88] sm:$0xff] }
  0x3c   : > { %252 = vst.msk [vmem:[#allocation2 + $0xd0] sm:$0x3] %vm227_vm1, %v3444_v0  ;;  %255 = vst.msk [vmem:[#allocation2 + $0xe8] sm:$0x3] %vm227_vm1, %v3444_v0  ;;  %v298_v20 = vld [vmem:[%s3609_s17 + $0x90] sm:$0xff]  ;;  %v299_v21 = vld [vmem:[%s3609_s17 + $0x98] sm:$0xff] }
  0x3d   : > { %253 = vst.msk [vmem:[#allocation2 + $0xd8] sm:$0xff] %vm224_vm0, %v3444_v0  ;;  %254 = vst.msk [vmem:[#allocation2 + $0xe0] sm:$0xff] %vm224_vm0, %v3444_v0  ;;  %v300_v22 = vld [vmem:[%s3609_s17 + $0xa0] sm:$0xff]  ;;  %v301_v23 = vld [vmem:[%s3609_s17 + $0xa8] sm:$0xff] }
  0x3e   : > { %256 = vst.msk [vmem:[#allocation2 + $0xf0] sm:$0xff] %vm224_vm0, %v3444_v0  ;;  %257 = vst.msk [vmem:[#allocation2 + $0xf8] sm:$0xff] %vm224_vm0, %v3444_v0  ;;  %v302_v24 = vld [vmem:[%s3609_s17 + $0xb0] sm:$0xff]  ;;  %v303_v25 = vld [vmem:[%s3609_s17 + $0xb8] sm:$0xff] }
  0x3f   : > { %258 = vst.msk [vmem:[#allocation2 + $0x100] sm:$0x3] %vm227_vm1, %v3444_v0  ;;  %261 = vst.msk [vmem:[#allocation2 + $0x118] sm:$0x3] %vm227_vm1, %v3444_v0  ;;  %v304_v26 = vld [vmem:[%s3609_s17 + $0xc0] sm:$0xff]  ;;  %v305_v27 = vld [vmem:[%s3609_s17 + $0xc8] sm:$0xff] }
  0x40   : > { %259 = vst.msk [vmem:[#allocation2 + $0x108] sm:$0xff] %vm224_vm0, %v3444_v0  ;;  %260 = vst.msk [vmem:[#allocation2 + $0x110] sm:$0xff] %vm224_vm0, %v3444_v0  ;;  %v306_v28 = vld [vmem:[%s3609_s17 + $0xd0] sm:$0xff]  ;;  %v307_v29 = vld [vmem:[%s3609_s17 + $0xd8] sm:$0xff] }
  0x41   : > { %262 = vst.msk [vmem:[#allocation2 + $0x120] sm:$0xff] %vm224_vm0, %v3444_v0  ;;  %263 = vst.msk [vmem:[#allocation2 + $0x128] sm:$0xff] %vm224_vm0, %v3444_v0  ;;  %v308_v30 = vld [vmem:[%s3609_s17 + $0xe0] sm:$0xff]  ;;  %v309_v31 = vld [vmem:[%s3609_s17 + $0xe8] sm:$0xff] }
  0x42   : > { %264 = vst.msk [vmem:[#allocation2 + $0x130] sm:$0x3] %vm227_vm1, %v3444_v0  ;;  %267 = vst.msk [vmem:[#allocation2 + $0x148] sm:$0x3] %vm227_vm1, %v3444_v0  ;;  %v310_v32 = vld [vmem:[%s3609_s17 + $0xf0] sm:$0xff]  ;;  %v311_v33 = vld [vmem:[%s3609_s17 + $0xf8] sm:$0xff] }
  0x43   : > { %265 = vst.msk [vmem:[#allocation2 + $0x138] sm:$0xff] %vm224_vm0, %v3444_v0  ;;  %266 = vst.msk [vmem:[#allocation2 + $0x140] sm:$0xff] %vm224_vm0, %v3444_v0 }
  0x44   : > { %268 = vst.msk [vmem:[#allocation2 + $0x150] sm:$0xff] %vm224_vm0, %v3444_v0  ;;  %269 = vst.msk [vmem:[#allocation2 + $0x158] sm:$0xff] %vm224_vm0, %v3444_v0 }
  0x45   : > { %270 = vst.msk [vmem:[#allocation2 + $0x160] sm:$0x3] %vm227_vm1, %v3444_v0  ;;  %273 = vst.msk [vmem:[#allocation2 + $0x178] sm:$0x3] %vm227_vm1, %v3444_v0 }
  0x46   : > { %271 = vst.msk [vmem:[#allocation2 + $0x168] sm:$0xff] %vm224_vm0, %v3444_v0  ;;  %272 = vst.msk [vmem:[#allocation2 + $0x170] sm:$0xff] %vm224_vm0, %v3444_v0 }
  0x47   : > { %274 = vst.msk [vmem:[#allocation2 + $0x180] sm:$0xff] %vm224_vm0, %v3444_v0  ;;  %275 = vst.msk [vmem:[#allocation2 + $0x188] sm:$0xff] %vm224_vm0, %v3444_v0 }
  0x48   : > { %276 = vst.msk [vmem:[#allocation2 + $0x190] sm:$0x3] %vm227_vm1, %v3444_v0  ;;  %279 = vst.msk [vmem:[#allocation2 + $0x1a8] sm:$0x3] %vm227_vm1, %v3444_v0 }
  0x49   : > { %277 = vst.msk [vmem:[#allocation2 + $0x198] sm:$0xff] %vm224_vm0, %v3444_v0  ;;  %278 = vst.msk [vmem:[#allocation2 + $0x1a0] sm:$0xff] %vm224_vm0, %v3444_v0 }
  0x4a   : > { %313 = vst.msk [vmem:[#allocation2 + $0x19] sm:$0xff] %vm224_vm0, %v280_v2  ;;  %314 = vst.msk [vmem:[#allocation2 + $0x21] sm:$0xff] %vm224_vm0, %v281_v3 }
  0x4b   : > { %315 = vst.msk [vmem:[#allocation2 + $0x31] sm:$0xff] %vm224_vm0, %v282_v4  ;;  %316 = vst.msk [vmem:[#allocation2 + $0x39] sm:$0xff] %vm224_vm0, %v283_v5 }
  0x4c   : > { %317 = vst.msk [vmem:[#allocation2 + $0x49] sm:$0xff] %vm224_vm0, %v284_v6  ;;  %318 = vst.msk [vmem:[#allocation2 + $0x51] sm:$0xff] %vm224_vm0, %v285_v7 }
  0x4d   : > { %319 = vst.msk [vmem:[#allocation2 + $0x61] sm:$0xff] %vm224_vm0, %v286_v8  ;;  %320 = vst.msk [vmem:[#allocation2 + $0x69] sm:$0xff] %vm224_vm0, %v287_v9 }
  0x4e   : > { %321 = vst.msk [vmem:[#allocation2 + $0x79] sm:$0xff] %vm224_vm0, %v288_v10  ;;  %322 = vst.msk [vmem:[#allocation2 + $0x81] sm:$0xff] %vm224_vm0, %v289_v11 }
  0x4f   : > { %323 = vst.msk [vmem:[#allocation2 + $0x91] sm:$0xff] %vm224_vm0, %v290_v12  ;;  %324 = vst.msk [vmem:[#allocation2 + $0x99] sm:$0xff] %vm224_vm0, %v291_v13 }
  0x50   : > { %325 = vst.msk [vmem:[#allocation2 + $0xa9] sm:$0xff] %vm224_vm0, %v292_v14  ;;  %326 = vst.msk [vmem:[#allocation2 + $0xb1] sm:$0xff] %vm224_vm0, %v293_v15 }
  0x51   : > { %327 = vst.msk [vmem:[#allocation2 + $0xc1] sm:$0xff] %vm224_vm0, %v294_v16  ;;  %328 = vst.msk [vmem:[#allocation2 + $0xc9] sm:$0xff] %vm224_vm0, %v295_v17 }
  0x52   : > { %329 = vst.msk [vmem:[#allocation2 + $0xd9] sm:$0xff] %vm224_vm0, %v296_v18  ;;  %330 = vst.msk [vmem:[#allocation2 + $0xe1] sm:$0xff] %vm224_vm0, %v297_v19 }
  0x53   : > { %331 = vst.msk [vmem:[#allocation2 + $0xf1] sm:$0xff] %vm224_vm0, %v298_v20  ;;  %332 = vst.msk [vmem:[#allocation2 + $0xf9] sm:$0xff] %vm224_vm0, %v299_v21 }
  0x54   : > { %333 = vst.msk [vmem:[#allocation2 + $0x109] sm:$0xff] %vm224_vm0, %v300_v22  ;;  %334 = vst.msk [vmem:[#allocation2 + $0x111] sm:$0xff] %vm224_vm0, %v301_v23 }
  0x55   : > { %335 = vst.msk [vmem:[#allocation2 + $0x121] sm:$0xff] %vm224_vm0, %v302_v24  ;;  %336 = vst.msk [vmem:[#allocation2 + $0x129] sm:$0xff] %vm224_vm0, %v303_v25  ;;  %v1927_v24 = vld [vmem:[#allocation3 + $0x38] sm:$0xff]  ;;  %v2154_v25 = vld [vmem:[#allocation3 + $0x40] sm:$0xff] }
  0x56   : > { %337 = vst.msk [vmem:[#allocation2 + $0x139] sm:$0xff] %vm224_vm0, %v304_v26  ;;  %338 = vst.msk [vmem:[#allocation2 + $0x141] sm:$0xff] %vm224_vm0, %v305_v27 }
  0x57   : > { %339 = vst.msk [vmem:[#allocation2 + $0x151] sm:$0xff] %vm224_vm0, %v306_v28  ;;  %340 = vst.msk [vmem:[#allocation2 + $0x159] sm:$0xff] %vm224_vm0, %v307_v29 }
  0x58   : > { %341 = vst.msk [vmem:[#allocation2 + $0x169] sm:$0xff] %vm224_vm0, %v308_v30  ;;  %342 = vst.msk [vmem:[#allocation2 + $0x171] sm:$0xff] %vm224_vm0, %v309_v31 }
  0x59   : > { %343 = vst.msk [vmem:[#allocation2 + $0x181] sm:$0xff] %vm224_vm0, %v310_v32  ;;  %344 = vst.msk [vmem:[#allocation2 + $0x189] sm:$0xff] %vm224_vm0, %v311_v33 }
  0x60   : > { %v365_v36 = vld [vmem:[%s3676_s21 + $0x1] sm:$0xff]  ;;  %v366_v38 = vld [vmem:[%s3676_s21 + $0x9] sm:$0xff]  ;;  %v3690_v40 = vld [vmem:[%s3676_s21 + $0x19] sm:$0xff] }
  0x61   : > { %v3680_v37 = vld [vmem:[%s3676_s21 + $0x61] sm:$0xff]  ;;  %3041 = vmatprep.mubr.msk.f32.mxu0 %vm224_vm0, %v365_v36  ;;  %v3687_v39 = vld [vmem:[%s3676_s21 + $0x69] sm:$0xff]  ;;  %v3693_v41 = vld [vmem:[%s3676_s21 + $0x79] sm:$0xff] }
  0x62   : > { %3053 = vmatprep.mubr.msk.f32.mxu1 %vm224_vm0, %v3680_v37  ;;  %3042 = vmatmul.mubr.msk.f32.vlgmr.msra.gmra.mxu0 %vm224_vm0, %v366_v38  ;;  %v3699_v44 = vld [vmem:[%s3676_s21 + $0x21] sm:$0xff]  ;;  %v3709_v46 = vld [vmem:[%s3676_s21 + $0x31] sm:$0xff]  ;;  %v3723_v48 = vld [vmem:[%s3676_s21 + $0x39] sm:$0xff] }
  0x63   : > { %3054 = vmatmul.mubr.msk.f32.vlgmr.msra.gmra.mxu1 %vm224_vm0, %v3687_v39  ;;  %3092 = vmatpush3.msra.mxu0 %v786_v35  ;;  %v3702_v45 = vld [vmem:[%s3676_s21 + $0x81] sm:$0xff]  ;;  %v3712_v47 = vld [vmem:[%s3676_s21 + $0x91] sm:$0xff]  ;;  %v3726_v49 = vld [vmem:[%s3676_s21 + $0x99] sm:$0xff] }
  0x64   : > { %3066 = vmatpush3.msra.mxu1 %v364_v34  ;;  %3044 = vmatprep.mubr.msk.f32.mxu0 %vm224_vm0, %v3690_v40  ;;  %v3729_v50 = vld [vmem:[%s3676_s21 + $0x49] sm:$0xff]  ;;  %v3743_v52 = vld [vmem:[%s3676_s21 + $0x51] sm:$0xff]  ;;  %v348_v54 = vld [vmem:[%s3676_s21] sm:$0xff] }
  0x65   : > { %3056 = vmatprep.mubr.msk.f32.mxu1 %vm224_vm0, %v3693_v41  ;;  %3117 = vmatprep.subr.mxu1 %v1016_v42  ;;  %v3732_v51 = vld [vmem:[%s3676_s21 + $0xa9] sm:$0xff]  ;;  %v3746_v53 = vld [vmem:[%s3676_s21 + $0xb1] sm:$0xff]  ;;  %v3762_v59 = vld [vmem:[%s3676_s21 + $0x1a] sm:$0xff] }
  0x66   : > { %3143 = vmatprep.subr.mxu0 %v1243_v43  ;;  %3045 = vmatmul.mubr.msk.f32.gmra.mxu0 %vm224_vm0, %v3699_v44  ;;  %v769_v55 = vld [vmem:[%s3676_s21 + $0x2] sm:$0xff]  ;;  %v770_v57 = vld [vmem:[%s3676_s21 + $0xa] sm:$0xff]  ;;  %v3759_v58 = vld [vmem:[%s3676_s21 + $0x18] sm:$0xff] }
  0x67   : > { %3057 = vmatmul.mubr.msk.f32.gmra.mxu1 %vm224_vm0, %v3702_v45  ;;  %3047 = vmatprep.mubr.msk.f32.mxu0 %vm224_vm0, %v3709_v46  ;;  %v349_v56 = vld [vmem:[%s3676_s21 + $0x8] sm:$0xff]  ;;  %v351_v62 = vld [vmem:[%s3676_s21 + $0x20] sm:$0xff]  ;;  %v3779_v0 = vld [vmem:[%s3676_s21 + $0x30] sm:$0xff] }
  0x68   : > { %3059 = vmatprep.mubr.msk.f32.mxu1 %vm224_vm0, %v3712_v47  ;;  %v3772_v63 = vld [vmem:[%s3676_s21 + $0x22] sm:$0xff]  ;;  %v3782_v1 = vld [vmem:[%s3676_s21 + $0x32] sm:$0xff]  ;;  %v3797_v3 = vld [vmem:[%s3676_s21 + $0x3a] sm:$0xff] }
  0x69   : > { %v3794_v2 = vld [vmem:[%s3676_s21 + $0x38] sm:$0xff]  ;;  %v3800_v4 = vld [vmem:[%s3676_s21 + $0x48] sm:$0xff]  ;;  %v3814_v6 = vld [vmem:[%s3676_s21 + $0x50] sm:$0xff] }
  0x6a   : > { %3048 = vmatmul.mubr.msk.f32.gmra.mxu0 %vm224_vm0, %v3723_v48  ;;  %v3803_v5 = vld [vmem:[%s3676_s21 + $0x4a] sm:$0xff]  ;;  %v3817_v7 = vld [vmem:[%s3676_s21 + $0x52] sm:$0xff]  ;;  %v3820_v8 = vld [vmem:[%s3676_s21 + $0x60] sm:$0xff] }
  0x6b   : > { %3060 = vmatmul.mubr.msk.f32.gmra.mxu1 %vm224_vm0, %v3726_v49  ;;  %3050 = vmatprep.mubr.msk.f32.mxu0 %vm224_vm0, %v3729_v50  ;;  %v3823_v9 = vld [vmem:[%s3676_s21 + $0x62] sm:$0xff]  ;;  %v3837_v11 = vld [vmem:[%s3676_s21 + $0x6a] sm:$0xff]  ;;  %v3840_v12 = vld [vmem:[%s3676_s21 + $0x78] sm:$0xff] }
  0x6c   : > { %3062 = vmatprep.mubr.msk.f32.mxu1 %vm224_vm0, %v3732_v51  ;;  %v3834_v10 = vld [vmem:[%s3676_s21 + $0x68] sm:$0xff]  ;;  %v3843_v13 = vld [vmem:[%s3676_s21 + $0x7a] sm:$0xff]  ;;  %v3860_v16 = vld [vmem:[%s3676_s21 + $0x90] sm:$0xff] }
  0x6d   : > { %v3854_v14 = vld [vmem:[%s3676_s21 + $0x80] sm:$0xff]  ;;  %v3863_v17 = vld [vmem:[%s3676_s21 + $0x92] sm:$0xff]  ;;  %v3880_v20 = vld [vmem:[%s3676_s21 + $0xa8] sm:$0xff] }
  0x6e   : > { %3051 = vmatmul.mubr.msk.f32.gmra.mxu0 %vm224_vm0, %v3743_v52  ;;  %v3857_v15 = vld [vmem:[%s3676_s21 + $0x82] sm:$0xff]  ;;  %v3874_v18 = vld [vmem:[%s3676_s21 + $0x98] sm:$0xff]  ;;  %v3883_v21 = vld [vmem:[%s3676_s21 + $0xaa] sm:$0xff] }
  0x6f   : > { %3063 = vmatmul.mubr.msk.f32.gmra.mxu1 %vm224_vm0, %v3746_v53  ;;  %3093 = vmatprep.mubr.msk.f32.mxu0 %vm224_vm0, %v769_v55  ;;  %v3877_v19 = vld [vmem:[%s3676_s21 + $0x9a] sm:$0xff]  ;;  %v3894_v22 = vld [vmem:[%s3676_s21 + $0xb0] sm:$0xff]  ;;  %v2703_v28 = vld [vmem:[%s3676_s21 + $0xc8] sm:$0xff] }
  0x70   : > { %3067 = vmatprep.mubr.msk.f32.mxu1 %vm224_vm0, %v348_v54  ;;  %v3897_v23 = vld [vmem:[%s3676_s21 + $0xb2] sm:$0xff]  ;;  %v2702_v26 = vld [vmem:[%s3676_s21 + $0xc0] sm:$0xff]  ;;  %v3969_v29 = vld [vmem:[%s3676_s21 + $0xc9] sm:$0xff] }
  0x71   : > { %v3958_v27 = vld [vmem:[%s3676_s21 + $0xc1] sm:$0xff]  ;;  %v2800_v31 = vld [vmem:[%s3676_s21 + $0xd8] sm:$0xff]  ;;  %v2767_v32 = vld [vmem:[%s3676_s21 + $0xca] sm:$0xff] }
  0x72   : > { %3094 = vmatmul.mubr.msk.f32.vlgmr.msra.gmra.mxu0 %vm224_vm0, %v770_v57  ;;  %v2766_v30 = vld [vmem:[%s3676_s21 + $0xc2] sm:$0xff]  ;;  %v2832_v34 = vld [vmem:[%s3676_s21 + $0xd9] sm:$0xff] }
  0x73   : > { %3068 = vmatmul.mubr.msk.f32.vlgmr.msra.gmra.mxu1 %vm224_vm0, %v349_v56  ;;  %3144 = vmatpush3.msra.mxu0 %v1243_v43  ;;  %v2801_v33 = vld [vmem:[%s3676_s21 + $0xe0] sm:$0xff] }
  0x74   : > { %3118 = vmatpush3.msra.mxu1 %v1016_v42  ;;  %3070 = vmatprep.mubr.msk.f32.mxu1 %vm224_vm0, %v3759_v58  ;;  %v2864_v35 = vld [vmem:[%s3676_s21 + $0xda] sm:$0xff] }
  0x75   : > { %3096 = vmatprep.mubr.msk.f32.mxu0 %vm224_vm0, %v3762_v59  ;;  %3169 = vmatprep.subr.mxu1 %v3766_v60  ;;  %v2833_v36 = vld [vmem:[%s3676_s21 + $0xe1] sm:$0xff] }
  0x76   : > { %3195 = vmatprep.subr.mxu0 %v3768_v61  ;;  %3097 = vmatmul.mubr.msk.f32.gmra.mxu0 %vm224_vm0, %v3772_v63 }
  0x77   : > { %3071 = vmatmul.mubr.msk.f32.gmra.mxu1 %vm224_vm0, %v351_v62  ;;  %3099 = vmatprep.mubr.msk.f32.mxu0 %vm224_vm0, %v3782_v1 }
  0x78   : > { %3073 = vmatprep.mubr.msk.f32.mxu1 %vm224_vm0, %v3779_v0 }
  0x7a   : > { %3100 = vmatmul.mubr.msk.f32.gmra.mxu0 %vm224_vm0, %v3797_v3 }
  0x7b   : > { %3074 = vmatmul.mubr.msk.f32.gmra.mxu1 %vm224_vm0, %v3794_v2  ;;  %3102 = vmatprep.mubr.msk.f32.mxu0 %vm224_vm0, %v3803_v5 }
  0x7c   : > { %3076 = vmatprep.mubr.msk.f32.mxu1 %vm224_vm0, %v3800_v4 }
  0x7e   : > { %3103 = vmatmul.mubr.msk.f32.gmra.mxu0 %vm224_vm0, %v3817_v7 }
  0x7f   : > { %3077 = vmatmul.mubr.msk.f32.gmra.mxu1 %vm224_vm0, %v3814_v6  ;;  %3105 = vmatprep.mubr.msk.f32.mxu0 %vm224_vm0, %v3823_v9 }
  0x80   : > { %3079 = vmatprep.mubr.msk.f32.mxu1 %vm224_vm0, %v3820_v8 }
  0x82   : > { %3106 = vmatmul.mubr.msk.f32.gmra.mxu0 %vm224_vm0, %v3837_v11 }
  0x83   : > { %3080 = vmatmul.mubr.msk.f32.gmra.mxu1 %vm224_vm0, %v3834_v10  ;;  %3108 = vmatprep.mubr.msk.f32.mxu0 %vm224_vm0, %v3843_v13 }
  0x84   : > { %3082 = vmatprep.mubr.msk.f32.mxu1 %vm224_vm0, %v3840_v12 }
  0x86   : > { %3109 = vmatmul.mubr.msk.f32.gmra.mxu0 %vm224_vm0, %v3857_v15 }
  0x87   : > { %3083 = vmatmul.mubr.msk.f32.gmra.mxu1 %vm224_vm0, %v3854_v14  ;;  %3111 = vmatprep.mubr.msk.f32.mxu0 %vm224_vm0, %v3863_v17 }
  0x88   : > { %3085 = vmatprep.mubr.msk.f32.mxu1 %vm224_vm0, %v3860_v16 }
  0x8a   : > { %3112 = vmatmul.mubr.msk.f32.gmra.mxu0 %vm224_vm0, %v3877_v19 }
  0x8b   : > { %3086 = vmatmul.mubr.msk.f32.gmra.mxu1 %vm224_vm0, %v3874_v18  ;;  %3114 = vmatprep.mubr.msk.f32.mxu0 %vm224_vm0, %v3883_v21 }
  0x8c   : > { %3088 = vmatprep.mubr.msk.f32.mxu1 %vm224_vm0, %v3880_v20 }
  0x8e   : > { %3115 = vmatmul.mubr.msk.f32.gmra.mxu0 %vm224_vm0, %v3897_v23 }
  0x8f   : > { %3089 = vmatmul.mubr.msk.f32.gmra.mxu1 %vm224_vm0, %v3894_v22  ;;  %3145 = vmatprep.mubr.msk.f32.mxu0 %vm224_vm0, %v3690_v40 }
  0x90   : > { %3119 = vmatprep.mubr.msk.f32.mxu1 %vm224_vm0, %v3759_v58 }
  0x92   : > { %3146 = vmatmul.mubr.msk.f32.vlgmr.msra.gmra.mxu0 %vm224_vm0, %v3699_v44 }
  0x93   : > { %3120 = vmatmul.mubr.msk.f32.vlgmr.msra.gmra.mxu1 %vm224_vm0, %v351_v62  ;;  %3196 = vmatpush3.msra.mxu0 %v3768_v61 }
  0x94   : > { %3170 = vmatpush3.msra.mxu1 %v3766_v60  ;;  %3122 = vmatprep.mubr.msk.f32.mxu1 %vm224_vm0, %v3779_v0 }
  0x95   : > { %3148 = vmatprep.mubr.msk.f32.mxu0 %vm224_vm0, %v3709_v46  ;;  %3221 = vmatprep.subr.mxu1 %v1927_v24 }
  0x96   : > { %3247 = vmatprep.subr.mxu0 %v2154_v25  ;;  %3149 = vmatmul.mubr.msk.f32.gmra.mxu0 %vm224_vm0, %v3723_v48 }
  0x97   : > { %3123 = vmatmul.mubr.msk.f32.gmra.mxu1 %vm224_vm0, %v3794_v2  ;;  %3151 = vmatprep.mubr.msk.f32.mxu0 %vm224_vm0, %v3729_v50 }
  0x98   : > { %3125 = vmatprep.mubr.msk.f32.mxu1 %vm224_vm0, %v3800_v4 }
  0x9a   : > { %3152 = vmatmul.mubr.msk.f32.gmra.mxu0 %vm224_vm0, %v3743_v52 }
  0x9b   : > { %3126 = vmatmul.mubr.msk.f32.gmra.mxu1 %vm224_vm0, %v3814_v6  ;;  %3154 = vmatprep.mubr.msk.f32.mxu0 %vm224_vm0, %v3680_v37 }
  0x9c   : > { %3128 = vmatprep.mubr.msk.f32.mxu1 %vm224_vm0, %v3820_v8 }
  0x9e   : > { %3155 = vmatmul.mubr.msk.f32.gmra.mxu0 %vm224_vm0, %v3687_v39 }
  0x9f   : > { %3129 = vmatmul.mubr.msk.f32.gmra.mxu1 %vm224_vm0, %v3834_v10  ;;  %3157 = vmatprep.mubr.msk.f32.mxu0 %vm224_vm0, %v3693_v41 }
  0xa0   : > { %3131 = vmatprep.mubr.msk.f32.mxu1 %vm224_vm0, %v3840_v12 }
  0xa2   : > { %3158 = vmatmul.mubr.msk.f32.gmra.mxu0 %vm224_vm0, %v3702_v45 }
  0xa3   : > { %3132 = vmatmul.mubr.msk.f32.gmra.mxu1 %vm224_vm0, %v3854_v14  ;;  %3160 = vmatprep.mubr.msk.f32.mxu0 %vm224_vm0, %v3712_v47 }
  0xa4   : > { %3134 = vmatprep.mubr.msk.f32.mxu1 %vm224_vm0, %v3860_v16 }
  0xa6   : > { %3161 = vmatmul.mubr.msk.f32.gmra.mxu0 %vm224_vm0, %v3726_v49 }
  0xa7   : > { %3135 = vmatmul.mubr.msk.f32.gmra.mxu1 %vm224_vm0, %v3874_v18  ;;  %3163 = vmatprep.mubr.msk.f32.mxu0 %vm224_vm0, %v3732_v51 }
  0xa8   : > { %3137 = vmatprep.mubr.msk.f32.mxu1 %vm224_vm0, %v3880_v20 }
  0xaa   : > { %3164 = vmatmul.mubr.msk.f32.gmra.mxu0 %vm224_vm0, %v3746_v53 }
  0xab   : > { %3138 = vmatmul.mubr.msk.f32.gmra.mxu1 %vm224_vm0, %v3894_v22  ;;  %3166 = vmatprep.mubr.msk.f32.mxu0 %vm224_vm0, %v3958_v27 }
  0xac   : > { %3140 = vmatprep.mubr.msk.f32.mxu1 %vm224_vm0, %v2702_v26 }
  0xae   : > { %3167 = vmatmul.mubr.msk.f32.gmra.mxu0 %vm224_vm0, %v3969_v29 }
  0xaf   : > { %3141 = vmatmul.mubr.msk.f32.gmra.mxu1 %vm224_vm0, %v2703_v28  ;;  %3197 = vmatprep.mubr.msk.f32.mxu0 %vm224_vm0, %v3779_v0 }
  0xb0   : > { %3171 = vmatprep.mubr.msk.f32.mxu1 %vm224_vm0, %v3762_v59 }
  0xb2   : > { %3198 = vmatmul.mubr.msk.f32.vlgmr.msra.gmra.mxu0 %vm224_vm0, %v3794_v2 }
  0xb3   : > { %3172 = vmatmul.mubr.msk.f32.vlgmr.msra.gmra.mxu1 %vm224_vm0, %v3772_v63  ;;  %3248 = vmatpush3.msra.mxu0 %v2154_v25 }
  0xb4   : > { %3222 = vmatpush3.msra.mxu1 %v1927_v24  ;;  %3174 = vmatprep.mubr.msk.f32.mxu1 %vm224_vm0, %v3782_v1 }
  0xb5   : > { %3200 = vmatprep.mubr.msk.f32.mxu0 %vm224_vm0, %v3800_v4 }
  0xb6   : > { %3201 = vmatmul.mubr.msk.f32.gmra.mxu0 %vm224_vm0, %v3814_v6 }
  0xb7   : > { %3175 = vmatmul.mubr.msk.f32.gmra.mxu1 %vm224_vm0, %v3797_v3  ;;  %3203 = vmatprep.mubr.msk.f32.mxu0 %vm224_vm0, %v3820_v8 }
  0xb8   : > { %3177 = vmatprep.mubr.msk.f32.mxu1 %vm224_vm0, %v3803_v5 }
  0xba   : > { %3204 = vmatmul.mubr.msk.f32.gmra.mxu0 %vm224_vm0, %v3834_v10 }
  0xbb   : > { %3178 = vmatmul.mubr.msk.f32.gmra.mxu1 %vm224_vm0, %v3817_v7  ;;  %3206 = vmatprep.mubr.msk.f32.mxu0 %vm224_vm0, %v3840_v12 }
  0xbc   : > { %3180 = vmatprep.mubr.msk.f32.mxu1 %vm224_vm0, %v3823_v9 }
  0xbe   : > { %3207 = vmatmul.mubr.msk.f32.gmra.mxu0 %vm224_vm0, %v3854_v14 }
  0xbf   : > { %3181 = vmatmul.mubr.msk.f32.gmra.mxu1 %vm224_vm0, %v3837_v11  ;;  %3209 = vmatprep.mubr.msk.f32.mxu0 %vm224_vm0, %v3860_v16 }
  0xc0   : > { %3183 = vmatprep.mubr.msk.f32.mxu1 %vm224_vm0, %v3843_v13 }
  0xc2   : > { %3210 = vmatmul.mubr.msk.f32.gmra.mxu0 %vm224_vm0, %v3874_v18 }
  0xc3   : > { %3184 = vmatmul.mubr.msk.f32.gmra.mxu1 %vm224_vm0, %v3857_v15  ;;  %3212 = vmatprep.mubr.msk.f32.mxu0 %vm224_vm0, %v3880_v20 }
  0xc4   : > { %3186 = vmatprep.mubr.msk.f32.mxu1 %vm224_vm0, %v3863_v17 }
  0xc6   : > { %3213 = vmatmul.mubr.msk.f32.gmra.mxu0 %vm224_vm0, %v3894_v22 }
  0xc7   : > { %3187 = vmatmul.mubr.msk.f32.gmra.mxu1 %vm224_vm0, %v3877_v19  ;;  %3215 = vmatprep.mubr.msk.f32.mxu0 %vm224_vm0, %v2702_v26 }
  0xc8   : > { %3189 = vmatprep.mubr.msk.f32.mxu1 %vm224_vm0, %v3883_v21 }
  0xca   : > { %3216 = vmatmul.mubr.msk.f32.gmra.mxu0 %vm224_vm0, %v2703_v28 }
  0xcb   : > { %3190 = vmatmul.mubr.msk.f32.gmra.mxu1 %vm224_vm0, %v3897_v23  ;;  %3218 = vmatprep.mubr.msk.f32.mxu0 %vm224_vm0, %v2800_v31 }
  0xcc   : > { %3192 = vmatprep.mubr.msk.f32.mxu1 %vm224_vm0, %v2766_v30 }
  0xce   : > { %3219 = vmatmul.mubr.msk.f32.gmra.mxu0 %vm224_vm0, %v2801_v33 }
  0xcf   : > { %3193 = vmatmul.mubr.msk.f32.gmra.mxu1 %vm224_vm0, %v2767_v32  ;;  %3249 = vmatprep.mubr.msk.f32.mxu0 %vm224_vm0, %v3782_v1 }
  0xd0   : > { %3223 = vmatprep.mubr.msk.f32.mxu1 %vm224_vm0, %v3709_v46 }
  0xd2   : > { %3250 = vmatmul.mubr.msk.f32.vlgmr.msra.gmra.mxu0 %vm224_vm0, %v3797_v3 }
  0xd3   : > { %3224 = vmatmul.mubr.msk.f32.vlgmr.msra.gmra.mxu1 %vm224_vm0, %v3723_v48  ;;  %3252 = vmatprep.mubr.msk.f32.mxu0 %vm224_vm0, %v3803_v5 }
  0xd4   : > { %3226 = vmatprep.mubr.msk.f32.mxu1 %vm224_vm0, %v3729_v50 }
  0xd6   : > { %3253 = vmatmul.mubr.msk.f32.gmra.mxu0 %vm224_vm0, %v3817_v7 }
  0xd7   : > { %3227 = vmatmul.mubr.msk.f32.gmra.mxu1 %vm224_vm0, %v3743_v52  ;;  %3255 = vmatprep.mubr.msk.f32.mxu0 %vm224_vm0, %v3823_v9 }
  0xd8   : > { %3229 = vmatprep.mubr.msk.f32.mxu1 %vm224_vm0, %v3680_v37  ;;  %v2865_v37 = vld [vmem:[%s3676_s21 + $0xe2] sm:$0xff] }
  0xda   : > { %3256 = vmatmul.mubr.msk.f32.gmra.mxu0 %vm224_vm0, %v3837_v11 }
  0xdb   : > { %3230 = vmatmul.mubr.msk.f32.gmra.mxu1 %vm224_vm0, %v3687_v39  ;;  %3258 = vmatprep.mubr.msk.f32.mxu0 %vm224_vm0, %v3843_v13 }
  0xdc   : > { %3232 = vmatprep.mubr.msk.f32.mxu1 %vm224_vm0, %v3693_v41 }
  0xde   : > { %3259 = vmatmul.mubr.msk.f32.gmra.mxu0 %vm224_vm0, %v3857_v15 }
  0xdf   : > { %3233 = vmatmul.mubr.msk.f32.gmra.mxu1 %vm224_vm0, %v3702_v45  ;;  %3261 = vmatprep.mubr.msk.f32.mxu0 %vm224_vm0, %v3863_v17 }
  0xe0   : > { %3235 = vmatprep.mubr.msk.f32.mxu1 %vm224_vm0, %v3712_v47 }
  0xe2   : > { %3262 = vmatmul.mubr.msk.f32.gmra.mxu0 %vm224_vm0, %v3877_v19 }
  0xe3   : > { %3236 = vmatmul.mubr.msk.f32.gmra.mxu1 %vm224_vm0, %v3726_v49  ;;  %3264 = vmatprep.mubr.msk.f32.mxu0 %vm224_vm0, %v3883_v21 }
  0xe4   : > { %3238 = vmatprep.mubr.msk.f32.mxu1 %vm224_vm0, %v3732_v51 }
  0xe6   : > { %3265 = vmatmul.mubr.msk.f32.gmra.mxu0 %vm224_vm0, %v3897_v23 }
  0xe7   : > { %3239 = vmatmul.mubr.msk.f32.gmra.mxu1 %vm224_vm0, %v3746_v53  ;;  %3267 = vmatprep.mubr.msk.f32.mxu0 %vm224_vm0, %v2766_v30 }
  0xe8   : > { %3241 = vmatprep.mubr.msk.f32.mxu1 %vm224_vm0, %v3958_v27 }
  0xea   : > { %3268 = vmatmul.mubr.msk.f32.gmra.mxu0 %vm224_vm0, %v2767_v32 }
  0xeb   : > { %3242 = vmatmul.mubr.msk.f32.gmra.mxu1 %vm224_vm0, %v3969_v29  ;;  %3270 = vmatprep.mubr.msk.f32.mxu0 %vm224_vm0, %v2864_v35 }
  0xec   : > { %3244 = vmatprep.mubr.msk.f32.mxu1 %vm224_vm0, %v2832_v34 }
  0xee   : > { %3271 = vmatmul.mubr.msk.f32.gmra.mxu0 %vm224_vm0, %v2865_v37 }
  0xef   : > { %3245 = vmatmul.mubr.msk.f32.gmra.mxu1 %vm224_vm0, %v2833_v36 }
 0x122   : > { %v3043_v38 = vpop.f32.mrf.mxu0 }
 0x123   : > { %v3055_v39 = vpop.f32.mrf.mxu1 }
 0x124   : > { %v497_v40 = vpop.f32.mrf.mxu0 }
 0x125   : > { %v537_v41 = vpop.f32.mrf.mxu1 }
 0x126   : > { %v3046_v42 = vpop.f32.mrf.mxu0 }
 0x127   : > { %v3058_v43 = vpop.f32.mrf.mxu1 }
 0x128   : > { %v507_v44 = vpop.f32.mrf.mxu0 }
 0x129   : > { %v547_v45 = vpop.f32.mrf.mxu1 }
 0x12a   : > { %v3049_v46 = vpop.f32.mrf.mxu0 }
 0x12b   : > { %v3061_v47 = vpop.f32.mrf.mxu1 }
 0x12c   : > { %v517_v48 = vpop.f32.mrf.mxu0 }
 0x12d   : > { %v557_v49 = vpop.f32.mrf.mxu1 }
 0x12e   : > { %v3052_v50 = vpop.f32.mrf.mxu0 }
 0x12f   : > { %v3064_v51 = vpop.f32.mrf.mxu1 }
 0x130   : > { %v527_v52 = vpop.f32.mrf.mxu0 }
 0x131   : > { %v4098_v53 = vpop.f32.mrf.mxu1 }
 0x132   : > { %v3095_v55 = vpop.f32.mrf.mxu0 }
 0x133   : > { %v3069_v54 = vpop.f32.mrf.mxu1 }
 0x134   : > { %v696_v56 = vadd.f32 %v3069_v54, %v3043_v38  ;;  %v901_v58 = vpop.f32.mrf.mxu0 }
 0x135   : > { %v690_v57 = vpop.f32.mrf.mxu1 }
 0x136   : > { %v4100_v59 = vadd.f32 %v3095_v55, %v696_v56  ;;  %v691_v60 = vadd.f32 %v690_v57, %v497_v40  ;;  %v3098_v62 = vpop.f32.mrf.mxu0 }
 0x137   : > { %v3072_v61 = vpop.f32.mrf.mxu1 }
 0x138   : > { %v4102_v63 = vadd.f32 %v901_v58, %v691_v60  ;;  %v706_v0 = vadd.f32 %v3072_v61, %v3046_v42  ;;  %v911_v2 = vpop.f32.mrf.mxu0 }
 0x139   : > { %v700_v1 = vpop.f32.mrf.mxu1 }
 0x13a   : > { %v4104_v3 = vadd.f32 %v3098_v62, %v706_v0  ;;  %v701_v4 = vadd.f32 %v700_v1, %v507_v44  ;;  %v3101_v6 = vpop.f32.mrf.mxu0 }
 0x13b   : > { %v3075_v5 = vpop.f32.mrf.mxu1 }
 0x13c   : > { %v4106_v7 = vadd.f32 %v911_v2, %v701_v4  ;;  %v716_v8 = vadd.f32 %v3075_v5, %v3049_v46  ;;  %v921_v10 = vpop.f32.mrf.mxu0 }
 0x13d   : > { %v710_v9 = vpop.f32.mrf.mxu1 }
 0x13e   : > { %v4108_v11 = vadd.f32 %v3101_v6, %v716_v8  ;;  %v711_v12 = vadd.f32 %v710_v9, %v517_v48  ;;  %v3104_v14 = vpop.f32.mrf.mxu0 }
 0x13f   : > { %v3078_v13 = vpop.f32.mrf.mxu1 }
 0x140   : > { %v4110_v15 = vadd.f32 %v921_v10, %v711_v12  ;;  %v726_v16 = vadd.f32 %v3078_v13, %v3052_v50  ;;  %v931_v18 = vpop.f32.mrf.mxu0 }
 0x141   : > { %v720_v17 = vpop.f32.mrf.mxu1 }
 0x142   : > { %v4112_v19 = vadd.f32 %v3104_v14, %v726_v16  ;;  %v721_v20 = vadd.f32 %v720_v17, %v527_v52  ;;  %v3107_v22 = vpop.f32.mrf.mxu0 }
 0x143   : > { %v3081_v21 = vpop.f32.mrf.mxu1 }
 0x144   : > { %v4114_v23 = vadd.f32 %v931_v18, %v721_v20  ;;  %v736_v24 = vadd.f32 %v3081_v21, %v3055_v39  ;;  %v941_v26 = vpop.f32.mrf.mxu0 }
 0x145   : > { %v730_v25 = vpop.f32.mrf.mxu1 }
 0x146   : > { %v4116_v27 = vadd.f32 %v3107_v22, %v736_v24  ;;  %v731_v28 = vadd.f32 %v730_v25, %v537_v41  ;;  %v3110_v30 = vpop.f32.mrf.mxu0 }
 0x147   : > { %v3084_v29 = vpop.f32.mrf.mxu1 }
 0x148   : > { %v4118_v31 = vadd.f32 %v941_v26, %v731_v28  ;;  %v746_v32 = vadd.f32 %v3084_v29, %v3058_v43  ;;  %v951_v34 = vpop.f32.mrf.mxu0 }
 0x149   : > { %v740_v33 = vpop.f32.mrf.mxu1 }
 0x14a   : > { %v4120_v35 = vadd.f32 %v3110_v30, %v746_v32  ;;  %v741_v36 = vadd.f32 %v740_v33, %v547_v45  ;;  %v3113_v38 = vpop.f32.mrf.mxu0 }
 0x14b   : > { %v3087_v37 = vpop.f32.mrf.mxu1 }
 0x14c   : > { %v4122_v40 = vadd.f32 %v951_v34, %v741_v36  ;;  %v756_v39 = vadd.f32 %v3087_v37, %v3061_v47  ;;  %v961_v44 = vpop.f32.mrf.mxu0 }
 0x14d   : > { %v750_v42 = vpop.f32.mrf.mxu1 }
 0x14e   : > { %v4124_v46 = vadd.f32 %v3113_v38, %v756_v39  ;;  %v751_v41 = vadd.f32 %v750_v42, %v557_v49  ;;  %v3116_v50 = vpop.f32.mrf.mxu0 }
 0x14f   : > { %v3090_v48 = vpop.f32.mrf.mxu1 }
 0x150   : > { %v4126_v52 = vadd.f32 %v961_v44, %v751_v41  ;;  %v766_v43 = vadd.f32 %v3090_v48, %v3064_v51  ;;  %v971_v55 = vpop.f32.mrf.mxu0 }
 0x151   : > { %v760_v54 = vpop.f32.mrf.mxu1 }
 0x152   : > { %4423 = vst [vmem:[#allocation9_spill] sm:$0xff] %v4126_v52  ;;  %v4128_v56 = vadd.f32 %v3116_v50, %v766_v43  ;;  %v761_v45 = vadd.f32 %v760_v54, %v4098_v53  ;;  %v3147_v58 = vpop.f32.mrf.mxu0 }
 0x153   : > { %v3121_v57 = vpop.f32.mrf.mxu1 }
 0x154   : > { %4424 = vst [vmem:[#allocation10_spill] sm:$0xff] %v4128_v56  ;;  %v4131_v60 = vadd.f32 %v971_v55, %v761_v45  ;;  %v4133_v61 = vpop.f32.mrf.mxu0  ;;  %v1211_v56 = vadd.f32 %v3121_v57, %v4100_v59 }
 0x155   : > { %v1131_v47 = vpop.f32.mrf.mxu1 }
 0x156   : > { %4425 = vst [vmem:[#allocation11_spill] sm:$0xff] %v4131_v60  ;;  %v4135_v49 = vpop.f32.mrf.mxu0  ;;  %v1210_v52 = vadd.f32 %v1131_v47, %v4102_v63 }
 0x157   : > { %v3124_v62 = vpop.f32.mrf.mxu1 }
 0x158   : > { %v4137_v1 = vpop.f32.mrf.mxu0  ;;  %v1437_v59 = vadd.f32 %v4133_v61, %v1210_v52 }
 0x159   : > { %v1141_v0 = vpop.f32.mrf.mxu1 }
 0x15a   : > { %v4139_v2 = vpop.f32.mrf.mxu0  ;;  %v1212_v57 = vadd.f32 %v1141_v0, %v4106_v7 }
 0x15b   : > { %v3127_v51 = vpop.f32.mrf.mxu1 }
 0x15c   : > { %v4143_v5 = vpop.f32.mrf.mxu0  ;;  %v1215_v63 = vadd.f32 %v3127_v51, %v4108_v11  ;;  %v1439_v7 = vadd.f32 %v4137_v1, %v1212_v57 }
 0x15d   : > { %v4141_v4 = vpop.f32.mrf.mxu1 }
 0x15e   : > { %v4147_v6 = vpop.f32.mrf.mxu0  ;;  %v1442_v61 = vadd.f32 %v4139_v2, %v1215_v63 }
 0x15f   : > { %v4145_v53 = vpop.f32.mrf.mxu1 }
 0x160   : > { %v4151_v9 = vpop.f32.mrf.mxu0  ;;  %v1217_v0 = vadd.f32 %v4145_v53, %v4112_v19 }
 0x161   : > { %v4149_v8 = vpop.f32.mrf.mxu1 }
 0x162   : > { %v4155_v12 = vpop.f32.mrf.mxu0  ;;  %v1444_v19 = vadd.f32 %v4147_v6, %v1217_v0 }
 0x163   : > { %v4153_v10 = vpop.f32.mrf.mxu1 }
 0x164   : > { %v4159_v14 = vpop.f32.mrf.mxu0  ;;  %v1219_v53 = vadd.f32 %v4153_v10, %v4116_v27 }
 0x165   : > { %v4157_v13 = vpop.f32.mrf.mxu1 }
 0x166   : > { %v4163_v17 = vpop.f32.mrf.mxu0 }
 0x167   : > { %v4161_v16 = vpop.f32.mrf.mxu1 }
 0x168   : > { %v4167_v20 = vpop.f32.mrf.mxu0 }
 0x169   : > { %v4165_v18 = vpop.f32.mrf.mxu1  ;;  %4426 = vst [vmem:[#allocation12_spill] sm:$0xff] %v4167_v20 }
 0x16a   : > { %v4171_v22 = vpop.f32.mrf.mxu0 }
 0x16b   : > { %v4169_v21 = vpop.f32.mrf.mxu1  ;;  %4427 = vst [vmem:[#allocation13_spill] sm:$0xff] %v4171_v22 }
 0x16c   : > { %v4175_v25 = vpop.f32.mrf.mxu0 }
 0x16d   : > { %v4173_v24 = vpop.f32.mrf.mxu1  ;;  %4429 = vst [vmem:[#allocation15_spill] sm:$0xff] %v4175_v25 }
 0x16e   : > { %4428 = vst [vmem:[#allocation14_spill] sm:$0xff] %v4173_v24  ;;  %v4179_v28 = vpop.f32.mrf.mxu0 }
 0x16f   : > { %v4177_v26 = vpop.f32.mrf.mxu1  ;;  %4431 = vst [vmem:[#allocation17_spill] sm:$0xff] %v4179_v28 }
 0x170   : > { %4430 = vst [vmem:[#allocation16_spill] sm:$0xff] %v4177_v26  ;;  %v4183_v30 = vpop.f32.mrf.mxu0 }
 0x171   : > { %v4181_v29 = vpop.f32.mrf.mxu1  ;;  %4433 = vst [vmem:[#allocation19_spill] sm:$0xff] %v4183_v30 }
 0x172   : > { %4432 = vst [vmem:[#allocation18_spill] sm:$0xff] %v4181_v29  ;;  %v3199_v33 = vpop.f32.mrf.mxu0 }
 0x173   : > { %v3173_v32 = vpop.f32.mrf.mxu1 }
 0x174   : > { %v1815_v36 = vpop.f32.mrf.mxu0 }
 0x175   : > { %v1585_v34 = vpop.f32.mrf.mxu1 }
 0x176   : > { %v3202_v38 = vpop.f32.mrf.mxu0 }
 0x177   : > { %v3176_v37 = vpop.f32.mrf.mxu1 }
 0x178   : > { %v4185_v42 = vpop.f32.mrf.mxu0 }
 0x179   : > { %v1595_v39 = vpop.f32.mrf.mxu1 }
 0x17a   : > { %v4187_v41 = vpop.f32.mrf.mxu0 }
 0x17b   : > { %v3179_v44 = vpop.f32.mrf.mxu1 }
 0x17c   : > { %v4189_v50 = vpop.f32.mrf.mxu0 }
 0x17d   : > { %v1605_v48 = vpop.f32.mrf.mxu1 }
 0x17e   : > { %v4193_v54 = vpop.f32.mrf.mxu0 }
 0x17f   : > { %v4191_v43 = vpop.f32.mrf.mxu1 }
 0x180   : > { %v4197_v45 = vpop.f32.mrf.mxu0  ;;  %v1671_v6 = vadd.f32 %v4191_v43, %v1444_v19 }
 0x181   : > { %v4195_v55 = vpop.f32.mrf.mxu1 }
 0x182   : > { %v4201_v28 = vpop.f32.mrf.mxu0 }
 0x183   : > { %v4199_v30 = vpop.f32.mrf.mxu1  ;;  %4434 = vst [vmem:[#allocation20_spill] sm:$0xff] %v4201_v28 }
 0x184   : > { %v4205_v60 = vpop.f32.mrf.mxu0 }
 0x185   : > { %v4203_v29 = vpop.f32.mrf.mxu1  ;;  %4436 = vst [vmem:[#allocation22_spill] sm:$0xff] %v4205_v60  ;;  %v1438_v60 = vadd.f32 %v3147_v58, %v1211_v56  ;;  %v1664_v58 = vadd.f32 %v1585_v34, %v1437_v59  ;;  %v1669_v59 = vadd.f32 %v3179_v44, %v1442_v61 }
 0x186   : > { %4435 = vst [vmem:[#allocation21_spill] sm:$0xff] %v4203_v29  ;;  %v4210_v26 = vpop.f32.mrf.mxu0  ;;  %v1213_v29 = vadd.f32 %v3124_v62, %v4104_v3  ;;  %v1214_v3 = vadd.f32 %v4141_v4, %v4110_v15  ;;  %v1216_v4 = vadd.f32 %v4149_v8, %v4114_v23 }
 0x187   : > { %v4208_v25 = vpop.f32.mrf.mxu1  ;;  %4438 = vst [vmem:[#allocation24_spill] sm:$0xff] %v4210_v26 }
 0x188   : > { %4437 = vst [vmem:[#allocation23_spill] sm:$0xff] %v4208_v25  ;;  %v4215_v24 = vpop.f32.mrf.mxu0  ;;  %v1440_v56 = vadd.f32 %v4135_v49, %v1213_v29  ;;  %v1894_v29 = vadd.f32 %v1815_v36, %v1664_v58  ;;  %v1441_v15 = vadd.f32 %v4143_v5, %v1214_v3  ;;  %v1899_v58 = vadd.f32 %v4187_v41, %v1669_v59 }
 0x189   : > { %v4213_v22 = vpop.f32.mrf.mxu1  ;;  %4439 = vst [vmem:[#allocation25_spill] sm:$0xff] %v4215_v24  ;;  %v1665_v24 = vadd.f32 %v3173_v32, %v1438_v60  ;;  %v1666_v32 = vadd.f32 %v1595_v39, %v1439_v7  ;;  %v1446_v7 = vadd.f32 %v4155_v12, %v1219_v53 }
 0x18a   : > { %v4220_v28 = vpop.f32.mrf.mxu0  ;;  %v1667_v11 = vadd.f32 %v3176_v37, %v1440_v56  ;;  %v1668_v36 = vadd.f32 %v1605_v48, %v1441_v15  ;;  %v1443_v56 = vadd.f32 %v4151_v9, %v1216_v4  ;;  %v4445_v19 = vld [vmem:[#allocation20_spill] sm:$0xff] }
 0x18b   : > { %v4218_v20 = vpop.f32.mrf.mxu1  ;;  %v1895_v60 = vadd.f32 %v3199_v33, %v1665_v24  ;;  %v4249_v33 = vld [vmem:[#allocation5] ss:$0 sm:$0xff]  ;;  %v1896_v63 = vadd.f32 %v4185_v42, %v1666_v32 }
 0x18c   : > { %4440 = vst [vmem:[#allocation26_spill] sm:$0xff] %v4218_v20  ;;  %v4225_v26 = vpop.f32.mrf.mxu0  ;;  %v1897_v2 = vadd.f32 %v3202_v38, %v1667_v11  ;;  %v1218_v38 = vadd.f32 %v4157_v13, %v4118_v31  ;;  %v1221_v31 = vadd.f32 %v4161_v16, %v4120_v35  ;;  %v1898_v13 = vadd.f32 %v4189_v50, %v1668_v36 }
 0x18d   : > { %v4223_v25 = vpop.f32.mrf.mxu1  ;;  %v1670_v41 = vadd.f32 %v4195_v55, %v1443_v56  ;;  %v1220_v35 = vadd.f32 %v4165_v18, %v4122_v40  ;;  %v1901_v16 = vadd.f32 %v4193_v54, %v1671_v6  ;;  %v1673_v50 = vadd.f32 %v4199_v30, %v1446_v7  ;;  %v4441_v18 = vld [vmem:[#allocation21_spill] sm:$0xff]  ;;  %v4448_v6 = vld [vmem:[#allocation10_spill] sm:$0xff] }
 0x18e   : > { %v4232_v20 = vpop.f32.mrf.mxu0  ;;  %v1448_v4 = vadd.f32 %v4163_v17, %v1221_v31  ;;  %v4442_v17 = vld [vmem:[#allocation12_spill] sm:$0xff] }
 0x18f   : > { %v4230_v47 = vpop.f32.mrf.mxu1  ;;  %v1900_v40 = vadd.f32 %v4197_v45, %v1670_v41  ;;  %v4444_v45 = vld [vmem:[#allocation14_spill] sm:$0xff]  ;;  %v1903_v53 = vadd.f32 %v4445_v19, %v1673_v50  ;;  %v4446_v36 = vld [vmem:[#allocation23_spill] sm:$0xff] }
 0x190   : > { %v4240_v52 = vpop.f32.mrf.mxu0 }
 0x191   : > { %v4238_v62 = vpop.f32.mrf.mxu1 }
 0x192   : > { %v3251_v51 = vpop.f32.mrf.mxu0 }
 0x193   : > { %v3225_v49 = vpop.f32.mrf.mxu1 }
 0x194   : > { %v2122_v34 = vadd.f32 %v3225_v49, %v1895_v60  ;;  %v2269_v24 = vpop.f32.mrf.mxu0  ;;  %v1445_v49 = vadd.f32 %v4159_v14, %v1218_v38  ;;  %v1223_v14 = vadd.f32 %v4169_v21, %v4124_v46  ;;  %v1447_v46 = vadd.f32 %v4442_v17, %v1220_v35  ;;  %v4443_v21 = vld [vmem:[#allocation9_spill] sm:$0xff] }
 0x195   : > { %v2042_v1 = vpop.f32.mrf.mxu1  ;;  %v4447_v38 = vld [vmem:[#allocation13_spill] sm:$0xff] }
 0x196   : > { %v2349_v37 = vadd.f32 %v3251_v51, %v2122_v34  ;;  %v2121_v57 = vadd.f32 %v2042_v1, %v1894_v29  ;;  %v3254_v5 = vpop.f32.mrf.mxu0  ;;  %v1672_v54 = vadd.f32 %v4441_v18, %v1445_v49  ;;  %v4454_v49 = vld [vmem:[#allocation24_spill] sm:$0xff] }
 0x197   : > { %v3228_v39 = vpop.f32.mrf.mxu1 }
 0x198   : > { %v2348_v23 = vadd.f32 %v2269_v24, %v2121_v57  ;;  %v2124_v8 = vadd.f32 %v3228_v39, %v1897_v2  ;;  %v2372_v44 = vadd.f32 %v4249_v33, %v2349_v37  ;;  %v2279_v10 = vpop.f32.mrf.mxu0  ;;  %v1222_v57 = vadd.f32 %v4444_v45, %v4443_v21 }
 0x199   : > { %v2052_v27 = vpop.f32.mrf.mxu1  ;;  %v1675_v39 = vadd.f32 %v4446_v36, %v1448_v4 }
 0x19a   : > { %v2371_v42 = vadd.f32 %v4249_v33, %v2348_v23  ;;  %v2351_v48 = vadd.f32 %v3254_v5, %v2124_v8  ;;  %v2123_v3 = vadd.f32 %v2052_v27, %v1896_v63  ;;  %v2388_v9 = vmax.f32 %v2372_v44, 0.0  ;;  %v3257_v60 = vpop.f32.mrf.mxu0  ;;  %v4449_v27 = vld [vmem:[#allocation16_spill] sm:$0xff] }
 0x19b   : > { %v3231_v43 = vpop.f32.mrf.mxu1  ;;  %v1905_v35 = vadd.f32 %v4454_v49, %v1675_v39 }
 0x19c   : > { %v2387_v11 = vmax.f32 %v2371_v42, 0.0  ;;  %v2350_v61 = vadd.f32 %v2279_v10, %v2123_v3  ;;  %v2126_v0 = vadd.f32 %v3231_v43, %v1899_v58  ;;  %2421 = vrot.lane.b32.xlu0 %v2388_v9, %s3445_s28  ;;  %2468 = vst.msk [vmem:[%s4264_s27 + $0x8] sm:$0xff] %vm224_vm0, %v2388_v9  ;;  %v2374_v12 = vadd.f32 %v4249_v33, %v2351_v48  ;;  %v2289_v51 = vpop.f32.mrf.mxu0  ;;  %v4450_v42 = vld [vmem:[#allocation22_spill] sm:$0xff] }
 0x19d   : > { %v2062_v55 = vpop.f32.mrf.mxu1  ;;  %v1450_v58 = vadd.f32 %v4447_v38, %v1223_v14  ;;  %v1225_v10 = vadd.f32 %v4449_v27, %v4448_v6  ;;  %v1902_v48 = vadd.f32 %v4450_v42, %v1672_v54  ;;  %v1674_v3 = vadd.f32 %v4213_v22, %v1447_v46  ;;  %v4455_v22 = vld [vmem:[#allocation26_spill] sm:$0xff]  ;;  %v4457_v14 = vld [vmem:[#allocation25_spill] sm:$0xff] }
 0x19e   : > { %2467 = vst.msk [vmem:[%s4264_s27] sm:$0xff] %vm224_vm0, %v2387_v11  ;;  %v2373_v29 = vadd.f32 %v4249_v33, %v2350_v61  ;;  %v2125_v32 = vadd.f32 %v2062_v55, %v1898_v13  ;;  %v2353_v34 = vadd.f32 %v3257_v60, %v2126_v0  ;;  %v2390_v15 = vmax.f32 %v2374_v12, 0.0  ;;  %v3260_v59 = vpop.f32.mrf.mxu0  ;;  %v4451_v60 = vld [vmem:[#allocation15_spill] sm:$0xff]  ;;  %v4453_v0 = vld [vmem:[#allocation18_spill] sm:$0xff] }
 0x19f   : > { %v3234_v30 = vpop.f32.mrf.mxu1  ;;  %v4452_v61 = vld [vmem:[#allocation11_spill] sm:$0xff] }
 0x1a0   : > { %v2389_v1 = vmax.f32 %v2373_v29, 0.0  ;;  %v2376_v24 = vadd.f32 %v4249_v33, %v2353_v34  ;;  %v2128_v2 = vadd.f32 %v3234_v30, %v1901_v16  ;;  %v2352_v37 = vadd.f32 %v2289_v51, %v2125_v32  ;;  %2425 = vrot.lane.b32.xlu1 %v2390_v15, %s3445_s28  ;;  %2472 = vst.msk [vmem:[%s4264_s27 + $0x28] sm:$0xff] %vm224_vm0, %v2390_v15  ;;  %v2299_v63 = vpop.f32.mrf.mxu0  ;;  %v4456_v15 = vld [vmem:[#allocation17_spill] sm:$0xff] }
 0x1a1   : > { %2419 = vrot.lane.b32.xlu0 %v2387_v11, %s3445_s28  ;;  %v2072_v5 = vpop.f32.mrf.mxu1  ;;  %v1449_v11 = vadd.f32 %v4451_v60, %v1222_v57  ;;  %v1224_v12 = vadd.f32 %v4453_v0, %v4452_v61  ;;  %v1677_v16 = vadd.f32 %v4455_v22, %v1450_v58  ;;  %v1452_v4 = vadd.f32 %v4456_v15, %v1225_v10 }
 0x1a2   : > { %2471 = vst.msk [vmem:[%s4264_s27 + $0x20] sm:$0xff] %vm224_vm0, %v2389_v1  ;;  %v2392_v23 = vmax.f32 %v2376_v24, 0.0  ;;  %v2375_v8 = vadd.f32 %v4249_v33, %v2352_v37  ;;  %v2127_v44 = vadd.f32 %v2072_v5, %v1900_v40  ;;  %v2355_v56 = vadd.f32 %v3260_v59, %v2128_v2  ;;  %v3263_v7 = vpop.f32.mrf.mxu0  ;;  %v4458_v37 = vld [vmem:[#allocation19_spill] sm:$0xff] }
 0x1a3   : > { %v3237_v9 = vpop.f32.mrf.mxu1  ;;  %v1904_v40 = vadd.f32 %v4457_v14, %v1674_v3  ;;  %v1676_v18 = vadd.f32 %v4223_v25, %v1449_v11  ;;  %v1451_v17 = vadd.f32 %v4458_v37, %v1224_v12  ;;  %v1907_v46 = vadd.f32 %v4220_v28, %v1677_v16 }
 0x1a4   : > { %2476 = vst.msk [vmem:[%s4264_s27 + $0x48] sm:$0xff] %vm224_vm0, %v2392_v23  ;;  %v2391_v31 = vmax.f32 %v2375_v8, 0.0  ;;  %v2378_v13 = vadd.f32 %v4249_v33, %v2355_v56  ;;  %v2130_v41 = vadd.f32 %v3237_v9, %v1903_v53  ;;  %v2354_v43 = vadd.f32 %v2299_v63, %v2127_v44  ;;  %2423 = vrot.lane.b32.xlu1 %v2389_v1, %s3445_s28  ;;  %v2309_v55 = vpop.f32.mrf.mxu0 }
 0x1a5   : > { %v2082_v50 = vpop.f32.mrf.mxu1  ;;  %v1679_v21 = vadd.f32 %v4230_v47, %v1452_v4  ;;  %v1906_v39 = vadd.f32 %v4225_v26, %v1676_v18  ;;  %v1678_v5 = vadd.f32 %v4238_v62, %v1451_v17 }
 0x1a6   : > { %2475 = vst.msk [vmem:[%s4264_s27 + $0x40] sm:$0xff] %vm224_vm0, %v2391_v31  ;;  %v2394_v51 = vmax.f32 %v2378_v13, 0.0  ;;  %v2377_v29 = vadd.f32 %v4249_v33, %v2354_v43  ;;  %v2129_v32 = vadd.f32 %v2082_v50, %v1902_v48  ;;  %v2357_v34 = vadd.f32 %v3263_v7, %v2130_v41  ;;  %2427 = vrot.lane.b32.xlu0 %v2391_v31, %s3445_s28  ;;  %v3266_v30 = vpop.f32.mrf.mxu0 }
 0x1a7   : > { %v3240_v54 = vpop.f32.mrf.mxu1  ;;  %v1909_v56 = vadd.f32 %v4232_v20, %v1679_v21  ;;  %v1908_v10 = vadd.f32 %v4240_v52, %v1678_v5 }
 0x1a8   : > { %2480 = vst.msk [vmem:[%s4264_s27 + $0x68] sm:$0xff] %vm224_vm0, %v2394_v51  ;;  %v2393_v59 = vmax.f32 %v2377_v29, 0.0  ;;  %v2380_v1 = vadd.f32 %v4249_v33, %v2357_v34  ;;  %v2132_v24 = vadd.f32 %v3240_v54, %v1905_v35  ;;  %v2356_v2 = vadd.f32 %v2309_v55, %v2129_v32  ;;  %2429 = vrot.lane.b32.xlu1 %v2392_v23, %s3445_s28  ;;  %v2319_v25 = vpop.f32.mrf.mxu0 }
 0x1a9   : > { %v2092_v45 = vpop.f32.mrf.mxu1 }
 0x1aa   : > { %2479 = vst.msk [vmem:[%s4264_s27 + $0x60] sm:$0xff] %vm224_vm0, %v2393_v59  ;;  %v2396_v57 = vmax.f32 %v2380_v1, 0.0  ;;  %v2379_v19 = vadd.f32 %v4249_v33, %v2356_v2  ;;  %v2131_v53 = vadd.f32 %v2092_v45, %v1904_v40  ;;  %v2359_v36 = vadd.f32 %v3266_v30, %v2132_v24  ;;  %2431 = vrot.lane.b32.xlu0 %v2393_v59, %s3445_s28  ;;  %v3269_v28 = vpop.f32.mrf.mxu0 }
 0x1ab   : > { %v3243_v63 = vpop.f32.mrf.mxu1 }
 0x1ac   : > { %2484 = vst.msk [vmem:[%s4264_s27 + $0x88] sm:$0xff] %vm224_vm0, %v2396_v57  ;;  %v2395_v47 = vmax.f32 %v2379_v19, 0.0  ;;  %v2382_v23 = vadd.f32 %v4249_v33, %v2359_v36  ;;  %v2134_v8 = vadd.f32 %v3243_v63, %v1907_v46  ;;  %v2358_v44 = vadd.f32 %v2319_v25, %v2131_v53  ;;  %2433 = vrot.lane.b32.xlu1 %v2394_v51, %s3445_s28  ;;  %v2329_v58 = vpop.f32.mrf.mxu0 }
 0x1ad   : > { %v2102_v38 = vpop.f32.mrf.mxu1 }
 0x1ae   : > { %2483 = vst.msk [vmem:[%s4264_s27 + $0x80] sm:$0xff] %vm224_vm0, %v2395_v47  ;;  %v2398_v26 = vmax.f32 %v2382_v23, 0.0  ;;  %v2381_v62 = vadd.f32 %v4249_v33, %v2358_v44  ;;  %v2133_v6 = vadd.f32 %v2102_v38, %v1906_v39  ;;  %v2361_v27 = vadd.f32 %v3269_v28, %v2134_v8  ;;  %2435 = vrot.lane.b32.xlu0 %v2395_v47, %s3445_s28  ;;  %v3272_v48 = vpop.f32.mrf.mxu0 }
 0x1af   : > { %v3246_v42 = vpop.f32.mrf.mxu1 }
 0x1b0   : > { %2488 = vst.msk [vmem:[%s4264_s27 + $0xa8] sm:$0xff] %vm224_vm0, %v2398_v26  ;;  %v2397_v20 = vmax.f32 %v2381_v62, 0.0  ;;  %v2384_v3 = vadd.f32 %v4249_v33, %v2361_v27  ;;  %v2136_v9 = vadd.f32 %v3246_v42, %v1909_v56  ;;  %v2360_v7 = vadd.f32 %v2329_v58, %v2133_v6  ;;  %2437 = vrot.lane.b32.xlu1 %v2396_v57, %s3445_s28  ;;  %v2339_v13 = vpop.f32.mrf.mxu0 }
 0x1b1   : > { %v2112_v31 = vpop.f32.mrf.mxu1 }
 0x1b2   : > { %2487 = vst.msk [vmem:[%s4264_s27 + $0xa0] sm:$0xff] %vm224_vm0, %v2397_v20  ;;  %v2400_v41 = vmax.f32 %v2384_v3, 0.0  ;;  %v2383_v52 = vadd.f32 %v4249_v33, %v2360_v7  ;;  %v2135_v43 = vadd.f32 %v2112_v31, %v1908_v10  ;;  %v2363_v60 = vadd.f32 %v3272_v48, %v2136_v9  ;;  %2439 = vrot.lane.b32.xlu0 %v2397_v20, %s3445_s28 }
 0x1b4   : > { %2492 = vst.msk [vmem:[%s4264_s27 + $0xc8] sm:$0xff] %vm224_vm0, %v2400_v41  ;;  %v2399_v11 = vmax.f32 %v2383_v52, 0.0  ;;  %v2386_v61 = vadd.f32 %v4249_v33, %v2363_v60  ;;  %v2362_v0 = vadd.f32 %v2339_v13, %v2135_v43  ;;  %2441 = vrot.lane.b32.xlu1 %v2398_v26, %s3445_s28 }
 0x1b6   : > { %2491 = vst.msk [vmem:[%s4264_s27 + $0xc0] sm:$0xff] %vm224_vm0, %v2399_v11  ;;  %v2402_v12 = vmax.f32 %v2386_v61, 0.0  ;;  %v2385_v49 = vadd.f32 %v4249_v33, %v2362_v0  ;;  %2443 = vrot.lane.b32.xlu0 %v2399_v11, %s3445_s28 }
 0x1b8   : > { %2496 = vst.msk [vmem:[%s4264_s27 + $0xe8] sm:$0xff] %vm224_vm0, %v2402_v12  ;;  %v2401_v35 = vmax.f32 %v2385_v49, 0.0  ;;  %2445 = vrot.lane.b32.xlu1 %v2400_v41, %s3445_s28 }
 0x1ba   : > { %2495 = vst.msk [vmem:[%s4264_s27 + $0xe0] sm:$0xff] %vm224_vm0, %v2401_v35  ;;  %2447 = vrot.lane.b32.xlu0 %v2401_v35, %s3445_s28 }
 0x1bc   : > { %2449 = vrot.lane.b32.xlu1 %v2402_v12, %s3445_s28 }
 0x20e   : > { %v2422_v22 = vpop.permute.xlu0 %2421 }
 0x20f   : > { %2470 = vst.msk [vmem:[%s4264_s27 + $0x18] sm:$0xff] %vm224_vm0, %v2422_v22 }
 0x212   : > { %v2426_v33 = vpop.permute.xlu1 %2425 }
 0x213   : > { %v2420_v16 = vpop.permute.xlu0 %2419  ;;  %2474 = vst.msk [vmem:[%s4264_s27 + $0x38] sm:$0xff] %vm224_vm0, %v2426_v33 }
 0x214   : > { %2469 = vst.msk [vmem:[%s4264_s27 + $0x10] sm:$0xff] %vm224_vm0, %v2420_v16 }
 0x216   : > { %v2424_v50 = vpop.permute.xlu1 %2423 }
 0x217   : > { %2473 = vst.msk [vmem:[%s4264_s27 + $0x30] sm:$0xff] %vm224_vm0, %v2424_v50 }
 0x218   : > { %v2428_v55 = vpop.permute.xlu0 %2427 }
 0x219   : > { %2477 = vst.msk [vmem:[%s4264_s27 + $0x50] sm:$0xff] %vm224_vm0, %v2428_v55 }
 0x21a   : > { %v2430_v51 = vpop.permute.xlu1 %2429 }
 0x21b   : > { %2478 = vst.msk [vmem:[%s4264_s27 + $0x58] sm:$0xff] %vm224_vm0, %v2430_v51 }
 0x21c   : > { %v2432_v29 = vpop.permute.xlu0 %2431 }
 0x21d   : > { %2481 = vst.msk [vmem:[%s4264_s27 + $0x70] sm:$0xff] %vm224_vm0, %v2432_v29 }
 0x21e   : > { %v2434_v32 = vpop.permute.xlu1 %2433 }
 0x21f   : > { %2482 = vst.msk [vmem:[%s4264_s27 + $0x78] sm:$0xff] %vm224_vm0, %v2434_v32 }
 0x220   : > { %v2436_v34 = vpop.permute.xlu0 %2435 }
 0x221   : > { %2485 = vst.msk [vmem:[%s4264_s27 + $0x90] sm:$0xff] %vm224_vm0, %v2436_v34 }
 0x222   : > { %v2438_v15 = vpop.permute.xlu1 %2437 }
 0x223   : > { %2486 = vst.msk [vmem:[%s4264_s27 + $0x98] sm:$0xff] %vm224_vm0, %v2438_v15 }
 0x224   : > { %v2440_v4 = vpop.permute.xlu0 %2439 }
 0x225   : > { %2489 = vst.msk [vmem:[%s4264_s27 + $0xb0] sm:$0xff] %vm224_vm0, %v2440_v4 }
 0x226   : > { %v2442_v14 = vpop.permute.xlu1 %2441 }
 0x227   : > { %2490 = vst.msk [vmem:[%s4264_s27 + $0xb8] sm:$0xff] %vm224_vm0, %v2442_v14 }
 0x228   : > { %v2444_v40 = vpop.permute.xlu0 %2443 }
 0x229   : > { %2493 = vst.msk [vmem:[%s4264_s27 + $0xd0] sm:$0xff] %vm224_vm0, %v2444_v40 }
 0x22a   : > { %v2446_v18 = vpop.permute.xlu1 %2445 }
 0x22b   : > { %2494 = vst.msk [vmem:[%s4264_s27 + $0xd8] sm:$0xff] %vm224_vm0, %v2446_v18 }
 0x22c   : > { %v2448_v54 = vpop.permute.xlu0 %2447 }
 0x22d   : > { %2497 = vst.msk [vmem:[%s4264_s27 + $0xf0] sm:$0xff] %vm224_vm0, %v2448_v54 }
 0x22e   : > { %v2450_v30 = vpop.permute.xlu1 %2449 }
 0x22f   : > { %2498 = vst.msk [vmem:[%s4264_s27 + $0xf8] sm:$0xff] %vm224_vm0, %v2450_v30 }
 0x230 PF: > { %s15_s16 = sadd.s32 1, %s3438_s16   ;;  %s4459_s12 = smov %s3430_s14 }
 0x231   : > { %p12_p5 = scmp.ge.s32.totalorder %s15_s16, 6   ;;  %s4460_s13 = smov %s3434_s15 }
 0x232   : > { %s4461_s14 = smov %s4464_s18  ;;  %s4462_s15 = smov %s4468_s19 }
 0x233   :  { %14 = sbr.rel (!%p12_p5) target bundleno = 4 (0x4), region = 83 }
 0x238   :  { %2531 = vsyncpa [#allocation4], 1 }
 0x239   :  { %2533 = vsyncpa [#allocation4 + $0x1], 1 }
 0x23a   :  { %2534 = vsyncpa [#allocation6], 1 }

// kernel: decoder_forward.9
= control target key start
LH: loop header
LB: loop body
LE: loop exit
PB: predicated region body
PF: predicated region fallthrough
CT: control target
= control target key end

     0   :  { %s10301_s12 = smov 0   ;;  %s10303_s13 = smov 0   ;;  %s13956_s0 = inlined_call_operand.vmem [shape: f32[2,32,32,4], index: 0, kind: input, shape index: {}]   ;;  %s13957_s1 = inlined_call_operand.vmem [shape: f32[9,4,24], index: 1, kind: input, shape index: {}]   ;;  %s13958_s2 = inlined_call_operand.vmem [shape: f32[1,24], index: 2, kind: input, shape index: {}]   ;;  %s13959_s3 = inlined_call_operand.vmem [shape: f32[2,64,32,12], index: 3, kind: output, shape index: {}]  }
   0x1   :  { %s10305_s14 = smov 0   ;;  %s10307_s15 = smov 0  }
   0x2   :  { %s10309_s16 = smov 0  }
   0x3 LB: > { %s22_s17 = sadd.s32 1, %s10269_s14  ;;  %s25_s18 = sadd.s32 1, %s10273_s15  ;;  %s10277_s16 = sphi %s10309_s16, %s13_s16   ;;  %s10273_s15 = sphi %s10307_s15, %s14333_s15   ;;  %s10269_s14 = sphi %s10305_s14, %s14332_s14   ;;  %s10265_s13 = sphi %s10303_s13, %s14331_s13   ;;  %s10261_s12 = sphi %s10301_s12, %s14330_s12  }
   0x4   : > { %p23_p0 = scmp.ge.s32.totalorder %s22_s17, 2  ;;  %p7667_p1 = scmp.ge.s32.totalorder %s10277_s16, 1 }
   0x5   : > { %p151_p2 = scmp.lt.s32.totalorder %s10277_s16, 5 }
   0x6   : > { %s14335_s17 = smov (%p23_p0, %s22_s17), 0  ;;  %s14337_s18 = smov (!%p23_p0, %s25_s18), %s10273_s15 }
   0x7   : > { %p152_p3 = pnand %p7667_p1, %p151_p2  ;;  %p27_p4 = scmp.ge.s32.totalorder %s14337_s18, 2 }
   0x9   : > { %s14339_s18 = smov (%p27_p4, %s14337_s18), 0  ;;  %155 = sbr.rel (%p152_p3) target bundleno = 1068 (0x42c), region = 32 }
   0xe   : > { %v10338_v0 = vld [vmem:[%s13957_s1 + $0x4] sm:$0xf]  ;;  %vm951_vm0 = vcmask 1043456   ;;  %p180_p5 = scmp.lt.s32.totalorder %s10265_s13, 1  ;;  %vm196_vm1 = vcmask 31744   ;;  %v10279_v1 = vmov 0.0  }
   0xf   : > { %10192 = vmatprep.subr.msk.mxu1 %vm951_vm0, %v10338_v0  ;;  %9310 = vmatprep.subr.msk.mxu0 %vm951_vm0, %v10338_v0  ;;  %197 = vst.msk [vmem:[#allocation2] sm:$0xff] %vm196_vm1, %v10279_v1  ;;  %198 = vst.msk [vmem:[#allocation2 + $0x8] sm:$0xff] %vm196_vm1, %v10279_v1  ;;  %vm201_vm2 = vcmask 25600   ;;  %v10620_v2 = vld [vmem:[%s13957_s1] sm:$0xf]  ;;  %s7675_s29 = smul.u32 640, %s10261_s12 }
  0x10   : > { %199 = vst.msk [vmem:[#allocation2 + $0x10] sm:$0xff] %vm196_vm1, %v10279_v1  ;;  %200 = vst.msk [vmem:[#allocation2 + $0x18] sm:$0xff] %vm196_vm1, %v10279_v1  ;;  %v10625_v3 = vld [vmem:[%s13957_s1 + $0x8] sm:$0xf]  ;;  %10193 = vmatpush3.msk.msra.mxu1 %vm951_vm0, %v10338_v0  ;;  %9311 = vmatpush3.msk.msra.mxu0 %vm951_vm0, %v10338_v0  ;;  %s14341_s13 = smov (!%p180_p5, %s10265_s13), 1  ;;  %s7670_s23 = sshll.u32 %s10261_s12, 5 }
  0x11   : > { %203 = vst.msk [vmem:[#allocation2 + $0x28] sm:$0xff] %vm196_vm1, %v10279_v1  ;;  %204 = vst.msk [vmem:[#allocation2 + $0x30] sm:$0xff] %vm196_vm1, %v10279_v1  ;;  %9408 = vmatprep.subr.msk.mxu1 %vm951_vm0, %v10620_v2  ;;  %9506 = vmatprep.subr.msk.mxu0 %vm951_vm0, %v10625_v3  ;;  %s8724_s25 = sshll.u32 %s14341_s13, 10  ;;  %s10971_s30 = scalar_lea.vmem [#allocation2], %s7675_s29  ;;  %vm7434_vm7 = vcmask 97280  }
  0x12   : > { %205 = vst.msk [vmem:[#allocation2 + $0x38] sm:$0xff] %vm196_vm1, %v10279_v1  ;;  %206 = vst.msk [vmem:[#allocation2 + $0x40] sm:$0xff] %vm196_vm1, %v10279_v1  ;;  %s10712_s28 = scalar_lea.vmem %s13956_s0, %s8724_s25  ;;  %p188_p6 = scmp.lt.s32.totalorder %s7670_s23, 63 }
  0x13   : > { %208 = vst.msk [vmem:[#allocation2 + $0x50] sm:$0xff] %vm196_vm1, %v10279_v1  ;;  %209 = vst.msk [vmem:[#allocation2 + $0x58] sm:$0xff] %vm196_vm1, %v10279_v1  ;;  %v368_v4 = vld [vmem:[%s10712_s28] sm:$0xff]  ;;  %v369_v5 = vld [vmem:[%s10712_s28 + $0x8] sm:$0xff]  ;;  %s7672_s24 = sshll.u32 %s14341_s13, 8  ;;  %s10280_s4 = smov 116  }
  0x14   : > { %210 = vst.msk [vmem:[#allocation2 + $0x60] sm:$0xff] %vm196_vm1, %v10279_v1  ;;  %211 = vst.msk [vmem:[#allocation2 + $0x68] sm:$0xff] %vm196_vm1, %v10279_v1  ;;  %v370_v6 = vld [vmem:[%s10712_s28 + $0x10] sm:$0xff]  ;;  %v371_v7 = vld [vmem:[%s10712_s28 + $0x18] sm:$0xff]  ;;  %s14343_s23 = smov (!%p188_p6, %s7670_s23), 63 }
  0x15   : > { %213 = vst.msk [vmem:[#allocation2 + $0x78] sm:$0xff] %vm196_vm1, %v10279_v1  ;;  %214 = vst.msk [vmem:[#allocation2 + $0x80] sm:$0xff] %vm196_vm1, %v10279_v1  ;;  %v372_v8 = vld [vmem:[%s10712_s28 + $0x20] sm:$0xff]  ;;  %v373_v9 = vld [vmem:[%s10712_s28 + $0x28] sm:$0xff]  ;;  %s7671_s12 = sshll.u32 %s14343_s23, 2 }
  0x16   : > { %215 = vst.msk [vmem:[#allocation2 + $0x88] sm:$0xff] %vm196_vm1, %v10279_v1  ;;  %216 = vst.msk [vmem:[#allocation2 + $0x90] sm:$0xff] %vm196_vm1, %v10279_v1  ;;  %v374_v10 = vld [vmem:[%s10712_s28 + $0x30] sm:$0xff]  ;;  %v375_v11 = vld [vmem:[%s10712_s28 + $0x38] sm:$0xff]  ;;  %s192_s27 = sadd.s32 %s7672_s24, %s7671_s12 }
  0x17   : > { %218 = vst.msk [vmem:[#allocation2 + $0xa0] sm:$0xff] %vm196_vm1, %v10279_v1  ;;  %219 = vst.msk [vmem:[#allocation2 + $0xa8] sm:$0xff] %vm196_vm1, %v10279_v1  ;;  %v376_v12 = vld [vmem:[%s10712_s28 + $0x40] sm:$0xff]  ;;  %v377_v13 = vld [vmem:[%s10712_s28 + $0x48] sm:$0xff]  ;;  %s7673_s13 = sshll.u32 %s192_s27, 3 }
  0x18   : > { %220 = vst.msk [vmem:[#allocation2 + $0xb0] sm:$0xff] %vm196_vm1, %v10279_v1  ;;  %221 = vst.msk [vmem:[#allocation2 + $0xb8] sm:$0xff] %vm196_vm1, %v10279_v1  ;;  %v378_v14 = vld [vmem:[%s10712_s28 + $0x50] sm:$0xff]  ;;  %v379_v15 = vld [vmem:[%s10712_s28 + $0x58] sm:$0xff] }
  0x19   : > { %223 = vst.msk [vmem:[#allocation2 + $0xc8] sm:$0xff] %vm196_vm1, %v10279_v1  ;;  %224 = vst.msk [vmem:[#allocation2 + $0xd0] sm:$0xff] %vm196_vm1, %v10279_v1  ;;  %v380_v16 = vld [vmem:[%s10712_s28 + $0x60] sm:$0xff]  ;;  %v381_v17 = vld [vmem:[%s10712_s28 + $0x68] sm:$0xff] }
  0x1a   : > { %225 = vst.msk [vmem:[#allocation2 + $0xd8] sm:$0xff] %vm196_vm1, %v10279_v1  ;;  %226 = vst.msk [vmem:[#allocation2 + $0xe0] sm:$0xff] %vm196_vm1, %v10279_v1  ;;  %v382_v18 = vld [vmem:[%s10712_s28 + $0x70] sm:$0xff]  ;;  %v383_v19 = vld [vmem:[%s10712_s28 + $0x78] sm:$0xff] }
  0x1b   : > { %228 = vst.msk [vmem:[#allocation2 + $0xf0] sm:$0xff] %vm196_vm1, %v10279_v1  ;;  %229 = vst.msk [vmem:[#allocation2 + $0xf8] sm:$0xff] %vm196_vm1, %v10279_v1  ;;  %v384_v20 = vld [vmem:[%s10712_s28 + $0x80] sm:$0xff]  ;;  %v385_v21 = vld [vmem:[%s10712_s28 + $0x88] sm:$0xff] }
  0x1c   : > { %230 = vst.msk [vmem:[#allocation2 + $0x100] sm:$0xff] %vm196_vm1, %v10279_v1  ;;  %231 = vst.msk [vmem:[#allocation2 + $0x108] sm:$0xff] %vm196_vm1, %v10279_v1  ;;  %v386_v22 = vld [vmem:[%s10712_s28 + $0x90] sm:$0xff]  ;;  %v387_v23 = vld [vmem:[%s10712_s28 + $0x98] sm:$0xff] }
  0x1d   : > { %233 = vst.msk [vmem:[#allocation2 + $0x118] sm:$0xff] %vm196_vm1, %v10279_v1  ;;  %234 = vst.msk [vmem:[#allocation2 + $0x120] sm:$0xff] %vm196_vm1, %v10279_v1  ;;  %v388_v24 = vld [vmem:[%s10712_s28 + $0xa0] sm:$0xff]  ;;  %v389_v25 = vld [vmem:[%s10712_s28 + $0xa8] sm:$0xff] }
  0x1e   : > { %235 = vst.msk [vmem:[#allocation2 + $0x128] sm:$0xff] %vm196_vm1, %v10279_v1  ;;  %236 = vst.msk [vmem:[#allocation2 + $0x130] sm:$0xff] %vm196_vm1, %v10279_v1  ;;  %v390_v26 = vld [vmem:[%s10712_s28 + $0xb0] sm:$0xff]  ;;  %v391_v27 = vld [vmem:[%s10712_s28 + $0xb8] sm:$0xff] }
  0x1f   : > { %238 = vst.msk [vmem:[#allocation2 + $0x140] sm:$0xff] %vm196_vm1, %v10279_v1  ;;  %239 = vst.msk [vmem:[#allocation2 + $0x148] sm:$0xff] %vm196_vm1, %v10279_v1  ;;  %v392_v28 = vld [vmem:[%s10712_s28 + $0xc0] sm:$0xff]  ;;  %v393_v29 = vld [vmem:[%s10712_s28 + $0xc8] sm:$0xff] }
  0x20   : > { %240 = vst.msk [vmem:[#allocation2 + $0x150] sm:$0xff] %vm196_vm1, %v10279_v1  ;;  %241 = vst.msk [vmem:[#allocation2 + $0x158] sm:$0xff] %vm196_vm1, %v10279_v1  ;;  %v394_v30 = vld [vmem:[%s10712_s28 + $0xd0] sm:$0xff]  ;;  %v395_v31 = vld [vmem:[%s10712_s28 + $0xd8] sm:$0xff] }
  0x21   : > { %243 = vst.msk [vmem:[#allocation2 + $0x168] sm:$0xff] %vm196_vm1, %v10279_v1  ;;  %244 = vst.msk [vmem:[#allocation2 + $0x170] sm:$0xff] %vm196_vm1, %v10279_v1  ;;  %v396_v32 = vld [vmem:[%s10712_s28 + $0xe0] sm:$0xff]  ;;  %v397_v33 = vld [vmem:[%s10712_s28 + $0xe8] sm:$0xff] }
  0x22   : > { %245 = vst.msk [vmem:[#allocation2 + $0x178] sm:$0xff] %vm196_vm1, %v10279_v1  ;;  %246 = vst.msk [vmem:[#allocation2 + $0x180] sm:$0xff] %vm196_vm1, %v10279_v1  ;;  %v398_v34 = vld [vmem:[%s10712_s28 + $0xf0] sm:$0xff]  ;;  %v399_v35 = vld [vmem:[%s10712_s28 + $0xf8] sm:$0xff] }
  0x23   : > { %248 = vst.msk [vmem:[#allocation2 + $0x190] sm:$0xff] %vm196_vm1, %v10279_v1  ;;  %249 = vst.msk [vmem:[#allocation2 + $0x198] sm:$0xff] %vm196_vm1, %v10279_v1  ;;  %v400_v36 = vld [vmem:[%s10712_s28 + $0x100] sm:$0xff]  ;;  %v401_v37 = vld [vmem:[%s10712_s28 + $0x108] sm:$0xff] }
  0x24   : > { %250 = vst.msk [vmem:[#allocation2 + $0x1a0] sm:$0xff] %vm196_vm1, %v10279_v1  ;;  %251 = vst.msk [vmem:[#allocation2 + $0x1a8] sm:$0xff] %vm196_vm1, %v10279_v1  ;;  %v402_v38 = vld [vmem:[%s10712_s28 + $0x110] sm:$0xff]  ;;  %v403_v39 = vld [vmem:[%s10712_s28 + $0x118] sm:$0xff] }
  0x25   : > { %253 = vst.msk [vmem:[#allocation2 + $0x1b8] sm:$0xff] %vm196_vm1, %v10279_v1  ;;  %254 = vst.msk [vmem:[#allocation2 + $0x1c0] sm:$0xff] %vm196_vm1, %v10279_v1  ;;  %v404_v40 = vld [vmem:[%s10712_s28 + $0x120] sm:$0xff]  ;;  %v405_v41 = vld [vmem:[%s10712_s28 + $0x128] sm:$0xff] }
  0x26   : > { %255 = vst.msk [vmem:[#allocation2 + $0x1c8] sm:$0xff] %vm196_vm1, %v10279_v1  ;;  %256 = vst.msk [vmem:[#allocation2 + $0x1d0] sm:$0xff] %vm196_vm1, %v10279_v1  ;;  %v406_v42 = vld [vmem:[%s10712_s28 + $0x130] sm:$0xff]  ;;  %v407_v43 = vld [vmem:[%s10712_s28 + $0x138] sm:$0xff] }
  0x27   : > { %258 = vst.msk [vmem:[#allocation2 + $0x1e0] sm:$0xff] %vm196_vm1, %v10279_v1  ;;  %259 = vst.msk [vmem:[#allocation2 + $0x1e8] sm:$0xff] %vm196_vm1, %v10279_v1  ;;  %v408_v44 = vld [vmem:[%s10712_s28 + $0x140] sm:$0xff]  ;;  %v409_v45 = vld [vmem:[%s10712_s28 + $0x148] sm:$0xff] }
  0x28   : > { %260 = vst.msk [vmem:[#allocation2 + $0x1f0] sm:$0xff] %vm196_vm1, %v10279_v1  ;;  %261 = vst.msk [vmem:[#allocation2 + $0x1f8] sm:$0xff] %vm196_vm1, %v10279_v1  ;;  %v410_v46 = vld [vmem:[%s10712_s28 + $0x150] sm:$0xff]  ;;  %v411_v47 = vld [vmem:[%s10712_s28 + $0x158] sm:$0xff] }
  0x29   : > { %263 = vst.msk [vmem:[#allocation2 + $0x208] sm:$0xff] %vm196_vm1, %v10279_v1  ;;  %264 = vst.msk [vmem:[#allocation2 + $0x210] sm:$0xff] %vm196_vm1, %v10279_v1  ;;  %v412_v48 = vld [vmem:[%s10712_s28 + $0x160] sm:$0xff]  ;;  %v413_v49 = vld [vmem:[%s10712_s28 + $0x168] sm:$0xff] }
  0x2a   : > { %265 = vst.msk [vmem:[#allocation2 + $0x218] sm:$0xff] %vm196_vm1, %v10279_v1  ;;  %266 = vst.msk [vmem:[#allocation2 + $0x220] sm:$0xff] %vm196_vm1, %v10279_v1  ;;  %v414_v50 = vld [vmem:[%s10712_s28 + $0x170] sm:$0xff]  ;;  %v415_v51 = vld [vmem:[%s10712_s28 + $0x178] sm:$0xff] }
  0x2b   : > { %268 = vst.msk [vmem:[#allocation2 + $0x230] sm:$0xff] %vm196_vm1, %v10279_v1  ;;  %269 = vst.msk [vmem:[#allocation2 + $0x238] sm:$0xff] %vm196_vm1, %v10279_v1  ;;  %v416_v52 = vld [vmem:[%s10712_s28 + $0x180] sm:$0xff]  ;;  %v417_v53 = vld [vmem:[%s10712_s28 + $0x188] sm:$0xff] }
  0x2c   : > { %270 = vst.msk [vmem:[#allocation2 + $0x240] sm:$0xff] %vm196_vm1, %v10279_v1  ;;  %271 = vst.msk [vmem:[#allocation2 + $0x248] sm:$0xff] %vm196_vm1, %v10279_v1  ;;  %v418_v54 = vld [vmem:[%s10712_s28 + $0x190] sm:$0xff]  ;;  %v419_v55 = vld [vmem:[%s10712_s28 + $0x198] sm:$0xff] }
  0x2d   : > { %273 = vst.msk [vmem:[#allocation2 + $0x258] sm:$0xff] %vm196_vm1, %v10279_v1  ;;  %274 = vst.msk [vmem:[#allocation2 + $0x260] sm:$0xff] %vm196_vm1, %v10279_v1  ;;  %v420_v56 = vld [vmem:[%s10712_s28 + $0x1a0] sm:$0xff]  ;;  %v421_v57 = vld [vmem:[%s10712_s28 + $0x1a8] sm:$0xff] }
  0x2e   : > { %275 = vst.msk [vmem:[#allocation2 + $0x268] sm:$0xff] %vm196_vm1, %v10279_v1  ;;  %276 = vst.msk [vmem:[#allocation2 + $0x270] sm:$0xff] %vm196_vm1, %v10279_v1  ;;  %v422_v58 = vld [vmem:[%s10712_s28 + $0x1b0] sm:$0xff]  ;;  %v423_v59 = vld [vmem:[%s10712_s28 + $0x1b8] sm:$0xff] }
  0x2f   : > { %278 = vst.msk [vmem:[#allocation2 + $0x280] sm:$0xff] %vm196_vm1, %v10279_v1  ;;  %279 = vst.msk [vmem:[#allocation2 + $0x288] sm:$0xff] %vm196_vm1, %v10279_v1  ;;  %v424_v60 = vld [vmem:[%s10712_s28 + $0x1c0] sm:$0xff]  ;;  %v425_v61 = vld [vmem:[%s10712_s28 + $0x1c8] sm:$0xff] }
  0x30   : > { %280 = vst.msk [vmem:[#allocation2 + $0x290] sm:$0xff] %vm196_vm1, %v10279_v1  ;;  %281 = vst.msk [vmem:[#allocation2 + $0x298] sm:$0xff] %vm196_vm1, %v10279_v1  ;;  %v426_v62 = vld [vmem:[%s10712_s28 + $0x1d0] sm:$0xff]  ;;  %v427_v63 = vld [vmem:[%s10712_s28 + $0x1d8] sm:$0xff] }
  0x31   : > { %283 = vst.msk [vmem:[#allocation2 + $0x2a8] sm:$0xff] %vm196_vm1, %v10279_v1  ;;  %284 = vst.msk [vmem:[#allocation2 + $0x2b0] sm:$0xff] %vm196_vm1, %v10279_v1  ;;  %v428_v0 = vld [vmem:[%s10712_s28 + $0x1e0] sm:$0xff] }
  0x32   : > { %285 = vst.msk [vmem:[#allocation2 + $0x2b8] sm:$0xff] %vm196_vm1, %v10279_v1  ;;  %286 = vst.msk [vmem:[#allocation2 + $0x2c0] sm:$0xff] %vm196_vm1, %v10279_v1 }
  0x33   : > { %288 = vst.msk [vmem:[#allocation2 + $0x2d0] sm:$0xff] %vm196_vm1, %v10279_v1  ;;  %289 = vst.msk [vmem:[#allocation2 + $0x2d8] sm:$0xff] %vm196_vm1, %v10279_v1 }
  0x34   : > { %290 = vst.msk [vmem:[#allocation2 + $0x2e0] sm:$0xff] %vm196_vm1, %v10279_v1  ;;  %291 = vst.msk [vmem:[#allocation2 + $0x2e8] sm:$0xff] %vm196_vm1, %v10279_v1 }
  0x35   : > { %293 = vst.msk [vmem:[#allocation2 + $0x2f8] sm:$0xff] %vm196_vm1, %v10279_v1  ;;  %294 = vst.msk [vmem:[#allocation2 + $0x300] sm:$0xff] %vm196_vm1, %v10279_v1 }
  0x36   : > { %295 = vst.msk [vmem:[#allocation2 + $0x308] sm:$0xff] %vm196_vm1, %v10279_v1  ;;  %296 = vst.msk [vmem:[#allocation2 + $0x310] sm:$0xff] %vm196_vm1, %v10279_v1 }
  0x37   : > { %298 = vst.msk [vmem:[#allocation2 + $0x320] sm:$0xff] %vm196_vm1, %v10279_v1  ;;  %299 = vst.msk [vmem:[#allocation2 + $0x328] sm:$0xff] %vm196_vm1, %v10279_v1 }
  0x38   : > { %300 = vst.msk [vmem:[#allocation2 + $0x330] sm:$0xff] %vm196_vm1, %v10279_v1  ;;  %301 = vst.msk [vmem:[#allocation2 + $0x338] sm:$0xff] %vm196_vm1, %v10279_v1 }
  0x39   : > { %303 = vst.msk [vmem:[#allocation2 + $0x348] sm:$0xff] %vm196_vm1, %v10279_v1  ;;  %304 = vst.msk [vmem:[#allocation2 + $0x350] sm:$0xff] %vm196_vm1, %v10279_v1 }
  0x3a   : > { %305 = vst.msk [vmem:[#allocation2 + $0x358] sm:$0xff] %vm196_vm1, %v10279_v1  ;;  %306 = vst.msk [vmem:[#allocation2 + $0x360] sm:$0xff] %vm196_vm1, %v10279_v1 }
  0x3b   : > { %308 = vst.msk [vmem:[#allocation2 + $0x370] sm:$0xff] %vm196_vm1, %v10279_v1  ;;  %309 = vst.msk [vmem:[#allocation2 + $0x378] sm:$0xff] %vm196_vm1, %v10279_v1 }
  0x3c   : > { %310 = vst.msk [vmem:[#allocation2 + $0x380] sm:$0xff] %vm196_vm1, %v10279_v1  ;;  %311 = vst.msk [vmem:[#allocation2 + $0x388] sm:$0xff] %vm196_vm1, %v10279_v1 }
  0x3d   : > { %313 = vst.msk [vmem:[#allocation2 + $0x398] sm:$0xff] %vm196_vm1, %v10279_v1  ;;  %314 = vst.msk [vmem:[#allocation2 + $0x3a0] sm:$0xff] %vm196_vm1, %v10279_v1 }
  0x3e   : > { %315 = vst.msk [vmem:[#allocation2 + $0x3a8] sm:$0xff] %vm196_vm1, %v10279_v1  ;;  %316 = vst.msk [vmem:[#allocation2 + $0x3b0] sm:$0xff] %vm196_vm1, %v10279_v1 }
  0x3f   : > { %318 = vst.msk [vmem:[#allocation2 + $0x3c0] sm:$0xff] %vm196_vm1, %v10279_v1  ;;  %319 = vst.msk [vmem:[#allocation2 + $0x3c8] sm:$0xff] %vm196_vm1, %v10279_v1 }
  0x40   : > { %320 = vst.msk [vmem:[#allocation2 + $0x3d0] sm:$0xff] %vm196_vm1, %v10279_v1  ;;  %321 = vst.msk [vmem:[#allocation2 + $0x3d8] sm:$0xff] %vm196_vm1, %v10279_v1 }
  0x41   : > { %323 = vst.msk [vmem:[#allocation2 + $0x3e8] sm:$0xff] %vm196_vm1, %v10279_v1  ;;  %324 = vst.msk [vmem:[#allocation2 + $0x3f0] sm:$0xff] %vm196_vm1, %v10279_v1 }
  0x42   : > { %325 = vst.msk [vmem:[#allocation2 + $0x3f8] sm:$0xff] %vm196_vm1, %v10279_v1  ;;  %326 = vst.msk [vmem:[#allocation2 + $0x400] sm:$0xff] %vm196_vm1, %v10279_v1 }
  0x43   : > { %328 = vst.msk [vmem:[#allocation2 + $0x410] sm:$0xff] %vm196_vm1, %v10279_v1  ;;  %329 = vst.msk [vmem:[#allocation2 + $0x418] sm:$0xff] %vm196_vm1, %v10279_v1 }
  0x44   : > { %330 = vst.msk [vmem:[#allocation2 + $0x420] sm:$0xff] %vm196_vm1, %v10279_v1  ;;  %331 = vst.msk [vmem:[#allocation2 + $0x428] sm:$0xff] %vm196_vm1, %v10279_v1 }
  0x45   : > { %333 = vst.msk [vmem:[#allocation2 + $0x438] sm:$0xff] %vm196_vm1, %v10279_v1  ;;  %334 = vst.msk [vmem:[#allocation2 + $0x440] sm:$0xff] %vm196_vm1, %v10279_v1 }
  0x46   : > { %335 = vst.msk [vmem:[#allocation2 + $0x448] sm:$0xff] %vm196_vm1, %v10279_v1  ;;  %336 = vst.msk [vmem:[#allocation2 + $0x450] sm:$0xff] %vm196_vm1, %v10279_v1 }
  0x47   : > { %338 = vst.msk [vmem:[#allocation2 + $0x460] sm:$0xff] %vm196_vm1, %v10279_v1  ;;  %339 = vst.msk [vmem:[#allocation2 + $0x468] sm:$0xff] %vm196_vm1, %v10279_v1 }
  0x48   : > { %340 = vst.msk [vmem:[#allocation2 + $0x470] sm:$0xff] %vm196_vm1, %v10279_v1  ;;  %341 = vst.msk [vmem:[#allocation2 + $0x478] sm:$0xff] %vm196_vm1, %v10279_v1 }
  0x49   : > { %343 = vst.msk [vmem:[#allocation2 + $0x488] sm:$0xff] %vm196_vm1, %v10279_v1  ;;  %344 = vst.msk [vmem:[#allocation2 + $0x490] sm:$0xff] %vm196_vm1, %v10279_v1 }
  0x4a   : > { %345 = vst.msk [vmem:[#allocation2 + $0x498] sm:$0xff] %vm196_vm1, %v10279_v1  ;;  %346 = vst.msk [vmem:[#allocation2 + $0x4a0] sm:$0xff] %vm196_vm1, %v10279_v1 }
  0x4b   : > { %348 = vst.msk [vmem:[#allocation2 + $0x4b0] sm:$0xff] %vm196_vm1, %v10279_v1  ;;  %349 = vst.msk [vmem:[#allocation2 + $0x4b8] sm:$0xff] %vm196_vm1, %v10279_v1 }
  0x4c   : > { %350 = vst.msk [vmem:[#allocation2 + $0x4c0] sm:$0xff] %vm196_vm1, %v10279_v1  ;;  %351 = vst.msk [vmem:[#allocation2 + $0x4c8] sm:$0xff] %vm196_vm1, %v10279_v1 }
  0x4d   : > { %353 = vst.msk [vmem:[#allocation2 + $0x4d8] sm:$0xff] %vm196_vm1, %v10279_v1  ;;  %354 = vst.msk [vmem:[#allocation2 + $0x4e0] sm:$0xff] %vm196_vm1, %v10279_v1 }
  0x4e   : > { %355 = vst.msk [vmem:[#allocation2 + $0x4e8] sm:$0xff] %vm196_vm1, %v10279_v1  ;;  %356 = vst.msk [vmem:[#allocation2 + $0x4f0] sm:$0xff] %vm196_vm1, %v10279_v1 }
  0x4f   : > { %358 = vst.msk [vmem:[#allocation2 + $0x500] sm:$0xff] %vm196_vm1, %v10279_v1  ;;  %359 = vst.msk [vmem:[#allocation2 + $0x508] sm:$0xff] %vm196_vm1, %v10279_v1 }
  0x50   : > { %360 = vst.msk [vmem:[#allocation2 + $0x510] sm:$0xff] %vm196_vm1, %v10279_v1  ;;  %361 = vst.msk [vmem:[#allocation2 + $0x518] sm:$0xff] %vm196_vm1, %v10279_v1 }
  0x51   : > { %363 = vst.msk [vmem:[#allocation2 + $0x528] sm:$0xff] %vm196_vm1, %v10279_v1  ;;  %364 = vst.msk [vmem:[#allocation2 + $0x530] sm:$0xff] %vm196_vm1, %v10279_v1 }
  0x52   : > { %365 = vst.msk [vmem:[#allocation2 + $0x538] sm:$0xff] %vm196_vm1, %v10279_v1  ;;  %366 = vst.msk [vmem:[#allocation2 + $0x540] sm:$0xff] %vm196_vm1, %v10279_v1 }
  0x53   : > { %202 = vst.msk [vmem:[#allocation2 + $0x20] sm:$0x3] %vm201_vm2, %v10279_v1  ;;  %207 = vst.msk [vmem:[#allocation2 + $0x48] sm:$0x3] %vm201_vm2, %v10279_v1 }
  0x54   : > { %212 = vst.msk [vmem:[#allocation2 + $0x70] sm:$0x3] %vm201_vm2, %v10279_v1  ;;  %217 = vst.msk [vmem:[#allocation2 + $0x98] sm:$0x3] %vm201_vm2, %v10279_v1 }
  0x55   : > { %222 = vst.msk [vmem:[#allocation2 + $0xc0] sm:$0x3] %vm201_vm2, %v10279_v1  ;;  %227 = vst.msk [vmem:[#allocation2 + $0xe8] sm:$0x3] %vm201_vm2, %v10279_v1 }
  0x56   : > { %232 = vst.msk [vmem:[#allocation2 + $0x110] sm:$0x3] %vm201_vm2, %v10279_v1  ;;  %237 = vst.msk [vmem:[#allocation2 + $0x138] sm:$0x3] %vm201_vm2, %v10279_v1 }
  0x57   : > { %242 = vst.msk [vmem:[#allocation2 + $0x160] sm:$0x3] %vm201_vm2, %v10279_v1  ;;  %247 = vst.msk [vmem:[#allocation2 + $0x188] sm:$0x3] %vm201_vm2, %v10279_v1 }
  0x58   : > { %252 = vst.msk [vmem:[#allocation2 + $0x1b0] sm:$0x3] %vm201_vm2, %v10279_v1  ;;  %257 = vst.msk [vmem:[#allocation2 + $0x1d8] sm:$0x3] %vm201_vm2, %v10279_v1 }
  0x59   : > { %262 = vst.msk [vmem:[#allocation2 + $0x200] sm:$0x3] %vm201_vm2, %v10279_v1  ;;  %267 = vst.msk [vmem:[#allocation2 + $0x228] sm:$0x3] %vm201_vm2, %v10279_v1 }
  0x5a   : > { %272 = vst.msk [vmem:[#allocation2 + $0x250] sm:$0x3] %vm201_vm2, %v10279_v1  ;;  %277 = vst.msk [vmem:[#allocation2 + $0x278] sm:$0x3] %vm201_vm2, %v10279_v1 }
  0x5b   : > { %282 = vst.msk [vmem:[#allocation2 + $0x2a0] sm:$0x3] %vm201_vm2, %v10279_v1  ;;  %287 = vst.msk [vmem:[#allocation2 + $0x2c8] sm:$0x3] %vm201_vm2, %v10279_v1 }
  0x5c   : > { %292 = vst.msk [vmem:[#allocation2 + $0x2f0] sm:$0x3] %vm201_vm2, %v10279_v1  ;;  %297 = vst.msk [vmem:[#allocation2 + $0x318] sm:$0x3] %vm201_vm2, %v10279_v1 }
  0x5d   : > { %302 = vst.msk [vmem:[#allocation2 + $0x340] sm:$0x3] %vm201_vm2, %v10279_v1  ;;  %307 = vst.msk [vmem:[#allocation2 + $0x368] sm:$0x3] %vm201_vm2, %v10279_v1 }
  0x5e   : > { %312 = vst.msk [vmem:[#allocation2 + $0x390] sm:$0x3] %vm201_vm2, %v10279_v1  ;;  %317 = vst.msk [vmem:[#allocation2 + $0x3b8] sm:$0x3] %vm201_vm2, %v10279_v1 }
  0x5f   : > { %322 = vst.msk [vmem:[#allocation2 + $0x3e0] sm:$0x3] %vm201_vm2, %v10279_v1  ;;  %327 = vst.msk [vmem:[#allocation2 + $0x408] sm:$0x3] %vm201_vm2, %v10279_v1 }
  0x60   : > { %332 = vst.msk [vmem:[#allocation2 + $0x430] sm:$0x3] %vm201_vm2, %v10279_v1  ;;  %337 = vst.msk [vmem:[#allocation2 + $0x458] sm:$0x3] %vm201_vm2, %v10279_v1 }
  0x61   : > { %342 = vst.msk [vmem:[#allocation2 + $0x480] sm:$0x3] %vm201_vm2, %v10279_v1  ;;  %347 = vst.msk [vmem:[#allocation2 + $0x4a8] sm:$0x3] %vm201_vm2, %v10279_v1 }
  0x62   : > { %352 = vst.msk [vmem:[#allocation2 + $0x4d0] sm:$0x3] %vm201_vm2, %v10279_v1  ;;  %357 = vst.msk [vmem:[#allocation2 + $0x4f8] sm:$0x3] %vm201_vm2, %v10279_v1 }
  0x63   : > { %362 = vst.msk [vmem:[#allocation2 + $0x520] sm:$0x3] %vm201_vm2, %v10279_v1  ;;  %367 = vst.msk [vmem:[#allocation2 + $0x548] sm:$0x3] %vm201_vm2, %v10279_v1  ;;  %v429_v1 = vld [vmem:[%s10712_s28 + $0x1e8] sm:$0xff] }
  0x64   : > { %497 = vst.msk [vmem:[#allocation2 + $0x29] sm:$0xff] %vm196_vm1, %v368_v4  ;;  %498 = vst.msk [vmem:[#allocation2 + $0x31] sm:$0xff] %vm196_vm1, %v369_v5  ;;  %v430_v4 = vld [vmem:[%s10712_s28 + $0x1f0] sm:$0xff]  ;;  %v431_v5 = vld [vmem:[%s10712_s28 + $0x1f8] sm:$0xff] }
  0x65   : > { %499 = vst.msk [vmem:[#allocation2 + $0x39] sm:$0xff] %vm196_vm1, %v370_v6  ;;  %500 = vst.msk [vmem:[#allocation2 + $0x41] sm:$0xff] %vm196_vm1, %v371_v7  ;;  %v432_v6 = vld [vmem:[%s10712_s28 + $0x200] sm:$0xff]  ;;  %v433_v7 = vld [vmem:[%s10712_s28 + $0x208] sm:$0xff] }
  0x66   : > { %501 = vst.msk [vmem:[#allocation2 + $0x51] sm:$0xff] %vm196_vm1, %v372_v8  ;;  %502 = vst.msk [vmem:[#allocation2 + $0x59] sm:$0xff] %vm196_vm1, %v373_v9  ;;  %v434_v8 = vld [vmem:[%s10712_s28 + $0x210] sm:$0xff]  ;;  %v435_v9 = vld [vmem:[%s10712_s28 + $0x218] sm:$0xff] }
  0x67   : > { %503 = vst.msk [vmem:[#allocation2 + $0x61] sm:$0xff] %vm196_vm1, %v374_v10  ;;  %504 = vst.msk [vmem:[#allocation2 + $0x69] sm:$0xff] %vm196_vm1, %v375_v11  ;;  %v436_v10 = vld [vmem:[%s10712_s28 + $0x220] sm:$0xff]  ;;  %v437_v11 = vld [vmem:[%s10712_s28 + $0x228] sm:$0xff] }
  0x68   : > { %505 = vst.msk [vmem:[#allocation2 + $0x79] sm:$0xff] %vm196_vm1, %v376_v12  ;;  %506 = vst.msk [vmem:[#allocation2 + $0x81] sm:$0xff] %vm196_vm1, %v377_v13  ;;  %v438_v12 = vld [vmem:[%s10712_s28 + $0x230] sm:$0xff]  ;;  %v439_v13 = vld [vmem:[%s10712_s28 + $0x238] sm:$0xff] }
  0x69   : > { %507 = vst.msk [vmem:[#allocation2 + $0x89] sm:$0xff] %vm196_vm1, %v378_v14  ;;  %508 = vst.msk [vmem:[#allocation2 + $0x91] sm:$0xff] %vm196_vm1, %v379_v15  ;;  %v440_v14 = vld [vmem:[%s10712_s28 + $0x240] sm:$0xff]  ;;  %v441_v15 = vld [vmem:[%s10712_s28 + $0x248] sm:$0xff] }
  0x6a   : > { %509 = vst.msk [vmem:[#allocation2 + $0xa1] sm:$0xff] %vm196_vm1, %v380_v16  ;;  %510 = vst.msk [vmem:[#allocation2 + $0xa9] sm:$0xff] %vm196_vm1, %v381_v17  ;;  %v442_v16 = vld [vmem:[%s10712_s28 + $0x250] sm:$0xff]  ;;  %v443_v17 = vld [vmem:[%s10712_s28 + $0x258] sm:$0xff] }
  0x6b   : > { %511 = vst.msk [vmem:[#allocation2 + $0xb1] sm:$0xff] %vm196_vm1, %v382_v18  ;;  %512 = vst.msk [vmem:[#allocation2 + $0xb9] sm:$0xff] %vm196_vm1, %v383_v19  ;;  %v444_v18 = vld [vmem:[%s10712_s28 + $0x260] sm:$0xff]  ;;  %v445_v19 = vld [vmem:[%s10712_s28 + $0x268] sm:$0xff] }
  0x6c   : > { %513 = vst.msk [vmem:[#allocation2 + $0xc9] sm:$0xff] %vm196_vm1, %v384_v20  ;;  %514 = vst.msk [vmem:[#allocation2 + $0xd1] sm:$0xff] %vm196_vm1, %v385_v21  ;;  %v446_v20 = vld [vmem:[%s10712_s28 + $0x270] sm:$0xff]  ;;  %v447_v21 = vld [vmem:[%s10712_s28 + $0x278] sm:$0xff] }
  0x6d   : > { %515 = vst.msk [vmem:[#allocation2 + $0xd9] sm:$0xff] %vm196_vm1, %v386_v22  ;;  %516 = vst.msk [vmem:[#allocation2 + $0xe1] sm:$0xff] %vm196_vm1, %v387_v23  ;;  %v448_v22 = vld [vmem:[%s10712_s28 + $0x280] sm:$0xff]  ;;  %v449_v23 = vld [vmem:[%s10712_s28 + $0x288] sm:$0xff] }
  0x6e   : > { %517 = vst.msk [vmem:[#allocation2 + $0xf1] sm:$0xff] %vm196_vm1, %v388_v24  ;;  %518 = vst.msk [vmem:[#allocation2 + $0xf9] sm:$0xff] %vm196_vm1, %v389_v25  ;;  %v450_v24 = vld [vmem:[%s10712_s28 + $0x290] sm:$0xff]  ;;  %v451_v25 = vld [vmem:[%s10712_s28 + $0x298] sm:$0xff] }
  0x6f   : > { %519 = vst.msk [vmem:[#allocation2 + $0x101] sm:$0xff] %vm196_vm1, %v390_v26  ;;  %520 = vst.msk [vmem:[#allocation2 + $0x109] sm:$0xff] %vm196_vm1, %v391_v27  ;;  %v452_v26 = vld [vmem:[%s10712_s28 + $0x2a0] sm:$0xff]  ;;  %v453_v27 = vld [vmem:[%s10712_s28 + $0x2a8] sm:$0xff] }
  0x70   : > { %521 = vst.msk [vmem:[#allocation2 + $0x119] sm:$0xff] %vm196_vm1, %v392_v28  ;;  %522 = vst.msk [vmem:[#allocation2 + $0x121] sm:$0xff] %vm196_vm1, %v393_v29  ;;  %v454_v28 = vld [vmem:[%s10712_s28 + $0x2b0] sm:$0xff]  ;;  %v455_v29 = vld [vmem:[%s10712_s28 + $0x2b8] sm:$0xff] }
  0x71   : > { %523 = vst.msk [vmem:[#allocation2 + $0x129] sm:$0xff] %vm196_vm1, %v394_v30  ;;  %524 = vst.msk [vmem:[#allocation2 + $0x131] sm:$0xff] %vm196_vm1, %v395_v31  ;;  %v456_v30 = vld [vmem:[%s10712_s28 + $0x2c0] sm:$0xff]  ;;  %v457_v31 = vld [vmem:[%s10712_s28 + $0x2c8] sm:$0xff] }
  0x72   : > { %525 = vst.msk [vmem:[#allocation2 + $0x141] sm:$0xff] %vm196_vm1, %v396_v32  ;;  %526 = vst.msk [vmem:[#allocation2 + $0x149] sm:$0xff] %vm196_vm1, %v397_v33  ;;  %v458_v32 = vld [vmem:[%s10712_s28 + $0x2d0] sm:$0xff]  ;;  %v459_v33 = vld [vmem:[%s10712_s28 + $0x2d8] sm:$0xff] }
  0x73   : > { %527 = vst.msk [vmem:[#allocation2 + $0x151] sm:$0xff] %vm196_vm1, %v398_v34  ;;  %528 = vst.msk [vmem:[#allocation2 + $0x159] sm:$0xff] %vm196_vm1, %v399_v35  ;;  %v460_v34 = vld [vmem:[%s10712_s28 + $0x2e0] sm:$0xff]  ;;  %v461_v35 = vld [vmem:[%s10712_s28 + $0x2e8] sm:$0xff] }
  0x74   : > { %529 = vst.msk [vmem:[#allocation2 + $0x169] sm:$0xff] %vm196_vm1, %v400_v36  ;;  %530 = vst.msk [vmem:[#allocation2 + $0x171] sm:$0xff] %vm196_vm1, %v401_v37  ;;  %v462_v36 = vld [vmem:[%s10712_s28 + $0x2f0] sm:$0xff]  ;;  %v463_v37 = vld [vmem:[%s10712_s28 + $0x2f8] sm:$0xff] }
  0x75   : > { %531 = vst.msk [vmem:[#allocation2 + $0x179] sm:$0xff] %vm196_vm1, %v402_v38  ;;  %532 = vst.msk [vmem:[#allocation2 + $0x181] sm:$0xff] %vm196_vm1, %v403_v39  ;;  %v464_v38 = vld [vmem:[%s10712_s28 + $0x300] sm:$0xff]  ;;  %v465_v39 = vld [vmem:[%s10712_s28 + $0x308] sm:$0xff] }
  0x76   : > { %533 = vst.msk [vmem:[#allocation2 + $0x191] sm:$0xff] %vm196_vm1, %v404_v40  ;;  %534 = vst.msk [vmem:[#allocation2 + $0x199] sm:$0xff] %vm196_vm1, %v405_v41  ;;  %v466_v40 = vld [vmem:[%s10712_s28 + $0x310] sm:$0xff]  ;;  %v467_v41 = vld [vmem:[%s10712_s28 + $0x318] sm:$0xff] }
  0x77   : > { %535 = vst.msk [vmem:[#allocation2 + $0x1a1] sm:$0xff] %vm196_vm1, %v406_v42  ;;  %536 = vst.msk [vmem:[#allocation2 + $0x1a9] sm:$0xff] %vm196_vm1, %v407_v43  ;;  %v468_v42 = vld [vmem:[%s10712_s28 + $0x320] sm:$0xff]  ;;  %v469_v43 = vld [vmem:[%s10712_s28 + $0x328] sm:$0xff] }
  0x78   : > { %537 = vst.msk [vmem:[#allocation2 + $0x1b9] sm:$0xff] %vm196_vm1, %v408_v44  ;;  %538 = vst.msk [vmem:[#allocation2 + $0x1c1] sm:$0xff] %vm196_vm1, %v409_v45  ;;  %v470_v44 = vld [vmem:[%s10712_s28 + $0x330] sm:$0xff]  ;;  %v471_v45 = vld [vmem:[%s10712_s28 + $0x338] sm:$0xff] }
  0x79   : > { %539 = vst.msk [vmem:[#allocation2 + $0x1c9] sm:$0xff] %vm196_vm1, %v410_v46  ;;  %540 = vst.msk [vmem:[#allocation2 + $0x1d1] sm:$0xff] %vm196_vm1, %v411_v47  ;;  %v472_v46 = vld [vmem:[%s10712_s28 + $0x340] sm:$0xff]  ;;  %v473_v47 = vld [vmem:[%s10712_s28 + $0x348] sm:$0xff] }
  0x7a   : > { %541 = vst.msk [vmem:[#allocation2 + $0x1e1] sm:$0xff] %vm196_vm1, %v412_v48  ;;  %542 = vst.msk [vmem:[#allocation2 + $0x1e9] sm:$0xff] %vm196_vm1, %v413_v49  ;;  %v474_v48 = vld [vmem:[%s10712_s28 + $0x350] sm:$0xff]  ;;  %v475_v49 = vld [vmem:[%s10712_s28 + $0x358] sm:$0xff] }
  0x7b   : > { %543 = vst.msk [vmem:[#allocation2 + $0x1f1] sm:$0xff] %vm196_vm1, %v414_v50  ;;  %544 = vst.msk [vmem:[#allocation2 + $0x1f9] sm:$0xff] %vm196_vm1, %v415_v51  ;;  %v476_v50 = vld [vmem:[%s10712_s28 + $0x360] sm:$0xff]  ;;  %v477_v51 = vld [vmem:[%s10712_s28 + $0x368] sm:$0xff] }
  0x7c   : > { %545 = vst.msk [vmem:[#allocation2 + $0x209] sm:$0xff] %vm196_vm1, %v416_v52  ;;  %546 = vst.msk [vmem:[#allocation2 + $0x211] sm:$0xff] %vm196_vm1, %v417_v53  ;;  %v478_v52 = vld [vmem:[%s10712_s28 + $0x370] sm:$0xff]  ;;  %v479_v53 = vld [vmem:[%s10712_s28 + $0x378] sm:$0xff] }
  0x7d   : > { %547 = vst.msk [vmem:[#allocation2 + $0x219] sm:$0xff] %vm196_vm1, %v418_v54  ;;  %548 = vst.msk [vmem:[#allocation2 + $0x221] sm:$0xff] %vm196_vm1, %v419_v55  ;;  %v480_v54 = vld [vmem:[%s10712_s28 + $0x380] sm:$0xff]  ;;  %v481_v55 = vld [vmem:[%s10712_s28 + $0x388] sm:$0xff] }
  0x7e   : > { %549 = vst.msk [vmem:[#allocation2 + $0x231] sm:$0xff] %vm196_vm1, %v420_v56  ;;  %550 = vst.msk [vmem:[#allocation2 + $0x239] sm:$0xff] %vm196_vm1, %v421_v57  ;;  %v482_v56 = vld [vmem:[%s10712_s28 + $0x390] sm:$0xff]  ;;  %v483_v57 = vld [vmem:[%s10712_s28 + $0x398] sm:$0xff] }
  0x7f   : > { %551 = vst.msk [vmem:[#allocation2 + $0x241] sm:$0xff] %vm196_vm1, %v422_v58  ;;  %552 = vst.msk [vmem:[#allocation2 + $0x249] sm:$0xff] %vm196_vm1, %v423_v59  ;;  %v484_v58 = vld [vmem:[%s10712_s28 + $0x3a0] sm:$0xff]  ;;  %v485_v59 = vld [vmem:[%s10712_s28 + $0x3a8] sm:$0xff] }
  0x80   : > { %553 = vst.msk [vmem:[#allocation2 + $0x259] sm:$0xff] %vm196_vm1, %v424_v60  ;;  %554 = vst.msk [vmem:[#allocation2 + $0x261] sm:$0xff] %vm196_vm1, %v425_v61  ;;  %v486_v60 = vld [vmem:[%s10712_s28 + $0x3b0] sm:$0xff]  ;;  %v487_v61 = vld [vmem:[%s10712_s28 + $0x3b8] sm:$0xff] }
  0x81   : > { %555 = vst.msk [vmem:[#allocation2 + $0x269] sm:$0xff] %vm196_vm1, %v426_v62  ;;  %556 = vst.msk [vmem:[#allocation2 + $0x271] sm:$0xff] %vm196_vm1, %v427_v63  ;;  %v488_v62 = vld [vmem:[%s10712_s28 + $0x3c0] sm:$0xff]  ;;  %v489_v63 = vld [vmem:[%s10712_s28 + $0x3c8] sm:$0xff] }
  0x82   : > { %557 = vst.msk [vmem:[#allocation2 + $0x281] sm:$0xff] %vm196_vm1, %v428_v0  ;;  %558 = vst.msk [vmem:[#allocation2 + $0x289] sm:$0xff] %vm196_vm1, %v429_v1  ;;  %v490_v0 = vld [vmem:[%s10712_s28 + $0x3d0] sm:$0xff]  ;;  %v491_v1 = vld [vmem:[%s10712_s28 + $0x3d8] sm:$0xff] }
  0x83   : > { %559 = vst.msk [vmem:[#allocation2 + $0x291] sm:$0xff] %vm196_vm1, %v430_v4  ;;  %560 = vst.msk [vmem:[#allocation2 + $0x299] sm:$0xff] %vm196_vm1, %v431_v5  ;;  %v492_v4 = vld [vmem:[%s10712_s28 + $0x3e0] sm:$0xff]  ;;  %v493_v5 = vld [vmem:[%s10712_s28 + $0x3e8] sm:$0xff] }
  0x84   : > { %561 = vst.msk [vmem:[#allocation2 + $0x2a9] sm:$0xff] %vm196_vm1, %v432_v6  ;;  %562 = vst.msk [vmem:[#allocation2 + $0x2b1] sm:$0xff] %vm196_vm1, %v433_v7  ;;  %v494_v6 = vld [vmem:[%s10712_s28 + $0x3f0] sm:$0xff]  ;;  %v495_v7 = vld [vmem:[%s10712_s28 + $0x3f8] sm:$0xff] }
  0x85   : > { %563 = vst.msk [vmem:[#allocation2 + $0x2b9] sm:$0xff] %vm196_vm1, %v434_v8  ;;  %564 = vst.msk [vmem:[#allocation2 + $0x2c1] sm:$0xff] %vm196_vm1, %v435_v9 }
  0x86   : > { %565 = vst.msk [vmem:[#allocation2 + $0x2d1] sm:$0xff] %vm196_vm1, %v436_v10  ;;  %566 = vst.msk [vmem:[#allocation2 + $0x2d9] sm:$0xff] %vm196_vm1, %v437_v11 }
  0x87   : > { %567 = vst.msk [vmem:[#allocation2 + $0x2e1] sm:$0xff] %vm196_vm1, %v438_v12  ;;  %568 = vst.msk [vmem:[#allocation2 + $0x2e9] sm:$0xff] %vm196_vm1, %v439_v13 }
  0x88   : > { %569 = vst.msk [vmem:[#allocation2 + $0x2f9] sm:$0xff] %vm196_vm1, %v440_v14  ;;  %570 = vst.msk [vmem:[#allocation2 + $0x301] sm:$0xff] %vm196_vm1, %v441_v15  ;;  %v10986_v14 = vld [vmem:[%s13957_s1 + $0xc] sm:$0xf]  ;;  %v10991_v15 = vld [vmem:[%s13957_s1 + $0x10] sm:$0xf] }
  0x89   : > { %571 = vst.msk [vmem:[#allocation2 + $0x309] sm:$0xff] %vm196_vm1, %v442_v16  ;;  %572 = vst.msk [vmem:[#allocation2 + $0x311] sm:$0xff] %vm196_vm1, %v443_v17 }
  0x8a   : > { %573 = vst.msk [vmem:[#allocation2 + $0x321] sm:$0xff] %vm196_vm1, %v444_v18  ;;  %574 = vst.msk [vmem:[#allocation2 + $0x329] sm:$0xff] %vm196_vm1, %v445_v19 }
  0x8b   : > { %575 = vst.msk [vmem:[#allocation2 + $0x331] sm:$0xff] %vm196_vm1, %v446_v20  ;;  %576 = vst.msk [vmem:[#allocation2 + $0x339] sm:$0xff] %vm196_vm1, %v447_v21 }
  0x8c   : > { %577 = vst.msk [vmem:[#allocation2 + $0x349] sm:$0xff] %vm196_vm1, %v448_v22  ;;  %578 = vst.msk [vmem:[#allocation2 + $0x351] sm:$0xff] %vm196_vm1, %v449_v23 }
  0x8d   : > { %579 = vst.msk [vmem:[#allocation2 + $0x359] sm:$0xff] %vm196_vm1, %v450_v24  ;;  %580 = vst.msk [vmem:[#allocation2 + $0x361] sm:$0xff] %vm196_vm1, %v451_v25 }
  0x8e   : > { %581 = vst.msk [vmem:[#allocation2 + $0x371] sm:$0xff] %vm196_vm1, %v452_v26  ;;  %582 = vst.msk [vmem:[#allocation2 + $0x379] sm:$0xff] %vm196_vm1, %v453_v27 }
  0x8f   : > { %583 = vst.msk [vmem:[#allocation2 + $0x381] sm:$0xff] %vm196_vm1, %v454_v28  ;;  %584 = vst.msk [vmem:[#allocation2 + $0x389] sm:$0xff] %vm196_vm1, %v455_v29 }
  0x90   : > { %585 = vst.msk [vmem:[#allocation2 + $0x399] sm:$0xff] %vm196_vm1, %v456_v30  ;;  %586 = vst.msk [vmem:[#allocation2 + $0x3a1] sm:$0xff] %vm196_vm1, %v457_v31 }
  0x91   : > { %587 = vst.msk [vmem:[#allocation2 + $0x3a9] sm:$0xff] %vm196_vm1, %v458_v32  ;;  %588 = vst.msk [vmem:[#allocation2 + $0x3b1] sm:$0xff] %vm196_vm1, %v459_v33 }
  0x92   : > { %589 = vst.msk [vmem:[#allocation2 + $0x3c1] sm:$0xff] %vm196_vm1, %v460_v34  ;;  %590 = vst.msk [vmem:[#allocation2 + $0x3c9] sm:$0xff] %vm196_vm1, %v461_v35 }
  0x93   : > { %591 = vst.msk [vmem:[#allocation2 + $0x3d1] sm:$0xff] %vm196_vm1, %v462_v36  ;;  %592 = vst.msk [vmem:[#allocation2 + $0x3d9] sm:$0xff] %vm196_vm1, %v463_v37 }
  0x94   : > { %593 = vst.msk [vmem:[#allocation2 + $0x3e9] sm:$0xff] %vm196_vm1, %v464_v38  ;;  %594 = vst.msk [vmem:[#allocation2 + $0x3f1] sm:$0xff] %vm196_vm1, %v465_v39 }
  0x95   : > { %595 = vst.msk [vmem:[#allocation2 + $0x3f9] sm:$0xff] %vm196_vm1, %v466_v40  ;;  %596 = vst.msk [vmem:[#allocation2 + $0x401] sm:$0xff] %vm196_vm1, %v467_v41 }
  0x96   : > { %597 = vst.msk [vmem:[#allocation2 + $0x411] sm:$0xff] %vm196_vm1, %v468_v42  ;;  %598 = vst.msk [vmem:[#allocation2 + $0x419] sm:$0xff] %vm196_vm1, %v469_v43 }
  0x97   : > { %599 = vst.msk [vmem:[#allocation2 + $0x421] sm:$0xff] %vm196_vm1, %v470_v44  ;;  %600 = vst.msk [vmem:[#allocation2 + $0x429] sm:$0xff] %vm196_vm1, %v471_v45 }
  0x98   : > { %601 = vst.msk [vmem:[#allocation2 + $0x439] sm:$0xff] %vm196_vm1, %v472_v46  ;;  %602 = vst.msk [vmem:[#allocation2 + $0x441] sm:$0xff] %vm196_vm1, %v473_v47 }
  0x99   : > { %603 = vst.msk [vmem:[#allocation2 + $0x449] sm:$0xff] %vm196_vm1, %v474_v48  ;;  %604 = vst.msk [vmem:[#allocation2 + $0x451] sm:$0xff] %vm196_vm1, %v475_v49 }
  0x9a   : > { %605 = vst.msk [vmem:[#allocation2 + $0x461] sm:$0xff] %vm196_vm1, %v476_v50  ;;  %606 = vst.msk [vmem:[#allocation2 + $0x469] sm:$0xff] %vm196_vm1, %v477_v51 }
  0x9b   : > { %607 = vst.msk [vmem:[#allocation2 + $0x471] sm:$0xff] %vm196_vm1, %v478_v52  ;;  %608 = vst.msk [vmem:[#allocation2 + $0x479] sm:$0xff] %vm196_vm1, %v479_v53 }
  0x9c   : > { %609 = vst.msk [vmem:[#allocation2 + $0x489] sm:$0xff] %vm196_vm1, %v480_v54  ;;  %610 = vst.msk [vmem:[#allocation2 + $0x491] sm:$0xff] %vm196_vm1, %v481_v55 }
  0x9d   : > { %611 = vst.msk [vmem:[#allocation2 + $0x499] sm:$0xff] %vm196_vm1, %v482_v56  ;;  %612 = vst.msk [vmem:[#allocation2 + $0x4a1] sm:$0xff] %vm196_vm1, %v483_v57 }
  0x9e   : > { %613 = vst.msk [vmem:[#allocation2 + $0x4b1] sm:$0xff] %vm196_vm1, %v484_v58  ;;  %614 = vst.msk [vmem:[#allocation2 + $0x4b9] sm:$0xff] %vm196_vm1, %v485_v59 }
  0x9f   : > { %615 = vst.msk [vmem:[#allocation2 + $0x4c1] sm:$0xff] %vm196_vm1, %v486_v60  ;;  %616 = vst.msk [vmem:[#allocation2 + $0x4c9] sm:$0xff] %vm196_vm1, %v487_v61 }
  0xa0   : > { %617 = vst.msk [vmem:[#allocation2 + $0x4d9] sm:$0xff] %vm196_vm1, %v488_v62  ;;  %618 = vst.msk [vmem:[#allocation2 + $0x4e1] sm:$0xff] %vm196_vm1, %v489_v63 }
  0xa1   : > { %619 = vst.msk [vmem:[#allocation2 + $0x4e9] sm:$0xff] %vm196_vm1, %v490_v0  ;;  %620 = vst.msk [vmem:[#allocation2 + $0x4f1] sm:$0xff] %vm196_vm1, %v491_v1 }
  0xa2   : > { %621 = vst.msk [vmem:[#allocation2 + $0x501] sm:$0xff] %vm196_vm1, %v492_v4  ;;  %622 = vst.msk [vmem:[#allocation2 + $0x509] sm:$0xff] %vm196_vm1, %v493_v5 }
  0xa3   : > { %623 = vst.msk [vmem:[#allocation2 + $0x511] sm:$0xff] %vm196_vm1, %v494_v6  ;;  %624 = vst.msk [vmem:[#allocation2 + $0x519] sm:$0xff] %vm196_vm1, %v495_v7 }
  0xaa   : > { %v693_v8 = vld [vmem:[%s10971_s30 + $0x1] sm:$0xff]  ;;  %v694_v10 = vld [vmem:[%s10971_s30 + $0x9] sm:$0xff]  ;;  %v695_v12 = vld [vmem:[%s10971_s30 + $0x11] sm:$0xff] }
  0xab   : > { %v725_v9 = vld [vmem:[%s10971_s30 + $0x141] sm:$0xff]  ;;  %9312 = vmatprep.mubr.msk.f32.mxu0 %vm196_vm1, %v693_v8  ;;  %v726_v11 = vld [vmem:[%s10971_s30 + $0x149] sm:$0xff]  ;;  %v727_v13 = vld [vmem:[%s10971_s30 + $0x151] sm:$0xff] }
  0xac   : > { %9360 = vmatprep.mubr.msk.f32.mxu1 %vm196_vm1, %v725_v9  ;;  %9313 = vmatmul.mubr.msk.f32.vlgmr.msra.gmra.mxu0 %vm196_vm1, %v694_v10  ;;  %v696_v16 = vld [vmem:[%s10971_s30 + $0x19] sm:$0xff]  ;;  %v11002_v18 = vld [vmem:[%s10971_s30 + $0x29] sm:$0xff]  ;;  %v11029_v22 = vld [vmem:[%s10971_s30 + $0x41] sm:$0xff] }
  0xad   : > { %9361 = vmatmul.mubr.msk.f32.vlgmr.msra.gmra.mxu1 %vm196_vm1, %v726_v11  ;;  %9507 = vmatpush3.msk.msra.mxu0 %vm951_vm0, %v10625_v3  ;;  %v728_v17 = vld [vmem:[%s10971_s30 + $0x159] sm:$0xff]  ;;  %v729_v19 = vld [vmem:[%s10971_s30 + $0x169] sm:$0xff]  ;;  %v730_v3 = vld [vmem:[%s10971_s30 + $0x171] sm:$0xff] }
  0xae   : > { %9409 = vmatpush3.msk.msra.mxu1 %vm951_vm0, %v10620_v2  ;;  %9315 = vmatprep.mubr.msk.f32.mxu0 %vm196_vm1, %v695_v12  ;;  %v11015_v2 = vld [vmem:[%s10971_s30 + $0x31] sm:$0xff]  ;;  %v11019_v20 = vld [vmem:[%s10971_s30 + $0x39] sm:$0xff]  ;;  %v732_v23 = vld [vmem:[%s10971_s30 + $0x181] sm:$0xff] }
  0xaf   : > { %9363 = vmatprep.mubr.msk.f32.mxu1 %vm196_vm1, %v727_v13  ;;  %9604 = vmatprep.subr.msk.mxu1 %vm951_vm0, %v10986_v14  ;;  %v731_v21 = vld [vmem:[%s10971_s30 + $0x179] sm:$0xff]  ;;  %v11033_v24 = vld [vmem:[%s10971_s30 + $0x51] sm:$0xff]  ;;  %v11047_v28 = vld [vmem:[%s10971_s30 + $0x61] sm:$0xff] }
  0xb0   : > { %9702 = vmatprep.subr.msk.mxu0 %vm951_vm0, %v10991_v15  ;;  %9316 = vmatmul.mubr.msk.f32.gmra.mxu0 %vm196_vm1, %v696_v16  ;;  %v733_v25 = vld [vmem:[%s10971_s30 + $0x191] sm:$0xff]  ;;  %v11043_v26 = vld [vmem:[%s10971_s30 + $0x59] sm:$0xff]  ;;  %v735_v29 = vld [vmem:[%s10971_s30 + $0x1a1] sm:$0xff] }
  0xb1   : > { %9364 = vmatmul.mubr.msk.f32.gmra.mxu1 %vm196_vm1, %v728_v17  ;;  %9318 = vmatprep.mubr.msk.f32.mxu0 %vm196_vm1, %v11002_v18  ;;  %v734_v27 = vld [vmem:[%s10971_s30 + $0x199] sm:$0xff]  ;;  %v11057_v30 = vld [vmem:[%s10971_s30 + $0x69] sm:$0xff]  ;;  %v11071_v34 = vld [vmem:[%s10971_s30 + $0x81] sm:$0xff] }
  0xb2   : > { %9366 = vmatprep.mubr.msk.f32.mxu1 %vm196_vm1, %v729_v19  ;;  %v736_v31 = vld [vmem:[%s10971_s30 + $0x1a9] sm:$0xff]  ;;  %v11061_v32 = vld [vmem:[%s10971_s30 + $0x79] sm:$0xff]  ;;  %v738_v35 = vld [vmem:[%s10971_s30 + $0x1c1] sm:$0xff] }
  0xb3   : > { %v737_v33 = vld [vmem:[%s10971_s30 + $0x1b9] sm:$0xff]  ;;  %v11075_v36 = vld [vmem:[%s10971_s30 + $0x89] sm:$0xff]  ;;  %v11085_v38 = vld [vmem:[%s10971_s30 + $0x91] sm:$0xff] }
  0xb4   : > { %9319 = vmatmul.mubr.msk.f32.gmra.mxu0 %vm196_vm1, %v11015_v2  ;;  %v739_v37 = vld [vmem:[%s10971_s30 + $0x1c9] sm:$0xff]  ;;  %v740_v39 = vld [vmem:[%s10971_s30 + $0x1d1] sm:$0xff]  ;;  %v11089_v40 = vld [vmem:[%s10971_s30 + $0xa1] sm:$0xff] }
  0xb5   : > { %9367 = vmatmul.mubr.msk.f32.gmra.mxu1 %vm196_vm1, %v730_v3  ;;  %9321 = vmatprep.mubr.msk.f32.mxu0 %vm196_vm1, %v11019_v20  ;;  %v741_v41 = vld [vmem:[%s10971_s30 + $0x1e1] sm:$0xff]  ;;  %v11099_v42 = vld [vmem:[%s10971_s30 + $0xa9] sm:$0xff]  ;;  %v11103_v44 = vld [vmem:[%s10971_s30 + $0xb1] sm:$0xff] }
  0xb6   : > { %9369 = vmatprep.mubr.msk.f32.mxu1 %vm196_vm1, %v731_v21  ;;  %v742_v43 = vld [vmem:[%s10971_s30 + $0x1e9] sm:$0xff]  ;;  %v743_v45 = vld [vmem:[%s10971_s30 + $0x1f1] sm:$0xff]  ;;  %v11113_v46 = vld [vmem:[%s10971_s30 + $0xb9] sm:$0xff] }
  0xb7   : > { %v744_v47 = vld [vmem:[%s10971_s30 + $0x1f9] sm:$0xff]  ;;  %v11117_v48 = vld [vmem:[%s10971_s30 + $0xc9] sm:$0xff]  ;;  %v11127_v50 = vld [vmem:[%s10971_s30 + $0xd1] sm:$0xff] }
  0xb8   : > { %9322 = vmatmul.mubr.msk.f32.gmra.mxu0 %vm196_vm1, %v11029_v22  ;;  %v745_v49 = vld [vmem:[%s10971_s30 + $0x209] sm:$0xff]  ;;  %v746_v51 = vld [vmem:[%s10971_s30 + $0x211] sm:$0xff]  ;;  %v11131_v52 = vld [vmem:[%s10971_s30 + $0xd9] sm:$0xff] }
  0xb9   : > { %9370 = vmatmul.mubr.msk.f32.gmra.mxu1 %vm196_vm1, %v732_v23  ;;  %9324 = vmatprep.mubr.msk.f32.mxu0 %vm196_vm1, %v11033_v24  ;;  %v747_v53 = vld [vmem:[%s10971_s30 + $0x219] sm:$0xff]  ;;  %v11141_v54 = vld [vmem:[%s10971_s30 + $0xe1] sm:$0xff]  ;;  %v11145_v56 = vld [vmem:[%s10971_s30 + $0xf1] sm:$0xff] }
  0xba   : > { %9372 = vmatprep.mubr.msk.f32.mxu1 %vm196_vm1, %v733_v25  ;;  %v748_v55 = vld [vmem:[%s10971_s30 + $0x221] sm:$0xff]  ;;  %v749_v57 = vld [vmem:[%s10971_s30 + $0x231] sm:$0xff]  ;;  %v11155_v58 = vld [vmem:[%s10971_s30 + $0xf9] sm:$0xff] }
  0xbb   : > { %v750_v59 = vld [vmem:[%s10971_s30 + $0x239] sm:$0xff]  ;;  %v11159_v60 = vld [vmem:[%s10971_s30 + $0x101] sm:$0xff]  ;;  %v11169_v62 = vld [vmem:[%s10971_s30 + $0x109] sm:$0xff] }
  0xbc   : > { %9325 = vmatmul.mubr.msk.f32.gmra.mxu0 %vm196_vm1, %v11043_v26  ;;  %v751_v61 = vld [vmem:[%s10971_s30 + $0x241] sm:$0xff]  ;;  %v752_v63 = vld [vmem:[%s10971_s30 + $0x249] sm:$0xff]  ;;  %v11173_v0 = vld [vmem:[%s10971_s30 + $0x119] sm:$0xff] }
  0xbd   : > { %9373 = vmatmul.mubr.msk.f32.gmra.mxu1 %vm196_vm1, %v734_v27  ;;  %9327 = vmatprep.mubr.msk.f32.mxu0 %vm196_vm1, %v11047_v28  ;;  %v753_v1 = vld [vmem:[%s10971_s30 + $0x259] sm:$0xff]  ;;  %v11183_v4 = vld [vmem:[%s10971_s30 + $0x121] sm:$0xff]  ;;  %v11187_v6 = vld [vmem:[%s10971_s30 + $0x129] sm:$0xff] }
  0xbe   : > { %9375 = vmatprep.mubr.msk.f32.mxu1 %vm196_vm1, %v735_v29  ;;  %v754_v5 = vld [vmem:[%s10971_s30 + $0x261] sm:$0xff]  ;;  %v755_v7 = vld [vmem:[%s10971_s30 + $0x269] sm:$0xff]  ;;  %v11197_v8 = vld [vmem:[%s10971_s30 + $0x131] sm:$0xff] }
  0xbf   : > { %14012 = vst [vmem:[#allocation3_spill] sm:$0xff] %v11197_v8  ;;  %v756_v9 = vld [vmem:[%s10971_s30 + $0x271] sm:$0xff]  ;;  %v628_v10 = vld [vmem:[%s10971_s30] sm:$0xff]  ;;  %v629_v12 = vld [vmem:[%s10971_s30 + $0x8] sm:$0xff] }
  0xc0   : > { %9328 = vmatmul.mubr.msk.f32.gmra.mxu0 %vm196_vm1, %v11057_v30  ;;  %v1920_v11 = vld [vmem:[%s10971_s30 + $0x2] sm:$0xff]  ;;  %v1921_v13 = vld [vmem:[%s10971_s30 + $0xa] sm:$0xff]  ;;  %v1922_v17 = vld [vmem:[%s10971_s30 + $0x12] sm:$0xff] }
  0xc1   : > { %9376 = vmatmul.mubr.msk.f32.gmra.mxu1 %vm196_vm1, %v736_v31  ;;  %9330 = vmatprep.mubr.msk.f32.mxu0 %vm196_vm1, %v11061_v32  ;;  %v630_v16 = vld [vmem:[%s10971_s30 + $0x10] sm:$0xff]  ;;  %v631_v3 = vld [vmem:[%s10971_s30 + $0x18] sm:$0xff]  ;;  %v11232_v25 = vld [vmem:[%s10971_s30 + $0x28] sm:$0xff] }
  0xc2   : > { %9378 = vmatprep.mubr.msk.f32.mxu1 %vm196_vm1, %v737_v33  ;;  %v11216_v19 = vld [vmem:[%s13957_s1 + $0x14] sm:$0xf]  ;;  %v1923_v21 = vld [vmem:[%s10971_s30 + $0x1a] sm:$0xff] }
  0xc3   : > { %v11227_v23 = vld [vmem:[%s13957_s1 + $0x18] sm:$0xf]  ;;  %v11259_v33 = vld [vmem:[%s10971_s30 + $0x40] sm:$0xff] }
  0xc4   : > { %9331 = vmatmul.mubr.msk.f32.gmra.mxu0 %vm196_vm1, %v11071_v34  ;;  %v1925_v27 = vld [vmem:[%s10971_s30 + $0x32] sm:$0xff]  ;;  %v1926_v31 = vld [vmem:[%s10971_s30 + $0x3a] sm:$0xff] }
  0xc5   : > { %9379 = vmatmul.mubr.msk.f32.gmra.mxu1 %vm196_vm1, %v738_v35  ;;  %9333 = vmatprep.mubr.msk.f32.mxu0 %vm196_vm1, %v11075_v36  ;;  %v11249_v29 = vld [vmem:[%s10971_s30 + $0x38] sm:$0xff]  ;;  %v1927_v35 = vld [vmem:[%s10971_s30 + $0x42] sm:$0xff] }
  0xc6   : > { %9381 = vmatprep.mubr.msk.f32.mxu1 %vm196_vm1, %v739_v37  ;;  %v11263_v37 = vld [vmem:[%s10971_s30 + $0x50] sm:$0xff] }
  0xc8   : > { %9334 = vmatmul.mubr.msk.f32.gmra.mxu0 %vm196_vm1, %v11085_v38 }
  0xc9   : > { %9382 = vmatmul.mubr.msk.f32.gmra.mxu1 %vm196_vm1, %v740_v39  ;;  %9336 = vmatprep.mubr.msk.f32.mxu0 %vm196_vm1, %v11089_v40  ;;  %v1928_v39 = vld [vmem:[%s10971_s30 + $0x52] sm:$0xff] }
  0xca   : > { %9384 = vmatprep.mubr.msk.f32.mxu1 %vm196_vm1, %v741_v41  ;;  %v11273_v41 = vld [vmem:[%s10971_s30 + $0x58] sm:$0xff] }
  0xcc   : > { %9337 = vmatmul.mubr.msk.f32.gmra.mxu0 %vm196_vm1, %v11099_v42 }
  0xcd   : > { %9385 = vmatmul.mubr.msk.f32.gmra.mxu1 %vm196_vm1, %v742_v43  ;;  %9339 = vmatprep.mubr.msk.f32.mxu0 %vm196_vm1, %v11103_v44  ;;  %v1929_v43 = vld [vmem:[%s10971_s30 + $0x5a] sm:$0xff] }
  0xce   : > { %9387 = vmatprep.mubr.msk.f32.mxu1 %vm196_vm1, %v743_v45  ;;  %v11277_v45 = vld [vmem:[%s10971_s30 + $0x60] sm:$0xff] }
  0xd0   : > { %9340 = vmatmul.mubr.msk.f32.gmra.mxu0 %vm196_vm1, %v11113_v46 }
  0xd1   : > { %9388 = vmatmul.mubr.msk.f32.gmra.mxu1 %vm196_vm1, %v744_v47  ;;  %9342 = vmatprep.mubr.msk.f32.mxu0 %vm196_vm1, %v11117_v48  ;;  %v1930_v47 = vld [vmem:[%s10971_s30 + $0x62] sm:$0xff] }
  0xd2   : > { %9390 = vmatprep.mubr.msk.f32.mxu1 %vm196_vm1, %v745_v49  ;;  %v11287_v49 = vld [vmem:[%s10971_s30 + $0x68] sm:$0xff] }
  0xd4   : > { %9343 = vmatmul.mubr.msk.f32.gmra.mxu0 %vm196_vm1, %v11127_v50 }
  0xd5   : > { %9391 = vmatmul.mubr.msk.f32.gmra.mxu1 %vm196_vm1, %v746_v51  ;;  %9345 = vmatprep.mubr.msk.f32.mxu0 %vm196_vm1, %v11131_v52  ;;  %v1931_v51 = vld [vmem:[%s10971_s30 + $0x6a] sm:$0xff] }
  0xd6   : > { %9393 = vmatprep.mubr.msk.f32.mxu1 %vm196_vm1, %v747_v53  ;;  %v11291_v53 = vld [vmem:[%s10971_s30 + $0x78] sm:$0xff] }
  0xd8   : > { %9346 = vmatmul.mubr.msk.f32.gmra.mxu0 %vm196_vm1, %v11141_v54 }
  0xd9   : > { %9394 = vmatmul.mubr.msk.f32.gmra.mxu1 %vm196_vm1, %v748_v55  ;;  %9348 = vmatprep.mubr.msk.f32.mxu0 %vm196_vm1, %v11145_v56  ;;  %v1932_v55 = vld [vmem:[%s10971_s30 + $0x7a] sm:$0xff] }
  0xda   : > { %9396 = vmatprep.mubr.msk.f32.mxu1 %vm196_vm1, %v749_v57  ;;  %v11301_v57 = vld [vmem:[%s10971_s30 + $0x80] sm:$0xff] }
  0xdc   : > { %9349 = vmatmul.mubr.msk.f32.gmra.mxu0 %vm196_vm1, %v11155_v58 }
  0xdd   : > { %9397 = vmatmul.mubr.msk.f32.gmra.mxu1 %vm196_vm1, %v750_v59  ;;  %9351 = vmatprep.mubr.msk.f32.mxu0 %vm196_vm1, %v11159_v60  ;;  %v1933_v59 = vld [vmem:[%s10971_s30 + $0x82] sm:$0xff] }
  0xde   : > { %9399 = vmatprep.mubr.msk.f32.mxu1 %vm196_vm1, %v751_v61  ;;  %v11305_v61 = vld [vmem:[%s10971_s30 + $0x88] sm:$0xff] }
  0xe0   : > { %9352 = vmatmul.mubr.msk.f32.gmra.mxu0 %vm196_vm1, %v11169_v62 }
  0xe1   : > { %9400 = vmatmul.mubr.msk.f32.gmra.mxu1 %vm196_vm1, %v752_v63  ;;  %9354 = vmatprep.mubr.msk.f32.mxu0 %vm196_vm1, %v11173_v0  ;;  %v1934_v63 = vld [vmem:[%s10971_s30 + $0x8a] sm:$0xff] }
  0xe2   : > { %9402 = vmatprep.mubr.msk.f32.mxu1 %vm196_vm1, %v753_v1  ;;  %v11315_v1 = vld [vmem:[%s10971_s30 + $0x90] sm:$0xff] }
  0xe4   : > { %9355 = vmatmul.mubr.msk.f32.gmra.mxu0 %vm196_vm1, %v11183_v4 }
  0xe5   : > { %9403 = vmatmul.mubr.msk.f32.gmra.mxu1 %vm196_vm1, %v754_v5  ;;  %9357 = vmatprep.mubr.msk.f32.mxu0 %vm196_vm1, %v11187_v6  ;;  %v1935_v5 = vld [vmem:[%s10971_s30 + $0x92] sm:$0xff] }
  0xe6   : > { %9405 = vmatprep.mubr.msk.f32.mxu1 %vm196_vm1, %v755_v7  ;;  %v11319_v7 = vld [vmem:[%s10971_s30 + $0xa0] sm:$0xff] }
  0xe8   : > { %9358 = vmatmul.mubr.msk.f32.gmra.mxu0 %vm196_vm1, %v11197_v8  ;;  %v1954_v8 = vld [vmem:[%s10971_s30 + $0x152] sm:$0xff] }
  0xe9   : > { %9406 = vmatmul.mubr.msk.f32.gmra.mxu1 %vm196_vm1, %v756_v9  ;;  %9508 = vmatprep.mubr.msk.f32.mxu0 %vm196_vm1, %v1920_v11  ;;  %v1936_v9 = vld [vmem:[%s10971_s30 + $0xa2] sm:$0xff]  ;;  %v1937_v11 = vld [vmem:[%s10971_s30 + $0xaa] sm:$0xff] }
  0xea   : > { %9410 = vmatprep.mubr.msk.f32.mxu1 %vm196_vm1, %v628_v10  ;;  %v11329_v10 = vld [vmem:[%s10971_s30 + $0xa8] sm:$0xff] }
  0xec   : > { %9509 = vmatmul.mubr.msk.f32.vlgmr.msra.gmra.mxu0 %vm196_vm1, %v1921_v13  ;;  %v1938_v13 = vld [vmem:[%s10971_s30 + $0xb2] sm:$0xff] }
  0xed   : > { %9411 = vmatmul.mubr.msk.f32.vlgmr.msra.gmra.mxu1 %vm196_vm1, %v629_v12  ;;  %9703 = vmatpush3.msk.msra.mxu0 %vm951_vm0, %v10991_v15  ;;  %v11245_v15 = vld [vmem:[%s10971_s30 + $0x30] sm:$0xff] }
  0xee   : > { %9605 = vmatpush3.msk.msra.mxu1 %vm951_vm0, %v10986_v14  ;;  %9413 = vmatprep.mubr.msk.f32.mxu1 %vm196_vm1, %v630_v16  ;;  %v1924_v14 = vld [vmem:[%s10971_s30 + $0x2a] sm:$0xff]  ;;  %v11343_v16 = vld [vmem:[%s10971_s30 + $0xb8] sm:$0xff] }
  0xef   : > { %9511 = vmatprep.mubr.msk.f32.mxu0 %vm196_vm1, %v1922_v17  ;;  %9800 = vmatprep.subr.msk.mxu1 %vm951_vm0, %v11216_v19  ;;  %v11333_v12 = vld [vmem:[%s10971_s30 + $0xb0] sm:$0xff]  ;;  %v1939_v17 = vld [vmem:[%s10971_s30 + $0xba] sm:$0xff] }
  0xf0   : > { %9898 = vmatprep.subr.msk.mxu0 %vm951_vm0, %v11227_v23  ;;  %9512 = vmatmul.mubr.msk.f32.gmra.mxu0 %vm196_vm1, %v1923_v21  ;;  %v1940_v21 = vld [vmem:[%s10971_s30 + $0xca] sm:$0xff] }
  0xf1   : > { %9414 = vmatmul.mubr.msk.f32.gmra.mxu1 %vm196_vm1, %v631_v3  ;;  %9514 = vmatprep.mubr.msk.f32.mxu0 %vm196_vm1, %v1924_v14  ;;  %v11347_v3 = vld [vmem:[%s10971_s30 + $0xc8] sm:$0xff]  ;;  %v11357_v14 = vld [vmem:[%s10971_s30 + $0xd0] sm:$0xff] }
  0xf2   : > { %9416 = vmatprep.mubr.msk.f32.mxu1 %vm196_vm1, %v11232_v25 }
  0xf4   : > { %9515 = vmatmul.mubr.msk.f32.gmra.mxu0 %vm196_vm1, %v1925_v27  ;;  %v1941_v27 = vld [vmem:[%s10971_s30 + $0xd2] sm:$0xff] }
  0xf5   : > { %9417 = vmatmul.mubr.msk.f32.gmra.mxu1 %vm196_vm1, %v11245_v15  ;;  %9517 = vmatprep.mubr.msk.f32.mxu0 %vm196_vm1, %v1926_v31  ;;  %v11361_v31 = vld [vmem:[%s10971_s30 + $0xd8] sm:$0xff] }
  0xf6   : > { %9419 = vmatprep.mubr.msk.f32.mxu1 %vm196_vm1, %v11249_v29 }
  0xf8   : > { %9518 = vmatmul.mubr.msk.f32.gmra.mxu0 %vm196_vm1, %v1927_v35  ;;  %v1942_v35 = vld [vmem:[%s10971_s30 + $0xda] sm:$0xff] }
  0xf9   : > { %9420 = vmatmul.mubr.msk.f32.gmra.mxu1 %vm196_vm1, %v11259_v33  ;;  %9520 = vmatprep.mubr.msk.f32.mxu0 %vm196_vm1, %v1928_v39  ;;  %v11371_v39 = vld [vmem:[%s10971_s30 + $0xe0] sm:$0xff] }
  0xfa   : > { %9422 = vmatprep.mubr.msk.f32.mxu1 %vm196_vm1, %v11263_v37 }
  0xfc   : > { %9521 = vmatmul.mubr.msk.f32.gmra.mxu0 %vm196_vm1, %v1929_v43  ;;  %v1943_v43 = vld [vmem:[%s10971_s30 + $0xe2] sm:$0xff] }
  0xfd   : > { %9423 = vmatmul.mubr.msk.f32.gmra.mxu1 %vm196_vm1, %v11273_v41  ;;  %9523 = vmatprep.mubr.msk.f32.mxu0 %vm196_vm1, %v1930_v47  ;;  %v11375_v47 = vld [vmem:[%s10971_s30 + $0xf0] sm:$0xff] }
  0xfe   : > { %9425 = vmatprep.mubr.msk.f32.mxu1 %vm196_vm1, %v11277_v45 }
 0x100   : > { %9524 = vmatmul.mubr.msk.f32.gmra.mxu0 %vm196_vm1, %v1931_v51  ;;  %v1944_v51 = vld [vmem:[%s10971_s30 + $0xf2] sm:$0xff] }
 0x101   : > { %9426 = vmatmul.mubr.msk.f32.gmra.mxu1 %vm196_vm1, %v11287_v49  ;;  %9526 = vmatprep.mubr.msk.f32.mxu0 %vm196_vm1, %v1932_v55  ;;  %v11385_v55 = vld [vmem:[%s10971_s30 + $0xf8] sm:$0xff] }
 0x102   : > { %9428 = vmatprep.mubr.msk.f32.mxu1 %vm196_vm1, %v11291_v53 }
 0x104   : > { %9527 = vmatmul.mubr.msk.f32.gmra.mxu0 %vm196_vm1, %v1933_v59  ;;  %v1945_v59 = vld [vmem:[%s10971_s30 + $0xfa] sm:$0xff] }
 0x105   : > { %9429 = vmatmul.mubr.msk.f32.gmra.mxu1 %vm196_vm1, %v11301_v57  ;;  %9529 = vmatprep.mubr.msk.f32.mxu0 %vm196_vm1, %v1934_v63  ;;  %v11389_v63 = vld [vmem:[%s10971_s30 + $0x100] sm:$0xff] }
 0x106   : > { %9431 = vmatprep.mubr.msk.f32.mxu1 %vm196_vm1, %v11305_v61 }
 0x108   : > { %9530 = vmatmul.mubr.msk.f32.gmra.mxu0 %vm196_vm1, %v1935_v5  ;;  %v1946_v5 = vld [vmem:[%s10971_s30 + $0x102] sm:$0xff] }
 0x109   : > { %9432 = vmatmul.mubr.msk.f32.gmra.mxu1 %vm196_vm1, %v11315_v1  ;;  %9532 = vmatprep.mubr.msk.f32.mxu0 %vm196_vm1, %v1936_v9  ;;  %v11399_v9 = vld [vmem:[%s10971_s30 + $0x108] sm:$0xff] }
 0x10a   : > { %9434 = vmatprep.mubr.msk.f32.mxu1 %vm196_vm1, %v11319_v7 }
 0x10c   : > { %9533 = vmatmul.mubr.msk.f32.gmra.mxu0 %vm196_vm1, %v1937_v11  ;;  %v1947_v11 = vld [vmem:[%s10971_s30 + $0x10a] sm:$0xff] }
 0x10d   : > { %9435 = vmatmul.mubr.msk.f32.gmra.mxu1 %vm196_vm1, %v11329_v10  ;;  %9535 = vmatprep.mubr.msk.f32.mxu0 %vm196_vm1, %v1938_v13  ;;  %v11403_v13 = vld [vmem:[%s10971_s30 + $0x118] sm:$0xff] }
 0x10e   : > { %9437 = vmatprep.mubr.msk.f32.mxu1 %vm196_vm1, %v11333_v12 }
 0x110   : > { %9536 = vmatmul.mubr.msk.f32.gmra.mxu0 %vm196_vm1, %v1939_v17  ;;  %v1948_v17 = vld [vmem:[%s10971_s30 + $0x11a] sm:$0xff] }
 0x111   : > { %9438 = vmatmul.mubr.msk.f32.gmra.mxu1 %vm196_vm1, %v11343_v16  ;;  %9538 = vmatprep.mubr.msk.f32.mxu0 %vm196_vm1, %v1940_v21  ;;  %v11413_v21 = vld [vmem:[%s10971_s30 + $0x120] sm:$0xff] }
 0x112   : > { %9440 = vmatprep.mubr.msk.f32.mxu1 %vm196_vm1, %v11347_v3 }
 0x114   : > { %9539 = vmatmul.mubr.msk.f32.gmra.mxu0 %vm196_vm1, %v1941_v27  ;;  %v1949_v27 = vld [vmem:[%s10971_s30 + $0x122] sm:$0xff] }
 0x115   : > { %9441 = vmatmul.mubr.msk.f32.gmra.mxu1 %vm196_vm1, %v11357_v14  ;;  %9541 = vmatprep.mubr.msk.f32.mxu0 %vm196_vm1, %v1942_v35  ;;  %v11417_v35 = vld [vmem:[%s10971_s30 + $0x128] sm:$0xff] }
 0x116   : > { %9443 = vmatprep.mubr.msk.f32.mxu1 %vm196_vm1, %v11361_v31 }
 0x118   : > { %9542 = vmatmul.mubr.msk.f32.gmra.mxu0 %vm196_vm1, %v1943_v43  ;;  %v1950_v43 = vld [vmem:[%s10971_s30 + $0x12a] sm:$0xff] }
 0x119   : > { %9444 = vmatmul.mubr.msk.f32.gmra.mxu1 %vm196_vm1, %v11371_v39  ;;  %9544 = vmatprep.mubr.msk.f32.mxu0 %vm196_vm1, %v1944_v51  ;;  %v11427_v51 = vld [vmem:[%s10971_s30 + $0x130] sm:$0xff] }
 0x11a   : > { %9446 = vmatprep.mubr.msk.f32.mxu1 %vm196_vm1, %v11375_v47  ;;  %14013 = vst [vmem:[#allocation4_spill] sm:$0xff] %v11427_v51 }
 0x11c   : > { %9545 = vmatmul.mubr.msk.f32.gmra.mxu0 %vm196_vm1, %v1945_v59  ;;  %v1951_v59 = vld [vmem:[%s10971_s30 + $0x132] sm:$0xff] }
 0x11d   : > { %9447 = vmatmul.mubr.msk.f32.gmra.mxu1 %vm196_vm1, %v11385_v55  ;;  %9547 = vmatprep.mubr.msk.f32.mxu0 %vm196_vm1, %v1946_v5  ;;  %v11431_v5 = vld [vmem:[%s10971_s30 + $0x140] sm:$0xff] }
 0x11e   : > { %9449 = vmatprep.mubr.msk.f32.mxu1 %vm196_vm1, %v11389_v63  ;;  %14014 = vst [vmem:[#allocation5_spill] sm:$0xff] %v11431_v5 }
 0x120   : > { %9548 = vmatmul.mubr.msk.f32.gmra.mxu0 %vm196_vm1, %v1947_v11  ;;  %v1952_v11 = vld [vmem:[%s10971_s30 + $0x142] sm:$0xff] }
 0x121   : > { %9450 = vmatmul.mubr.msk.f32.gmra.mxu1 %vm196_vm1, %v11399_v9  ;;  %9550 = vmatprep.mubr.msk.f32.mxu0 %vm196_vm1, %v1948_v17  ;;  %v11441_v17 = vld [vmem:[%s10971_s30 + $0x148] sm:$0xff] }
 0x122   : > { %9452 = vmatprep.mubr.msk.f32.mxu1 %vm196_vm1, %v11403_v13  ;;  %14015 = vst [vmem:[#allocation6_spill] sm:$0xff] %v11441_v17 }
 0x124   : > { %9551 = vmatmul.mubr.msk.f32.gmra.mxu0 %vm196_vm1, %v1949_v27  ;;  %v1953_v27 = vld [vmem:[%s10971_s30 + $0x14a] sm:$0xff] }
 0x125   : > { %9453 = vmatmul.mubr.msk.f32.gmra.mxu1 %vm196_vm1, %v11413_v21  ;;  %9553 = vmatprep.mubr.msk.f32.mxu0 %vm196_vm1, %v1950_v43  ;;  %v11445_v43 = vld [vmem:[%s10971_s30 + $0x150] sm:$0xff] }
 0x126   : > { %9455 = vmatprep.mubr.msk.f32.mxu1 %vm196_vm1, %v11417_v35  ;;  %14016 = vst [vmem:[#allocation7_spill] sm:$0xff] %v11445_v43 }
 0x128   : > { %9554 = vmatmul.mubr.msk.f32.gmra.mxu0 %vm196_vm1, %v1951_v59  ;;  %v11455_v59 = vld [vmem:[%s10971_s30 + $0x158] sm:$0xff] }
 0x129   : > { %9456 = vmatmul.mubr.msk.f32.gmra.mxu1 %vm196_vm1, %v11427_v51  ;;  %9556 = vmatprep.mubr.msk.f32.mxu0 %vm196_vm1, %v1952_v11  ;;  %14017 = vst [vmem:[#allocation8_spill] sm:$0xff] %v11455_v59  ;;  %v1955_v11 = vld [vmem:[%s10971_s30 + $0x15a] sm:$0xff]  ;;  %v1956_v51 = vld [vmem:[%s10971_s30 + $0x16a] sm:$0xff] }
 0x12a   : > { %9458 = vmatprep.mubr.msk.f32.mxu1 %vm196_vm1, %v11431_v5  ;;  %v11459_v5 = vld [vmem:[%s10971_s30 + $0x168] sm:$0xff] }
 0x12b   : > { %14018 = vst [vmem:[#allocation9_spill] sm:$0xff] %v11459_v5 }
 0x12c   : > { %9557 = vmatmul.mubr.msk.f32.gmra.mxu0 %vm196_vm1, %v1953_v27  ;;  %v1957_v27 = vld [vmem:[%s10971_s30 + $0x172] sm:$0xff] }
 0x12d   : > { %9459 = vmatmul.mubr.msk.f32.gmra.mxu1 %vm196_vm1, %v11441_v17  ;;  %9559 = vmatprep.mubr.msk.f32.mxu0 %vm196_vm1, %v1954_v8  ;;  %v11469_v8 = vld [vmem:[%s10971_s30 + $0x170] sm:$0xff]  ;;  %v1958_v17 = vld [vmem:[%s10971_s30 + $0x17a] sm:$0xff] }
 0x12e   : > { %9461 = vmatprep.mubr.msk.f32.mxu1 %vm196_vm1, %v11445_v43  ;;  %14019 = vst [vmem:[#allocation10_spill] sm:$0xff] %v11469_v8  ;;  %v11473_v43 = vld [vmem:[%s10971_s30 + $0x178] sm:$0xff] }
 0x12f   : > { %14020 = vst [vmem:[#allocation11_spill] sm:$0xff] %v11473_v43 }
 0x130   : > { %9560 = vmatmul.mubr.msk.f32.gmra.mxu0 %vm196_vm1, %v1955_v11  ;;  %v1959_v11 = vld [vmem:[%s10971_s30 + $0x182] sm:$0xff] }
 0x131   : > { %9462 = vmatmul.mubr.msk.f32.gmra.mxu1 %vm196_vm1, %v11455_v59  ;;  %9562 = vmatprep.mubr.msk.f32.mxu0 %vm196_vm1, %v1956_v51  ;;  %v11483_v51 = vld [vmem:[%s10971_s30 + $0x180] sm:$0xff]  ;;  %v1960_v59 = vld [vmem:[%s10971_s30 + $0x192] sm:$0xff] }
 0x132   : > { %9464 = vmatprep.mubr.msk.f32.mxu1 %vm196_vm1, %v11459_v5  ;;  %14021 = vst [vmem:[#allocation12_spill] sm:$0xff] %v11483_v51  ;;  %v11487_v5 = vld [vmem:[%s10971_s30 + $0x190] sm:$0xff] }
 0x133   : > { %14022 = vst [vmem:[#allocation13_spill] sm:$0xff] %v11487_v5 }
 0x134   : > { %9563 = vmatmul.mubr.msk.f32.gmra.mxu0 %vm196_vm1, %v1957_v27  ;;  %v1961_v27 = vld [vmem:[%s10971_s30 + $0x19a] sm:$0xff] }
 0x135   : > { %9465 = vmatmul.mubr.msk.f32.gmra.mxu1 %vm196_vm1, %v11469_v8  ;;  %9565 = vmatprep.mubr.msk.f32.mxu0 %vm196_vm1, %v1958_v17  ;;  %v11497_v17 = vld [vmem:[%s10971_s30 + $0x198] sm:$0xff]  ;;  %v1962_v8 = vld [vmem:[%s10971_s30 + $0x1a2] sm:$0xff] }
 0x136   : > { %9467 = vmatprep.mubr.msk.f32.mxu1 %vm196_vm1, %v11473_v43  ;;  %14023 = vst [vmem:[#allocation14_spill] sm:$0xff] %v11497_v17  ;;  %v11501_v43 = vld [vmem:[%s10971_s30 + $0x1a0] sm:$0xff] }
 0x137   : > { %14024 = vst [vmem:[#allocation15_spill] sm:$0xff] %v11501_v43 }
 0x138   : > { %9566 = vmatmul.mubr.msk.f32.gmra.mxu0 %vm196_vm1, %v1959_v11  ;;  %v1963_v11 = vld [vmem:[%s10971_s30 + $0x1aa] sm:$0xff] }
 0x139   : > { %9468 = vmatmul.mubr.msk.f32.gmra.mxu1 %vm196_vm1, %v11483_v51  ;;  %9568 = vmatprep.mubr.msk.f32.mxu0 %vm196_vm1, %v1960_v59  ;;  %v11511_v59 = vld [vmem:[%s10971_s30 + $0x1a8] sm:$0xff]  ;;  %v1964_v51 = vld [vmem:[%s10971_s30 + $0x1ba] sm:$0xff] }
 0x13a   : > { %9470 = vmatprep.mubr.msk.f32.mxu1 %vm196_vm1, %v11487_v5  ;;  %14025 = vst [vmem:[#allocation16_spill] sm:$0xff] %v11511_v59  ;;  %v11515_v5 = vld [vmem:[%s10971_s30 + $0x1b8] sm:$0xff] }
 0x13b   : > { %14026 = vst [vmem:[#allocation17_spill] sm:$0xff] %v11515_v5 }
 0x13c   : > { %9569 = vmatmul.mubr.msk.f32.gmra.mxu0 %vm196_vm1, %v1961_v27  ;;  %v1965_v27 = vld [vmem:[%s10971_s30 + $0x1c2] sm:$0xff] }
 0x13d   : > { %9471 = vmatmul.mubr.msk.f32.gmra.mxu1 %vm196_vm1, %v11497_v17  ;;  %9571 = vmatprep.mubr.msk.f32.mxu0 %vm196_vm1, %v1962_v8  ;;  %v11525_v8 = vld [vmem:[%s10971_s30 + $0x1c0] sm:$0xff]  ;;  %v1966_v17 = vld [vmem:[%s10971_s30 + $0x1ca] sm:$0xff] }
 0x13e   : > { %9473 = vmatprep.mubr.msk.f32.mxu1 %vm196_vm1, %v11501_v43  ;;  %14027 = vst [vmem:[#allocation18_spill] sm:$0xff] %v11525_v8  ;;  %v11529_v43 = vld [vmem:[%s10971_s30 + $0x1c8] sm:$0xff] }
 0x13f   : > { %14028 = vst [vmem:[#allocation19_spill] sm:$0xff] %v11529_v43 }
 0x140   : > { %9572 = vmatmul.mubr.msk.f32.gmra.mxu0 %vm196_vm1, %v1963_v11  ;;  %v1967_v11 = vld [vmem:[%s10971_s30 + $0x1d2] sm:$0xff] }
 0x141   : > { %9474 = vmatmul.mubr.msk.f32.gmra.mxu1 %vm196_vm1, %v11511_v59  ;;  %9574 = vmatprep.mubr.msk.f32.mxu0 %vm196_vm1, %v1964_v51  ;;  %v11539_v51 = vld [vmem:[%s10971_s30 + $0x1d0] sm:$0xff]  ;;  %v1968_v59 = vld [vmem:[%s10971_s30 + $0x1e2] sm:$0xff] }
 0x142   : > { %9476 = vmatprep.mubr.msk.f32.mxu1 %vm196_vm1, %v11515_v5  ;;  %14029 = vst [vmem:[#allocation20_spill] sm:$0xff] %v11539_v51  ;;  %v11543_v5 = vld [vmem:[%s10971_s30 + $0x1e0] sm:$0xff] }
 0x143   : > { %14030 = vst [vmem:[#allocation21_spill] sm:$0xff] %v11543_v5 }
 0x144   : > { %9575 = vmatmul.mubr.msk.f32.gmra.mxu0 %vm196_vm1, %v1965_v27  ;;  %v1969_v27 = vld [vmem:[%s10971_s30 + $0x1ea] sm:$0xff] }
 0x145   : > { %9477 = vmatmul.mubr.msk.f32.gmra.mxu1 %vm196_vm1, %v11525_v8  ;;  %9577 = vmatprep.mubr.msk.f32.mxu0 %vm196_vm1, %v1966_v17  ;;  %v11553_v17 = vld [vmem:[%s10971_s30 + $0x1e8] sm:$0xff]  ;;  %v1970_v8 = vld [vmem:[%s10971_s30 + $0x1f2] sm:$0xff] }
 0x146   : > { %9479 = vmatprep.mubr.msk.f32.mxu1 %vm196_vm1, %v11529_v43  ;;  %14031 = vst [vmem:[#allocation22_spill] sm:$0xff] %v11553_v17  ;;  %v11557_v43 = vld [vmem:[%s10971_s30 + $0x1f0] sm:$0xff] }
 0x147   : > { %14032 = vst [vmem:[#allocation23_spill] sm:$0xff] %v11557_v43 }
 0x148   : > { %9578 = vmatmul.mubr.msk.f32.gmra.mxu0 %vm196_vm1, %v1967_v11  ;;  %v1971_v11 = vld [vmem:[%s10971_s30 + $0x1fa] sm:$0xff] }
 0x149   : > { %9480 = vmatmul.mubr.msk.f32.gmra.mxu1 %vm196_vm1, %v11539_v51  ;;  %9580 = vmatprep.mubr.msk.f32.mxu0 %vm196_vm1, %v1968_v59  ;;  %v11567_v59 = vld [vmem:[%s10971_s30 + $0x1f8] sm:$0xff]  ;;  %v1972_v51 = vld [vmem:[%s10971_s30 + $0x20a] sm:$0xff] }
 0x14a   : > { %9482 = vmatprep.mubr.msk.f32.mxu1 %vm196_vm1, %v11543_v5  ;;  %14033 = vst [vmem:[#allocation24_spill] sm:$0xff] %v11567_v59  ;;  %v11571_v5 = vld [vmem:[%s10971_s30 + $0x208] sm:$0xff] }
 0x14b   : > { %14034 = vst [vmem:[#allocation25_spill] sm:$0xff] %v11571_v5 }
 0x14c   : > { %9581 = vmatmul.mubr.msk.f32.gmra.mxu0 %vm196_vm1, %v1969_v27  ;;  %v1973_v27 = vld [vmem:[%s10971_s30 + $0x212] sm:$0xff] }
 0x14d   : > { %9483 = vmatmul.mubr.msk.f32.gmra.mxu1 %vm196_vm1, %v11553_v17  ;;  %9583 = vmatprep.mubr.msk.f32.mxu0 %vm196_vm1, %v1970_v8  ;;  %v11581_v8 = vld [vmem:[%s10971_s30 + $0x210] sm:$0xff]  ;;  %v1974_v17 = vld [vmem:[%s10971_s30 + $0x21a] sm:$0xff] }
 0x14e   : > { %9485 = vmatprep.mubr.msk.f32.mxu1 %vm196_vm1, %v11557_v43  ;;  %14035 = vst [vmem:[#allocation26_spill] sm:$0xff] %v11581_v8  ;;  %v11585_v43 = vld [vmem:[%s10971_s30 + $0x218] sm:$0xff] }
 0x14f   : > { %14036 = vst [vmem:[#allocation27_spill] sm:$0xff] %v11585_v43 }
 0x150   : > { %9584 = vmatmul.mubr.msk.f32.gmra.mxu0 %vm196_vm1, %v1971_v11  ;;  %v1975_v11 = vld [vmem:[%s10971_s30 + $0x222] sm:$0xff] }
 0x151   : > { %9486 = vmatmul.mubr.msk.f32.gmra.mxu1 %vm196_vm1, %v11567_v59  ;;  %9586 = vmatprep.mubr.msk.f32.mxu0 %vm196_vm1, %v1972_v51  ;;  %v11595_v51 = vld [vmem:[%s10971_s30 + $0x220] sm:$0xff]  ;;  %v1976_v59 = vld [vmem:[%s10971_s30 + $0x232] sm:$0xff] }
 0x152   : > { %9488 = vmatprep.mubr.msk.f32.mxu1 %vm196_vm1, %v11571_v5  ;;  %14037 = vst [vmem:[#allocation28_spill] sm:$0xff] %v11595_v51  ;;  %v11599_v5 = vld [vmem:[%s10971_s30 + $0x230] sm:$0xff] }
 0x153   : > { %14038 = vst [vmem:[#allocation29_spill] sm:$0xff] %v11599_v5 }
 0x154   : > { %9587 = vmatmul.mubr.msk.f32.gmra.mxu0 %vm196_vm1, %v1973_v27  ;;  %v1977_v27 = vld [vmem:[%s10971_s30 + $0x23a] sm:$0xff] }
 0x155   : > { %9489 = vmatmul.mubr.msk.f32.gmra.mxu1 %vm196_vm1, %v11581_v8  ;;  %9589 = vmatprep.mubr.msk.f32.mxu0 %vm196_vm1, %v1974_v17  ;;  %v11609_v17 = vld [vmem:[%s10971_s30 + $0x238] sm:$0xff]  ;;  %v1978_v8 = vld [vmem:[%s10971_s30 + $0x242] sm:$0xff] }
 0x156   : > { %9491 = vmatprep.mubr.msk.f32.mxu1 %vm196_vm1, %v11585_v43  ;;  %14039 = vst [vmem:[#allocation30_spill] sm:$0xff] %v11609_v17  ;;  %v11613_v43 = vld [vmem:[%s10971_s30 + $0x240] sm:$0xff] }
 0x157   : > { %14040 = vst [vmem:[#allocation31_spill] sm:$0xff] %v11613_v43 }
 0x158   : > { %9590 = vmatmul.mubr.msk.f32.gmra.mxu0 %vm196_vm1, %v1975_v11  ;;  %v1979_v11 = vld [vmem:[%s10971_s30 + $0x24a] sm:$0xff] }
 0x159   : > { %9492 = vmatmul.mubr.msk.f32.gmra.mxu1 %vm196_vm1, %v11595_v51  ;;  %9592 = vmatprep.mubr.msk.f32.mxu0 %vm196_vm1, %v1976_v59  ;;  %v11623_v59 = vld [vmem:[%s10971_s30 + $0x248] sm:$0xff]  ;;  %v1980_v51 = vld [vmem:[%s10971_s30 + $0x25a] sm:$0xff] }
 0x15a   : > { %9494 = vmatprep.mubr.msk.f32.mxu1 %vm196_vm1, %v11599_v5  ;;  %v11627_v5 = vld [vmem:[%s10971_s30 + $0x258] sm:$0xff] }
 0x15b   : > { %14041 = vst [vmem:[#allocation32_spill] sm:$0xff] %v11627_v5 }
 0x15c   : > { %9593 = vmatmul.mubr.msk.f32.gmra.mxu0 %vm196_vm1, %v1977_v27  ;;  %v11637_v27 = vld [vmem:[%s10971_s30 + $0x260] sm:$0xff] }
 0x15d   : > { %9495 = vmatmul.mubr.msk.f32.gmra.mxu1 %vm196_vm1, %v11609_v17  ;;  %9595 = vmatprep.mubr.msk.f32.mxu0 %vm196_vm1, %v1978_v8  ;;  %v1981_v8 = vld [vmem:[%s10971_s30 + $0x262] sm:$0xff]  ;;  %v1982_v17 = vld [vmem:[%s10971_s30 + $0x26a] sm:$0xff] }
 0x15e   : > { %9497 = vmatprep.mubr.msk.f32.mxu1 %vm196_vm1, %v11613_v43  ;;  %v11641_v43 = vld [vmem:[%s10971_s30 + $0x268] sm:$0xff] }
 0x160   : > { %9596 = vmatmul.mubr.msk.f32.gmra.mxu0 %vm196_vm1, %v1979_v11  ;;  %v11651_v11 = vld [vmem:[%s10971_s30 + $0x270] sm:$0xff] }
 0x161   : > { %9498 = vmatmul.mubr.msk.f32.gmra.mxu1 %vm196_vm1, %v11623_v59  ;;  %9598 = vmatprep.mubr.msk.f32.mxu0 %vm196_vm1, %v1980_v51 }
 0x162   : > { %9500 = vmatprep.mubr.msk.f32.mxu1 %vm196_vm1, %v11627_v5  ;;  %v1983_v5 = vld [vmem:[%s10971_s30 + $0x272] sm:$0xff] }
 0x164   : > { %9599 = vmatmul.mubr.msk.f32.gmra.mxu0 %vm196_vm1, %v1981_v8 }
 0x165   : > { %9501 = vmatmul.mubr.msk.f32.gmra.mxu1 %vm196_vm1, %v11637_v27  ;;  %9601 = vmatprep.mubr.msk.f32.mxu0 %vm196_vm1, %v1982_v17 }
 0x166   : > { %9503 = vmatprep.mubr.msk.f32.mxu1 %vm196_vm1, %v11641_v43 }
 0x168   : > { %9602 = vmatmul.mubr.msk.f32.gmra.mxu0 %vm196_vm1, %v1983_v5 }
 0x169   : > { %9504 = vmatmul.mubr.msk.f32.gmra.mxu1 %vm196_vm1, %v11651_v11  ;;  %9704 = vmatprep.mubr.msk.f32.mxu0 %vm196_vm1, %v11002_v18  ;;  %v11676_v18 = vld [vmem:[%s13957_s1 + $0x1c] sm:$0xf] }
 0x16a   : > { %9606 = vmatprep.mubr.msk.f32.mxu1 %vm196_vm1, %v11232_v25 }
 0x16c   : > { %v11661_v51 = vpop.f32.mrf.mxu0  ;;  %9705 = vmatmul.mubr.msk.f32.vlgmr.msra.gmra.mxu0 %vm196_vm1, %v11015_v2  ;;  %v11691_v2 = vld [vmem:[%s13957_s1 + $0x20] sm:$0xf] }
 0x16d   : > { %v11663_v8 = vpop.f32.mrf.mxu1  ;;  %9607 = vmatmul.mubr.msk.f32.vlgmr.msra.gmra.mxu1 %vm196_vm1, %v11245_v15  ;;  %9899 = vmatpush3.msk.msra.mxu0 %vm951_vm0, %v11227_v23 }
 0x16e   : > { %9801 = vmatpush3.msk.msra.mxu1 %vm951_vm0, %v11216_v19  ;;  %v11678_v25 = vpop.f32.mrf.mxu0  ;;  %9609 = vmatprep.mubr.msk.f32.mxu1 %vm196_vm1, %v11249_v29 }
 0x16f   : > { %v11680_v5 = vpop.f32.mrf.mxu1  ;;  %9707 = vmatprep.mubr.msk.f32.mxu0 %vm196_vm1, %v11019_v20  ;;  %9996 = vmatprep.subr.msk.mxu1 %vm951_vm0, %v11676_v18 }
 0x170   : > { %v11693_v19 = vpop.f32.mrf.mxu0  ;;  %9708 = vmatmul.mubr.msk.f32.gmra.mxu0 %vm196_vm1, %v11029_v22  ;;  %10094 = vmatprep.subr.msk.mxu0 %vm951_vm0, %v11691_v2 }
 0x171   : > { %v11695_v23 = vpop.f32.mrf.mxu1  ;;  %9610 = vmatmul.mubr.msk.f32.gmra.mxu1 %vm196_vm1, %v11259_v33  ;;  %9710 = vmatprep.mubr.msk.f32.mxu0 %vm196_vm1, %v11033_v24 }
 0x172   : > { %9612 = vmatprep.mubr.msk.f32.mxu1 %vm196_vm1, %v11263_v37  ;;  %v11705_v20 = vpop.f32.mrf.mxu0 }
 0x173   : > { %v11707_v15 = vpop.f32.mrf.mxu1 }
 0x174   : > { %v11711_v29 = vpop.f32.mrf.mxu0  ;;  %9711 = vmatmul.mubr.msk.f32.gmra.mxu0 %vm196_vm1, %v11043_v26 }
 0x175   : > { %v11713_v17 = vpop.f32.mrf.mxu1  ;;  %9613 = vmatmul.mubr.msk.f32.gmra.mxu1 %vm196_vm1, %v11273_v41  ;;  %9713 = vmatprep.mubr.msk.f32.mxu0 %vm196_vm1, %v11047_v28 }
 0x176   : > { %9615 = vmatprep.mubr.msk.f32.mxu1 %vm196_vm1, %v11277_v45  ;;  %v11723_v22 = vpop.f32.mrf.mxu0 }
 0x177   : > { %v11725_v24 = vpop.f32.mrf.mxu1 }
 0x178   : > { %v11727_v33 = vpop.f32.mrf.mxu0  ;;  %9714 = vmatmul.mubr.msk.f32.gmra.mxu0 %vm196_vm1, %v11057_v30 }
 0x179   : > { %v11729_v37 = vpop.f32.mrf.mxu1  ;;  %9616 = vmatmul.mubr.msk.f32.gmra.mxu1 %vm196_vm1, %v11287_v49  ;;  %9716 = vmatprep.mubr.msk.f32.mxu0 %vm196_vm1, %v11061_v32 }
 0x17a   : > { %9618 = vmatprep.mubr.msk.f32.mxu1 %vm196_vm1, %v11291_v53  ;;  %v11739_v26 = vpop.f32.mrf.mxu0 }
 0x17b   : > { %v11741_v28 = vpop.f32.mrf.mxu1 }
 0x17c   : > { %v11743_v41 = vpop.f32.mrf.mxu0  ;;  %9717 = vmatmul.mubr.msk.f32.gmra.mxu0 %vm196_vm1, %v11071_v34 }
 0x17d   : > { %v11745_v45 = vpop.f32.mrf.mxu1  ;;  %9619 = vmatmul.mubr.msk.f32.gmra.mxu1 %vm196_vm1, %v11301_v57  ;;  %9719 = vmatprep.mubr.msk.f32.mxu0 %vm196_vm1, %v11075_v36 }
 0x17e   : > { %9621 = vmatprep.mubr.msk.f32.mxu1 %vm196_vm1, %v11305_v61  ;;  %v11755_v30 = vpop.f32.mrf.mxu0 }
 0x17f   : > { %v11757_v32 = vpop.f32.mrf.mxu1 }
 0x180   : > { %v11759_v49 = vpop.f32.mrf.mxu0  ;;  %9720 = vmatmul.mubr.msk.f32.gmra.mxu0 %vm196_vm1, %v11085_v38 }
 0x181   : > { %v11761_v53 = vpop.f32.mrf.mxu1  ;;  %9622 = vmatmul.mubr.msk.f32.gmra.mxu1 %vm196_vm1, %v11315_v1  ;;  %9722 = vmatprep.mubr.msk.f32.mxu0 %vm196_vm1, %v11089_v40 }
 0x182   : > { %9624 = vmatprep.mubr.msk.f32.mxu1 %vm196_vm1, %v11319_v7  ;;  %v11771_v34 = vpop.f32.mrf.mxu0 }
 0x183   : > { %v11773_v36 = vpop.f32.mrf.mxu1 }
 0x184   : > { %v11775_v57 = vpop.f32.mrf.mxu0  ;;  %9723 = vmatmul.mubr.msk.f32.gmra.mxu0 %vm196_vm1, %v11099_v42 }
 0x185   : > { %v11777_v61 = vpop.f32.mrf.mxu1  ;;  %9625 = vmatmul.mubr.msk.f32.gmra.mxu1 %vm196_vm1, %v11329_v10  ;;  %9725 = vmatprep.mubr.msk.f32.mxu0 %vm196_vm1, %v11103_v44 }
 0x186   : > { %14042 = vst [vmem:[#allocation33_spill] sm:$0xff] %v11777_v61  ;;  %9627 = vmatprep.mubr.msk.f32.mxu1 %vm196_vm1, %v11333_v12  ;;  %v11787_v38 = vpop.f32.mrf.mxu0 }
 0x187   : > { %v11789_v40 = vpop.f32.mrf.mxu1 }
 0x188   : > { %14043 = vst [vmem:[#allocation34_spill] sm:$0xff] %v11789_v40  ;;  %v11791_v1 = vpop.f32.mrf.mxu0  ;;  %9726 = vmatmul.mubr.msk.f32.gmra.mxu0 %vm196_vm1, %v11113_v46 }
 0x189   : > { %v11793_v7 = vpop.f32.mrf.mxu1  ;;  %9628 = vmatmul.mubr.msk.f32.gmra.mxu1 %vm196_vm1, %v11343_v16  ;;  %9728 = vmatprep.mubr.msk.f32.mxu0 %vm196_vm1, %v11117_v48 }
 0x18a   : > { %14044 = vst [vmem:[#allocation35_spill] sm:$0xff] %v11793_v7  ;;  %9630 = vmatprep.mubr.msk.f32.mxu1 %vm196_vm1, %v11347_v3  ;;  %v11803_v42 = vpop.f32.mrf.mxu0 }
 0x18b   : > { %v11805_v44 = vpop.f32.mrf.mxu1 }
 0x18c   : > { %14045 = vst [vmem:[#allocation36_spill] sm:$0xff] %v11805_v44  ;;  %v11807_v10 = vpop.f32.mrf.mxu0  ;;  %9729 = vmatmul.mubr.msk.f32.gmra.mxu0 %vm196_vm1, %v11127_v50  ;;  %v8041_v44 = vld [vmem:[%s10971_s30 + $0x191] sm:$0xff] }
 0x18d   : > { %v11809_v12 = vpop.f32.mrf.mxu1  ;;  %9631 = vmatmul.mubr.msk.f32.gmra.mxu1 %vm196_vm1, %v11357_v14  ;;  %9731 = vmatprep.mubr.msk.f32.mxu0 %vm196_vm1, %v11131_v52 }
 0x18e   : > { %14046 = vst [vmem:[#allocation37_spill] sm:$0xff] %v11809_v12  ;;  %9633 = vmatprep.mubr.msk.f32.mxu1 %vm196_vm1, %v11361_v31  ;;  %v11819_v46 = vpop.f32.mrf.mxu0  ;;  %v14069_v12 = vld [vmem:[#allocation10_spill] sm:$0xff] }
 0x18f   : > { %v11821_v48 = vpop.f32.mrf.mxu1 }
 0x190   : > { %14047 = vst [vmem:[#allocation38_spill] sm:$0xff] %v11821_v48  ;;  %v11823_v16 = vpop.f32.mrf.mxu0  ;;  %9732 = vmatmul.mubr.msk.f32.gmra.mxu0 %vm196_vm1, %v11141_v54 }
 0x191   : > { %v11825_v3 = vpop.f32.mrf.mxu1  ;;  %9634 = vmatmul.mubr.msk.f32.gmra.mxu1 %vm196_vm1, %v11371_v39  ;;  %9734 = vmatprep.mubr.msk.f32.mxu0 %vm196_vm1, %v11145_v56 }
 0x192   : > { %14048 = vst [vmem:[#allocation39_spill] sm:$0xff] %v11825_v3  ;;  %9636 = vmatprep.mubr.msk.f32.mxu1 %vm196_vm1, %v11375_v47  ;;  %v11835_v50 = vpop.f32.mrf.mxu0  ;;  %v14066_v3 = vld [vmem:[#allocation8_spill] sm:$0xff] }
 0x193   : > { %v11837_v52 = vpop.f32.mrf.mxu1 }
 0x194   : > { %14049 = vst [vmem:[#allocation40_spill] sm:$0xff] %v11837_v52  ;;  %v11839_v14 = vpop.f32.mrf.mxu0  ;;  %9735 = vmatmul.mubr.msk.f32.gmra.mxu0 %vm196_vm1, %v11155_v58 }
 0x195   : > { %v11841_v31 = vpop.f32.mrf.mxu1  ;;  %9637 = vmatmul.mubr.msk.f32.gmra.mxu1 %vm196_vm1, %v11385_v55  ;;  %9737 = vmatprep.mubr.msk.f32.mxu0 %vm196_vm1, %v11159_v60 }
 0x196   : > { %14050 = vst [vmem:[#allocation41_spill] sm:$0xff] %v11841_v31  ;;  %9639 = vmatprep.mubr.msk.f32.mxu1 %vm196_vm1, %v11389_v63  ;;  %v11851_v54 = vpop.f32.mrf.mxu0  ;;  %v8037_v31 = vld [vmem:[%s10971_s30 + $0x169] sm:$0xff] }
 0x197   : > { %v11853_v56 = vpop.f32.mrf.mxu1 }
 0x198   : > { %14051 = vst [vmem:[#allocation42_spill] sm:$0xff] %v11853_v56  ;;  %v11855_v39 = vpop.f32.mrf.mxu0  ;;  %9738 = vmatmul.mubr.msk.f32.gmra.mxu0 %vm196_vm1, %v11169_v62 }
 0x199   : > { %v11857_v47 = vpop.f32.mrf.mxu1  ;;  %9640 = vmatmul.mubr.msk.f32.gmra.mxu1 %vm196_vm1, %v11399_v9  ;;  %9740 = vmatprep.mubr.msk.f32.mxu0 %vm196_vm1, %v11173_v0  ;;  %v8033_v9 = vld [vmem:[%s10971_s30 + $0x141] sm:$0xff] }
 0x19a   : > { %14052 = vst [vmem:[#allocation43_spill] sm:$0xff] %v11857_v47  ;;  %9642 = vmatprep.mubr.msk.f32.mxu1 %vm196_vm1, %v11403_v13  ;;  %v11867_v58 = vpop.f32.mrf.mxu0  ;;  %v8035_v47 = vld [vmem:[%s10971_s30 + $0x151] sm:$0xff] }
 0x19b   : > { %v11869_v60 = vpop.f32.mrf.mxu1 }
 0x19c   : > { %14053 = vst [vmem:[#allocation44_spill] sm:$0xff] %v11869_v60  ;;  %v11871_v55 = vpop.f32.mrf.mxu0  ;;  %9741 = vmatmul.mubr.msk.f32.gmra.mxu0 %vm196_vm1, %v11183_v4  ;;  %v14058_v4 = vld [vmem:[#allocation3_spill] sm:$0xff] }
 0x19d   : > { %v11873_v63 = vpop.f32.mrf.mxu1  ;;  %9643 = vmatmul.mubr.msk.f32.gmra.mxu1 %vm196_vm1, %v11413_v21  ;;  %9743 = vmatprep.mubr.msk.f32.mxu0 %vm196_vm1, %v11187_v6  ;;  %v14057_v21 = vld [vmem:[#allocation4_spill] sm:$0xff]  ;;  %v8034_v6 = vld [vmem:[%s10971_s30 + $0x149] sm:$0xff] }
 0x19e   : > { %14054 = vst [vmem:[#allocation45_spill] sm:$0xff] %v11873_v63  ;;  %9645 = vmatprep.mubr.msk.f32.mxu1 %vm196_vm1, %v11417_v35  ;;  %v11883_v62 = vpop.f32.mrf.mxu0  ;;  %v14059_v35 = vld [vmem:[#allocation5_spill] sm:$0xff] }
 0x19f   : > { %v11885_v0 = vpop.f32.mrf.mxu1 }
 0x1a0   : > { %14055 = vst [vmem:[#allocation46_spill] sm:$0xff] %v11885_v0  ;;  %v11888_v13 = vpop.f32.mrf.mxu0  ;;  %9744 = vmatmul.mubr.msk.f32.gmra.mxu0 %vm196_vm1, %v14058_v4  ;;  %v14063_v4 = vld [vmem:[#allocation7_spill] sm:$0xff] }
 0x1a1   : > { %v11890_v63 = vpop.f32.mrf.mxu1  ;;  %9646 = vmatmul.mubr.msk.f32.gmra.mxu1 %vm196_vm1, %v14057_v21  ;;  %9746 = vmatprep.mubr.msk.f32.mxu0 %vm196_vm1, %v8033_v9  ;;  %v14062_v21 = vld [vmem:[#allocation6_spill] sm:$0xff]  ;;  %v8036_v9 = vld [vmem:[%s10971_s30 + $0x159] sm:$0xff] }
 0x1a2   : > { %14056 = vst [vmem:[#allocation47_spill] sm:$0xff] %v11890_v63  ;;  %9648 = vmatprep.mubr.msk.f32.mxu1 %vm196_vm1, %v14059_v35  ;;  %v11900_v0 = vpop.f32.mrf.mxu0 }
 0x1a3   : > { %v11902_v60 = vpop.f32.mrf.mxu1 }
 0x1a4   : > { %14060 = vst [vmem:[#allocation4_spill] sm:$0xff] %v11902_v60  ;;  %v11905_v56 = vpop.f32.mrf.mxu0  ;;  %9747 = vmatmul.mubr.msk.f32.gmra.mxu0 %vm196_vm1, %v8034_v6  ;;  %v14067_v6 = vld [vmem:[#allocation9_spill] sm:$0xff] }
 0x1a5   : > { %v11907_v63 = vpop.f32.mrf.mxu1  ;;  %9649 = vmatmul.mubr.msk.f32.gmra.mxu1 %vm196_vm1, %v14062_v21  ;;  %9749 = vmatprep.mubr.msk.f32.mxu0 %vm196_vm1, %v8035_v47  ;;  %v8038_v47 = vld [vmem:[%s10971_s30 + $0x171] sm:$0xff] }
 0x1a6   : > { %14061 = vst [vmem:[#allocation3_spill] sm:$0xff] %v11907_v63  ;;  %9651 = vmatprep.mubr.msk.f32.mxu1 %vm196_vm1, %v14063_v4  ;;  %v11916_v35 = vpop.f32.mrf.mxu0 }
 0x1a7   : > { %v11918_v60 = vpop.f32.mrf.mxu1 }
 0x1a8   : > { %14064 = vst [vmem:[#allocation5_spill] sm:$0xff] %v11918_v60  ;;  %v11921_v52 = vpop.f32.mrf.mxu0  ;;  %9750 = vmatmul.mubr.msk.f32.gmra.mxu0 %vm196_vm1, %v8036_v9  ;;  %v8039_v60 = vld [vmem:[%s10971_s30 + $0x179] sm:$0xff]  ;;  %v14070_v9 = vld [vmem:[#allocation11_spill] sm:$0xff] }
 0x1a9   : > { %v11923_v63 = vpop.f32.mrf.mxu1  ;;  %9652 = vmatmul.mubr.msk.f32.gmra.mxu1 %vm196_vm1, %v14066_v3  ;;  %9752 = vmatprep.mubr.msk.f32.mxu0 %vm196_vm1, %v8037_v31  ;;  %v8040_v31 = vld [vmem:[%s10971_s30 + $0x181] sm:$0xff] }
 0x1aa   : > { %14065 = vst [vmem:[#allocation6_spill] sm:$0xff] %v11923_v63  ;;  %9654 = vmatprep.mubr.msk.f32.mxu1 %vm196_vm1, %v14067_v6  ;;  %v11932_v21 = vpop.f32.mrf.mxu0 }
 0x1ab   : > { %v11934_v4 = vpop.f32.mrf.mxu1 }
 0x1ac   : > { %14068 = vst [vmem:[#allocation7_spill] sm:$0xff] %v11934_v4  ;;  %v9510_v63 = vpop.f32.mrf.mxu0  ;;  %9753 = vmatmul.mubr.msk.f32.gmra.mxu0 %vm196_vm1, %v8038_v47  ;;  %v14071_v47 = vld [vmem:[#allocation12_spill] sm:$0xff] }
 0x1ad   : > { %v9412_v48 = vpop.f32.mrf.mxu1  ;;  %9655 = vmatmul.mubr.msk.f32.gmra.mxu1 %vm196_vm1, %v14069_v12  ;;  %9755 = vmatprep.mubr.msk.f32.mxu0 %vm196_vm1, %v8039_v60  ;;  %v14072_v60 = vld [vmem:[#allocation13_spill] sm:$0xff] }
 0x1ae   : > { %v1607_v3 = vadd.f32 %v9412_v48, %v11661_v51  ;;  %9657 = vmatprep.mubr.msk.f32.mxu1 %vm196_vm1, %v14070_v9  ;;  %v2247_v4 = vpop.f32.mrf.mxu0  ;;  %v8043_v9 = vld [vmem:[%s10971_s30 + $0x1a1] sm:$0xff] }
 0x1af   : > { %v1601_v6 = vpop.f32.mrf.mxu1 }
 0x1b0   : > { %v11946_v7 = vadd.f32 %v9510_v63, %v1607_v3  ;;  %v1602_v40 = vadd.f32 %v1601_v6, %v11678_v25  ;;  %v9513_v61 = vpop.f32.mrf.mxu0  ;;  %9756 = vmatmul.mubr.msk.f32.gmra.mxu0 %vm196_vm1, %v8040_v31  ;;  %v8042_v63 = vld [vmem:[%s10971_s30 + $0x199] sm:$0xff] }
 0x1b1   : > { %v9415_v12 = vpop.f32.mrf.mxu1  ;;  %9658 = vmatmul.mubr.msk.f32.gmra.mxu1 %vm196_vm1, %v14071_v47  ;;  %9758 = vmatprep.mubr.msk.f32.mxu0 %vm196_vm1, %v8041_v44 }
 0x1b2   : > { %v11952_v51 = vadd.f32 %v2247_v4, %v1602_v40  ;;  %v1617_v48 = vadd.f32 %v9415_v12, %v11693_v19  ;;  %9660 = vmatprep.mubr.msk.f32.mxu1 %vm196_vm1, %v14072_v60  ;;  %v2257_v25 = vpop.f32.mrf.mxu0  ;;  %v14073_v4 = vld [vmem:[#allocation14_spill] sm:$0xff]  ;;  %v14074_v12 = vld [vmem:[#allocation15_spill] sm:$0xff]  ;;  %v8045_v60 = vld [vmem:[%s10971_s30 + $0x1b9] sm:$0xff] }
 0x1b3   : > { %v1611_v3 = vpop.f32.mrf.mxu1 }
 0x1b4   : > { %v11960_v6 = vadd.f32 %v9513_v61, %v1617_v48  ;;  %v1612_v47 = vadd.f32 %v1611_v3, %v11705_v20  ;;  %v9516_v40 = vpop.f32.mrf.mxu0  ;;  %9759 = vmatmul.mubr.msk.f32.gmra.mxu0 %vm196_vm1, %v8042_v63  ;;  %v8044_v61 = vld [vmem:[%s10971_s30 + $0x1a9] sm:$0xff] }
 0x1b5   : > { %v9418_v31 = vpop.f32.mrf.mxu1  ;;  %9661 = vmatmul.mubr.msk.f32.gmra.mxu1 %vm196_vm1, %v14073_v4  ;;  %9761 = vmatprep.mubr.msk.f32.mxu0 %vm196_vm1, %v8043_v9 }
 0x1b6   : > { %v11966_v19 = vadd.f32 %v2257_v25, %v1612_v47  ;;  %v1627_v44 = vadd.f32 %v9418_v31, %v11711_v29  ;;  %9663 = vmatprep.mubr.msk.f32.mxu1 %vm196_vm1, %v14074_v12  ;;  %v2267_v20 = vpop.f32.mrf.mxu0  ;;  %v14075_v47 = vld [vmem:[#allocation16_spill] sm:$0xff]  ;;  %v14076_v31 = vld [vmem:[#allocation17_spill] sm:$0xff]  ;;  %v8047_v12 = vld [vmem:[%s10971_s30 + $0x1c9] sm:$0xff] }
 0x1b7   : > { %v1621_v48 = vpop.f32.mrf.mxu1 }
 0x1b8   : > { %v11974_v3 = vadd.f32 %v9516_v40, %v1627_v44  ;;  %v1622_v4 = vadd.f32 %v1621_v48, %v11723_v22  ;;  %v9519_v25 = vpop.f32.mrf.mxu0  ;;  %9762 = vmatmul.mubr.msk.f32.gmra.mxu0 %vm196_vm1, %v8044_v61  ;;  %v8046_v40 = vld [vmem:[%s10971_s30 + $0x1c1] sm:$0xff] }
 0x1b9   : > { %v9421_v63 = vpop.f32.mrf.mxu1  ;;  %9664 = vmatmul.mubr.msk.f32.gmra.mxu1 %vm196_vm1, %v14075_v47  ;;  %9764 = vmatprep.mubr.msk.f32.mxu0 %vm196_vm1, %v8045_v60 }
 0x1ba   : > { %v11980_v29 = vadd.f32 %v2267_v20, %v1622_v4  ;;  %v1637_v9 = vadd.f32 %v9421_v63, %v11727_v33  ;;  %9666 = vmatprep.mubr.msk.f32.mxu1 %vm196_vm1, %v14076_v31  ;;  %v2277_v22 = vpop.f32.mrf.mxu0  ;;  %v14077_v4 = vld [vmem:[#allocation18_spill] sm:$0xff]  ;;  %v14078_v63 = vld [vmem:[#allocation19_spill] sm:$0xff] }
 0x1bb   : > { %v1631_v44 = vpop.f32.mrf.mxu1  ;;  %v8049_v31 = vld [vmem:[%s10971_s30 + $0x1e1] sm:$0xff] }
 0x1bc   : > { %v11988_v48 = vadd.f32 %v9519_v25, %v1637_v9  ;;  %v1632_v47 = vadd.f32 %v1631_v44, %v11739_v26  ;;  %v9522_v20 = vpop.f32.mrf.mxu0  ;;  %9765 = vmatmul.mubr.msk.f32.gmra.mxu0 %vm196_vm1, %v8046_v40  ;;  %v8048_v25 = vld [vmem:[%s10971_s30 + $0x1d1] sm:$0xff] }
 0x1bd   : > { %v9424_v61 = vpop.f32.mrf.mxu1  ;;  %9667 = vmatmul.mubr.msk.f32.gmra.mxu1 %vm196_vm1, %v14077_v4  ;;  %9767 = vmatprep.mubr.msk.f32.mxu0 %vm196_vm1, %v8047_v12 }
 0x1be   : > { %v11994_v33 = vadd.f32 %v2277_v22, %v1632_v47  ;;  %v1647_v60 = vadd.f32 %v9424_v61, %v11743_v41  ;;  %9669 = vmatprep.mubr.msk.f32.mxu1 %vm196_vm1, %v14078_v63  ;;  %v2287_v26 = vpop.f32.mrf.mxu0  ;;  %v14079_v47 = vld [vmem:[#allocation20_spill] sm:$0xff]  ;;  %v14080_v61 = vld [vmem:[#allocation21_spill] sm:$0xff] }
 0x1bf   : > { %v1641_v9 = vpop.f32.mrf.mxu1  ;;  %v8051_v63 = vld [vmem:[%s10971_s30 + $0x1f1] sm:$0xff] }
 0x1c0   : > { %v12002_v44 = vadd.f32 %v9522_v20, %v1647_v60  ;;  %v1642_v4 = vadd.f32 %v1641_v9, %v11755_v30  ;;  %v9525_v22 = vpop.f32.mrf.mxu0  ;;  %9768 = vmatmul.mubr.msk.f32.gmra.mxu0 %vm196_vm1, %v8048_v25  ;;  %v8050_v20 = vld [vmem:[%s10971_s30 + $0x1e9] sm:$0xff] }
 0x1c1   : > { %v9427_v40 = vpop.f32.mrf.mxu1  ;;  %9670 = vmatmul.mubr.msk.f32.gmra.mxu1 %vm196_vm1, %v14079_v47  ;;  %9770 = vmatprep.mubr.msk.f32.mxu0 %vm196_vm1, %v8049_v31 }
 0x1c2   : > { %v12008_v41 = vadd.f32 %v2287_v26, %v1642_v4  ;;  %v1657_v12 = vadd.f32 %v9427_v40, %v11759_v49  ;;  %9672 = vmatprep.mubr.msk.f32.mxu1 %vm196_vm1, %v14080_v61  ;;  %v2297_v30 = vpop.f32.mrf.mxu0  ;;  %v14081_v4 = vld [vmem:[#allocation22_spill] sm:$0xff]  ;;  %v14082_v40 = vld [vmem:[#allocation23_spill] sm:$0xff] }
 0x1c3   : > { %v1651_v60 = vpop.f32.mrf.mxu1  ;;  %v8053_v61 = vld [vmem:[%s10971_s30 + $0x209] sm:$0xff] }
 0x1c4   : > { %v12016_v9 = vadd.f32 %v9525_v22, %v1657_v12  ;;  %v1652_v47 = vadd.f32 %v1651_v60, %v11771_v34  ;;  %v9528_v26 = vpop.f32.mrf.mxu0  ;;  %9771 = vmatmul.mubr.msk.f32.gmra.mxu0 %vm196_vm1, %v8050_v20  ;;  %v8052_v22 = vld [vmem:[%s10971_s30 + $0x1f9] sm:$0xff] }
 0x1c5   : > { %v9430_v25 = vpop.f32.mrf.mxu1  ;;  %9673 = vmatmul.mubr.msk.f32.gmra.mxu1 %vm196_vm1, %v14081_v4  ;;  %9773 = vmatprep.mubr.msk.f32.mxu0 %vm196_vm1, %v8051_v63 }
 0x1c6   : > { %v12022_v49 = vadd.f32 %v2297_v30, %v1652_v47  ;;  %v1667_v31 = vadd.f32 %v9430_v25, %v11775_v57  ;;  %9675 = vmatprep.mubr.msk.f32.mxu1 %vm196_vm1, %v14082_v40  ;;  %v2307_v34 = vpop.f32.mrf.mxu0  ;;  %v14083_v47 = vld [vmem:[#allocation24_spill] sm:$0xff]  ;;  %v14084_v25 = vld [vmem:[#allocation25_spill] sm:$0xff] }
 0x1c7   : > { %v1661_v12 = vpop.f32.mrf.mxu1  ;;  %v8055_v40 = vld [vmem:[%s10971_s30 + $0x219] sm:$0xff] }
 0x1c8   : > { %v12030_v60 = vadd.f32 %v9528_v26, %v1667_v31  ;;  %v1662_v4 = vadd.f32 %v1661_v12, %v11787_v38  ;;  %v9531_v30 = vpop.f32.mrf.mxu0  ;;  %9774 = vmatmul.mubr.msk.f32.gmra.mxu0 %vm196_vm1, %v8052_v22  ;;  %v8054_v26 = vld [vmem:[%s10971_s30 + $0x211] sm:$0xff] }
 0x1c9   : > { %v9433_v20 = vpop.f32.mrf.mxu1  ;;  %9676 = vmatmul.mubr.msk.f32.gmra.mxu1 %vm196_vm1, %v14083_v47  ;;  %9776 = vmatprep.mubr.msk.f32.mxu0 %vm196_vm1, %v8053_v61 }
 0x1ca   : > { %v12036_v57 = vadd.f32 %v2307_v34, %v1662_v4  ;;  %v1677_v63 = vadd.f32 %v9433_v20, %v11791_v1  ;;  %9678 = vmatprep.mubr.msk.f32.mxu1 %vm196_vm1, %v14084_v25  ;;  %v2317_v38 = vpop.f32.mrf.mxu0  ;;  %v14085_v4 = vld [vmem:[#allocation26_spill] sm:$0xff]  ;;  %v14086_v20 = vld [vmem:[#allocation27_spill] sm:$0xff] }
 0x1cb   : > { %v1671_v31 = vpop.f32.mrf.mxu1  ;;  %v8057_v25 = vld [vmem:[%s10971_s30 + $0x231] sm:$0xff] }
 0x1cc   : > { %v12044_v12 = vadd.f32 %v9531_v30, %v1677_v63  ;;  %v1672_v47 = vadd.f32 %v1671_v31, %v11803_v42  ;;  %v9534_v34 = vpop.f32.mrf.mxu0  ;;  %9777 = vmatmul.mubr.msk.f32.gmra.mxu0 %vm196_vm1, %v8054_v26  ;;  %v8056_v30 = vld [vmem:[%s10971_s30 + $0x221] sm:$0xff] }
 0x1cd   : > { %v9436_v22 = vpop.f32.mrf.mxu1  ;;  %9679 = vmatmul.mubr.msk.f32.gmra.mxu1 %vm196_vm1, %v14085_v4  ;;  %9779 = vmatprep.mubr.msk.f32.mxu0 %vm196_vm1, %v8055_v40 }
 0x1ce   : > { %v12050_v1 = vadd.f32 %v2317_v38, %v1672_v47  ;;  %v1687_v61 = vadd.f32 %v9436_v22, %v11807_v10  ;;  %9681 = vmatprep.mubr.msk.f32.mxu1 %vm196_vm1, %v14086_v20  ;;  %v2327_v42 = vpop.f32.mrf.mxu0  ;;  %v14087_v47 = vld [vmem:[#allocation28_spill] sm:$0xff]  ;;  %v14088_v22 = vld [vmem:[#allocation29_spill] sm:$0xff] }
 0x1cf   : > { %v1681_v63 = vpop.f32.mrf.mxu1  ;;  %v8059_v20 = vld [vmem:[%s10971_s30 + $0x241] sm:$0xff] }
 0x1d0   : > { %v12058_v31 = vadd.f32 %v9534_v34, %v1687_v61  ;;  %v1682_v4 = vadd.f32 %v1681_v63, %v11819_v46  ;;  %v9537_v38 = vpop.f32.mrf.mxu0  ;;  %9780 = vmatmul.mubr.msk.f32.gmra.mxu0 %vm196_vm1, %v8056_v30  ;;  %v8058_v34 = vld [vmem:[%s10971_s30 + $0x239] sm:$0xff] }
 0x1d1   : > { %v9439_v26 = vpop.f32.mrf.mxu1  ;;  %9682 = vmatmul.mubr.msk.f32.gmra.mxu1 %vm196_vm1, %v14087_v47  ;;  %9782 = vmatprep.mubr.msk.f32.mxu0 %vm196_vm1, %v8057_v25 }
 0x1d2   : > { %v12064_v10 = vadd.f32 %v2327_v42, %v1682_v4  ;;  %v1697_v40 = vadd.f32 %v9439_v26, %v11823_v16  ;;  %9684 = vmatprep.mubr.msk.f32.mxu1 %vm196_vm1, %v14088_v22  ;;  %v2337_v46 = vpop.f32.mrf.mxu0  ;;  %v14089_v4 = vld [vmem:[#allocation30_spill] sm:$0xff]  ;;  %v14090_v26 = vld [vmem:[#allocation31_spill] sm:$0xff]  ;;  %v8061_v22 = vld [vmem:[%s10971_s30 + $0x259] sm:$0xff] }
 0x1d3   : > { %v1691_v61 = vpop.f32.mrf.mxu1 }
 0x1d4   : > { %v12072_v63 = vadd.f32 %v9537_v38, %v1697_v40  ;;  %v1692_v47 = vadd.f32 %v1691_v61, %v11835_v50  ;;  %v9540_v42 = vpop.f32.mrf.mxu0  ;;  %9783 = vmatmul.mubr.msk.f32.gmra.mxu0 %vm196_vm1, %v8058_v34  ;;  %v8060_v38 = vld [vmem:[%s10971_s30 + $0x249] sm:$0xff] }
 0x1d5   : > { %v9442_v30 = vpop.f32.mrf.mxu1  ;;  %9685 = vmatmul.mubr.msk.f32.gmra.mxu1 %vm196_vm1, %v14089_v4  ;;  %9785 = vmatprep.mubr.msk.f32.mxu0 %vm196_vm1, %v8059_v20 }
 0x1d6   : > { %v12078_v16 = vadd.f32 %v2337_v46, %v1692_v47  ;;  %v1707_v25 = vadd.f32 %v9442_v30, %v11839_v14  ;;  %9687 = vmatprep.mubr.msk.f32.mxu1 %vm196_vm1, %v14090_v26  ;;  %v2347_v50 = vpop.f32.mrf.mxu0  ;;  %v14091_v47 = vld [vmem:[#allocation32_spill] sm:$0xff]  ;;  %v8062_v30 = vld [vmem:[%s10971_s30 + $0x261] sm:$0xff] }
 0x1d7   : > { %v1701_v40 = vpop.f32.mrf.mxu1 }
 0x1d8   : > { %v12086_v61 = vadd.f32 %v9540_v42, %v1707_v25  ;;  %v1702_v4 = vadd.f32 %v1701_v40, %v11851_v54  ;;  %v9543_v46 = vpop.f32.mrf.mxu0  ;;  %9786 = vmatmul.mubr.msk.f32.gmra.mxu0 %vm196_vm1, %v8060_v38  ;;  %v8063_v25 = vld [vmem:[%s10971_s30 + $0x269] sm:$0xff] }
 0x1d9   : > { %v9445_v34 = vpop.f32.mrf.mxu1  ;;  %9688 = vmatmul.mubr.msk.f32.gmra.mxu1 %vm196_vm1, %v11623_v59  ;;  %9788 = vmatprep.mubr.msk.f32.mxu0 %vm196_vm1, %v8061_v22  ;;  %v8064_v22 = vld [vmem:[%s10971_s30 + $0x271] sm:$0xff] }
 0x1da   : > { %v12092_v14 = vadd.f32 %v2347_v50, %v1702_v4  ;;  %v1717_v20 = vadd.f32 %v9445_v34, %v11855_v39  ;;  %9690 = vmatprep.mubr.msk.f32.mxu1 %vm196_vm1, %v14091_v47  ;;  %v2357_v54 = vpop.f32.mrf.mxu0  ;;  %v12114_v34 = vld [vmem:[%s10971_s30 + $0x280] sm:$0xff] }
 0x1db   : > { %v1711_v42 = vpop.f32.mrf.mxu1 }
 0x1dc   : > { %v12100_v26 = vadd.f32 %v9543_v46, %v1717_v20  ;;  %v1712_v59 = vadd.f32 %v1711_v42, %v11867_v58  ;;  %v9546_v40 = vpop.f32.mrf.mxu0  ;;  %9789 = vmatmul.mubr.msk.f32.gmra.mxu0 %vm196_vm1, %v8062_v30  ;;  %v12130_v42 = vld [vmem:[%s10971_s30 + $0x288] sm:$0xff] }
 0x1dd   : > { %v9448_v38 = vpop.f32.mrf.mxu1  ;;  %9691 = vmatmul.mubr.msk.f32.gmra.mxu1 %vm196_vm1, %v11637_v27  ;;  %9791 = vmatprep.mubr.msk.f32.mxu0 %vm196_vm1, %v8063_v25  ;;  %v8065_v27 = vld [vmem:[%s10971_s30 + $0x281] sm:$0xff] }
 0x1de   : > { %v12106_v39 = vadd.f32 %v2357_v54, %v1712_v59  ;;  %v1727_v50 = vadd.f32 %v9448_v38, %v11871_v55  ;;  %9693 = vmatprep.mubr.msk.f32.mxu1 %vm196_vm1, %v11641_v43  ;;  %v2367_v4 = vpop.f32.mrf.mxu0  ;;  %v12134_v59 = vld [vmem:[%s10971_s30 + $0x290] sm:$0xff] }
 0x1df   : > { %v1721_v58 = vpop.f32.mrf.mxu1 }
 0x1e0   : > { %v12117_v46 = vadd.f32 %v9546_v40, %v1727_v50  ;;  %v1722_v20 = vadd.f32 %v1721_v58, %v11883_v62  ;;  %v9549_v47 = vpop.f32.mrf.mxu0  ;;  %9792 = vmatmul.mubr.msk.f32.gmra.mxu0 %vm196_vm1, %v8064_v22  ;;  %v8066_v62 = vld [vmem:[%s10971_s30 + $0x289] sm:$0xff] }
 0x1e1   : > { %v9451_v55 = vpop.f32.mrf.mxu1  ;;  %9694 = vmatmul.mubr.msk.f32.gmra.mxu1 %vm196_vm1, %v11651_v11  ;;  %9794 = vmatprep.mubr.msk.f32.mxu0 %vm196_vm1, %v8065_v27  ;;  %v8067_v11 = vld [vmem:[%s10971_s30 + $0x291] sm:$0xff] }
 0x1e2   : > { %v12123_v43 = vadd.f32 %v2367_v4, %v1722_v20  ;;  %v1737_v30 = vadd.f32 %v9451_v55, %v11888_v13  ;;  %9696 = vmatprep.mubr.msk.f32.mxu1 %vm196_vm1, %v12114_v34  ;;  %v2377_v25 = vpop.f32.mrf.mxu0  ;;  %v12150_v4 = vld [vmem:[%s10971_s30 + $0x298] sm:$0xff]  ;;  %v8135_v55 = vld [vmem:[%s10971_s30 + $0x2a] sm:$0xff] }
 0x1e3   : > { %v1731_v54 = vpop.f32.mrf.mxu1 }
 0x1e4   : > { %v12137_v38 = vadd.f32 %v9549_v47, %v1737_v30  ;;  %v1732_v13 = vadd.f32 %v1731_v54, %v11900_v0  ;;  %v9552_v50 = vpop.f32.mrf.mxu0  ;;  %9795 = vmatmul.mubr.msk.f32.gmra.mxu0 %vm196_vm1, %v8066_v62  ;;  %v8068_v0 = vld [vmem:[%s10971_s30 + $0x299] sm:$0xff]  ;;  %v8267_v47 = vld [vmem:[%s10971_s30 + $0x50] sm:$0xff] }
 0x1e5   : > { %v9454_v40 = vpop.f32.mrf.mxu1  ;;  %9697 = vmatmul.mubr.msk.f32.gmra.mxu1 %vm196_vm1, %v12130_v42  ;;  %9797 = vmatprep.mubr.msk.f32.mxu0 %vm196_vm1, %v8067_v11 }
 0x1e6   : > { %v12143_v22 = vadd.f32 %v2377_v25, %v1732_v13  ;;  %v1747_v58 = vadd.f32 %v9454_v40, %v11905_v56  ;;  %9699 = vmatprep.mubr.msk.f32.mxu1 %vm196_vm1, %v12134_v59  ;;  %v2387_v20 = vpop.f32.mrf.mxu0  ;;  %v8136_v13 = vld [vmem:[%s10971_s30 + $0x32] sm:$0xff] }
 0x1e7   : > { %v1741_v27 = vpop.f32.mrf.mxu1  ;;  %v8268_v40 = vld [vmem:[%s10971_s30 + $0x58] sm:$0xff] }
 0x1e8   : > { %v12155_v30 = vadd.f32 %v9552_v50, %v1747_v58  ;;  %v1742_v62 = vadd.f32 %v1741_v27, %v11916_v35  ;;  %v9555_v54 = vpop.f32.mrf.mxu0  ;;  %9798 = vmatmul.mubr.msk.f32.gmra.mxu0 %vm196_vm1, %v8068_v0  ;;  %v8269_v0 = vld [vmem:[%s10971_s30 + $0x60] sm:$0xff] }
 0x1e9   : > { %v9457_v56 = vpop.f32.mrf.mxu1  ;;  %9700 = vmatmul.mubr.msk.f32.gmra.mxu1 %vm196_vm1, %v12150_v4  ;;  %9900 = vmatprep.mubr.msk.f32.mxu0 %vm196_vm1, %v8267_v47 }
 0x1ea   : > { %14092 = vst [vmem:[#allocation8_spill] sm:$0xff] %v12155_v30  ;;  %v12161_v25 = vadd.f32 %v2387_v20, %v1742_v62  ;;  %v1757_v11 = vadd.f32 %v9457_v56, %v11921_v52  ;;  %9802 = vmatprep.mubr.msk.f32.mxu1 %vm196_vm1, %v8135_v55  ;;  %v2397_v50 = vpop.f32.mrf.mxu0  ;;  %v8137_v30 = vld [vmem:[%s10971_s30 + $0x3a] sm:$0xff]  ;;  %v8270_v62 = vld [vmem:[%s10971_s30 + $0x68] sm:$0xff] }
 0x1eb   : > { %v1751_v35 = vpop.f32.mrf.mxu1 }
 0x1ec   : > { %v12168_v58 = vadd.f32 %v9555_v54, %v1757_v11  ;;  %v1752_v27 = vadd.f32 %v1751_v35, %v11932_v21  ;;  %v9558_v52 = vpop.f32.mrf.mxu0  ;;  %9901 = vmatmul.mubr.msk.f32.vlgmr.msra.gmra.mxu0 %vm196_vm1, %v8268_v40  ;;  %v8138_v21 = vld [vmem:[%s10971_s30 + $0x42] sm:$0xff]  ;;  %v12187_v11 = vld [vmem:[%s10971_s30 + $0x52] sm:$0xff] }
 0x1ed   : > { %v9460_v20 = vpop.f32.mrf.mxu1  ;;  %9803 = vmatmul.mubr.msk.f32.vlgmr.msra.gmra.mxu1 %vm196_vm1, %v8136_v13  ;;  %10095 = vmatpush3.msk.msra.mxu0 %vm951_vm0, %v11691_v2 }
 0x1ee   : > { %v12175_v55 = vadd.f32 %v2397_v50, %v1752_v27  ;;  %v1767_v47 = vadd.f32 %v9460_v20, %v11663_v8  ;;  %9997 = vmatpush3.msk.msra.mxu1 %vm951_vm0, %v11676_v18  ;;  %v2407_v54 = vpop.f32.mrf.mxu0  ;;  %9805 = vmatprep.mubr.msk.f32.mxu1 %vm196_vm1, %v8137_v30  ;;  %v8271_v8 = vld [vmem:[%s10971_s30 + $0x78] sm:$0xff]  ;;  %v8272_v27 = vld [vmem:[%s10971_s30 + $0x80] sm:$0xff] }
 0x1ef   : > { %v1761_v56 = vpop.f32.mrf.mxu1  ;;  %9903 = vmatprep.mubr.msk.f32.mxu0 %vm196_vm1, %v8269_v0  ;;  %v12202_v50 = vld [vmem:[%s10971_s30 + $0x5a] sm:$0xff]  ;;  %v12206_v20 = vld [vmem:[%s10971_s30 + $0x62] sm:$0xff] }
 0x1f0   : > { %v12190_v13 = vadd.f32 %v9558_v52, %v1767_v47  ;;  %v1762_v18 = vadd.f32 %v1761_v56, %v11680_v5  ;;  %v9561_v40 = vpop.f32.mrf.mxu0  ;;  %9904 = vmatmul.mubr.msk.f32.gmra.mxu0 %vm196_vm1, %v8270_v62  ;;  %v8273_v52 = vld [vmem:[%s10971_s30 + $0x88] sm:$0xff] }
 0x1f1   : > { %v9463_v2 = vpop.f32.mrf.mxu1  ;;  %9806 = vmatmul.mubr.msk.f32.gmra.mxu1 %vm196_vm1, %v8138_v21  ;;  %9906 = vmatprep.mubr.msk.f32.mxu0 %vm196_vm1, %v8271_v8  ;;  %v12222_v8 = vld [vmem:[%s10971_s30 + $0x6a] sm:$0xff] }
 0x1f2   : > { %v12195_v35 = vadd.f32 %v2407_v54, %v1762_v18  ;;  %v1777_v30 = vadd.f32 %v9463_v2, %v11695_v23  ;;  %9808 = vmatprep.mubr.msk.f32.mxu1 %vm196_vm1, %v12187_v11  ;;  %v2417_v0 = vpop.f32.mrf.mxu0 }
 0x1f3   : > { %v1771_v5 = vpop.f32.mrf.mxu1 }
 0x1f4   : > { %v12209_v47 = vadd.f32 %v9561_v40, %v1777_v30  ;;  %v1772_v23 = vadd.f32 %v1771_v5, %v11707_v15  ;;  %v9564_v62 = vpop.f32.mrf.mxu0  ;;  %9907 = vmatmul.mubr.msk.f32.gmra.mxu0 %vm196_vm1, %v8272_v27  ;;  %v8274_v15 = vld [vmem:[%s10971_s30 + $0x90] sm:$0xff]  ;;  %v12226_v40 = vld [vmem:[%s10971_s30 + $0x7a] sm:$0xff] }
 0x1f5   : > { %v9466_v21 = vpop.f32.mrf.mxu1  ;;  %9809 = vmatmul.mubr.msk.f32.gmra.mxu1 %vm196_vm1, %v12202_v50  ;;  %9909 = vmatprep.mubr.msk.f32.mxu0 %vm196_vm1, %v8273_v52  ;;  %v8275_v30 = vld [vmem:[%s10971_s30 + $0xa0] sm:$0xff] }
 0x1f6   : > { %v12215_v56 = vadd.f32 %v2417_v0, %v1772_v23  ;;  %v1787_v54 = vadd.f32 %v9466_v21, %v11713_v17  ;;  %9811 = vmatprep.mubr.msk.f32.mxu1 %vm196_vm1, %v12206_v20  ;;  %v2427_v2 = vpop.f32.mrf.mxu0  ;;  %v12242_v21 = vld [vmem:[%s10971_s30 + $0x82] sm:$0xff] }
 0x1f7   : > { %v1781_v18 = vpop.f32.mrf.mxu1 }
 0x1f8   : > { %v12229_v27 = vadd.f32 %v9564_v62, %v1787_v54  ;;  %v1782_v17 = vadd.f32 %v1781_v18, %v11725_v24  ;;  %v9567_v0 = vpop.f32.mrf.mxu0  ;;  %9910 = vmatmul.mubr.msk.f32.gmra.mxu0 %vm196_vm1, %v8274_v15  ;;  %v8276_v24 = vld [vmem:[%s10971_s30 + $0xa8] sm:$0xff]  ;;  %v8277_v15 = vld [vmem:[%s10971_s30 + $0xb0] sm:$0xff] }
 0x1f9   : > { %v9469_v5 = vpop.f32.mrf.mxu1  ;;  %9812 = vmatmul.mubr.msk.f32.gmra.mxu1 %vm196_vm1, %v12222_v8  ;;  %9912 = vmatprep.mubr.msk.f32.mxu0 %vm196_vm1, %v8275_v30  ;;  %v12246_v18 = vld [vmem:[%s10971_s30 + $0x8a] sm:$0xff] }
 0x1fa   : > { %v12235_v52 = vadd.f32 %v2427_v2, %v1782_v17  ;;  %v1797_v23 = vadd.f32 %v9469_v5, %v11729_v37  ;;  %9814 = vmatprep.mubr.msk.f32.mxu1 %vm196_vm1, %v12226_v40  ;;  %v2437_v54 = vpop.f32.mrf.mxu0 }
 0x1fb   : > { %v1791_v62 = vpop.f32.mrf.mxu1 }
 0x1fc   : > { %14093 = vst [vmem:[#allocation9_spill] sm:$0xff] %v12235_v52  ;;  %v12249_v2 = vadd.f32 %v9567_v0, %v1797_v23  ;;  %v1792_v37 = vadd.f32 %v1791_v62, %v11741_v28  ;;  %v9570_v5 = vpop.f32.mrf.mxu0  ;;  %9913 = vmatmul.mubr.msk.f32.gmra.mxu0 %vm196_vm1, %v8276_v24  ;;  %v12262_v0 = vld [vmem:[%s10971_s30 + $0x92] sm:$0xff]  ;;  %v8279_v24 = vld [vmem:[%s10971_s30 + $0xc8] sm:$0xff] }
 0x1fd   : > { %v9472_v17 = vpop.f32.mrf.mxu1  ;;  %9815 = vmatmul.mubr.msk.f32.gmra.mxu1 %vm196_vm1, %v12242_v21  ;;  %9915 = vmatprep.mubr.msk.f32.mxu0 %vm196_vm1, %v8277_v15  ;;  %v8278_v28 = vld [vmem:[%s10971_s30 + $0xb8] sm:$0xff] }
 0x1fe   : > { %14094 = vst [vmem:[#allocation10_spill] sm:$0xff] %v12249_v2  ;;  %v12255_v30 = vadd.f32 %v2437_v54, %v1792_v37  ;;  %v1807_v52 = vadd.f32 %v9472_v17, %v11745_v45  ;;  %9817 = vmatprep.mubr.msk.f32.mxu1 %vm196_vm1, %v12246_v18  ;;  %v2447_v62 = vpop.f32.mrf.mxu0  ;;  %v12266_v2 = vld [vmem:[%s10971_s30 + $0xa2] sm:$0xff] }
 0x1ff   : > { %v1801_v23 = vpop.f32.mrf.mxu1  ;;  %14096 = vst [vmem:[#allocation12_spill] sm:$0xff] %v12266_v2 }
 0x200   : > { %14095 = vst [vmem:[#allocation11_spill] sm:$0xff] %v12255_v30  ;;  %v12269_v54 = vadd.f32 %v9570_v5, %v1807_v52  ;;  %v1802_v45 = vadd.f32 %v1801_v23, %v11757_v32  ;;  %v9573_v17 = vpop.f32.mrf.mxu0  ;;  %9916 = vmatmul.mubr.msk.f32.gmra.mxu0 %vm196_vm1, %v8278_v28  ;;  %v12282_v52 = vld [vmem:[%s10971_s30 + $0xaa] sm:$0xff]  ;;  %v8281_v28 = vld [vmem:[%s10971_s30 + $0xd8] sm:$0xff] }
 0x201   : > { %v9475_v37 = vpop.f32.mrf.mxu1  ;;  %9818 = vmatmul.mubr.msk.f32.gmra.mxu1 %vm196_vm1, %v12262_v0  ;;  %9918 = vmatprep.mubr.msk.f32.mxu0 %vm196_vm1, %v8279_v24  ;;  %14099 = vst [vmem:[#allocation15_spill] sm:$0xff] %v12282_v52  ;;  %v8280_v32 = vld [vmem:[%s10971_s30 + $0xd0] sm:$0xff] }
 0x202   : > { %14097 = vst [vmem:[#allocation13_spill] sm:$0xff] %v12269_v54  ;;  %v12275_v15 = vadd.f32 %v2447_v62, %v1802_v45  ;;  %v1817_v30 = vadd.f32 %v9475_v37, %v11761_v53  ;;  %9820 = vmatprep.mubr.msk.f32.mxu1 %vm196_vm1, %v12266_v2  ;;  %v2457_v23 = vpop.f32.mrf.mxu0  ;;  %v12286_v54 = vld [vmem:[%s10971_s30 + $0xb2] sm:$0xff] }
 0x203   : > { %v1811_v5 = vpop.f32.mrf.mxu1  ;;  %14100 = vst [vmem:[#allocation16_spill] sm:$0xff] %v12286_v54 }
 0x204   : > { %14098 = vst [vmem:[#allocation14_spill] sm:$0xff] %v12275_v15  ;;  %v12289_v62 = vadd.f32 %v9573_v17, %v1817_v30  ;;  %v1812_v53 = vadd.f32 %v1811_v5, %v11773_v36  ;;  %v9576_v37 = vpop.f32.mrf.mxu0  ;;  %9919 = vmatmul.mubr.msk.f32.gmra.mxu0 %vm196_vm1, %v8280_v32  ;;  %v14103_v15 = vld [vmem:[#allocation33_spill] sm:$0xff]  ;;  %v8283_v32 = vld [vmem:[%s10971_s30 + $0xf0] sm:$0xff] }
 0x205   : > { %v9478_v45 = vpop.f32.mrf.mxu1  ;;  %9821 = vmatmul.mubr.msk.f32.gmra.mxu1 %vm196_vm1, %v12282_v52  ;;  %9921 = vmatprep.mubr.msk.f32.mxu0 %vm196_vm1, %v8281_v28  ;;  %v12302_v30 = vld [vmem:[%s10971_s30 + $0xba] sm:$0xff] }
 0x206   : > { %14101 = vst [vmem:[#allocation17_spill] sm:$0xff] %v12289_v62  ;;  %v12295_v24 = vadd.f32 %v2457_v23, %v1812_v53  ;;  %v1827_v2 = vadd.f32 %v9478_v45, %v14103_v15  ;;  %9823 = vmatprep.mubr.msk.f32.mxu1 %vm196_vm1, %v12286_v54  ;;  %14104 = vst [vmem:[#allocation19_spill] sm:$0xff] %v12302_v30  ;;  %v8282_v36 = vld [vmem:[%s10971_s30 + $0xe0] sm:$0xff]  ;;  %v2467_v5 = vpop.f32.mrf.mxu0  ;;  %v12306_v62 = vld [vmem:[%s10971_s30 + $0xca] sm:$0xff] }
 0x207   : > { %v1821_v17 = vpop.f32.mrf.mxu1  ;;  %14105 = vst [vmem:[#allocation20_spill] sm:$0xff] %v12306_v62  ;;  %v14107_v15 = vld [vmem:[#allocation34_spill] sm:$0xff]  ;;  %v14109_v54 = vld [vmem:[#allocation35_spill] sm:$0xff] }
 0x208   : > { %14102 = vst [vmem:[#allocation18_spill] sm:$0xff] %v12295_v24  ;;  %v12309_v23 = vadd.f32 %v9576_v37, %v1827_v2  ;;  %v1822_v53 = vadd.f32 %v1821_v17, %v14107_v15  ;;  %v9579_v24 = vpop.f32.mrf.mxu0  ;;  %9922 = vmatmul.mubr.msk.f32.gmra.mxu0 %vm196_vm1, %v8282_v36  ;;  %v12322_v2 = vld [vmem:[%s10971_s30 + $0xd2] sm:$0xff]  ;;  %v8285_v36 = vld [vmem:[%s10971_s30 + $0x100] sm:$0xff] }
 0x209   : > { %v9481_v45 = vpop.f32.mrf.mxu1  ;;  %9824 = vmatmul.mubr.msk.f32.gmra.mxu1 %vm196_vm1, %v12302_v30  ;;  %9924 = vmatprep.mubr.msk.f32.mxu0 %vm196_vm1, %v8283_v32  ;;  %14110 = vst [vmem:[#allocation23_spill] sm:$0xff] %v12322_v2  ;;  %v8284_v37 = vld [vmem:[%s10971_s30 + $0xf8] sm:$0xff] }
 0x20a   : > { %14106 = vst [vmem:[#allocation21_spill] sm:$0xff] %v12309_v23  ;;  %v12315_v28 = vadd.f32 %v2467_v5, %v1822_v53  ;;  %v1837_v52 = vadd.f32 %v9481_v45, %v14109_v54  ;;  %9826 = vmatprep.mubr.msk.f32.mxu1 %vm196_vm1, %v12306_v62  ;;  %v2477_v15 = vpop.f32.mrf.mxu0  ;;  %v12326_v23 = vld [vmem:[%s10971_s30 + $0xda] sm:$0xff] }
 0x20b   : > { %v1831_v17 = vpop.f32.mrf.mxu1  ;;  %14111 = vst [vmem:[#allocation24_spill] sm:$0xff] %v12326_v23  ;;  %v14113_v54 = vld [vmem:[#allocation36_spill] sm:$0xff]  ;;  %v14115_v62 = vld [vmem:[#allocation37_spill] sm:$0xff] }
 0x20c   : > { %14108 = vst [vmem:[#allocation22_spill] sm:$0xff] %v12315_v28  ;;  %v12329_v5 = vadd.f32 %v9579_v24, %v1837_v52  ;;  %v1832_v53 = vadd.f32 %v1831_v17, %v14113_v54  ;;  %v9582_v28 = vpop.f32.mrf.mxu0  ;;  %9925 = vmatmul.mubr.msk.f32.gmra.mxu0 %vm196_vm1, %v8284_v37  ;;  %v12342_v52 = vld [vmem:[%s10971_s30 + $0xe2] sm:$0xff]  ;;  %v8287_v37 = vld [vmem:[%s10971_s30 + $0x118] sm:$0xff] }
 0x20d   : > { %v9484_v45 = vpop.f32.mrf.mxu1  ;;  %9827 = vmatmul.mubr.msk.f32.gmra.mxu1 %vm196_vm1, %v12322_v2  ;;  %9927 = vmatprep.mubr.msk.f32.mxu0 %vm196_vm1, %v8285_v36  ;;  %14116 = vst [vmem:[#allocation27_spill] sm:$0xff] %v12342_v52  ;;  %v8286_v24 = vld [vmem:[%s10971_s30 + $0x108] sm:$0xff] }
 0x20e   : > { %14112 = vst [vmem:[#allocation25_spill] sm:$0xff] %v12329_v5  ;;  %v12335_v32 = vadd.f32 %v2477_v15, %v1832_v53  ;;  %v1847_v30 = vadd.f32 %v9484_v45, %v14115_v62  ;;  %9829 = vmatprep.mubr.msk.f32.mxu1 %vm196_vm1, %v12326_v23  ;;  %v2487_v54 = vpop.f32.mrf.mxu0  ;;  %v12346_v5 = vld [vmem:[%s10971_s30 + $0xf2] sm:$0xff]  ;;  %v14119_v62 = vld [vmem:[#allocation38_spill] sm:$0xff] }
 0x20f   : > { %v1841_v17 = vpop.f32.mrf.mxu1  ;;  %14117 = vst [vmem:[#allocation28_spill] sm:$0xff] %v12346_v5  ;;  %v14121_v23 = vld [vmem:[#allocation39_spill] sm:$0xff] }
 0x210   : > { %14114 = vst [vmem:[#allocation26_spill] sm:$0xff] %v12335_v32  ;;  %v12349_v15 = vadd.f32 %v9582_v28, %v1847_v30  ;;  %v1842_v53 = vadd.f32 %v1841_v17, %v14119_v62  ;;  %v9585_v32 = vpop.f32.mrf.mxu0  ;;  %9928 = vmatmul.mubr.msk.f32.gmra.mxu0 %vm196_vm1, %v8286_v24  ;;  %v12362_v30 = vld [vmem:[%s10971_s30 + $0xfa] sm:$0xff]  ;;  %v8289_v24 = vld [vmem:[%s10971_s30 + $0x128] sm:$0xff] }
 0x211   : > { %v9487_v45 = vpop.f32.mrf.mxu1  ;;  %9830 = vmatmul.mubr.msk.f32.gmra.mxu1 %vm196_vm1, %v12342_v52  ;;  %9930 = vmatprep.mubr.msk.f32.mxu0 %vm196_vm1, %v8287_v37  ;;  %14122 = vst [vmem:[#allocation31_spill] sm:$0xff] %v12362_v30  ;;  %v8288_v28 = vld [vmem:[%s10971_s30 + $0x120] sm:$0xff] }
 0x212   : > { %14118 = vst [vmem:[#allocation29_spill] sm:$0xff] %v12349_v15  ;;  %v12355_v36 = vadd.f32 %v2487_v54, %v1842_v53  ;;  %v1857_v2 = vadd.f32 %v9487_v45, %v14121_v23  ;;  %9832 = vmatprep.mubr.msk.f32.mxu1 %vm196_vm1, %v12346_v5  ;;  %v2497_v62 = vpop.f32.mrf.mxu0  ;;  %v12366_v15 = vld [vmem:[%s10971_s30 + $0x102] sm:$0xff]  ;;  %v14125_v23 = vld [vmem:[#allocation40_spill] sm:$0xff] }
 0x213   : > { %v1851_v17 = vpop.f32.mrf.mxu1  ;;  %14123 = vst [vmem:[#allocation32_spill] sm:$0xff] %v12366_v15  ;;  %v14127_v5 = vld [vmem:[#allocation41_spill] sm:$0xff] }
 0x214   : > { %14120 = vst [vmem:[#allocation30_spill] sm:$0xff] %v12355_v36  ;;  %v12369_v54 = vadd.f32 %v9585_v32, %v1857_v2  ;;  %v1852_v53 = vadd.f32 %v1851_v17, %v14125_v23  ;;  %v9588_v36 = vpop.f32.mrf.mxu0  ;;  %9931 = vmatmul.mubr.msk.f32.gmra.mxu0 %vm196_vm1, %v8288_v28  ;;  %v12382_v2 = vld [vmem:[%s10971_s30 + $0x10a] sm:$0xff]  ;;  %v8291_v28 = vld [vmem:[%s10971_s30 + $0x140] sm:$0xff] }
 0x215   : > { %v9490_v45 = vpop.f32.mrf.mxu1  ;;  %9833 = vmatmul.mubr.msk.f32.gmra.mxu1 %vm196_vm1, %v12362_v30  ;;  %9933 = vmatprep.mubr.msk.f32.mxu0 %vm196_vm1, %v8289_v24  ;;  %14128 = vst [vmem:[#allocation35_spill] sm:$0xff] %v12382_v2  ;;  %v8290_v32 = vld [vmem:[%s10971_s30 + $0x130] sm:$0xff] }
 0x216   : > { %14124 = vst [vmem:[#allocation33_spill] sm:$0xff] %v12369_v54  ;;  %v12375_v37 = vadd.f32 %v2497_v62, %v1852_v53  ;;  %v1867_v52 = vadd.f32 %v9490_v45, %v14127_v5  ;;  %9835 = vmatprep.mubr.msk.f32.mxu1 %vm196_vm1, %v12366_v15  ;;  %v2507_v23 = vpop.f32.mrf.mxu0  ;;  %v12386_v54 = vld [vmem:[%s10971_s30 + $0x11a] sm:$0xff]  ;;  %v14131_v5 = vld [vmem:[#allocation42_spill] sm:$0xff]  ;;  %v14133_v15 = vld [vmem:[#allocation43_spill] sm:$0xff] }
 0x217   : > { %v1861_v17 = vpop.f32.mrf.mxu1  ;;  %14129 = vst [vmem:[#allocation36_spill] sm:$0xff] %v12386_v54 }
 0x218   : > { %14126 = vst [vmem:[#allocation34_spill] sm:$0xff] %v12375_v37  ;;  %v12389_v62 = vadd.f32 %v9588_v36, %v1867_v52  ;;  %v1862_v53 = vadd.f32 %v1861_v17, %v14131_v5  ;;  %v9591_v37 = vpop.f32.mrf.mxu0  ;;  %9934 = vmatmul.mubr.msk.f32.gmra.mxu0 %vm196_vm1, %v8290_v32  ;;  %v12402_v52 = vld [vmem:[%s10971_s30 + $0x122] sm:$0xff]  ;;  %v8293_v32 = vld [vmem:[%s10971_s30 + $0x150] sm:$0xff] }
 0x219   : > { %v9493_v45 = vpop.f32.mrf.mxu1  ;;  %9836 = vmatmul.mubr.msk.f32.gmra.mxu1 %vm196_vm1, %v12382_v2  ;;  %9936 = vmatprep.mubr.msk.f32.mxu0 %vm196_vm1, %v8291_v28  ;;  %14134 = vst [vmem:[#allocation39_spill] sm:$0xff] %v12402_v52  ;;  %v8292_v36 = vld [vmem:[%s10971_s30 + $0x148] sm:$0xff] }
 0x21a   : > { %14130 = vst [vmem:[#allocation37_spill] sm:$0xff] %v12389_v62  ;;  %v12395_v24 = vadd.f32 %v2507_v23, %v1862_v53  ;;  %v1877_v30 = vadd.f32 %v9493_v45, %v14133_v15  ;;  %9838 = vmatprep.mubr.msk.f32.mxu1 %vm196_vm1, %v12386_v54  ;;  %v2517_v5 = vpop.f32.mrf.mxu0  ;;  %v12406_v62 = vld [vmem:[%s10971_s30 + $0x12a] sm:$0xff]  ;;  %v14137_v15 = vld [vmem:[#allocation44_spill] sm:$0xff]  ;;  %v14139_v54 = vld [vmem:[#allocation45_spill] sm:$0xff] }
 0x21b   : > { %v1871_v17 = vpop.f32.mrf.mxu1  ;;  %14135 = vst [vmem:[#allocation40_spill] sm:$0xff] %v12406_v62 }
 0x21c   : > { %14132 = vst [vmem:[#allocation38_spill] sm:$0xff] %v12395_v24  ;;  %v12409_v23 = vadd.f32 %v9591_v37, %v1877_v30  ;;  %v1872_v53 = vadd.f32 %v1871_v17, %v14137_v15  ;;  %v9594_v24 = vpop.f32.mrf.mxu0  ;;  %9937 = vmatmul.mubr.msk.f32.gmra.mxu0 %vm196_vm1, %v8292_v36  ;;  %v12422_v30 = vld [vmem:[%s10971_s30 + $0x132] sm:$0xff]  ;;  %v8295_v36 = vld [vmem:[%s10971_s30 + $0x168] sm:$0xff] }
 0x21d   : > { %v9496_v45 = vpop.f32.mrf.mxu1  ;;  %9839 = vmatmul.mubr.msk.f32.gmra.mxu1 %vm196_vm1, %v12402_v52  ;;  %9939 = vmatprep.mubr.msk.f32.mxu0 %vm196_vm1, %v8293_v32  ;;  %14140 = vst [vmem:[#allocation43_spill] sm:$0xff] %v12422_v30  ;;  %v8294_v37 = vld [vmem:[%s10971_s30 + $0x158] sm:$0xff] }
 0x21e   : > { %14136 = vst [vmem:[#allocation41_spill] sm:$0xff] %v12409_v23  ;;  %v12415_v28 = vadd.f32 %v2517_v5, %v1872_v53  ;;  %v1887_v2 = vadd.f32 %v9496_v45, %v14139_v54  ;;  %9841 = vmatprep.mubr.msk.f32.mxu1 %vm196_vm1, %v12406_v62  ;;  %v2527_v15 = vpop.f32.mrf.mxu0  ;;  %v12426_v23 = vld [vmem:[%s10971_s30 + $0x142] sm:$0xff]  ;;  %v14145_v62 = vld [vmem:[#allocation47_spill] sm:$0xff] }
 0x21f   : > { %v1881_v17 = vpop.f32.mrf.mxu1  ;;  %14141 = vst [vmem:[#allocation44_spill] sm:$0xff] %v12426_v23  ;;  %v14143_v54 = vld [vmem:[#allocation46_spill] sm:$0xff] }
 0x220   : > { %14138 = vst [vmem:[#allocation42_spill] sm:$0xff] %v12415_v28  ;;  %v12429_v5 = vadd.f32 %v9594_v24, %v1887_v2  ;;  %v1882_v53 = vadd.f32 %v1881_v17, %v14143_v54  ;;  %v9597_v28 = vpop.f32.mrf.mxu0  ;;  %9940 = vmatmul.mubr.msk.f32.gmra.mxu0 %vm196_vm1, %v8294_v37  ;;  %v12442_v2 = vld [vmem:[%s10971_s30 + $0x14a] sm:$0xff]  ;;  %v8297_v37 = vld [vmem:[%s10971_s30 + $0x178] sm:$0xff] }
 0x221   : > { %v9499_v45 = vpop.f32.mrf.mxu1  ;;  %9842 = vmatmul.mubr.msk.f32.gmra.mxu1 %vm196_vm1, %v12422_v30  ;;  %9942 = vmatprep.mubr.msk.f32.mxu0 %vm196_vm1, %v8295_v36  ;;  %14146 = vst [vmem:[#allocation47_spill] sm:$0xff] %v12442_v2  ;;  %v8296_v24 = vld [vmem:[%s10971_s30 + $0x170] sm:$0xff] }
 0x222   : > { %14142 = vst [vmem:[#allocation45_spill] sm:$0xff] %v12429_v5  ;;  %v12435_v32 = vadd.f32 %v2527_v15, %v1882_v53  ;;  %v1897_v52 = vadd.f32 %v9499_v45, %v14145_v62  ;;  %9844 = vmatprep.mubr.msk.f32.mxu1 %vm196_vm1, %v12426_v23  ;;  %v2537_v54 = vpop.f32.mrf.mxu0  ;;  %v12446_v5 = vld [vmem:[%s10971_s30 + $0x152] sm:$0xff] }
 0x223   : > { %v1891_v17 = vpop.f32.mrf.mxu1  ;;  %14147 = vst [vmem:[#allocation48_spill] sm:$0xff] %v12446_v5  ;;  %v14149_v62 = vld [vmem:[#allocation4_spill] sm:$0xff]  ;;  %v14151_v23 = vld [vmem:[#allocation3_spill] sm:$0xff] }
 0x224   : > { %14144 = vst [vmem:[#allocation46_spill] sm:$0xff] %v12435_v32  ;;  %v12449_v15 = vadd.f32 %v9597_v28, %v1897_v52  ;;  %v1892_v53 = vadd.f32 %v1891_v17, %v14149_v62  ;;  %v9600_v32 = vpop.f32.mrf.mxu0  ;;  %9943 = vmatmul.mubr.msk.f32.gmra.mxu0 %vm196_vm1, %v8296_v24  ;;  %v12462_v52 = vld [vmem:[%s10971_s30 + $0x15a] sm:$0xff]  ;;  %v8299_v24 = vld [vmem:[%s10971_s30 + $0x190] sm:$0xff] }
 0x225   : > { %v9502_v45 = vpop.f32.mrf.mxu1  ;;  %9845 = vmatmul.mubr.msk.f32.gmra.mxu1 %vm196_vm1, %v12442_v2  ;;  %9945 = vmatprep.mubr.msk.f32.mxu0 %vm196_vm1, %v8297_v37  ;;  %v8298_v28 = vld [vmem:[%s10971_s30 + $0x180] sm:$0xff] }
 0x226   : > { %14148 = vst [vmem:[#allocation49_spill] sm:$0xff] %v12449_v15  ;;  %v12455_v36 = vadd.f32 %v2537_v54, %v1892_v53  ;;  %v1907_v30 = vadd.f32 %v9502_v45, %v14151_v23  ;;  %9847 = vmatprep.mubr.msk.f32.mxu1 %vm196_vm1, %v12446_v5  ;;  %v2547_v62 = vpop.f32.mrf.mxu0  ;;  %v12466_v15 = vld [vmem:[%s10971_s30 + $0x16a] sm:$0xff]  ;;  %v14154_v23 = vld [vmem:[#allocation5_spill] sm:$0xff] }
 0x227   : > { %v1901_v17 = vpop.f32.mrf.mxu1  ;;  %14152 = vst [vmem:[#allocation3_spill] sm:$0xff] %v12466_v15  ;;  %v14156_v5 = vld [vmem:[#allocation6_spill] sm:$0xff] }
 0x228   : > { %14150 = vst [vmem:[#allocation4_spill] sm:$0xff] %v12455_v36  ;;  %v12469_v54 = vadd.f32 %v9600_v32, %v1907_v30  ;;  %v1902_v53 = vadd.f32 %v1901_v17, %v14154_v23  ;;  %v9603_v36 = vpop.f32.mrf.mxu0  ;;  %9946 = vmatmul.mubr.msk.f32.gmra.mxu0 %vm196_vm1, %v8298_v28  ;;  %v12482_v30 = vld [vmem:[%s10971_s30 + $0x172] sm:$0xff]  ;;  %v8301_v28 = vld [vmem:[%s10971_s30 + $0x1a0] sm:$0xff] }
 0x229   : > { %v9505_v45 = vpop.f32.mrf.mxu1  ;;  %9848 = vmatmul.mubr.msk.f32.gmra.mxu1 %vm196_vm1, %v12462_v52  ;;  %9948 = vmatprep.mubr.msk.f32.mxu0 %vm196_vm1, %v8299_v24  ;;  %v8300_v32 = vld [vmem:[%s10971_s30 + $0x198] sm:$0xff] }
 0x22a   : > { %14153 = vst [vmem:[#allocation50_spill] sm:$0xff] %v12469_v54  ;;  %v12475_v37 = vadd.f32 %v2547_v62, %v1902_v53  ;;  %v1917_v2 = vadd.f32 %v9505_v45, %v14156_v5  ;;  %9850 = vmatprep.mubr.msk.f32.mxu1 %vm196_vm1, %v12466_v15  ;;  %v2557_v23 = vpop.f32.mrf.mxu0  ;;  %v12486_v54 = vld [vmem:[%s10971_s30 + $0x17a] sm:$0xff]  ;;  %v14158_v5 = vld [vmem:[#allocation7_spill] sm:$0xff] }
 0x22b   : > { %v1911_v17 = vpop.f32.mrf.mxu1 }
 0x22c   : > { %14155 = vst [vmem:[#allocation5_spill] sm:$0xff] %v12475_v37  ;;  %v12489_v62 = vadd.f32 %v9603_v36, %v1917_v2  ;;  %v1912_v53 = vadd.f32 %v1911_v17, %v14158_v5  ;;  %v9706_v37 = vpop.f32.mrf.mxu0  ;;  %9949 = vmatmul.mubr.msk.f32.gmra.mxu0 %vm196_vm1, %v8300_v32  ;;  %v12502_v2 = vld [vmem:[%s10971_s30 + $0x182] sm:$0xff]  ;;  %v8303_v32 = vld [vmem:[%s10971_s30 + $0x1b8] sm:$0xff] }
 0x22d   : > { %v9608_v45 = vpop.f32.mrf.mxu1  ;;  %9851 = vmatmul.mubr.msk.f32.gmra.mxu1 %vm196_vm1, %v12482_v30  ;;  %9951 = vmatprep.mubr.msk.f32.mxu0 %vm196_vm1, %v8301_v28  ;;  %v8302_v36 = vld [vmem:[%s10971_s30 + $0x1a8] sm:$0xff] }
 0x22e   : > { %14157 = vst [vmem:[#allocation6_spill] sm:$0xff] %v12489_v62  ;;  %v12495_v24 = vadd.f32 %v2557_v23, %v1912_v53  ;;  %v3280_v15 = vadd.f32 %v9608_v45, %v11946_v7  ;;  %9853 = vmatprep.mubr.msk.f32.mxu1 %vm196_vm1, %v12486_v54  ;;  %v3670_v5 = vpop.f32.mrf.mxu0  ;;  %v12506_v62 = vld [vmem:[%s10971_s30 + $0x192] sm:$0xff] }
 0x22f   : > { %v2960_v17 = vpop.f32.mrf.mxu1 }
 0x230   : > { %14159 = vst [vmem:[#allocation7_spill] sm:$0xff] %v12495_v24  ;;  %v12509_v23 = vadd.f32 %v9706_v37, %v3280_v15  ;;  %v3279_v7 = vadd.f32 %v2960_v17, %v11952_v51  ;;  %v9709_v45 = vpop.f32.mrf.mxu0  ;;  %9952 = vmatmul.mubr.msk.f32.gmra.mxu0 %vm196_vm1, %v8302_v36  ;;  %v12522_v15 = vld [vmem:[%s10971_s30 + $0x19a] sm:$0xff]  ;;  %v8305_v36 = vld [vmem:[%s10971_s30 + $0x1c8] sm:$0xff] }
 0x231   : > { %v9611_v53 = vpop.f32.mrf.mxu1  ;;  %9854 = vmatmul.mubr.msk.f32.gmra.mxu1 %vm196_vm1, %v12502_v2  ;;  %9954 = vmatprep.mubr.msk.f32.mxu0 %vm196_vm1, %v8303_v32  ;;  %v8304_v51 = vld [vmem:[%s10971_s30 + $0x1c0] sm:$0xff] }
 0x232   : > { %14160 = vst [vmem:[#allocation51_spill] sm:$0xff] %v12509_v23  ;;  %v12515_v28 = vadd.f32 %v3670_v5, %v3279_v7  ;;  %v3282_v24 = vadd.f32 %v9611_v53, %v11960_v6  ;;  %9856 = vmatprep.mubr.msk.f32.mxu1 %vm196_vm1, %v12506_v62  ;;  %v3680_v17 = vpop.f32.mrf.mxu0  ;;  %v12526_v23 = vld [vmem:[%s10971_s30 + $0x1a2] sm:$0xff] }
 0x233   : > { %v2970_v37 = vpop.f32.mrf.mxu1 }
 0x234   : > { %14161 = vst [vmem:[#allocation52_spill] sm:$0xff] %v12515_v28  ;;  %v12529_v5 = vadd.f32 %v9709_v45, %v3282_v24  ;;  %v3281_v6 = vadd.f32 %v2970_v37, %v11966_v19  ;;  %v9712_v53 = vpop.f32.mrf.mxu0  ;;  %9955 = vmatmul.mubr.msk.f32.gmra.mxu0 %vm196_vm1, %v8304_v51  ;;  %v12542_v24 = vld [vmem:[%s10971_s30 + $0x1aa] sm:$0xff]  ;;  %v8307_v51 = vld [vmem:[%s10971_s30 + $0x1e0] sm:$0xff] }
 0x235   : > { %v9614_v7 = vpop.f32.mrf.mxu1  ;;  %9857 = vmatmul.mubr.msk.f32.gmra.mxu1 %vm196_vm1, %v12522_v15  ;;  %9957 = vmatprep.mubr.msk.f32.mxu0 %vm196_vm1, %v8305_v36  ;;  %v8306_v19 = vld [vmem:[%s10971_s30 + $0x1d0] sm:$0xff] }
 0x236   : > { %14162 = vst [vmem:[#allocation53_spill] sm:$0xff] %v12529_v5  ;;  %v12535_v32 = vadd.f32 %v3680_v17, %v3281_v6  ;;  %v3284_v28 = vadd.f32 %v9614_v7, %v11974_v3  ;;  %9859 = vmatprep.mubr.msk.f32.mxu1 %vm196_vm1, %v12526_v23  ;;  %v3690_v37 = vpop.f32.mrf.mxu0  ;;  %v12546_v5 = vld [vmem:[%s10971_s30 + $0x1ba] sm:$0xff] }
 0x237   : > { %v2980_v45 = vpop.f32.mrf.mxu1 }
 0x238   : > { %14163 = vst [vmem:[#allocation54_spill] sm:$0xff] %v12535_v32  ;;  %v12549_v17 = vadd.f32 %v9712_v53, %v3284_v28  ;;  %v3283_v3 = vadd.f32 %v2980_v45, %v11980_v29  ;;  %v9715_v7 = vpop.f32.mrf.mxu0  ;;  %9958 = vmatmul.mubr.msk.f32.gmra.mxu0 %vm196_vm1, %v8306_v19  ;;  %v12562_v28 = vld [vmem:[%s10971_s30 + $0x1c2] sm:$0xff]  ;;  %v8309_v19 = vld [vmem:[%s10971_s30 + $0x1f0] sm:$0xff] }
 0x239   : > { %v9617_v6 = vpop.f32.mrf.mxu1  ;;  %9860 = vmatmul.mubr.msk.f32.gmra.mxu1 %vm196_vm1, %v12542_v24  ;;  %9960 = vmatprep.mubr.msk.f32.mxu0 %vm196_vm1, %v8307_v51  ;;  %v8308_v29 = vld [vmem:[%s10971_s30 + $0x1e8] sm:$0xff] }
 0x23a   : > { %14164 = vst [vmem:[#allocation55_spill] sm:$0xff] %v12549_v17  ;;  %v12555_v36 = vadd.f32 %v3690_v37, %v3283_v3  ;;  %v3286_v32 = vadd.f32 %v9617_v6, %v11988_v48  ;;  %9862 = vmatprep.mubr.msk.f32.mxu1 %vm196_vm1, %v12546_v5  ;;  %v3700_v45 = vpop.f32.mrf.mxu0  ;;  %v12566_v17 = vld [vmem:[%s10971_s30 + $0x1ca] sm:$0xff] }
 0x23b   : > { %v2990_v53 = vpop.f32.mrf.mxu1 }
 0x23c   : > { %14165 = vst [vmem:[#allocation56_spill] sm:$0xff] %v12555_v36  ;;  %v12569_v37 = vadd.f32 %v9715_v7, %v3286_v32  ;;  %v3285_v48 = vadd.f32 %v2990_v53, %v11994_v33  ;;  %v9718_v6 = vpop.f32.mrf.mxu0  ;;  %9961 = vmatmul.mubr.msk.f32.gmra.mxu0 %vm196_vm1, %v8308_v29  ;;  %v12582_v32 = vld [vmem:[%s10971_s30 + $0x1d2] sm:$0xff]  ;;  %v8311_v29 = vld [vmem:[%s10971_s30 + $0x208] sm:$0xff] }
 0x23d   : > { %v9620_v3 = vpop.f32.mrf.mxu1  ;;  %9863 = vmatmul.mubr.msk.f32.gmra.mxu1 %vm196_vm1, %v12562_v28  ;;  %9963 = vmatprep.mubr.msk.f32.mxu0 %vm196_vm1, %v8309_v19  ;;  %v8310_v33 = vld [vmem:[%s10971_s30 + $0x1f8] sm:$0xff] }
 0x23e   : > { %14166 = vst [vmem:[#allocation57_spill] sm:$0xff] %v12569_v37  ;;  %v12575_v51 = vadd.f32 %v3700_v45, %v3285_v48  ;;  %v3288_v36 = vadd.f32 %v9620_v3, %v12002_v44  ;;  %9865 = vmatprep.mubr.msk.f32.mxu1 %vm196_vm1, %v12566_v17  ;;  %v3710_v53 = vpop.f32.mrf.mxu0  ;;  %v12586_v37 = vld [vmem:[%s10971_s30 + $0x1e2] sm:$0xff] }
 0x23f   : > { %v3000_v7 = vpop.f32.mrf.mxu1 }
 0x240   : > { %14167 = vst [vmem:[#allocation58_spill] sm:$0xff] %v12575_v51  ;;  %v12589_v45 = vadd.f32 %v9718_v6, %v3288_v36  ;;  %v3287_v44 = vadd.f32 %v3000_v7, %v12008_v41  ;;  %v9721_v3 = vpop.f32.mrf.mxu0  ;;  %9964 = vmatmul.mubr.msk.f32.gmra.mxu0 %vm196_vm1, %v8310_v33  ;;  %v12602_v36 = vld [vmem:[%s10971_s30 + $0x1ea] sm:$0xff]  ;;  %v8313_v33 = vld [vmem:[%s10971_s30 + $0x218] sm:$0xff] }
 0x241   : > { %v9623_v48 = vpop.f32.mrf.mxu1  ;;  %9866 = vmatmul.mubr.msk.f32.gmra.mxu1 %vm196_vm1, %v12582_v32  ;;  %9966 = vmatprep.mubr.msk.f32.mxu0 %vm196_vm1, %v8311_v29  ;;  %v8312_v41 = vld [vmem:[%s10971_s30 + $0x210] sm:$0xff] }
 0x242   : > { %14168 = vst [vmem:[#allocation59_spill] sm:$0xff] %v12589_v45  ;;  %v12595_v19 = vadd.f32 %v3710_v53, %v3287_v44  ;;  %v3290_v51 = vadd.f32 %v9623_v48, %v12016_v9  ;;  %9868 = vmatprep.mubr.msk.f32.mxu1 %vm196_vm1, %v12586_v37  ;;  %v3720_v7 = vpop.f32.mrf.mxu0  ;;  %v12606_v45 = vld [vmem:[%s10971_s30 + $0x1f2] sm:$0xff] }
 0x243   : > { %v3010_v6 = vpop.f32.mrf.mxu1 }
 0x244   : > { %14169 = vst [vmem:[#allocation60_spill] sm:$0xff] %v12595_v19  ;;  %v12609_v53 = vadd.f32 %v9721_v3, %v3290_v51  ;;  %v3289_v9 = vadd.f32 %v3010_v6, %v12022_v49  ;;  %v9724_v48 = vpop.f32.mrf.mxu0  ;;  %9967 = vmatmul.mubr.msk.f32.gmra.mxu0 %vm196_vm1, %v8312_v41  ;;  %v12622_v51 = vld [vmem:[%s10971_s30 + $0x1fa] sm:$0xff]  ;;  %v8315_v41 = vld [vmem:[%s10971_s30 + $0x230] sm:$0xff] }
 0x245   : > { %v9626_v44 = vpop.f32.mrf.mxu1  ;;  %9869 = vmatmul.mubr.msk.f32.gmra.mxu1 %vm196_vm1, %v12602_v36  ;;  %9969 = vmatprep.mubr.msk.f32.mxu0 %vm196_vm1, %v8313_v33  ;;  %v8314_v49 = vld [vmem:[%s10971_s30 + $0x220] sm:$0xff] }
 0x246   : > { %14170 = vst [vmem:[#allocation61_spill] sm:$0xff] %v12609_v53  ;;  %v12615_v29 = vadd.f32 %v3720_v7, %v3289_v9  ;;  %v3292_v19 = vadd.f32 %v9626_v44, %v12030_v60  ;;  %9871 = vmatprep.mubr.msk.f32.mxu1 %vm196_vm1, %v12606_v45  ;;  %v3730_v6 = vpop.f32.mrf.mxu0  ;;  %v12626_v53 = vld [vmem:[%s10971_s30 + $0x20a] sm:$0xff] }
 0x247   : > { %v3020_v3 = vpop.f32.mrf.mxu1 }
 0x248   : > { %14171 = vst [vmem:[#allocation62_spill] sm:$0xff] %v12615_v29  ;;  %v12629_v7 = vadd.f32 %v9724_v48, %v3292_v19  ;;  %v3291_v60 = vadd.f32 %v3020_v3, %v12036_v57  ;;  %v9727_v44 = vpop.f32.mrf.mxu0  ;;  %9970 = vmatmul.mubr.msk.f32.gmra.mxu0 %vm196_vm1, %v8314_v49  ;;  %v12642_v19 = vld [vmem:[%s10971_s30 + $0x212] sm:$0xff]  ;;  %v8317_v49 = vld [vmem:[%s10971_s30 + $0x240] sm:$0xff] }
 0x249   : > { %v9629_v9 = vpop.f32.mrf.mxu1  ;;  %9872 = vmatmul.mubr.msk.f32.gmra.mxu1 %vm196_vm1, %v12622_v51  ;;  %9972 = vmatprep.mubr.msk.f32.mxu0 %vm196_vm1, %v8315_v41  ;;  %v8316_v57 = vld [vmem:[%s10971_s30 + $0x238] sm:$0xff] }
 0x24a   : > { %14172 = vst [vmem:[#allocation63_spill] sm:$0xff] %v12629_v7  ;;  %v12635_v33 = vadd.f32 %v3730_v6, %v3291_v60  ;;  %v3294_v29 = vadd.f32 %v9629_v9, %v12044_v12  ;;  %9874 = vmatprep.mubr.msk.f32.mxu1 %vm196_vm1, %v12626_v53  ;;  %v3740_v3 = vpop.f32.mrf.mxu0  ;;  %v12646_v7 = vld [vmem:[%s10971_s30 + $0x21a] sm:$0xff] }
 0x24b   : > { %v3030_v48 = vpop.f32.mrf.mxu1 }
 0x24c   : > { %14173 = vst [vmem:[#allocation64_spill] sm:$0xff] %v12635_v33  ;;  %v12649_v6 = vadd.f32 %v9727_v44, %v3294_v29  ;;  %v3293_v12 = vadd.f32 %v3030_v48, %v12050_v1  ;;  %v9730_v9 = vpop.f32.mrf.mxu0  ;;  %9973 = vmatmul.mubr.msk.f32.gmra.mxu0 %vm196_vm1, %v8316_v57  ;;  %v12662_v29 = vld [vmem:[%s10971_s30 + $0x222] sm:$0xff]  ;;  %v8319_v57 = vld [vmem:[%s10971_s30 + $0x258] sm:$0xff] }
 0x24d   : > { %v9632_v60 = vpop.f32.mrf.mxu1  ;;  %9875 = vmatmul.mubr.msk.f32.gmra.mxu1 %vm196_vm1, %v12642_v19  ;;  %9975 = vmatprep.mubr.msk.f32.mxu0 %vm196_vm1, %v8317_v49  ;;  %v8318_v1 = vld [vmem:[%s10971_s30 + $0x248] sm:$0xff] }
 0x24e   : > { %14174 = vst [vmem:[#allocation65_spill] sm:$0xff] %v12649_v6  ;;  %v12655_v41 = vadd.f32 %v3740_v3, %v3293_v12  ;;  %v3296_v33 = vadd.f32 %v9632_v60, %v12058_v31  ;;  %9877 = vmatprep.mubr.msk.f32.mxu1 %vm196_vm1, %v12646_v7  ;;  %v3750_v48 = vpop.f32.mrf.mxu0  ;;  %v12666_v6 = vld [vmem:[%s10971_s30 + $0x232] sm:$0xff] }
 0x24f   : > { %v3040_v44 = vpop.f32.mrf.mxu1 }
 0x250   : > { %14175 = vst [vmem:[#allocation66_spill] sm:$0xff] %v12655_v41  ;;  %v12669_v3 = vadd.f32 %v9730_v9, %v3296_v33  ;;  %v3295_v31 = vadd.f32 %v3040_v44, %v12064_v10  ;;  %v9733_v60 = vpop.f32.mrf.mxu0  ;;  %9976 = vmatmul.mubr.msk.f32.gmra.mxu0 %vm196_vm1, %v8318_v1  ;;  %v12682_v33 = vld [vmem:[%s10971_s30 + $0x23a] sm:$0xff]  ;;  %v8321_v1 = vld [vmem:[%s10971_s30 + $0x268] sm:$0xff] }
 0x251   : > { %v9635_v12 = vpop.f32.mrf.mxu1  ;;  %9878 = vmatmul.mubr.msk.f32.gmra.mxu1 %vm196_vm1, %v12662_v29  ;;  %9978 = vmatprep.mubr.msk.f32.mxu0 %vm196_vm1, %v8319_v57  ;;  %14178 = vst [vmem:[#allocation69_spill] sm:$0xff] %v12682_v33  ;;  %v8320_v10 = vld [vmem:[%s10971_s30 + $0x260] sm:$0xff] }
 0x252   : > { %14176 = vst [vmem:[#allocation67_spill] sm:$0xff] %v12669_v3  ;;  %v12675_v49 = vadd.f32 %v3750_v48, %v3295_v31  ;;  %v3298_v41 = vadd.f32 %v9635_v12, %v12072_v63  ;;  %9880 = vmatprep.mubr.msk.f32.mxu1 %vm196_vm1, %v12666_v6  ;;  %v3760_v44 = vpop.f32.mrf.mxu0  ;;  %v12686_v3 = vld [vmem:[%s10971_s30 + $0x242] sm:$0xff] }
 0x253   : > { %v3050_v9 = vpop.f32.mrf.mxu1 }
 0x254   : > { %14177 = vst [vmem:[#allocation68_spill] sm:$0xff] %v12675_v49  ;;  %v12689_v48 = vadd.f32 %v9733_v60, %v3298_v41  ;;  %v3297_v63 = vadd.f32 %v3050_v9, %v12078_v16  ;;  %v9736_v12 = vpop.f32.mrf.mxu0  ;;  %9979 = vmatmul.mubr.msk.f32.gmra.mxu0 %vm196_vm1, %v8320_v10  ;;  %v12702_v41 = vld [vmem:[%s10971_s30 + $0x24a] sm:$0xff] }
 0x255   : > { %v9638_v31 = vpop.f32.mrf.mxu1  ;;  %9881 = vmatmul.mubr.msk.f32.gmra.mxu1 %vm196_vm1, %v12682_v33  ;;  %9981 = vmatprep.mubr.msk.f32.mxu0 %vm196_vm1, %v8321_v1  ;;  %v8322_v16 = vld [vmem:[%s10971_s30 + $0x270] sm:$0xff] }
 0x256   : > { %14179 = vst [vmem:[#allocation70_spill] sm:$0xff] %v12689_v48  ;;  %v12695_v57 = vadd.f32 %v3760_v44, %v3297_v63  ;;  %v3300_v49 = vadd.f32 %v9638_v31, %v12086_v61  ;;  %9883 = vmatprep.mubr.msk.f32.mxu1 %vm196_vm1, %v12686_v3  ;;  %v3770_v9 = vpop.f32.mrf.mxu0  ;;  %v12706_v48 = vld [vmem:[%s10971_s30 + $0x25a] sm:$0xff] }
 0x257   : > { %v3060_v60 = vpop.f32.mrf.mxu1 }
 0x258   : > { %v12708_v33 = vadd.f32 %v9736_v12, %v3300_v49  ;;  %v3299_v10 = vadd.f32 %v3060_v60, %v12092_v14  ;;  %v9739_v61 = vpop.f32.mrf.mxu0  ;;  %9982 = vmatmul.mubr.msk.f32.gmra.mxu0 %vm196_vm1, %v8322_v16  ;;  %v12722_v49 = vld [vmem:[%s10971_s30 + $0x262] sm:$0xff]  ;;  %v12725_v12 = vld [vmem:[%s10971_s30 + $0x26a] sm:$0xff] }
 0x259   : > { %v9641_v44 = vpop.f32.mrf.mxu1  ;;  %9884 = vmatmul.mubr.msk.f32.gmra.mxu1 %vm196_vm1, %v12702_v41  ;;  %9984 = vmatprep.mubr.msk.f32.mxu0 %vm196_vm1, %v12114_v34 }
 0x25a   : > { %v12714_v1 = vadd.f32 %v3770_v9, %v3299_v10  ;;  %v3302_v63 = vadd.f32 %v9641_v44, %v12100_v26  ;;  %9886 = vmatprep.mubr.msk.f32.mxu1 %vm196_vm1, %v12706_v48  ;;  %v3780_v31 = vpop.f32.mrf.mxu0 }
 0x25b   : > { %v3070_v14 = vpop.f32.mrf.mxu1 }
 0x25c   : > { %v12727_v16 = vadd.f32 %v9739_v61, %v3302_v63  ;;  %v3301_v60 = vadd.f32 %v3070_v14, %v12106_v39  ;;  %v9742_v9 = vpop.f32.mrf.mxu0  ;;  %9985 = vmatmul.mubr.msk.f32.gmra.mxu0 %vm196_vm1, %v12130_v42  ;;  %v12742_v39 = vld [vmem:[%s10971_s30 + $0x272] sm:$0xff]  ;;  %v12745_v63 = vld [vmem:[%s10971_s30 + $0x282] sm:$0xff] }
 0x25d   : > { %v9644_v26 = vpop.f32.mrf.mxu1  ;;  %9887 = vmatmul.mubr.msk.f32.gmra.mxu1 %vm196_vm1, %v12722_v49  ;;  %9987 = vmatprep.mubr.msk.f32.mxu0 %vm196_vm1, %v12134_v59  ;;  %v8327_v42 = vld [vmem:[%s10971_s30 + $0x2a8] sm:$0xff] }
 0x25e   : > { %v12734_v34 = vadd.f32 %v3780_v31, %v3301_v60  ;;  %v3304_v10 = vadd.f32 %v9644_v26, %v12117_v46  ;;  %9889 = vmatprep.mubr.msk.f32.mxu1 %vm196_vm1, %v12725_v12  ;;  %v3790_v61 = vpop.f32.mrf.mxu0 }
 0x25f   : > { %v3080_v44 = vpop.f32.mrf.mxu1 }
 0x260   : > { %14180 = vst [vmem:[#allocation71_spill] sm:$0xff] %v12734_v34  ;;  %v12748_v14 = vadd.f32 %v9742_v9, %v3304_v10  ;;  %v3303_v46 = vadd.f32 %v3080_v44, %v12123_v43  ;;  %v9745_v60 = vpop.f32.mrf.mxu0  ;;  %9988 = vmatmul.mubr.msk.f32.gmra.mxu0 %vm196_vm1, %v12150_v4  ;;  %v12762_v9 = vld [vmem:[%s10971_s30 + $0x28a] sm:$0xff]  ;;  %v8329_v4 = vld [vmem:[%s10971_s30 + $0x2b8] sm:$0xff] }
 0x261   : > { %v9647_v31 = vpop.f32.mrf.mxu1  ;;  %9890 = vmatmul.mubr.msk.f32.gmra.mxu1 %vm196_vm1, %v12742_v39  ;;  %9990 = vmatprep.mubr.msk.f32.mxu0 %vm196_vm1, %v8327_v42  ;;  %14183 = vst [vmem:[#allocation74_spill] sm:$0xff] %v12762_v9  ;;  %v8328_v43 = vld [vmem:[%s10971_s30 + $0x2b0] sm:$0xff] }
 0x262   : > { %14181 = vst [vmem:[#allocation72_spill] sm:$0xff] %v12748_v14  ;;  %v12755_v59 = vadd.f32 %v3790_v61, %v3303_v46  ;;  %v3306_v26 = vadd.f32 %v9647_v31, %v12137_v38  ;;  %9892 = vmatprep.mubr.msk.f32.mxu1 %vm196_vm1, %v12745_v63  ;;  %v3800_v44 = vpop.f32.mrf.mxu0  ;;  %v12766_v14 = vld [vmem:[%s10971_s30 + $0x292] sm:$0xff] }
 0x263   : > { %v3090_v10 = vpop.f32.mrf.mxu1 }
 0x264   : > { %14182 = vst [vmem:[#allocation73_spill] sm:$0xff] %v12755_v59  ;;  %v12769_v61 = vadd.f32 %v9745_v60, %v3306_v26  ;;  %v3305_v38 = vadd.f32 %v3090_v10, %v12143_v22  ;;  %v9748_v31 = vpop.f32.mrf.mxu0  ;;  %9991 = vmatmul.mubr.msk.f32.gmra.mxu0 %vm196_vm1, %v8328_v43  ;;  %v14185_v59 = vld [vmem:[#allocation8_spill] sm:$0xff]  ;;  %v8330_v22 = vld [vmem:[%s10971_s30 + $0x2c0] sm:$0xff] }
 0x265   : > { %v9650_v46 = vpop.f32.mrf.mxu1  ;;  %9893 = vmatmul.mubr.msk.f32.gmra.mxu1 %vm196_vm1, %v12762_v9  ;;  %9993 = vmatprep.mubr.msk.f32.mxu0 %vm196_vm1, %v8329_v4  ;;  %v12782_v60 = vld [vmem:[%s10971_s30 + $0x29a] sm:$0xff] }
 0x266   : > { %14184 = vst [vmem:[#allocation75_spill] sm:$0xff] %v12769_v61  ;;  %v12775_v42 = vadd.f32 %v3800_v44, %v3305_v38  ;;  %v3308_v34 = vadd.f32 %v9650_v46, %v14185_v59  ;;  %9895 = vmatprep.mubr.msk.f32.mxu1 %vm196_vm1, %v12766_v14  ;;  %v3810_v10 = vpop.f32.mrf.mxu0  ;;  %v8397_v61 = vld [vmem:[%s10971_s30 + $0x51] sm:$0xff] }
 0x267   : > { %v3100_v26 = vpop.f32.mrf.mxu1 }
 0x268   : > { %v12786_v9 = vadd.f32 %v9748_v31, %v3308_v34  ;;  %v3307_v43 = vadd.f32 %v3100_v26, %v12161_v25  ;;  %v9751_v38 = vpop.f32.mrf.mxu0  ;;  %9994 = vmatmul.mubr.msk.f32.gmra.mxu0 %vm196_vm1, %v8330_v22  ;;  %v8398_v34 = vld [vmem:[%s10971_s30 + $0x59] sm:$0xff]  ;;  %v8399_v31 = vld [vmem:[%s10971_s30 + $0x61] sm:$0xff] }
 0x269   : > { %v9653_v44 = vpop.f32.mrf.mxu1  ;;  %9896 = vmatmul.mubr.msk.f32.gmra.mxu1 %vm196_vm1, %v12782_v60  ;;  %10096 = vmatprep.mubr.msk.f32.mxu0 %vm196_vm1, %v12187_v11 }
 0x26a   : > { %14186 = vst [vmem:[#allocation8_spill] sm:$0xff] %v12786_v9  ;;  %v12792_v59 = vadd.f32 %v3810_v10, %v3307_v43  ;;  %v3310_v4 = vadd.f32 %v9653_v44, %v12168_v58  ;;  %9998 = vmatprep.mubr.msk.f32.mxu1 %vm196_vm1, %v8397_v61  ;;  %v3820_v25 = vpop.f32.mrf.mxu0  ;;  %v8400_v61 = vld [vmem:[%s10971_s30 + $0x69] sm:$0xff]  ;;  %v8401_v44 = vld [vmem:[%s10971_s30 + $0x79] sm:$0xff] }
 0x26b   : > { %v3110_v46 = vpop.f32.mrf.mxu1 }
 0x26c   : > { %v12800_v26 = vadd.f32 %v9751_v38, %v3310_v4  ;;  %v3309_v9 = vadd.f32 %v3110_v46, %v12175_v55  ;;  %v9754_v10 = vpop.f32.mrf.mxu0  ;;  %10097 = vmatmul.mubr.msk.f32.vlgmr.msra.gmra.mxu0 %vm196_vm1, %v12202_v50 }
 0x26d   : > { %v9656_v22 = vpop.f32.mrf.mxu1  ;;  %9999 = vmatmul.mubr.msk.f32.vlgmr.msra.gmra.mxu1 %vm196_vm1, %v8398_v34  ;;  %10099 = vmatprep.mubr.msk.f32.mxu0 %vm196_vm1, %v12206_v20  ;;  %v8402_v34 = vld [vmem:[%s10971_s30 + $0x81] sm:$0xff] }
 0x26e   : > { %v12806_v58 = vadd.f32 %v3820_v25, %v3309_v9  ;;  %v3312_v11 = vadd.f32 %v9656_v22, %v12190_v13  ;;  %10001 = vmatprep.mubr.msk.f32.mxu1 %vm196_vm1, %v8399_v31  ;;  %v3830_v55 = vpop.f32.mrf.mxu0  ;;  %v8403_v25 = vld [vmem:[%s10971_s30 + $0x89] sm:$0xff] }
 0x26f   : > { %v3120_v43 = vpop.f32.mrf.mxu1 }
 0x270   : > { %v12814_v38 = vadd.f32 %v9754_v10, %v3312_v11  ;;  %v3311_v4 = vadd.f32 %v3120_v43, %v12195_v35  ;;  %v9757_v9 = vpop.f32.mrf.mxu0  ;;  %10100 = vmatmul.mubr.msk.f32.gmra.mxu0 %vm196_vm1, %v12222_v8  ;;  %v8405_v43 = vld [vmem:[%s10971_s30 + $0xa1] sm:$0xff] }
 0x271   : > { %v9659_v50 = vpop.f32.mrf.mxu1  ;;  %10002 = vmatmul.mubr.msk.f32.gmra.mxu1 %vm196_vm1, %v8400_v61  ;;  %10102 = vmatprep.mubr.msk.f32.mxu0 %vm196_vm1, %v12226_v40  ;;  %v8404_v40 = vld [vmem:[%s10971_s30 + $0x91] sm:$0xff] }
 0x272   : > { %v12820_v13 = vadd.f32 %v3830_v55, %v3311_v4  ;;  %v3314_v20 = vadd.f32 %v9659_v50, %v12209_v47  ;;  %10004 = vmatprep.mubr.msk.f32.mxu1 %vm196_vm1, %v8401_v44  ;;  %v3840_v35 = vpop.f32.mrf.mxu0  ;;  %v14187_v44 = vld [vmem:[#allocation9_spill] sm:$0xff] }
 0x273   : > { %v3130_v46 = vpop.f32.mrf.mxu1 }
 0x274   : > { %v12828_v31 = vadd.f32 %v9757_v9, %v3314_v20  ;;  %v3313_v22 = vadd.f32 %v3130_v46, %v12215_v56  ;;  %v9760_v10 = vpop.f32.mrf.mxu0  ;;  %10103 = vmatmul.mubr.msk.f32.gmra.mxu0 %vm196_vm1, %v12242_v21  ;;  %v14188_v9 = vld [vmem:[#allocation10_spill] sm:$0xff] }
 0x275   : > { %v9662_v8 = vpop.f32.mrf.mxu1  ;;  %10005 = vmatmul.mubr.msk.f32.gmra.mxu1 %vm196_vm1, %v8402_v34  ;;  %10105 = vmatprep.mubr.msk.f32.mxu0 %vm196_vm1, %v12246_v18  ;;  %v8406_v18 = vld [vmem:[%s10971_s30 + $0xa9] sm:$0xff]  ;;  %v14189_v34 = vld [vmem:[#allocation12_spill] sm:$0xff] }
 0x276   : > { %v12834_v47 = vadd.f32 %v3840_v35, %v3313_v22  ;;  %v3316_v11 = vadd.f32 %v9662_v8, %v12229_v27  ;;  %10007 = vmatprep.mubr.msk.f32.mxu1 %vm196_vm1, %v8403_v25  ;;  %v3850_v56 = vpop.f32.mrf.mxu0  ;;  %v8407_v25 = vld [vmem:[%s10971_s30 + $0xb1] sm:$0xff] }
 0x277   : > { %v3140_v61 = vpop.f32.mrf.mxu1  ;;  %v14190_v8 = vld [vmem:[#allocation11_spill] sm:$0xff] }
 0x278   : > { %v12842_v55 = vadd.f32 %v9760_v10, %v3316_v11  ;;  %v3315_v4 = vadd.f32 %v3140_v61, %v14187_v44  ;;  %v9763_v50 = vpop.f32.mrf.mxu0  ;;  %10106 = vmatmul.mubr.msk.f32.gmra.mxu0 %vm196_vm1, %v12262_v0  ;;  %v8408_v44 = vld [vmem:[%s10971_s30 + $0xb9] sm:$0xff] }
 0x279   : > { %v9665_v21 = vpop.f32.mrf.mxu1  ;;  %10008 = vmatmul.mubr.msk.f32.gmra.mxu1 %vm196_vm1, %v8404_v40  ;;  %10108 = vmatprep.mubr.msk.f32.mxu0 %vm196_vm1, %v14189_v34  ;;  %v14191_v40 = vld [vmem:[#allocation15_spill] sm:$0xff] }
 0x27a   : > { %v12848_v27 = vadd.f32 %v3850_v56, %v3315_v4  ;;  %v3318_v20 = vadd.f32 %v9665_v21, %v14188_v9  ;;  %10010 = vmatprep.mubr.msk.f32.mxu1 %vm196_vm1, %v8405_v43  ;;  %v3860_v35 = vpop.f32.mrf.mxu0  ;;  %v14192_v56 = vld [vmem:[#allocation13_spill] sm:$0xff]  ;;  %v14193_v4 = vld [vmem:[#allocation16_spill] sm:$0xff]  ;;  %v8409_v9 = vld [vmem:[%s10971_s30 + $0xc9] sm:$0xff] }
 0x27b   : > { %v3150_v46 = vpop.f32.mrf.mxu1 }
 0x27c   : > { %v12856_v22 = vadd.f32 %v9763_v50, %v3318_v20  ;;  %v3317_v10 = vadd.f32 %v3150_v46, %v14190_v8  ;;  %v9766_v11 = vpop.f32.mrf.mxu0  ;;  %10109 = vmatmul.mubr.msk.f32.gmra.mxu0 %vm196_vm1, %v14191_v40  ;;  %v14195_v8 = vld [vmem:[#allocation19_spill] sm:$0xff] }
 0x27d   : > { %v9668_v0 = vpop.f32.mrf.mxu1  ;;  %10011 = vmatmul.mubr.msk.f32.gmra.mxu1 %vm196_vm1, %v8406_v18  ;;  %10111 = vmatprep.mubr.msk.f32.mxu0 %vm196_vm1, %v14193_v4  ;;  %v14194_v18 = vld [vmem:[#allocation14_spill] sm:$0xff]  ;;  %v8410_v40 = vld [vmem:[%s10971_s30 + $0xd1] sm:$0xff]  ;;  %v8411_v4 = vld [vmem:[%s10971_s30 + $0xd9] sm:$0xff] }
 0x27e   : > { %v12862_v61 = vadd.f32 %v3860_v35, %v3317_v10  ;;  %v3320_v43 = vadd.f32 %v9668_v0, %v14192_v56  ;;  %10013 = vmatprep.mubr.msk.f32.mxu1 %vm196_vm1, %v8407_v25  ;;  %v3870_v50 = vpop.f32.mrf.mxu0  ;;  %v14197_v10 = vld [vmem:[#allocation17_spill] sm:$0xff]  ;;  %v14198_v56 = vld [vmem:[#allocation20_spill] sm:$0xff] }
 0x27f   : > { %v3160_v21 = vpop.f32.mrf.mxu1 }
 0x280   : > { %v12870_v20 = vadd.f32 %v9766_v11, %v3320_v43  ;;  %v3319_v34 = vadd.f32 %v3160_v21, %v14194_v18  ;;  %v9769_v35 = vpop.f32.mrf.mxu0  ;;  %10112 = vmatmul.mubr.msk.f32.gmra.mxu0 %vm196_vm1, %v14195_v8 }
 0x281   : > { %v9671_v46 = vpop.f32.mrf.mxu1  ;;  %10014 = vmatmul.mubr.msk.f32.gmra.mxu1 %vm196_vm1, %v8408_v44  ;;  %10114 = vmatprep.mubr.msk.f32.mxu0 %vm196_vm1, %v14198_v56  ;;  %v14200_v44 = vld [vmem:[#allocation18_spill] sm:$0xff] }
 0x282   : > { %v12876_v25 = vadd.f32 %v3870_v50, %v3319_v34  ;;  %v3322_v0 = vadd.f32 %v9671_v46, %v14197_v10  ;;  %10016 = vmatprep.mubr.msk.f32.mxu1 %vm196_vm1, %v8409_v9  ;;  %v3880_v43 = vpop.f32.mrf.mxu0  ;;  %v14201_v34 = vld [vmem:[#allocation23_spill] sm:$0xff]  ;;  %v14203_v46 = vld [vmem:[#allocation21_spill] sm:$0xff] }
 0x283   : > { %v3170_v11 = vpop.f32.mrf.mxu1  ;;  %v8412_v56 = vld [vmem:[%s10971_s30 + $0xe1] sm:$0xff] }
 0x284   : > { %14196 = vst [vmem:[#allocation9_spill] sm:$0xff] %v12876_v25  ;;  %v12884_v21 = vadd.f32 %v9769_v35, %v3322_v0  ;;  %v3321_v18 = vadd.f32 %v3170_v11, %v14200_v44  ;;  %v9772_v50 = vpop.f32.mrf.mxu0  ;;  %10115 = vmatmul.mubr.msk.f32.gmra.mxu0 %vm196_vm1, %v14201_v34  ;;  %v14204_v25 = vld [vmem:[#allocation24_spill] sm:$0xff] }
 0x285   : > { %v9674_v8 = vpop.f32.mrf.mxu1  ;;  %10017 = vmatmul.mubr.msk.f32.gmra.mxu1 %vm196_vm1, %v8410_v40  ;;  %10117 = vmatprep.mubr.msk.f32.mxu0 %vm196_vm1, %v14204_v25  ;;  %v8413_v11 = vld [vmem:[%s10971_s30 + $0xf1] sm:$0xff]  ;;  %v14206_v40 = vld [vmem:[#allocation22_spill] sm:$0xff]  ;;  %v8414_v25 = vld [vmem:[%s10971_s30 + $0xf9] sm:$0xff] }
 0x286   : > { %14199 = vst [vmem:[#allocation10_spill] sm:$0xff] %v12884_v21  ;;  %v12890_v9 = vadd.f32 %v3880_v43, %v3321_v18  ;;  %v3324_v10 = vadd.f32 %v9674_v8, %v14203_v46  ;;  %10019 = vmatprep.mubr.msk.f32.mxu1 %vm196_vm1, %v8411_v4  ;;  %v3890_v0 = vpop.f32.mrf.mxu0  ;;  %v14207_v18 = vld [vmem:[#allocation27_spill] sm:$0xff]  ;;  %v14209_v8 = vld [vmem:[#allocation25_spill] sm:$0xff] }
 0x287   : > { %v3180_v35 = vpop.f32.mrf.mxu1 }
 0x288   : > { %14202 = vst [vmem:[#allocation12_spill] sm:$0xff] %v12890_v9  ;;  %v12898_v44 = vadd.f32 %v9772_v50, %v3324_v10  ;;  %v3323_v21 = vadd.f32 %v3180_v35, %v14206_v40  ;;  %v9775_v43 = vpop.f32.mrf.mxu0  ;;  %10118 = vmatmul.mubr.msk.f32.gmra.mxu0 %vm196_vm1, %v14207_v18  ;;  %v14210_v9 = vld [vmem:[#allocation28_spill] sm:$0xff]  ;;  %v8415_v35 = vld [vmem:[%s10971_s30 + $0x101] sm:$0xff] }
 0x289   : > { %v9677_v34 = vpop.f32.mrf.mxu1  ;;  %10020 = vmatmul.mubr.msk.f32.gmra.mxu1 %vm196_vm1, %v8412_v56  ;;  %10120 = vmatprep.mubr.msk.f32.mxu0 %vm196_vm1, %v14210_v9  ;;  %v14212_v56 = vld [vmem:[#allocation26_spill] sm:$0xff] }
 0x28a   : > { %14205 = vst [vmem:[#allocation11_spill] sm:$0xff] %v12898_v44  ;;  %v12904_v4 = vadd.f32 %v3890_v0, %v3323_v21  ;;  %v3326_v46 = vadd.f32 %v9677_v34, %v14209_v8  ;;  %10022 = vmatprep.mubr.msk.f32.mxu1 %vm196_vm1, %v8413_v11  ;;  %v3900_v10 = vpop.f32.mrf.mxu0  ;;  %v14213_v0 = vld [vmem:[#allocation31_spill] sm:$0xff]  ;;  %v14215_v34 = vld [vmem:[#allocation29_spill] sm:$0xff] }
 0x28b   : > { %v3190_v50 = vpop.f32.mrf.mxu1  ;;  %v8416_v9 = vld [vmem:[%s10971_s30 + $0x109] sm:$0xff] }
 0x28c   : > { %14208 = vst [vmem:[#allocation15_spill] sm:$0xff] %v12904_v4  ;;  %v12912_v40 = vadd.f32 %v9775_v43, %v3326_v46  ;;  %v3325_v44 = vadd.f32 %v3190_v50, %v14212_v56  ;;  %v9778_v21 = vpop.f32.mrf.mxu0  ;;  %10121 = vmatmul.mubr.msk.f32.gmra.mxu0 %vm196_vm1, %v14213_v0  ;;  %v14216_v4 = vld [vmem:[#allocation32_spill] sm:$0xff] }
 0x28d   : > { %v9680_v18 = vpop.f32.mrf.mxu1  ;;  %10023 = vmatmul.mubr.msk.f32.gmra.mxu1 %vm196_vm1, %v8414_v25  ;;  %10123 = vmatprep.mubr.msk.f32.mxu0 %vm196_vm1, %v14216_v4  ;;  %v8417_v50 = vld [vmem:[%s10971_s30 + $0x119] sm:$0xff]  ;;  %v14218_v25 = vld [vmem:[#allocation30_spill] sm:$0xff] }
 0x28e   : > { %14211 = vst [vmem:[#allocation13_spill] sm:$0xff] %v12912_v40  ;;  %v12918_v11 = vadd.f32 %v3900_v10, %v3325_v44  ;;  %v3328_v8 = vadd.f32 %v9680_v18, %v14215_v34  ;;  %10025 = vmatprep.mubr.msk.f32.mxu1 %vm196_vm1, %v8415_v35  ;;  %v3910_v46 = vpop.f32.mrf.mxu0  ;;  %v14219_v10 = vld [vmem:[#allocation35_spill] sm:$0xff]  ;;  %v14221_v18 = vld [vmem:[#allocation33_spill] sm:$0xff] }
 0x28f   : > { %v3200_v43 = vpop.f32.mrf.mxu1  ;;  %v8418_v4 = vld [vmem:[%s10971_s30 + $0x121] sm:$0xff] }
 0x290   : > { %14214 = vst [vmem:[#allocation16_spill] sm:$0xff] %v12918_v11  ;;  %v12926_v56 = vadd.f32 %v9778_v21, %v3328_v8  ;;  %v3327_v40 = vadd.f32 %v3200_v43, %v14218_v25  ;;  %v9781_v44 = vpop.f32.mrf.mxu0  ;;  %10124 = vmatmul.mubr.msk.f32.gmra.mxu0 %vm196_vm1, %v14219_v10  ;;  %v14222_v11 = vld [vmem:[#allocation36_spill] sm:$0xff]  ;;  %v8419_v43 = vld [vmem:[%s10971_s30 + $0x129] sm:$0xff] }
 0x291   : > { %v9683_v0 = vpop.f32.mrf.mxu1  ;;  %10026 = vmatmul.mubr.msk.f32.gmra.mxu1 %vm196_vm1, %v8416_v9  ;;  %10126 = vmatprep.mubr.msk.f32.mxu0 %vm196_vm1, %v14222_v11  ;;  %v14224_v9 = vld [vmem:[#allocation34_spill] sm:$0xff]  ;;  %v8420_v11 = vld [vmem:[%s10971_s30 + $0x131] sm:$0xff] }
 0x292   : > { %14217 = vst [vmem:[#allocation14_spill] sm:$0xff] %v12926_v56  ;;  %v12932_v35 = vadd.f32 %v3910_v46, %v3327_v40  ;;  %v3330_v34 = vadd.f32 %v9683_v0, %v14221_v18  ;;  %10028 = vmatprep.mubr.msk.f32.mxu1 %vm196_vm1, %v8417_v50  ;;  %v3920_v8 = vpop.f32.mrf.mxu0  ;;  %v14225_v46 = vld [vmem:[#allocation39_spill] sm:$0xff]  ;;  %v14227_v0 = vld [vmem:[#allocation37_spill] sm:$0xff] }
 0x293   : > { %v3210_v21 = vpop.f32.mrf.mxu1 }
 0x294   : > { %14220 = vst [vmem:[#allocation19_spill] sm:$0xff] %v12932_v35  ;;  %v12940_v25 = vadd.f32 %v9781_v44, %v3330_v34  ;;  %v3329_v56 = vadd.f32 %v3210_v21, %v14224_v9  ;;  %v9784_v40 = vpop.f32.mrf.mxu0  ;;  %10127 = vmatmul.mubr.msk.f32.gmra.mxu0 %vm196_vm1, %v14225_v46  ;;  %v14228_v35 = vld [vmem:[#allocation40_spill] sm:$0xff]  ;;  %v8421_v21 = vld [vmem:[%s10971_s30 + $0x141] sm:$0xff] }
 0x295   : > { %v9686_v10 = vpop.f32.mrf.mxu1  ;;  %10029 = vmatmul.mubr.msk.f32.gmra.mxu1 %vm196_vm1, %v8418_v4  ;;  %10129 = vmatprep.mubr.msk.f32.mxu0 %vm196_vm1, %v14228_v35  ;;  %v14230_v4 = vld [vmem:[#allocation38_spill] sm:$0xff] }
 0x296   : > { %14223 = vst [vmem:[#allocation17_spill] sm:$0xff] %v12940_v25  ;;  %v12946_v50 = vadd.f32 %v3920_v8, %v3329_v56  ;;  %v3332_v18 = vadd.f32 %v9686_v10, %v14227_v0  ;;  %10031 = vmatprep.mubr.msk.f32.mxu1 %vm196_vm1, %v8419_v43  ;;  %v3930_v34 = vpop.f32.mrf.mxu0  ;;  %v14231_v8 = vld [vmem:[#allocation43_spill] sm:$0xff]  ;;  %v14233_v10 = vld [vmem:[#allocation41_spill] sm:$0xff] }
 0x297   : > { %v3220_v44 = vpop.f32.mrf.mxu1  ;;  %v8422_v35 = vld [vmem:[%s10971_s30 + $0x149] sm:$0xff] }
 0x298   : > { %14226 = vst [vmem:[#allocation20_spill] sm:$0xff] %v12946_v50  ;;  %v12954_v9 = vadd.f32 %v9784_v40, %v3332_v18  ;;  %v3331_v25 = vadd.f32 %v3220_v44, %v14230_v4  ;;  %v9787_v56 = vpop.f32.mrf.mxu0  ;;  %10130 = vmatmul.mubr.msk.f32.gmra.mxu0 %vm196_vm1, %v14231_v8  ;;  %v14234_v50 = vld [vmem:[#allocation44_spill] sm:$0xff] }
 0x299   : > { %v9689_v46 = vpop.f32.mrf.mxu1  ;;  %10032 = vmatmul.mubr.msk.f32.gmra.mxu1 %vm196_vm1, %v8420_v11  ;;  %10132 = vmatprep.mubr.msk.f32.mxu0 %vm196_vm1, %v14234_v50  ;;  %v8423_v44 = vld [vmem:[%s10971_s30 + $0x151] sm:$0xff]  ;;  %v14236_v11 = vld [vmem:[#allocation42_spill] sm:$0xff]  ;;  %v8424_v50 = vld [vmem:[%s10971_s30 + $0x159] sm:$0xff] }
 0x29a   : > { %14229 = vst [vmem:[#allocation18_spill] sm:$0xff] %v12954_v9  ;;  %v12960_v43 = vadd.f32 %v3930_v34, %v3331_v25  ;;  %v3334_v0 = vadd.f32 %v9689_v46, %v14233_v10  ;;  %10034 = vmatprep.mubr.msk.f32.mxu1 %vm196_vm1, %v8421_v21  ;;  %v3940_v18 = vpop.f32.mrf.mxu0  ;;  %v14237_v34 = vld [vmem:[#allocation47_spill] sm:$0xff]  ;;  %v14238_v46 = vld [vmem:[#allocation45_spill] sm:$0xff] }
 0x29b   : > { %v3230_v40 = vpop.f32.mrf.mxu1 }
 0x29c   : > { %14232 = vst [vmem:[#allocation23_spill] sm:$0xff] %v12960_v43  ;;  %v12968_v4 = vadd.f32 %v9787_v56, %v3334_v0  ;;  %v3333_v9 = vadd.f32 %v3230_v40, %v14236_v11  ;;  %v9790_v25 = vpop.f32.mrf.mxu0  ;;  %10133 = vmatmul.mubr.msk.f32.gmra.mxu0 %vm196_vm1, %v14237_v34  ;;  %v14239_v43 = vld [vmem:[#allocation48_spill] sm:$0xff]  ;;  %v8425_v40 = vld [vmem:[%s10971_s30 + $0x169] sm:$0xff] }
 0x29d   : > { %v9692_v8 = vpop.f32.mrf.mxu1  ;;  %10035 = vmatmul.mubr.msk.f32.gmra.mxu1 %vm196_vm1, %v8422_v35  ;;  %10135 = vmatprep.mubr.msk.f32.mxu0 %vm196_vm1, %v14239_v43  ;;  %v14241_v35 = vld [vmem:[#allocation46_spill] sm:$0xff]  ;;  %v8426_v43 = vld [vmem:[%s10971_s30 + $0x171] sm:$0xff] }
 0x29e   : > { %14235 = vst [vmem:[#allocation21_spill] sm:$0xff] %v12968_v4  ;;  %v12974_v21 = vadd.f32 %v3940_v18, %v3333_v9  ;;  %v3336_v10 = vadd.f32 %v9692_v8, %v14238_v46  ;;  %10037 = vmatprep.mubr.msk.f32.mxu1 %vm196_vm1, %v8423_v44  ;;  %v3950_v0 = vpop.f32.mrf.mxu0  ;;  %v14242_v44 = vld [vmem:[#allocation49_spill] sm:$0xff]  ;;  %v14243_v46 = vld [vmem:[#allocation3_spill] sm:$0xff] }
 0x29f   : > { %v3240_v56 = vpop.f32.mrf.mxu1 }
 0x2a0   : > { %v12982_v11 = vadd.f32 %v9790_v25, %v3336_v10  ;;  %v3335_v4 = vadd.f32 %v3240_v56, %v14241_v35  ;;  %v9793_v9 = vpop.f32.mrf.mxu0  ;;  %10136 = vmatmul.mubr.msk.f32.gmra.mxu0 %vm196_vm1, %v12462_v52  ;;  %v8427_v56 = vld [vmem:[%s10971_s30 + $0x179] sm:$0xff] }
 0x2a1   : > { %v9695_v34 = vpop.f32.mrf.mxu1  ;;  %10038 = vmatmul.mubr.msk.f32.gmra.mxu1 %vm196_vm1, %v8424_v50  ;;  %10138 = vmatprep.mubr.msk.f32.mxu0 %vm196_vm1, %v14243_v46  ;;  %v14244_v50 = vld [vmem:[#allocation4_spill] sm:$0xff] }
 0x2a2   : > { %14240 = vst [vmem:[#allocation24_spill] sm:$0xff] %v12982_v11  ;;  %v12988_v18 = vadd.f32 %v3950_v0, %v3335_v4  ;;  %v3338_v8 = vadd.f32 %v9695_v34, %v14242_v44  ;;  %10040 = vmatprep.mubr.msk.f32.mxu1 %vm196_vm1, %v8425_v40  ;;  %v3960_v10 = vpop.f32.mrf.mxu0  ;;  %v14245_v40 = vld [vmem:[#allocation50_spill] sm:$0xff]  ;;  %v8429_v46 = vld [vmem:[%s10971_s30 + $0x191] sm:$0xff] }
 0x2a3   : > { %v3250_v25 = vpop.f32.mrf.mxu1  ;;  %v8428_v44 = vld [vmem:[%s10971_s30 + $0x181] sm:$0xff] }
 0x2a4   : > { %v12996_v35 = vadd.f32 %v9793_v9, %v3338_v8  ;;  %v3337_v11 = vadd.f32 %v3250_v25, %v14244_v50  ;;  %v9796_v4 = vpop.f32.mrf.mxu0  ;;  %10139 = vmatmul.mubr.msk.f32.gmra.mxu0 %vm196_vm1, %v12482_v30 }
 0x2a5   : > { %v9698_v52 = vpop.f32.mrf.mxu1  ;;  %10041 = vmatmul.mubr.msk.f32.gmra.mxu1 %vm196_vm1, %v8426_v43  ;;  %10141 = vmatprep.mubr.msk.f32.mxu0 %vm196_vm1, %v12486_v54  ;;  %v14246_v43 = vld [vmem:[#allocation5_spill] sm:$0xff] }
 0x2a6   : > { %v13002_v0 = vadd.f32 %v3960_v10, %v3337_v11  ;;  %v3340_v34 = vadd.f32 %v9698_v52, %v14245_v40  ;;  %10043 = vmatprep.mubr.msk.f32.mxu1 %vm196_vm1, %v8427_v56  ;;  %v3970_v8 = vpop.f32.mrf.mxu0  ;;  %v14247_v56 = vld [vmem:[#allocation6_spill] sm:$0xff]  ;;  %v8430_v54 = vld [vmem:[%s10971_s30 + $0x199] sm:$0xff] }
 0x2a7   : > { %v3260_v9 = vpop.f32.mrf.mxu1 }
 0x2a8   : > { %v13010_v25 = vadd.f32 %v9796_v4, %v3340_v34  ;;  %v3339_v50 = vadd.f32 %v3260_v9, %v14246_v43  ;;  %v9799_v11 = vpop.f32.mrf.mxu0  ;;  %10142 = vmatmul.mubr.msk.f32.gmra.mxu0 %vm196_vm1, %v12502_v2  ;;  %v8431_v34 = vld [vmem:[%s10971_s30 + $0x1a1] sm:$0xff] }
 0x2a9   : > { %v9701_v30 = vpop.f32.mrf.mxu1  ;;  %10044 = vmatmul.mubr.msk.f32.gmra.mxu1 %vm196_vm1, %v8428_v44  ;;  %10144 = vmatprep.mubr.msk.f32.mxu0 %vm196_vm1, %v12506_v62  ;;  %v14248_v44 = vld [vmem:[#allocation7_spill] sm:$0xff] }
 0x2aa   : > { %v13016_v10 = vadd.f32 %v3970_v8, %v3339_v50  ;;  %v3342_v52 = vadd.f32 %v9701_v30, %v14247_v56  ;;  %10046 = vmatprep.mubr.msk.f32.mxu1 %vm196_vm1, %v8429_v46  ;;  %v3980_v40 = vpop.f32.mrf.mxu0  ;;  %v14249_v50 = vld [vmem:[#allocation51_spill] sm:$0xff] }
 0x2ab   : > { %v3270_v4 = vpop.f32.mrf.mxu1  ;;  %v8432_v62 = vld [vmem:[%s10971_s30 + $0x1a9] sm:$0xff] }
 0x2ac   : > { %v13024_v9 = vadd.f32 %v9799_v11, %v3342_v52  ;;  %v3341_v43 = vadd.f32 %v3270_v4, %v14248_v44  ;;  %v9902_v8 = vpop.f32.mrf.mxu0  ;;  %10145 = vmatmul.mubr.msk.f32.gmra.mxu0 %vm196_vm1, %v12522_v15  ;;  %v8433_v52 = vld [vmem:[%s10971_s30 + $0x1b9] sm:$0xff] }
 0x2ad   : > { %v9804_v2 = vpop.f32.mrf.mxu1  ;;  %10047 = vmatmul.mubr.msk.f32.gmra.mxu1 %vm196_vm1, %v8430_v54  ;;  %10147 = vmatprep.mubr.msk.f32.mxu0 %vm196_vm1, %v12526_v23  ;;  %v14250_v54 = vld [vmem:[#allocation52_spill] sm:$0xff]  ;;  %v8434_v23 = vld [vmem:[%s10971_s30 + $0x1c1] sm:$0xff] }
 0x2ae   : > { %v13030_v46 = vadd.f32 %v3980_v40, %v3341_v43  ;;  %v4700_v30 = vadd.f32 %v9804_v2, %v14249_v50  ;;  %10049 = vmatprep.mubr.msk.f32.mxu1 %vm196_vm1, %v8431_v34  ;;  %v5093_v56 = vpop.f32.mrf.mxu0  ;;  %v14251_v43 = vld [vmem:[#allocation53_spill] sm:$0xff] }
 0x2af   : > { %v4380_v11 = vpop.f32.mrf.mxu1 }
 0x2b0   : > { %v13038_v4 = vadd.f32 %v9902_v8, %v4700_v30  ;;  %v4699_v44 = vadd.f32 %v4380_v11, %v14250_v54  ;;  %v9905_v40 = vpop.f32.mrf.mxu0  ;;  %10148 = vmatmul.mubr.msk.f32.gmra.mxu0 %vm196_vm1, %v12542_v24  ;;  %v8435_v30 = vld [vmem:[%s10971_s30 + $0x1c9] sm:$0xff] }
 0x2b1   : > { %v9807_v15 = vpop.f32.mrf.mxu1  ;;  %10050 = vmatmul.mubr.msk.f32.gmra.mxu1 %vm196_vm1, %v8432_v62  ;;  %10150 = vmatprep.mubr.msk.f32.mxu0 %vm196_vm1, %v12546_v5  ;;  %v14252_v62 = vld [vmem:[#allocation54_spill] sm:$0xff]  ;;  %v8436_v5 = vld [vmem:[%s10971_s30 + $0x1d1] sm:$0xff] }
 0x2b2   : > { %v13044_v34 = vadd.f32 %v5093_v56, %v4699_v44  ;;  %v4702_v2 = vadd.f32 %v9807_v15, %v14251_v43  ;;  %10052 = vmatprep.mubr.msk.f32.mxu1 %vm196_vm1, %v8433_v52  ;;  %v5103_v50 = vpop.f32.mrf.mxu0  ;;  %v14253_v44 = vld [vmem:[#allocation55_spill] sm:$0xff] }
 0x2b3   : > { %v4390_v8 = vpop.f32.mrf.mxu1 }
 0x2b4   : > { %v13052_v11 = vadd.f32 %v9905_v40, %v4702_v2  ;;  %v4701_v54 = vadd.f32 %v4390_v8, %v14252_v62  ;;  %v9908_v56 = vpop.f32.mrf.mxu0  ;;  %10151 = vmatmul.mubr.msk.f32.gmra.mxu0 %vm196_vm1, %v12562_v28  ;;  %v8437_v2 = vld [vmem:[%s10971_s30 + $0x1e1] sm:$0xff] }
 0x2b5   : > { %v9810_v24 = vpop.f32.mrf.mxu1  ;;  %10053 = vmatmul.mubr.msk.f32.gmra.mxu1 %vm196_vm1, %v8434_v23  ;;  %10153 = vmatprep.mubr.msk.f32.mxu0 %vm196_vm1, %v12566_v17  ;;  %v14254_v23 = vld [vmem:[#allocation56_spill] sm:$0xff]  ;;  %v8438_v17 = vld [vmem:[%s10971_s30 + $0x1e9] sm:$0xff] }
 0x2b6   : > { %v13058_v52 = vadd.f32 %v5103_v50, %v4701_v54  ;;  %v4704_v15 = vadd.f32 %v9810_v24, %v14253_v44  ;;  %10055 = vmatprep.mubr.msk.f32.mxu1 %vm196_vm1, %v8435_v30  ;;  %v5113_v43 = vpop.f32.mrf.mxu0  ;;  %v14255_v54 = vld [vmem:[#allocation57_spill] sm:$0xff] }
 0x2b7   : > { %v4400_v40 = vpop.f32.mrf.mxu1 }
 0x2b8   : > { %v13066_v8 = vadd.f32 %v9908_v56, %v4704_v15  ;;  %v4703_v62 = vadd.f32 %v4400_v40, %v14254_v23  ;;  %v9911_v50 = vpop.f32.mrf.mxu0  ;;  %10154 = vmatmul.mubr.msk.f32.gmra.mxu0 %vm196_vm1, %v12582_v32  ;;  %v8439_v15 = vld [vmem:[%s10971_s30 + $0x1f1] sm:$0xff] }
 0x2b9   : > { %v9813_v28 = vpop.f32.mrf.mxu1  ;;  %10056 = vmatmul.mubr.msk.f32.gmra.mxu1 %vm196_vm1, %v8436_v5  ;;  %10156 = vmatprep.mubr.msk.f32.mxu0 %vm196_vm1, %v12586_v37  ;;  %v14256_v5 = vld [vmem:[#allocation58_spill] sm:$0xff]  ;;  %v8440_v37 = vld [vmem:[%s10971_s30 + $0x1f9] sm:$0xff] }
 0x2ba   : > { %v13072_v30 = vadd.f32 %v5113_v43, %v4703_v62  ;;  %v4706_v24 = vadd.f32 %v9813_v28, %v14255_v54  ;;  %10058 = vmatprep.mubr.msk.f32.mxu1 %vm196_vm1, %v8437_v2  ;;  %v5123_v44 = vpop.f32.mrf.mxu0  ;;  %v14257_v62 = vld [vmem:[#allocation59_spill] sm:$0xff] }
 0x2bb   : > { %v4410_v56 = vpop.f32.mrf.mxu1 }
 0x2bc   : > { %v13080_v40 = vadd.f32 %v9911_v50, %v4706_v24  ;;  %v4705_v23 = vadd.f32 %v4410_v56, %v14256_v5  ;;  %v9914_v43 = vpop.f32.mrf.mxu0  ;;  %10157 = vmatmul.mubr.msk.f32.gmra.mxu0 %vm196_vm1, %v12602_v36  ;;  %v8441_v24 = vld [vmem:[%s10971_s30 + $0x209] sm:$0xff] }
 0x2bd   : > { %v9816_v32 = vpop.f32.mrf.mxu1  ;;  %10059 = vmatmul.mubr.msk.f32.gmra.mxu1 %vm196_vm1, %v8438_v17  ;;  %10159 = vmatprep.mubr.msk.f32.mxu0 %vm196_vm1, %v12606_v45  ;;  %v14258_v17 = vld [vmem:[#allocation60_spill] sm:$0xff] }
 0x2be   : > { %v13086_v2 = vadd.f32 %v5123_v44, %v4705_v23  ;;  %v4708_v28 = vadd.f32 %v9816_v32, %v14257_v62  ;;  %10061 = vmatprep.mubr.msk.f32.mxu1 %vm196_vm1, %v8439_v15  ;;  %v5133_v54 = vpop.f32.mrf.mxu0  ;;  %v14259_v23 = vld [vmem:[#allocation61_spill] sm:$0xff]  ;;  %v8442_v45 = vld [vmem:[%s10971_s30 + $0x211] sm:$0xff] }
 0x2bf   : > { %v4420_v50 = vpop.f32.mrf.mxu1 }
 0x2c0   : > { %v13094_v56 = vadd.f32 %v9914_v43, %v4708_v28  ;;  %v4707_v5 = vadd.f32 %v4420_v50, %v14258_v17  ;;  %v9917_v44 = vpop.f32.mrf.mxu0  ;;  %10160 = vmatmul.mubr.msk.f32.gmra.mxu0 %vm196_vm1, %v12622_v51  ;;  %v8443_v28 = vld [vmem:[%s10971_s30 + $0x219] sm:$0xff] }
 0x2c1   : > { %v9819_v36 = vpop.f32.mrf.mxu1  ;;  %10062 = vmatmul.mubr.msk.f32.gmra.mxu1 %vm196_vm1, %v8440_v37  ;;  %10162 = vmatprep.mubr.msk.f32.mxu0 %vm196_vm1, %v12626_v53  ;;  %v14260_v37 = vld [vmem:[#allocation62_spill] sm:$0xff] }
 0x2c2   : > { %v13100_v15 = vadd.f32 %v5133_v54, %v4707_v5  ;;  %v4710_v32 = vadd.f32 %v9819_v36, %v14259_v23  ;;  %10064 = vmatprep.mubr.msk.f32.mxu1 %vm196_vm1, %v8441_v24  ;;  %v5143_v62 = vpop.f32.mrf.mxu0  ;;  %v14261_v5 = vld [vmem:[#allocation63_spill] sm:$0xff]  ;;  %v8444_v53 = vld [vmem:[%s10971_s30 + $0x221] sm:$0xff] }
 0x2c3   : > { %v4430_v43 = vpop.f32.mrf.mxu1 }
 0x2c4   : > { %v13108_v50 = vadd.f32 %v9917_v44, %v4710_v32  ;;  %v4709_v17 = vadd.f32 %v4430_v43, %v14260_v37  ;;  %v9920_v54 = vpop.f32.mrf.mxu0  ;;  %10163 = vmatmul.mubr.msk.f32.gmra.mxu0 %vm196_vm1, %v12642_v19  ;;  %v8445_v32 = vld [vmem:[%s10971_s30 + $0x231] sm:$0xff] }
 0x2c5   : > { %v9822_v51 = vpop.f32.mrf.mxu1  ;;  %10065 = vmatmul.mubr.msk.f32.gmra.mxu1 %vm196_vm1, %v8442_v45  ;;  %10165 = vmatprep.mubr.msk.f32.mxu0 %vm196_vm1, %v12646_v7  ;;  %v14262_v45 = vld [vmem:[#allocation64_spill] sm:$0xff] }
 0x2c6   : > { %v13114_v24 = vadd.f32 %v5143_v62, %v4709_v17  ;;  %v4712_v36 = vadd.f32 %v9822_v51, %v14261_v5  ;;  %10067 = vmatprep.mubr.msk.f32.mxu1 %vm196_vm1, %v8443_v28  ;;  %v5153_v23 = vpop.f32.mrf.mxu0  ;;  %v14263_v17 = vld [vmem:[#allocation65_spill] sm:$0xff] }
 0x2c7   : > { %v4440_v44 = vpop.f32.mrf.mxu1  ;;  %v8446_v7 = vld [vmem:[%s10971_s30 + $0x239] sm:$0xff] }
 0x2c8   : > { %v13122_v43 = vadd.f32 %v9920_v54, %v4712_v36  ;;  %v4711_v37 = vadd.f32 %v4440_v44, %v14262_v45  ;;  %v9923_v62 = vpop.f32.mrf.mxu0  ;;  %10166 = vmatmul.mubr.msk.f32.gmra.mxu0 %vm196_vm1, %v12662_v29  ;;  %v8447_v36 = vld [vmem:[%s10971_s30 + $0x241] sm:$0xff] }
 0x2c9   : > { %v9825_v19 = vpop.f32.mrf.mxu1  ;;  %10068 = vmatmul.mubr.msk.f32.gmra.mxu1 %vm196_vm1, %v8444_v53  ;;  %10168 = vmatprep.mubr.msk.f32.mxu0 %vm196_vm1, %v12666_v6  ;;  %v14265_v53 = vld [vmem:[#allocation66_spill] sm:$0xff] }
 0x2ca   : > { %v13128_v28 = vadd.f32 %v5153_v23, %v4711_v37  ;;  %v4714_v51 = vadd.f32 %v9825_v19, %v14263_v17  ;;  %10070 = vmatprep.mubr.msk.f32.mxu1 %vm196_vm1, %v8445_v32  ;;  %v5163_v5 = vpop.f32.mrf.mxu0  ;;  %v14266_v37 = vld [vmem:[#allocation69_spill] sm:$0xff]  ;;  %v14267_v19 = vld [vmem:[#allocation67_spill] sm:$0xff] }
 0x2cb   : > { %v4450_v54 = vpop.f32.mrf.mxu1  ;;  %v8448_v6 = vld [vmem:[%s10971_s30 + $0x249] sm:$0xff] }
 0x2cc   : > { %v13136_v44 = vadd.f32 %v9923_v62, %v4714_v51  ;;  %v4713_v45 = vadd.f32 %v4450_v54, %v14265_v53  ;;  %v9926_v23 = vpop.f32.mrf.mxu0  ;;  %10169 = vmatmul.mubr.msk.f32.gmra.mxu0 %vm196_vm1, %v14266_v37  ;;  %v8449_v54 = vld [vmem:[%s10971_s30 + $0x259] sm:$0xff] }
 0x2cd   : > { %v9828_v29 = vpop.f32.mrf.mxu1  ;;  %10071 = vmatmul.mubr.msk.f32.gmra.mxu1 %vm196_vm1, %v8446_v7  ;;  %10171 = vmatprep.mubr.msk.f32.mxu0 %vm196_vm1, %v12686_v3  ;;  %v14268_v7 = vld [vmem:[#allocation68_spill] sm:$0xff]  ;;  %v8450_v3 = vld [vmem:[%s10971_s30 + $0x261] sm:$0xff] }
 0x2ce   : > { %14264 = vst [vmem:[#allocation22_spill] sm:$0xff] %v13136_v44  ;;  %v13142_v32 = vadd.f32 %v5163_v5, %v4713_v45  ;;  %v4716_v17 = vadd.f32 %v9828_v29, %v14267_v19  ;;  %10073 = vmatprep.mubr.msk.f32.mxu1 %vm196_vm1, %v8447_v36  ;;  %v5173_v51 = vpop.f32.mrf.mxu0  ;;  %v14269_v45 = vld [vmem:[#allocation70_spill] sm:$0xff] }
 0x2cf   : > { %v4460_v62 = vpop.f32.mrf.mxu1 }
 0x2d0   : > { %v13150_v53 = vadd.f32 %v9926_v23, %v4716_v17  ;;  %v4715_v44 = vadd.f32 %v4460_v62, %v14268_v7  ;;  %v9929_v5 = vpop.f32.mrf.mxu0  ;;  %10172 = vmatmul.mubr.msk.f32.gmra.mxu0 %vm196_vm1, %v12702_v41  ;;  %v8451_v17 = vld [vmem:[%s10971_s30 + $0x269] sm:$0xff] }
 0x2d1   : > { %v9831_v37 = vpop.f32.mrf.mxu1  ;;  %10074 = vmatmul.mubr.msk.f32.gmra.mxu1 %vm196_vm1, %v8448_v6  ;;  %10174 = vmatprep.mubr.msk.f32.mxu0 %vm196_vm1, %v12706_v48  ;;  %v8452_v48 = vld [vmem:[%s10971_s30 + $0x271] sm:$0xff] }
 0x2d2   : > { %v13156_v36 = vadd.f32 %v5173_v51, %v4715_v44  ;;  %v4718_v29 = vadd.f32 %v9831_v37, %v14269_v45  ;;  %10076 = vmatprep.mubr.msk.f32.mxu1 %vm196_vm1, %v8449_v54  ;;  %v5183_v19 = vpop.f32.mrf.mxu0  ;;  %v8453_v37 = vld [vmem:[%s10971_s30 + $0x281] sm:$0xff] }
 0x2d3   : > { %v4470_v23 = vpop.f32.mrf.mxu1 }
 0x2d4   : > { %v13164_v62 = vadd.f32 %v9929_v5, %v4718_v29  ;;  %v4717_v6 = vadd.f32 %v4470_v23, %v12695_v57  ;;  %v9932_v44 = vpop.f32.mrf.mxu0  ;;  %10175 = vmatmul.mubr.msk.f32.gmra.mxu0 %vm196_vm1, %v12722_v49 }
 0x2d5   : > { %v9834_v41 = vpop.f32.mrf.mxu1  ;;  %10077 = vmatmul.mubr.msk.f32.gmra.mxu1 %vm196_vm1, %v8450_v3  ;;  %10177 = vmatprep.mubr.msk.f32.mxu0 %vm196_vm1, %v12725_v12  ;;  %v8454_v12 = vld [vmem:[%s10971_s30 + $0x289] sm:$0xff] }
 0x2d6   : > { %v13170_v51 = vadd.f32 %v5183_v19, %v4717_v6  ;;  %v4720_v54 = vadd.f32 %v9834_v41, %v12708_v33  ;;  %10079 = vmatprep.mubr.msk.f32.mxu1 %vm196_vm1, %v8451_v17  ;;  %v5193_v57 = vpop.f32.mrf.mxu0  ;;  %v8455_v19 = vld [vmem:[%s10971_s30 + $0x291] sm:$0xff] }
 0x2d7   : > { %v4480_v7 = vpop.f32.mrf.mxu1  ;;  %v14270_v6 = vld [vmem:[#allocation71_spill] sm:$0xff] }
 0x2d8   : > { %v13178_v5 = vadd.f32 %v9932_v44, %v4720_v54  ;;  %v4719_v45 = vadd.f32 %v4480_v7, %v12714_v1  ;;  %v9935_v29 = vpop.f32.mrf.mxu0  ;;  %10178 = vmatmul.mubr.msk.f32.gmra.mxu0 %vm196_vm1, %v12742_v39  ;;  %v8456_v7 = vld [vmem:[%s10971_s30 + $0x299] sm:$0xff] }
 0x2d9   : > { %v9837_v49 = vpop.f32.mrf.mxu1  ;;  %10080 = vmatmul.mubr.msk.f32.gmra.mxu1 %vm196_vm1, %v8452_v48  ;;  %10180 = vmatprep.mubr.msk.f32.mxu0 %vm196_vm1, %v12745_v63  ;;  %v14272_v48 = vld [vmem:[#allocation72_spill] sm:$0xff] }
 0x2da   : > { %v13184_v33 = vadd.f32 %v5193_v57, %v4719_v45  ;;  %v4722_v3 = vadd.f32 %v9837_v49, %v12727_v16  ;;  %10082 = vmatprep.mubr.msk.f32.mxu1 %vm196_vm1, %v8453_v37  ;;  %v5203_v1 = vpop.f32.mrf.mxu0  ;;  %v14271_v16 = vld [vmem:[#allocation74_spill] sm:$0xff] }
 0x2db   : > { %v4490_v23 = vpop.f32.mrf.mxu1  ;;  %v8457_v45 = vld [vmem:[%s10971_s30 + $0x2a9] sm:$0xff] }
 0x2dc   : > { %v13192_v17 = vadd.f32 %v9935_v29, %v4722_v3  ;;  %v4721_v39 = vadd.f32 %v4490_v23, %v14270_v6  ;;  %v9938_v44 = vpop.f32.mrf.mxu0  ;;  %10181 = vmatmul.mubr.msk.f32.gmra.mxu0 %vm196_vm1, %v14271_v16  ;;  %v8587_v49 = vld [vmem:[%s10971_s30 + $0x2aa] sm:$0xff]  ;;  %v14273_v3 = vld [vmem:[#allocation73_spill] sm:$0xff] }
 0x2dd   : > { %v9840_v41 = vpop.f32.mrf.mxu1  ;;  %10083 = vmatmul.mubr.msk.f32.gmra.mxu1 %vm196_vm1, %v8454_v12  ;;  %10183 = vmatprep.mubr.msk.f32.mxu0 %vm196_vm1, %v12766_v14  ;;  %v14274_v14 = vld [vmem:[#allocation75_spill] sm:$0xff] }
 0x2de   : > { %v13198_v54 = vadd.f32 %v5203_v1, %v4721_v39  ;;  %v4724_v63 = vadd.f32 %v9840_v41, %v14272_v48  ;;  %10085 = vmatprep.mubr.msk.f32.mxu1 %vm196_vm1, %v8455_v19  ;;  %v5213_v37 = vpop.f32.mrf.mxu0  ;;  %v8458_v39 = vld [vmem:[%s10971_s30 + $0x2b1] sm:$0xff]  ;;  %v8459_v48 = vld [vmem:[%s10971_s30 + $0x2b9] sm:$0xff] }
 0x2df   : > { %v4500_v57 = vpop.f32.mrf.mxu1  ;;  %v8588_v41 = vld [vmem:[%s10971_s30 + $0x2b2] sm:$0xff] }
 0x2e0   : > { %v13207_v29 = vadd.f32 %v9938_v44, %v4724_v63  ;;  %v4723_v12 = vadd.f32 %v4500_v57, %v14273_v3  ;;  %v9941_v1 = vpop.f32.mrf.mxu0  ;;  %10184 = vmatmul.mubr.msk.f32.gmra.mxu0 %vm196_vm1, %v12782_v60  ;;  %v8589_v63 = vld [vmem:[%s10971_s30 + $0x2ba] sm:$0xff] }
 0x2e1   : > { %v9843_v23 = vpop.f32.mrf.mxu1  ;;  %10086 = vmatmul.mubr.msk.f32.gmra.mxu1 %vm196_vm1, %v8456_v7  ;;  %10186 = vmatprep.mubr.msk.f32.mxu0 %vm196_vm1, %v8587_v49  ;;  %v14275_v3 = vld [vmem:[#allocation8_spill] sm:$0xff] }
 0x2e2   : > { %v13213_v19 = vadd.f32 %v5213_v37, %v4723_v12  ;;  %v4726_v6 = vadd.f32 %v9843_v23, %v14274_v14  ;;  %10088 = vmatprep.mubr.msk.f32.mxu1 %vm196_vm1, %v8457_v45  ;;  %v5223_v16 = vpop.f32.mrf.mxu0  ;;  %v8460_v12 = vld [vmem:[%s10971_s30 + $0x2c1] sm:$0xff] }
 0x2e3   : > { %v4510_v44 = vpop.f32.mrf.mxu1  ;;  %v8590_v23 = vld [vmem:[%s10971_s30 + $0x2c2] sm:$0xff]  ;;  %s13373_s30 = scalar_lea.vmem %s13959_s3, %s7673_s13 }
 0x2e4   : > { %v13222_v7 = vadd.f32 %v9941_v1, %v4726_v6  ;;  %v4725_v60 = vadd.f32 %v4510_v44, %v12775_v42  ;;  %v9944_v37 = vpop.f32.mrf.mxu0  ;;  %10187 = vmatmul.mubr.msk.f32.gmra.mxu0 %vm196_vm1, %v8588_v41 }
 0x2e5   : > { %v9846_v57 = vpop.f32.mrf.mxu1  ;;  %10089 = vmatmul.mubr.msk.f32.gmra.mxu1 %vm196_vm1, %v8458_v39  ;;  %10189 = vmatprep.mubr.msk.f32.mxu0 %vm196_vm1, %v8589_v63 }
 0x2e6   : > { %v13227_v45 = vadd.f32 %v5223_v16, %v4725_v60  ;;  %v4728_v49 = vadd.f32 %v9846_v57, %v14275_v3  ;;  %10091 = vmatprep.mubr.msk.f32.mxu1 %vm196_vm1, %v8459_v48  ;;  %v5233_v14 = vpop.f32.mrf.mxu0 }
 0x2e7   : > { %v4520_v1 = vpop.f32.mrf.mxu1 }
 0x2e8   : > { %v13234_v6 = vadd.f32 %v9944_v37, %v4728_v49  ;;  %v4727_v42 = vadd.f32 %v4520_v1, %v12792_v59  ;;  %v9947_v39 = vpop.f32.mrf.mxu0  ;;  %10190 = vmatmul.mubr.msk.f32.gmra.mxu0 %vm196_vm1, %v8590_v23 }
 0x2e9   : > { %v9849_v44 = vpop.f32.mrf.mxu1  ;;  %10092 = vmatmul.mubr.msk.f32.gmra.mxu1 %vm196_vm1, %v8460_v12 }
 0x2ea   : > { %14276 = vst [vmem:[#allocation27_spill] sm:$0xff] %v13234_v6  ;;  %v13239_v41 = vadd.f32 %v5233_v14, %v4727_v42  ;;  %v4730_v16 = vadd.f32 %v9849_v44, %v12800_v26  ;;  %v5243_v60 = vpop.f32.mrf.mxu0 }
 0x2eb   : > { %v4530_v48 = vpop.f32.mrf.mxu1 }
 0x2ec   : > { %v13242_v63 = vadd.f32 %v9947_v39, %v4730_v16  ;;  %v4729_v57 = vadd.f32 %v4530_v48, %v12806_v58  ;;  %v9950_v3 = vpop.f32.mrf.mxu0 }
 0x2ed   : > { %v9852_v37 = vpop.f32.mrf.mxu1 }
 0x2ee   : > { %v13245_v49 = vadd.f32 %v5243_v60, %v4729_v57  ;;  %v4732_v59 = vadd.f32 %v9852_v37, %v12814_v38  ;;  %v5253_v12 = vpop.f32.mrf.mxu0 }
 0x2ef   : > { %v4540_v1 = vpop.f32.mrf.mxu1 }
 0x2f0   : > { %v13248_v6 = vadd.f32 %v9950_v3, %v4732_v59  ;;  %v4731_v23 = vadd.f32 %v4540_v1, %v12820_v13  ;;  %v9953_v26 = vpop.f32.mrf.mxu0 }
 0x2f1   : > { %v9855_v14 = vpop.f32.mrf.mxu1 }
 0x2f2   : > { %v13251_v42 = vadd.f32 %v5253_v12, %v4731_v23  ;;  %v4734_v44 = vadd.f32 %v9855_v14, %v12828_v31  ;;  %v5263_v58 = vpop.f32.mrf.mxu0 }
 0x2f3   : > { %v4550_v39 = vpop.f32.mrf.mxu1 }
 0x2f4   : > { %v13254_v16 = vadd.f32 %v9953_v26, %v4734_v44  ;;  %v4733_v48 = vadd.f32 %v4550_v39, %v12834_v47  ;;  %v9956_v38 = vpop.f32.mrf.mxu0 }
 0x2f5   : > { %v9858_v60 = vpop.f32.mrf.mxu1 }
 0x2f6   : > { %v13257_v57 = vadd.f32 %v5263_v58, %v4733_v48  ;;  %v4736_v37 = vadd.f32 %v9858_v60, %v12842_v55  ;;  %v5273_v13 = vpop.f32.mrf.mxu0 }
 0x2f7   : > { %v4560_v3 = vpop.f32.mrf.mxu1 }
 0x2f8   : > { %v13260_v59 = vadd.f32 %v9956_v38, %v4736_v37  ;;  %v4735_v1 = vadd.f32 %v4560_v3, %v12848_v27  ;;  %v9959_v31 = vpop.f32.mrf.mxu0  ;;  %v14282_v3 = vld [vmem:[#allocation9_spill] sm:$0xff] }
 0x2f9   : > { %v9861_v12 = vpop.f32.mrf.mxu1 }
 0x2fa   : > { %14277 = vst [vmem:[#allocation25_spill] sm:$0xff] %v13260_v59  ;;  %v13263_v23 = vadd.f32 %v5273_v13, %v4735_v1  ;;  %v4738_v14 = vadd.f32 %v9861_v12, %v12856_v22  ;;  %v5283_v47 = vpop.f32.mrf.mxu0 }
 0x2fb   : > { %v4570_v26 = vpop.f32.mrf.mxu1 }
 0x2fc   : > { %14278 = vst [vmem:[#allocation28_spill] sm:$0xff] %v13263_v23  ;;  %v13266_v44 = vadd.f32 %v9959_v31, %v4738_v14  ;;  %v4737_v39 = vadd.f32 %v4570_v26, %v12862_v61  ;;  %v9962_v55 = vpop.f32.mrf.mxu0  ;;  %v14284_v31 = vld [vmem:[#allocation10_spill] sm:$0xff] }
 0x2fd   : > { %v9864_v58 = vpop.f32.mrf.mxu1 }
 0x2fe   : > { %14279 = vst [vmem:[#allocation26_spill] sm:$0xff] %v13266_v44  ;;  %v13269_v48 = vadd.f32 %v5283_v47, %v4737_v39  ;;  %v4740_v60 = vadd.f32 %v9864_v58, %v12870_v20  ;;  %v5293_v27 = vpop.f32.mrf.mxu0  ;;  %v14286_v47 = vld [vmem:[#allocation12_spill] sm:$0xff] }
 0x2ff   : > { %v4580_v38 = vpop.f32.mrf.mxu1 }
 0x300   : > { %14280 = vst [vmem:[#allocation31_spill] sm:$0xff] %v13269_v48  ;;  %v13272_v37 = vadd.f32 %v9962_v55, %v4740_v60  ;;  %v4739_v13 = vadd.f32 %v4580_v38, %v14282_v3  ;;  %v9965_v22 = vpop.f32.mrf.mxu0  ;;  %v14288_v55 = vld [vmem:[#allocation11_spill] sm:$0xff] }
 0x301   : > { %v9867_v1 = vpop.f32.mrf.mxu1 }
 0x302   : > { %14281 = vst [vmem:[#allocation29_spill] sm:$0xff] %v13272_v37  ;;  %v13275_v12 = vadd.f32 %v5293_v27, %v4739_v13  ;;  %v4742_v14 = vadd.f32 %v9867_v1, %v14284_v31  ;;  %v5303_v61 = vpop.f32.mrf.mxu0  ;;  %v14290_v27 = vld [vmem:[#allocation15_spill] sm:$0xff] }
 0x303   : > { %v4590_v44 = vpop.f32.mrf.mxu1 }
 0x304   : > { %14283 = vst [vmem:[#allocation32_spill] sm:$0xff] %v13275_v12  ;;  %v13278_v26 = vadd.f32 %v9965_v22, %v4742_v14  ;;  %v4741_v39 = vadd.f32 %v4590_v44, %v14286_v47  ;;  %v9968_v20 = vpop.f32.mrf.mxu0  ;;  %v14292_v22 = vld [vmem:[#allocation13_spill] sm:$0xff] }
 0x305   : > { %v9870_v48 = vpop.f32.mrf.mxu1 }
 0x306   : > { %14285 = vst [vmem:[#allocation30_spill] sm:$0xff] %v13278_v26  ;;  %v13281_v58 = vadd.f32 %v5303_v61, %v4741_v39  ;;  %v4744_v60 = vadd.f32 %v9870_v48, %v14288_v55  ;;  %v5313_v38 = vpop.f32.mrf.mxu0  ;;  %v14294_v61 = vld [vmem:[#allocation16_spill] sm:$0xff] }
 0x307   : > { %v4600_v37 = vpop.f32.mrf.mxu1 }
 0x308   : > { %14287 = vst [vmem:[#allocation35_spill] sm:$0xff] %v13281_v58  ;;  %v13284_v3 = vadd.f32 %v9968_v20, %v4744_v60  ;;  %v4743_v13 = vadd.f32 %v4600_v37, %v14290_v27  ;;  %v9971_v1 = vpop.f32.mrf.mxu0  ;;  %v14296_v20 = vld [vmem:[#allocation14_spill] sm:$0xff] }
 0x309   : > { %v9873_v12 = vpop.f32.mrf.mxu1 }
 0x30a   : > { %14289 = vst [vmem:[#allocation33_spill] sm:$0xff] %v13284_v3  ;;  %v13287_v31 = vadd.f32 %v5313_v38, %v4743_v13  ;;  %v4746_v14 = vadd.f32 %v9873_v12, %v14292_v22  ;;  %v5323_v44 = vpop.f32.mrf.mxu0  ;;  %v6967_v3 = vlaneseq  ;;  %v14297_v38 = vld [vmem:[#allocation19_spill] sm:$0xff] }
 0x30b   : > { %v4610_v26 = vpop.f32.mrf.mxu1 }
 0x30c   : > { %14291 = vst [vmem:[#allocation36_spill] sm:$0xff] %v13287_v31  ;;  %v13290_v47 = vadd.f32 %v9971_v1, %v4746_v14  ;;  %v4745_v39 = vadd.f32 %v4610_v26, %v14294_v61  ;;  %v9974_v48 = vpop.f32.mrf.mxu0  ;;  %v14299_v1 = vld [vmem:[#allocation17_spill] sm:$0xff]  ;;  %v6968_v26 = vand.u32 127, %v6967_v3  ;;  %v14304_v3 = vld [vmem:[#allocation23_spill] sm:$0xff] }
 0x30d   : > { %v9876_v58 = vpop.f32.mrf.mxu1 }
 0x30e   : > { %14293 = vst [vmem:[#allocation34_spill] sm:$0xff] %v13290_v47  ;;  %v13293_v55 = vadd.f32 %v5323_v44, %v4745_v39  ;;  %v4748_v60 = vadd.f32 %v9876_v58, %v14296_v20  ;;  %v5333_v27 = vpop.f32.mrf.mxu0  ;;  %v14301_v39 = vld [vmem:[#allocation20_spill] sm:$0xff] }
 0x30f   : > { %v4620_v37 = vpop.f32.mrf.mxu1 }
 0x310   : > { %14295 = vst [vmem:[#allocation39_spill] sm:$0xff] %v13293_v55  ;;  %v13296_v23 = vadd.f32 %v9974_v48, %v4748_v60  ;;  %v4747_v13 = vadd.f32 %v4620_v37, %v14297_v38  ;;  %v9977_v22 = vpop.f32.mrf.mxu0  ;;  %v14303_v48 = vld [vmem:[#allocation18_spill] sm:$0xff]  ;;  %v13308_v37 = vmul.u32.u64.low 2863311531, %v6968_v26  ;;  %v13309_v38 = vmul.u32.u64.high 2863311531, %v6968_v26, %v13308_v37 }
 0x311   : > { %v9879_v12 = vpop.f32.mrf.mxu1 }
 0x312   : > { %v13299_v31 = vadd.f32 %v5333_v27, %v4747_v13  ;;  %v4750_v14 = vadd.f32 %v9879_v12, %v14299_v1  ;;  %v5343_v47 = vpop.f32.mrf.mxu0 }
 0x313   : > { %v4630_v61 = vpop.f32.mrf.mxu1 }
 0x314   : > { %14298 = vst [vmem:[#allocation37_spill] sm:$0xff] %v13299_v31  ;;  %v13302_v44 = vadd.f32 %v9977_v22, %v4750_v14  ;;  %v4749_v58 = vadd.f32 %v4630_v61, %v14301_v39  ;;  %v9980_v55 = vpop.f32.mrf.mxu0  ;;  %v14306_v61 = vld [vmem:[#allocation21_spill] sm:$0xff] }
 0x315   : > { %v9882_v20 = vpop.f32.mrf.mxu1 }
 0x316   : > { %14300 = vst [vmem:[#allocation40_spill] sm:$0xff] %v13302_v44  ;;  %v13305_v59 = vadd.f32 %v5343_v47, %v4749_v58  ;;  %v4752_v60 = vadd.f32 %v9882_v20, %v14303_v48  ;;  %v5353_v13 = vpop.f32.mrf.mxu0 }
 0x317   : > { %v4640_v27 = vpop.f32.mrf.mxu1 }
 0x318   : > { %14302 = vst [vmem:[#allocation38_spill] sm:$0xff] %v13305_v59  ;;  %v13311_v31 = vadd.f32 %v9980_v55, %v4752_v60  ;;  %v4751_v12 = vadd.f32 %v4640_v27, %v14304_v3  ;;  %v9983_v22 = vpop.f32.mrf.mxu0  ;;  %v14307_v55 = vld [vmem:[#allocation24_spill] sm:$0xff]  ;;  %v6975_v27 = vshrl.u32 %v13309_v38, 2 }
 0x319   : > { %v9885_v1 = vpop.f32.mrf.mxu1 }
 0x31a   : > { %v13314_v14 = vadd.f32 %v5353_v13, %v4751_v12  ;;  %v4754_v39 = vadd.f32 %v9885_v1, %v14306_v61  ;;  %v5363_v58 = vpop.f32.mrf.mxu0 }
 0x31b   : > { %v4650_v47 = vpop.f32.mrf.mxu1 }
 0x31c   : > { %14305 = vst [vmem:[#allocation43_spill] sm:$0xff] %v13314_v14  ;;  %v13317_v59 = vadd.f32 %v9983_v22, %v4754_v39  ;;  %v4753_v20 = vadd.f32 %v4650_v47, %v12974_v21  ;;  %v9986_v37 = vpop.f32.mrf.mxu0  ;;  %v6976_v39 = vmul.u32 6, %v6975_v27 }
 0x31d   : > { %v9888_v48 = vpop.f32.mrf.mxu1 }
 0x31e   : > { %v13320_v44 = vadd.f32 %v5363_v58, %v4753_v20  ;;  %v4756_v60 = vadd.f32 %v9888_v48, %v14307_v55  ;;  %v5373_v13 = vpop.f32.mrf.mxu0 }
 0x31f   : > { %v4660_v3 = vpop.f32.mrf.mxu1 }
 0x320   : > { %v13324_v12 = vadd.f32 %v9986_v37, %v4756_v60  ;;  %v4755_v1 = vadd.f32 %v4660_v3, %v12988_v18  ;;  %v9989_v14 = vpop.f32.mrf.mxu0  ;;  %v6977_v60 = vsub.s32 %v6968_v26, %v6976_v39 }
 0x321   : > { %v9891_v61 = vpop.f32.mrf.mxu1 }
 0x322   : > { %v13328_v22 = vadd.f32 %v5373_v13, %v4755_v1  ;;  %v4758_v21 = vadd.f32 %v9891_v61, %v12996_v35  ;;  %v5383_v58 = vpop.f32.mrf.mxu0  ;;  %vm6980_vm3 = vcmp.ne.s32.totalorder %v6977_v60, 0  ;;  %vm6981_vm4 = vcmp.lt.s32.totalorder %v6977_v60, 0 }
 0x323   : > { %v4670_v47 = vpop.f32.mrf.mxu1  ;;  %v6983_v39 = vadd.s32 6, %v6977_v60  ;;  %vm13347_vm5 = vmand %vm6981_vm4, %vm6980_vm3 }
 0x324   : > { %v13331_v20 = vadd.f32 %v9989_v14, %v4758_v21  ;;  %v4757_v38 = vadd.f32 %v4670_v47, %v13002_v0  ;;  %v9992_v37 = vpop.f32.mrf.mxu0 }
 0x325   : > { %v9894_v48 = vpop.f32.mrf.mxu1 }
 0x326   : > { %v13334_v55 = vadd.f32 %v5383_v58, %v4757_v38  ;;  %v4760_v18 = vadd.f32 %v9894_v48, %v13010_v25  ;;  %v5393_v13 = vpop.f32.mrf.mxu0 }
 0x327   : > { %v4680_v3 = vpop.f32.mrf.mxu1 }
 0x328   : > { %v13337_v1 = vadd.f32 %v9992_v37, %v4760_v18  ;;  %v4759_v35 = vadd.f32 %v4680_v3, %v13016_v10  ;;  %v9995_v27 = vpop.f32.mrf.mxu0  ;;  %v13357_v37 = vld [vmem:[%s13958_s2] ss:$0 sm:$0xff] }
 0x329   : > { %v9897_v14 = vpop.f32.mrf.mxu1 }
 0x32a   : > { %v13340_v61 = vadd.f32 %v5393_v13, %v4759_v35  ;;  %v4762_v0 = vadd.f32 %v9897_v14, %v13024_v9  ;;  %v5403_v47 = vpop.f32.mrf.mxu0  ;;  %v6984_v35 = vsel %vm13347_vm5, %v6983_v39, %v6977_v60 }
 0x32b   : > { %v4690_v21 = vpop.f32.mrf.mxu1  ;;  %vm13364_vm6 = vcmp.ge.s32.totalorder %v6984_v35, 3 }
 0x32c   : > { %v13343_v25 = vadd.f32 %v9995_v27, %v4762_v0  ;;  %v4761_v26 = vadd.f32 %v4690_v21, %v13030_v46  ;;  %v10098_v10 = vpop.f32.mrf.mxu0 }
 0x32d   : > { %v10000_v58 = vpop.f32.mrf.mxu1 }
 0x32e   : > { %v13351_v48 = vadd.f32 %v5403_v47, %v4761_v26  ;;  %v6123_v9 = vadd.f32 %v10000_v58, %v13038_v4  ;;  %v6513_v46 = vpop.f32.mrf.mxu0 }
 0x32f   : > { %v5803_v18 = vpop.f32.mrf.mxu1 }
 0x330   : > { %v6833_v3 = vadd.f32 %v10098_v10, %v6123_v9  ;;  %v6122_v13 = vadd.f32 %v5803_v18, %v13044_v34  ;;  %v10101_v27 = vpop.f32.mrf.mxu0 }
 0x331   : > { %v10003_v14 = vpop.f32.mrf.mxu1 }
 0x332   : > { %v6904_v0 = vadd.f32 %v13357_v37, %v6833_v3  ;;  %v6832_v21 = vadd.f32 %v6513_v46, %v6122_v13  ;;  %v6125_v4 = vadd.f32 %v10003_v14, %v13052_v11  ;;  %v6523_v26 = vpop.f32.mrf.mxu0 }
 0x333   : > { %v5813_v47 = vpop.f32.mrf.mxu1 }
 0x334   : > { %v8659_v10 = vclamps-f32 %v6904_v0, 10.0  ;;  %v6903_v34 = vadd.f32 %v13357_v37, %v6832_v21  ;;  %v6835_v9 = vadd.f32 %v10101_v27, %v6125_v4  ;;  %v6124_v60 = vadd.f32 %v5813_v47, %v13058_v52  ;;  %v10104_v38 = vpop.f32.mrf.mxu0 }
 0x335   : > { %v10006_v39 = vpop.f32.mrf.mxu1 }
 0x336   : > { %v8658_v11 = vclamps-f32 %v6903_v34, 10.0  ;;  %v6906_v18 = vadd.f32 %v13357_v37, %v6835_v9  ;;  %v6834_v46 = vadd.f32 %v6523_v26, %v6124_v60  ;;  %v6127_v3 = vadd.f32 %v10006_v39, %v13066_v8  ;;  %v6533_v52 = vpop.f32.mrf.mxu0 }
 0x337   : > { %v7115_v13 = vsel %vm13364_vm6, %v8659_v10, %v6904_v0  ;;  %v5823_v35 = vpop.f32.mrf.mxu1 }
 0x338   : > { %v8661_v14 = vclamps-f32 %v6906_v18, 10.0  ;;  %v6905_v27 = vadd.f32 %v13357_v37, %v6834_v46  ;;  %v6837_v21 = vadd.f32 %v10104_v38, %v6127_v3  ;;  %7244 = vrot.lane.b32.xlu0 %v7115_v13, %s10280_s4  ;;  %7436 = vst.msk [vmem:[%s13373_s30 + $0x8] sm:$0xff] %vm7434_vm7, %v7115_v13  ;;  %v6126_v4 = vadd.f32 %v5823_v35, %v13072_v30  ;;  %v10107_v8 = vpop.f32.mrf.mxu0 }
 0x339   : > { %v10009_v47 = vpop.f32.mrf.mxu1  ;;  %v7114_v0 = vsel %vm13364_vm6, %v8658_v11, %v6903_v34 }
 0x33a   : > { %v8660_v26 = vclamps-f32 %v6905_v27, 10.0  ;;  %v6908_v10 = vadd.f32 %v13357_v37, %v6837_v21  ;;  %v6129_v9 = vadd.f32 %v10009_v47, %v13080_v40  ;;  %v6836_v60 = vadd.f32 %v6533_v52, %v6126_v4  ;;  %7435 = vst.msk [vmem:[%s13373_s30] sm:$0xff] %vm7434_vm7, %v7114_v0  ;;  %v6543_v30 = vpop.f32.mrf.mxu0 }
 0x33b   : > { %v7117_v39 = vsel %vm13364_vm6, %v8661_v14, %v6906_v18  ;;  %v5833_v38 = vpop.f32.mrf.mxu1 }
 0x33c   : > { %v8663_v46 = vclamps-f32 %v6908_v10, 10.0  ;;  %v6907_v3 = vadd.f32 %v13357_v37, %v6836_v60  ;;  %v6839_v13 = vadd.f32 %v10107_v8, %v6129_v9  ;;  %7248 = vrot.lane.b32.xlu1 %v7117_v39, %s10280_s4  ;;  %7438 = vst.msk [vmem:[%s13373_s30 + $0x18] sm:$0xff] %vm7434_vm7, %v7117_v39  ;;  %v6128_v34 = vadd.f32 %v5833_v38, %v13086_v2  ;;  %v10110_v11 = vpop.f32.mrf.mxu0 }
 0x33d   : > { %7242 = vrot.lane.b32.xlu0 %v7114_v0, %s10280_s4  ;;  %v10012_v40 = vpop.f32.mrf.mxu1  ;;  %v7116_v18 = vsel %vm13364_vm6, %v8660_v26, %v6905_v27 }
 0x33e   : > { %v8662_v35 = vclamps-f32 %v6907_v3, 10.0  ;;  %v6910_v52 = vadd.f32 %v13357_v37, %v6839_v13  ;;  %v6131_v14 = vadd.f32 %v10012_v40, %v13094_v56  ;;  %v6838_v21 = vadd.f32 %v6543_v30, %v6128_v34  ;;  %7437 = vst.msk [vmem:[%s13373_s30 + $0x10] sm:$0xff] %vm7434_vm7, %v7116_v18  ;;  %v6553_v47 = vpop.f32.mrf.mxu0 }
 0x33f   : > { %v5843_v4 = vpop.f32.mrf.mxu1  ;;  %v7119_v2 = vsel %vm13364_vm6, %v8663_v46, %v6908_v10 }
 0x340   : > { %v8665_v8 = vclamps-f32 %v6910_v52, 10.0  ;;  %v6909_v0 = vadd.f32 %v13357_v37, %v6838_v21  ;;  %v6130_v9 = vadd.f32 %v5843_v4, %v13100_v15  ;;  %v6841_v27 = vadd.f32 %v10110_v11, %v6131_v14  ;;  %7246 = vrot.lane.b32.xlu1 %v7116_v18, %s10280_s4  ;;  %7444 = vst.msk [vmem:[%s13373_s30 + $0x48] sm:$0xff] %vm7434_vm7, %v7119_v2  ;;  %v10113_v60 = vpop.f32.mrf.mxu0 }
 0x341   : > { %v10015_v56 = vpop.f32.mrf.mxu1  ;;  %v7118_v26 = vsel %vm13364_vm6, %v8662_v35, %v6907_v3 }
 0x342   : > { %v8664_v39 = vclamps-f32 %v6909_v0, 10.0  ;;  %v6912_v38 = vadd.f32 %v13357_v37, %v6841_v27  ;;  %v6133_v10 = vadd.f32 %v10015_v56, %v13108_v50  ;;  %v6840_v30 = vadd.f32 %v6553_v47, %v6130_v9  ;;  %7443 = vst.msk [vmem:[%s13373_s30 + $0x40] sm:$0xff] %vm7434_vm7, %v7118_v26  ;;  %7250 = vrot.lane.b32.xlu0 %v7118_v26, %s10280_s4  ;;  %v6563_v46 = vpop.f32.mrf.mxu0 }
 0x343   : > { %v5853_v15 = vpop.f32.mrf.mxu1  ;;  %v7121_v13 = vsel %vm13364_vm6, %v8665_v8, %v6910_v52 }
 0x344   : > { %v8667_v34 = vclamps-f32 %v6912_v38, 10.0  ;;  %v6911_v3 = vadd.f32 %v13357_v37, %v6840_v30  ;;  %v6132_v40 = vadd.f32 %v5853_v15, %v13114_v24  ;;  %v6843_v11 = vadd.f32 %v10113_v60, %v6133_v10  ;;  %7252 = vrot.lane.b32.xlu1 %v7119_v2, %s10280_s4  ;;  %7446 = vst.msk [vmem:[%s13373_s30 + $0x58] sm:$0xff] %vm7434_vm7, %v7121_v13  ;;  %v10116_v35 = vpop.f32.mrf.mxu0 }
 0x345   : > { %v10018_v50 = vpop.f32.mrf.mxu1  ;;  %v7120_v18 = vsel %vm13364_vm6, %v8664_v39, %v6909_v0 }
 0x346   : > { %v8666_v14 = vclamps-f32 %v6911_v3, 10.0  ;;  %v6914_v21 = vadd.f32 %v13357_v37, %v6843_v11  ;;  %v6135_v52 = vadd.f32 %v10018_v50, %v13122_v43  ;;  %v6842_v4 = vadd.f32 %v6563_v46, %v6132_v40  ;;  %7445 = vst.msk [vmem:[%s13373_s30 + $0x50] sm:$0xff] %vm7434_vm7, %v7120_v18  ;;  %7254 = vrot.lane.b32.xlu0 %v7120_v18, %s10280_s4  ;;  %v6573_v47 = vpop.f32.mrf.mxu0 }
 0x347   : > { %v5863_v24 = vpop.f32.mrf.mxu1  ;;  %v7123_v2 = vsel %vm13364_vm6, %v8667_v34, %v6912_v38  ;;  %v14312_v38 = vld [vmem:[#allocation22_spill] sm:$0xff] }
 0x348   : > { %v8669_v8 = vclamps-f32 %v6914_v21, 10.0  ;;  %v6913_v0 = vadd.f32 %v13357_v37, %v6842_v4  ;;  %v6134_v9 = vadd.f32 %v5863_v24, %v13128_v28  ;;  %v6845_v27 = vadd.f32 %v10116_v35, %v6135_v52  ;;  %7256 = vrot.lane.b32.xlu1 %v7121_v13, %s10280_s4  ;;  %7452 = vst.msk [vmem:[%s13373_s30 + $0x88] sm:$0xff] %vm7434_vm7, %v7123_v2  ;;  %v10119_v26 = vpop.f32.mrf.mxu0 }
 0x349   : > { %v10021_v43 = vpop.f32.mrf.mxu1  ;;  %v7122_v56 = vsel %vm13364_vm6, %v8666_v14, %v6911_v3 }
 0x34a   : > { %v8668_v60 = vclamps-f32 %v6913_v0, 10.0  ;;  %v6916_v39 = vadd.f32 %v13357_v37, %v6845_v27  ;;  %v6137_v10 = vadd.f32 %v10021_v43, %v14312_v38  ;;  %v6844_v30 = vadd.f32 %v6573_v47, %v6134_v9  ;;  %7451 = vst.msk [vmem:[%s13373_s30 + $0x80] sm:$0xff] %vm7434_vm7, %v7122_v56  ;;  %7258 = vrot.lane.b32.xlu0 %v7122_v56, %s10280_s4  ;;  %v6583_v15 = vpop.f32.mrf.mxu0 }
 0x34b   : > { %v5873_v28 = vpop.f32.mrf.mxu1  ;;  %v7125_v46 = vsel %vm13364_vm6, %v8669_v8, %v6914_v21 }
 0x34c   : > { %v8671_v13 = vclamps-f32 %v6916_v39, 10.0  ;;  %v6915_v34 = vadd.f32 %v13357_v37, %v6844_v30  ;;  %v6136_v3 = vadd.f32 %v5873_v28, %v13142_v32  ;;  %v6847_v40 = vadd.f32 %v10119_v26, %v6137_v10  ;;  %7260 = vrot.lane.b32.xlu1 %v7123_v2, %s10280_s4  ;;  %7454 = vst.msk [vmem:[%s13373_s30 + $0x98] sm:$0xff] %vm7434_vm7, %v7125_v46  ;;  %v10122_v18 = vpop.f32.mrf.mxu0 }
 0x34d   : > { %v10024_v11 = vpop.f32.mrf.mxu1  ;;  %v7124_v50 = vsel %vm13364_vm6, %v8668_v60, %v6913_v0 }
 0x34e   : > { %v8670_v35 = vclamps-f32 %v6915_v34, 10.0  ;;  %v6918_v14 = vadd.f32 %v13357_v37, %v6847_v40  ;;  %v6139_v21 = vadd.f32 %v10024_v11, %v13150_v53  ;;  %v6846_v52 = vadd.f32 %v6583_v15, %v6136_v3  ;;  %7453 = vst.msk [vmem:[%s13373_s30 + $0x90] sm:$0xff] %vm7434_vm7, %v7124_v50  ;;  %7262 = vrot.lane.b32.xlu0 %v7124_v50, %s10280_s4  ;;  %v6593_v4 = vpop.f32.mrf.mxu0 }
 0x34f   : > { %v5883_v32 = vpop.f32.mrf.mxu1  ;;  %v7127_v24 = vsel %vm13364_vm6, %v8671_v13, %v6916_v39 }
 0x350   : > { %v8673_v47 = vclamps-f32 %v6918_v14, 10.0  ;;  %v6917_v2 = vadd.f32 %v13357_v37, %v6846_v52  ;;  %v6138_v8 = vadd.f32 %v5883_v32, %v13156_v36  ;;  %v6849_v0 = vadd.f32 %v10122_v18, %v6139_v21  ;;  %7264 = vrot.lane.b32.xlu1 %v7125_v46, %s10280_s4  ;;  %7460 = vst.msk [vmem:[%s13373_s30 + $0xc8] sm:$0xff] %vm7434_vm7, %v7127_v24  ;;  %v10125_v27 = vpop.f32.mrf.mxu0 }
 0x351   : > { %v10027_v53 = vpop.f32.mrf.mxu1  ;;  %v7126_v9 = vsel %vm13364_vm6, %v8670_v35, %v6915_v34 }
 0x352   : > { %v8672_v43 = vclamps-f32 %v6917_v2, 10.0  ;;  %v6920_v56 = vadd.f32 %v13357_v37, %v6849_v0  ;;  %v6141_v26 = vadd.f32 %v10027_v53, %v13164_v62  ;;  %v6848_v60 = vadd.f32 %v6593_v4, %v6138_v8  ;;  %7459 = vst.msk [vmem:[%s13373_s30 + $0xc0] sm:$0xff] %vm7434_vm7, %v7126_v9  ;;  %7266 = vrot.lane.b32.xlu0 %v7126_v9, %s10280_s4  ;;  %v6603_v39 = vpop.f32.mrf.mxu0 }
 0x353   : > { %v5893_v36 = vpop.f32.mrf.mxu1  ;;  %v7129_v38 = vsel %vm13364_vm6, %v8673_v47, %v6918_v14 }
 0x354   : > { %v8675_v10 = vclamps-f32 %v6920_v56, 10.0  ;;  %v6919_v30 = vadd.f32 %v13357_v37, %v6848_v60  ;;  %v6140_v28 = vadd.f32 %v5893_v36, %v13170_v51  ;;  %v6851_v15 = vadd.f32 %v10125_v27, %v6141_v26  ;;  %7268 = vrot.lane.b32.xlu1 %v7127_v24, %s10280_s4  ;;  %7462 = vst.msk [vmem:[%s13373_s30 + $0xd8] sm:$0xff] %vm7434_vm7, %v7129_v38  ;;  %v10128_v13 = vpop.f32.mrf.mxu0 }
 0x355   : > { %v10030_v62 = vpop.f32.mrf.mxu1  ;;  %v7128_v46 = vsel %vm13364_vm6, %v8672_v43, %v6917_v2 }
 0x356   : > { %v8674_v34 = vclamps-f32 %v6919_v30, 10.0  ;;  %v6922_v3 = vadd.f32 %v13357_v37, %v6851_v15  ;;  %v6143_v40 = vadd.f32 %v10030_v62, %v13178_v5  ;;  %v6850_v11 = vadd.f32 %v6603_v39, %v6140_v28  ;;  %7461 = vst.msk [vmem:[%s13373_s30 + $0xd0] sm:$0xff] %vm7434_vm7, %v7128_v46  ;;  %7270 = vrot.lane.b32.xlu0 %v7128_v46, %s10280_s4  ;;  %v6613_v50 = vpop.f32.mrf.mxu0 }
 0x357   : > { %v5903_v51 = vpop.f32.mrf.mxu1  ;;  %v7131_v18 = vsel %vm13364_vm6, %v8675_v10, %v6920_v56 }
 0x358   : > { %v8677_v35 = vclamps-f32 %v6922_v3, 10.0  ;;  %v6921_v14 = vadd.f32 %v13357_v37, %v6850_v11  ;;  %v6142_v21 = vadd.f32 %v5903_v51, %v13184_v33  ;;  %v6853_v52 = vadd.f32 %v10128_v13, %v6143_v40  ;;  %7272 = vrot.lane.b32.xlu1 %v7129_v38, %s10280_s4  ;;  %7468 = vst.msk [vmem:[%s13373_s30 + $0x108] sm:$0xff] %vm7434_vm7, %v7131_v18  ;;  %v10131_v4 = vpop.f32.mrf.mxu0 }
 0x359   : > { %v10033_v5 = vpop.f32.mrf.mxu1  ;;  %v7130_v32 = vsel %vm13364_vm6, %v8674_v34, %v6919_v30 }
 0x35a   : > { %v8676_v24 = vclamps-f32 %v6921_v14, 10.0  ;;  %v6924_v47 = vadd.f32 %v13357_v37, %v6853_v52  ;;  %v6145_v2 = vadd.f32 %v10033_v5, %v13192_v17  ;;  %v6852_v8 = vadd.f32 %v6613_v50, %v6142_v21  ;;  %7467 = vst.msk [vmem:[%s13373_s30 + $0x100] sm:$0xff] %vm7434_vm7, %v7130_v32  ;;  %7274 = vrot.lane.b32.xlu0 %v7130_v32, %s10280_s4  ;;  %v6623_v0 = vpop.f32.mrf.mxu0 }
 0x35b   : > { %v5913_v33 = vpop.f32.mrf.mxu1  ;;  %v7133_v53 = vsel %vm13364_vm6, %v8677_v35, %v6922_v3 }
 0x35c   : > { %v8679_v9 = vclamps-f32 %v6924_v47, 10.0  ;;  %v6923_v27 = vadd.f32 %v13357_v37, %v6852_v8  ;;  %v6144_v43 = vadd.f32 %v5913_v33, %v13198_v54  ;;  %v6855_v56 = vadd.f32 %v10131_v4, %v6145_v2  ;;  %7276 = vrot.lane.b32.xlu1 %v7131_v18, %s10280_s4  ;;  %7470 = vst.msk [vmem:[%s13373_s30 + $0x118] sm:$0xff] %vm7434_vm7, %v7133_v53  ;;  %v10134_v60 = vpop.f32.mrf.mxu0  ;;  %v14313_v2 = vld [vmem:[#allocation27_spill] sm:$0xff] }
 0x35d   : > { %v10036_v17 = vpop.f32.mrf.mxu1  ;;  %v7132_v26 = vsel %vm13364_vm6, %v8676_v24, %v6921_v14 }
 0x35e   : > { %v8678_v36 = vclamps-f32 %v6923_v27, 10.0  ;;  %v6926_v39 = vadd.f32 %v13357_v37, %v6855_v56  ;;  %v6147_v38 = vadd.f32 %v10036_v17, %v13207_v29  ;;  %v6854_v10 = vadd.f32 %v6623_v0, %v6144_v43  ;;  %7469 = vst.msk [vmem:[%s13373_s30 + $0x110] sm:$0xff] %vm7434_vm7, %v7132_v26  ;;  %7278 = vrot.lane.b32.xlu0 %v7132_v26, %s10280_s4  ;;  %v6633_v30 = vpop.f32.mrf.mxu0 }
 0x35f   : > { %v5923_v54 = vpop.f32.mrf.mxu1  ;;  %v7135_v28 = vsel %vm13364_vm6, %v8679_v9, %v6924_v47 }
 0x360   : > { %v8681_v15 = vclamps-f32 %v6926_v39, 10.0  ;;  %v6925_v62 = vadd.f32 %v13357_v37, %v6854_v10  ;;  %v6146_v46 = vadd.f32 %v5923_v54, %v13213_v19  ;;  %v6857_v13 = vadd.f32 %v10134_v60, %v6147_v38  ;;  %7280 = vrot.lane.b32.xlu1 %v7133_v53, %s10280_s4  ;;  %7476 = vst.msk [vmem:[%s13373_s30 + $0x148] sm:$0xff] %vm7434_vm7, %v7135_v28  ;;  %v10137_v3 = vpop.f32.mrf.mxu0 }
 0x361   : > { %v10039_v29 = vpop.f32.mrf.mxu1  ;;  %v7134_v34 = vsel %vm13364_vm6, %v8678_v36, %v6923_v27 }
 0x362   : > { %v8680_v40 = vclamps-f32 %v6925_v62, 10.0  ;;  %v6928_v11 = vadd.f32 %v13357_v37, %v6857_v13  ;;  %v6149_v51 = vadd.f32 %v10039_v29, %v13222_v7  ;;  %v6856_v50 = vadd.f32 %v6633_v30, %v6146_v46  ;;  %7475 = vst.msk [vmem:[%s13373_s30 + $0x140] sm:$0xff] %vm7434_vm7, %v7134_v34  ;;  %7282 = vrot.lane.b32.xlu0 %v7134_v34, %s10280_s4  ;;  %v6643_v18 = vpop.f32.mrf.mxu0 }
 0x363   : > { %v5933_v19 = vpop.f32.mrf.mxu1  ;;  %v7137_v35 = vsel %vm13364_vm6, %v8681_v15, %v6926_v39 }
 0x364   : > { %v8683_v14 = vclamps-f32 %v6928_v11, 10.0  ;;  %v6927_v21 = vadd.f32 %v13357_v37, %v6856_v50  ;;  %v6148_v52 = vadd.f32 %v5933_v19, %v13227_v45  ;;  %v6859_v5 = vadd.f32 %v10137_v3, %v6149_v51  ;;  %7284 = vrot.lane.b32.xlu1 %v7135_v28, %s10280_s4  ;;  %7478 = vst.msk [vmem:[%s13373_s30 + $0x158] sm:$0xff] %vm7434_vm7, %v7137_v35  ;;  %v10140_v4 = vpop.f32.mrf.mxu0 }
 0x365   : > { %v10042_v7 = vpop.f32.mrf.mxu1  ;;  %v7136_v32 = vsel %vm13364_vm6, %v8680_v40, %v6925_v62 }
 0x366   : > { %v8682_v24 = vclamps-f32 %v6927_v21, 10.0  ;;  %v6930_v47 = vadd.f32 %v13357_v37, %v6859_v5  ;;  %v6151_v8 = vadd.f32 %v10042_v7, %v14313_v2  ;;  %v6858_v33 = vadd.f32 %v6643_v18, %v6148_v52  ;;  %7477 = vst.msk [vmem:[%s13373_s30 + $0x150] sm:$0xff] %vm7434_vm7, %v7136_v32  ;;  %7286 = vrot.lane.b32.xlu0 %v7136_v32, %s10280_s4  ;;  %v6653_v0 = vpop.f32.mrf.mxu0 }
 0x367   : > { %v5943_v45 = vpop.f32.mrf.mxu1  ;;  %v7139_v53 = vsel %vm13364_vm6, %v8683_v14, %v6928_v11 }
 0x368   : > { %v8685_v9 = vclamps-f32 %v6930_v47, 10.0  ;;  %v6929_v27 = vadd.f32 %v13357_v37, %v6858_v33  ;;  %v6150_v43 = vadd.f32 %v5943_v45, %v13239_v41  ;;  %v6861_v56 = vadd.f32 %v10140_v4, %v6151_v8  ;;  %7288 = vrot.lane.b32.xlu1 %v7137_v35, %s10280_s4  ;;  %7484 = vst.msk [vmem:[%s13373_s30 + $0x188] sm:$0xff] %vm7434_vm7, %v7139_v53  ;;  %v10143_v60 = vpop.f32.mrf.mxu0 }
 0x369   : > { %v10045_v17 = vpop.f32.mrf.mxu1  ;;  %v7138_v26 = vsel %vm13364_vm6, %v8682_v24, %v6927_v21 }
 0x36a   : > { %v8684_v36 = vclamps-f32 %v6929_v27, 10.0  ;;  %v6932_v39 = vadd.f32 %v13357_v37, %v6861_v56  ;;  %v6153_v38 = vadd.f32 %v10045_v17, %v13242_v63  ;;  %v6860_v10 = vadd.f32 %v6653_v0, %v6150_v43  ;;  %7483 = vst.msk [vmem:[%s13373_s30 + $0x180] sm:$0xff] %vm7434_vm7, %v7138_v26  ;;  %7290 = vrot.lane.b32.xlu0 %v7138_v26, %s10280_s4  ;;  %v6663_v54 = vpop.f32.mrf.mxu0  ;;  %v14314_v43 = vld [vmem:[#allocation25_spill] sm:$0xff] }
 0x36b   : > { %v5953_v41 = vpop.f32.mrf.mxu1  ;;  %v7141_v30 = vsel %vm13364_vm6, %v8685_v9, %v6930_v47 }
 0x36c   : > { %v8687_v28 = vclamps-f32 %v6932_v39, 10.0  ;;  %v6931_v15 = vadd.f32 %v13357_v37, %v6860_v10  ;;  %v6152_v62 = vadd.f32 %v5953_v41, %v13245_v49  ;;  %v6863_v46 = vadd.f32 %v10143_v60, %v6153_v38  ;;  %7292 = vrot.lane.b32.xlu1 %v7139_v53, %s10280_s4  ;;  %7486 = vst.msk [vmem:[%s13373_s30 + $0x198] sm:$0xff] %vm7434_vm7, %v7141_v30  ;;  %v10146_v29 = vpop.f32.mrf.mxu0  ;;  %v14315_v38 = vld [vmem:[#allocation28_spill] sm:$0xff] }
 0x36d   : > { %v10048_v63 = vpop.f32.mrf.mxu1  ;;  %v7140_v13 = vsel %vm13364_vm6, %v8684_v36, %v6929_v27 }
 0x36e   : > { %v8686_v34 = vclamps-f32 %v6931_v15, 10.0  ;;  %v6934_v3 = vadd.f32 %v13357_v37, %v6863_v46  ;;  %v6155_v40 = vadd.f32 %v10048_v63, %v13248_v6  ;;  %v6862_v11 = vadd.f32 %v6663_v54, %v6152_v62  ;;  %7485 = vst.msk [vmem:[%s13373_s30 + $0x190] sm:$0xff] %vm7434_vm7, %v7140_v13  ;;  %7294 = vrot.lane.b32.xlu0 %v7140_v13, %s10280_s4  ;;  %v6673_v51 = vpop.f32.mrf.mxu0  ;;  %v14316_v46 = vld [vmem:[#allocation26_spill] sm:$0xff] }
 0x36f   : > { %v5963_v49 = vpop.f32.mrf.mxu1  ;;  %v7143_v50 = vsel %vm13364_vm6, %v8687_v28, %v6932_v39 }
 0x370   : > { %v8689_v19 = vclamps-f32 %v6934_v3, 10.0  ;;  %v6933_v18 = vadd.f32 %v13357_v37, %v6862_v11  ;;  %v6154_v35 = vadd.f32 %v5963_v49, %v13251_v42  ;;  %v6865_v14 = vadd.f32 %v10146_v29, %v6155_v40  ;;  %7296 = vrot.lane.b32.xlu1 %v7141_v30, %s10280_s4  ;;  %7492 = vst.msk [vmem:[%s13373_s30 + $0x1c8] sm:$0xff] %vm7434_vm7, %v7143_v50  ;;  %v10149_v52 = vpop.f32.mrf.mxu0  ;;  %v14317_v49 = vld [vmem:[#allocation31_spill] sm:$0xff] }
 0x371   : > { %v10051_v6 = vpop.f32.mrf.mxu1  ;;  %v7142_v21 = vsel %vm13364_vm6, %v8686_v34, %v6931_v15 }
 0x372   : > { %v8688_v5 = vclamps-f32 %v6933_v18, 10.0  ;;  %v6936_v7 = vadd.f32 %v13357_v37, %v6865_v14  ;;  %v6157_v32 = vadd.f32 %v10051_v6, %v13254_v16  ;;  %v6864_v4 = vadd.f32 %v6673_v51, %v6154_v35  ;;  %7491 = vst.msk [vmem:[%s13373_s30 + $0x1c0] sm:$0xff] %vm7434_vm7, %v7142_v21  ;;  %7298 = vrot.lane.b32.xlu0 %v7142_v21, %s10280_s4  ;;  %v6683_v24 = vpop.f32.mrf.mxu0  ;;  %v14318_v21 = vld [vmem:[#allocation29_spill] sm:$0xff] }
 0x373   : > { %v5973_v42 = vpop.f32.mrf.mxu1  ;;  %v7145_v47 = vsel %vm13364_vm6, %v8689_v19, %v6934_v3 }
 0x374   : > { %v8691_v2 = vclamps-f32 %v6936_v7, 10.0  ;;  %v6935_v8 = vadd.f32 %v13357_v37, %v6864_v4  ;;  %v6156_v33 = vadd.f32 %v5973_v42, %v13257_v57  ;;  %v6867_v45 = vadd.f32 %v10149_v52, %v6157_v32  ;;  %7300 = vrot.lane.b32.xlu1 %v7143_v50, %s10280_s4  ;;  %7494 = vst.msk [vmem:[%s13373_s30 + $0x1d8] sm:$0xff] %vm7434_vm7, %v7145_v47  ;;  %v10152_v53 = vpop.f32.mrf.mxu0 }
 0x375   : > { %v10054_v16 = vpop.f32.mrf.mxu1  ;;  %v7144_v0 = vsel %vm13364_vm6, %v8688_v5, %v6933_v18 }
 0x376   : > { %v8690_v9 = vclamps-f32 %v6935_v8, 10.0  ;;  %v6938_v27 = vadd.f32 %v13357_v37, %v6867_v45  ;;  %v6159_v56 = vadd.f32 %v10054_v16, %v14314_v43  ;;  %v6866_v17 = vadd.f32 %v6683_v24, %v6156_v33  ;;  %7493 = vst.msk [vmem:[%s13373_s30 + $0x1d0] sm:$0xff] %vm7434_vm7, %v7144_v0  ;;  %7302 = vrot.lane.b32.xlu0 %v7144_v0, %s10280_s4  ;;  %v6693_v26 = vpop.f32.mrf.mxu0 }
 0x377   : > { %v5983_v57 = vpop.f32.mrf.mxu1  ;;  %v7147_v60 = vsel %vm13364_vm6, %v8691_v2, %v6936_v7 }
 0x378   : > { %v8693_v36 = vclamps-f32 %v6938_v27, 10.0  ;;  %v6937_v39 = vadd.f32 %v13357_v37, %v6866_v17  ;;  %v6158_v10 = vadd.f32 %v5983_v57, %v14315_v38  ;;  %v6869_v41 = vadd.f32 %v10152_v53, %v6159_v56  ;;  %7304 = vrot.lane.b32.xlu1 %v7145_v47, %s10280_s4  ;;  %7500 = vst.msk [vmem:[%s13373_s30 + $0x208] sm:$0xff] %vm7434_vm7, %v7147_v60  ;;  %v10155_v28 = vpop.f32.mrf.mxu0  ;;  %v14319_v47 = vld [vmem:[#allocation32_spill] sm:$0xff] }
 0x379   : > { %v10057_v54 = vpop.f32.mrf.mxu1  ;;  %v7146_v30 = vsel %vm13364_vm6, %v8690_v9, %v6935_v8  ;;  %v14320_v9 = vld [vmem:[#allocation30_spill] sm:$0xff] }
 0x37a   : > { %v8692_v15 = vclamps-f32 %v6937_v39, 10.0  ;;  %v6940_v62 = vadd.f32 %v13357_v37, %v6869_v41  ;;  %v6161_v63 = vadd.f32 %v10057_v54, %v14316_v46  ;;  %v6868_v13 = vadd.f32 %v6693_v26, %v6158_v10  ;;  %7499 = vst.msk [vmem:[%s13373_s30 + $0x200] sm:$0xff] %vm7434_vm7, %v7146_v30  ;;  %7306 = vrot.lane.b32.xlu0 %v7146_v30, %s10280_s4  ;;  %v6703_v34 = vpop.f32.mrf.mxu0 }
 0x37b   : > { %v5993_v29 = vpop.f32.mrf.mxu1  ;;  %v7149_v3 = vsel %vm13364_vm6, %v8693_v36, %v6938_v27  ;;  %v14321_v36 = vld [vmem:[#allocation35_spill] sm:$0xff] }
 0x37c   : > { %v8695_v40 = vclamps-f32 %v6940_v62, 10.0  ;;  %v6939_v11 = vadd.f32 %v13357_v37, %v6868_v13  ;;  %v6160_v51 = vadd.f32 %v5993_v29, %v14317_v49  ;;  %v6871_v50 = vadd.f32 %v10155_v28, %v6161_v63  ;;  %7308 = vrot.lane.b32.xlu1 %v7147_v60, %s10280_s4  ;;  %7502 = vst.msk [vmem:[%s13373_s30 + $0x218] sm:$0xff] %vm7434_vm7, %v7149_v3  ;;  %v10158_v35 = vpop.f32.mrf.mxu0 }
 0x37d   : > { %v10060_v19 = vpop.f32.mrf.mxu1  ;;  %v7148_v18 = vsel %vm13364_vm6, %v8692_v15, %v6937_v39  ;;  %v14322_v15 = vld [vmem:[#allocation33_spill] sm:$0xff] }
 0x37e   : > { %v8694_v14 = vclamps-f32 %v6939_v11, 10.0  ;;  %v6942_v6 = vadd.f32 %v13357_v37, %v6871_v50  ;;  %v6163_v52 = vadd.f32 %v10060_v19, %v14318_v21  ;;  %v6870_v5 = vadd.f32 %v6703_v34, %v6160_v51  ;;  %7501 = vst.msk [vmem:[%s13373_s30 + $0x210] sm:$0xff] %vm7434_vm7, %v7148_v18  ;;  %7310 = vrot.lane.b32.xlu0 %v7148_v18, %s10280_s4  ;;  %v6713_v32 = vpop.f32.mrf.mxu0 }
 0x37f   : > { %v6003_v7 = vpop.f32.mrf.mxu1  ;;  %v7151_v4 = vsel %vm13364_vm6, %v8695_v40, %v6940_v62  ;;  %v14323_v40 = vld [vmem:[#allocation36_spill] sm:$0xff] }
 0x380   : > { %v8697_v42 = vclamps-f32 %v6942_v6, 10.0  ;;  %v6941_v24 = vadd.f32 %v13357_v37, %v6870_v5  ;;  %v6162_v2 = vadd.f32 %v6003_v7, %v14319_v47  ;;  %v6873_v8 = vadd.f32 %v10158_v35, %v6163_v52  ;;  %7312 = vrot.lane.b32.xlu1 %v7149_v3, %s10280_s4  ;;  %7508 = vst.msk [vmem:[%s13373_s30 + $0x248] sm:$0xff] %vm7434_vm7, %v7151_v4  ;;  %v10161_v16 = vpop.f32.mrf.mxu0 }
 0x381   : > { %v10063_v33 = vpop.f32.mrf.mxu1  ;;  %v7150_v45 = vsel %vm13364_vm6, %v8694_v14, %v6939_v11  ;;  %v14324_v14 = vld [vmem:[#allocation34_spill] sm:$0xff] }
 0x382   : > { %v8696_v0 = vclamps-f32 %v6941_v24, 10.0  ;;  %v6944_v53 = vadd.f32 %v13357_v37, %v6873_v8  ;;  %v6165_v27 = vadd.f32 %v10063_v33, %v14320_v9  ;;  %v6872_v43 = vadd.f32 %v6713_v32, %v6162_v2  ;;  %7507 = vst.msk [vmem:[%s13373_s30 + $0x240] sm:$0xff] %vm7434_vm7, %v7150_v45  ;;  %7314 = vrot.lane.b32.xlu0 %v7150_v45, %s10280_s4  ;;  %v6723_v17 = vpop.f32.mrf.mxu0 }
 0x383   : > { %v6013_v56 = vpop.f32.mrf.mxu1  ;;  %v7153_v57 = vsel %vm13364_vm6, %v8697_v42, %v6942_v6  ;;  %v14325_v42 = vld [vmem:[#allocation39_spill] sm:$0xff] }
 0x384   : > { %v8699_v26 = vclamps-f32 %v6944_v53, 10.0  ;;  %v6943_v60 = vadd.f32 %v13357_v37, %v6872_v43  ;;  %v6164_v39 = vadd.f32 %v6013_v56, %v14321_v36  ;;  %v6875_v38 = vadd.f32 %v10161_v16, %v6165_v27  ;;  %7316 = vrot.lane.b32.xlu1 %v7151_v4, %s10280_s4  ;;  %7510 = vst.msk [vmem:[%s13373_s30 + $0x258] sm:$0xff] %vm7434_vm7, %v7153_v57  ;;  %v10164_v54 = vpop.f32.mrf.mxu0 }
 0x385   : > { %v10066_v10 = vpop.f32.mrf.mxu1  ;;  %v7152_v41 = vsel %vm13364_vm6, %v8696_v0, %v6941_v24 }
 0x386   : > { %v8698_v30 = vclamps-f32 %v6943_v60, 10.0  ;;  %v6946_v28 = vadd.f32 %v13357_v37, %v6875_v38  ;;  %v6167_v62 = vadd.f32 %v10066_v10, %v14322_v15  ;;  %v6874_v46 = vadd.f32 %v6723_v17, %v6164_v39  ;;  %7509 = vst.msk [vmem:[%s13373_s30 + $0x250] sm:$0xff] %vm7434_vm7, %v7152_v41  ;;  %7318 = vrot.lane.b32.xlu0 %v7152_v41, %s10280_s4  ;;  %v6733_v13 = vpop.f32.mrf.mxu0  ;;  %v14327_v41 = vld [vmem:[#allocation40_spill] sm:$0xff] }
 0x387   : > { %v6023_v63 = vpop.f32.mrf.mxu1  ;;  %v7155_v29 = vsel %vm13364_vm6, %v8699_v26, %v6944_v53 }
 0x388   : > { %v8701_v34 = vclamps-f32 %v6946_v28, 10.0  ;;  %v6945_v3 = vadd.f32 %v13357_v37, %v6874_v46  ;;  %v6166_v11 = vadd.f32 %v6023_v63, %v14323_v40  ;;  %v6877_v49 = vadd.f32 %v10164_v54, %v6167_v62  ;;  %7320 = vrot.lane.b32.xlu1 %v7153_v57, %s10280_s4  ;;  %7516 = vst.msk [vmem:[%s13373_s30 + $0x288] sm:$0xff] %vm7434_vm7, %v7155_v29  ;;  %v10167_v19 = vpop.f32.mrf.mxu0  ;;  %v14326_v57 = vld [vmem:[#allocation37_spill] sm:$0xff] }
 0x389   : > { %v10069_v51 = vpop.f32.mrf.mxu1  ;;  %v7154_v50 = vsel %vm13364_vm6, %v8698_v30, %v6943_v60 }
 0x38a   : > { %v8700_v18 = vclamps-f32 %v6945_v3, 10.0  ;;  %v6948_v35 = vadd.f32 %v13357_v37, %v6877_v49  ;;  %v6169_v6 = vadd.f32 %v10069_v51, %v14324_v14  ;;  %v6876_v21 = vadd.f32 %v6733_v13, %v6166_v11  ;;  %7515 = vst.msk [vmem:[%s13373_s30 + $0x280] sm:$0xff] %vm7434_vm7, %v7154_v50  ;;  %7322 = vrot.lane.b32.xlu0 %v7154_v50, %s10280_s4  ;;  %v6743_v5 = vpop.f32.mrf.mxu0  ;;  %v14328_v13 = vld [vmem:[#allocation38_spill] sm:$0xff] }
 0x38b   : > { %v6033_v52 = vpop.f32.mrf.mxu1  ;;  %v7157_v7 = vsel %vm13364_vm6, %v8701_v34, %v6946_v28 }
 0x38c   : > { %v8703_v32 = vclamps-f32 %v6948_v35, 10.0  ;;  %v6947_v4 = vadd.f32 %v13357_v37, %v6876_v21  ;;  %v6168_v24 = vadd.f32 %v6033_v52, %v14325_v42  ;;  %v6879_v47 = vadd.f32 %v10167_v19, %v6169_v6  ;;  %7324 = vrot.lane.b32.xlu1 %v7155_v29, %s10280_s4  ;;  %7518 = vst.msk [vmem:[%s13373_s30 + $0x298] sm:$0xff] %vm7434_vm7, %v7157_v7  ;;  %v10170_v33 = vpop.f32.mrf.mxu0  ;;  %v14329_v52 = vld [vmem:[#allocation43_spill] sm:$0xff] }
 0x38d   : > { %v10072_v2 = vpop.f32.mrf.mxu1  ;;  %v7156_v8 = vsel %vm13364_vm6, %v8700_v18, %v6945_v3 }
 0x38e   : > { %v8702_v45 = vclamps-f32 %v6947_v4, 10.0  ;;  %v6950_v16 = vadd.f32 %v13357_v37, %v6879_v47  ;;  %v6171_v0 = vadd.f32 %v10072_v2, %v13296_v23  ;;  %v6878_v53 = vadd.f32 %v6743_v5, %v6168_v24  ;;  %7517 = vst.msk [vmem:[%s13373_s30 + $0x290] sm:$0xff] %vm7434_vm7, %v7156_v8  ;;  %7326 = vrot.lane.b32.xlu0 %v7156_v8, %s10280_s4  ;;  %v6753_v27 = vpop.f32.mrf.mxu0 }
 0x38f   : > { %v6043_v9 = vpop.f32.mrf.mxu1  ;;  %v7159_v43 = vsel %vm13364_vm6, %v8703_v32, %v6948_v35 }
 0x390   : > { %v8705_v56 = vclamps-f32 %v6950_v16, 10.0  ;;  %v6949_v17 = vadd.f32 %v13357_v37, %v6878_v53  ;;  %v6170_v26 = vadd.f32 %v6043_v9, %v14326_v57  ;;  %v6881_v60 = vadd.f32 %v10170_v33, %v6171_v0  ;;  %7328 = vrot.lane.b32.xlu1 %v7157_v7, %s10280_s4  ;;  %7524 = vst.msk [vmem:[%s13373_s30 + $0x2c8] sm:$0xff] %vm7434_vm7, %v7159_v43  ;;  %v10173_v39 = vpop.f32.mrf.mxu0 }
 0x391   : > { %v10075_v23 = vpop.f32.mrf.mxu1  ;;  %v7158_v36 = vsel %vm13364_vm6, %v8702_v45, %v6947_v4 }
 0x392   : > { %v8704_v38 = vclamps-f32 %v6949_v17, 10.0  ;;  %v6952_v10 = vadd.f32 %v13357_v37, %v6881_v60  ;;  %v6173_v54 = vadd.f32 %v10075_v23, %v14327_v41  ;;  %v6880_v30 = vadd.f32 %v6753_v27, %v6170_v26  ;;  %7523 = vst.msk [vmem:[%s13373_s30 + $0x2c0] sm:$0xff] %vm7434_vm7, %v7158_v36  ;;  %7330 = vrot.lane.b32.xlu0 %v7158_v36, %s10280_s4  ;;  %v6763_v15 = vpop.f32.mrf.mxu0 }
 0x393   : > { %v6053_v28 = vpop.f32.mrf.mxu1  ;;  %v7161_v62 = vsel %vm13364_vm6, %v8705_v56, %v6950_v16 }
 0x394   : > { %v8707_v46 = vclamps-f32 %v6952_v10, 10.0  ;;  %v6951_v63 = vadd.f32 %v13357_v37, %v6880_v30  ;;  %v6172_v29 = vadd.f32 %v6053_v28, %v14328_v13  ;;  %v6883_v34 = vadd.f32 %v10173_v39, %v6173_v54  ;;  %7332 = vrot.lane.b32.xlu1 %v7159_v43, %s10280_s4  ;;  %7526 = vst.msk [vmem:[%s13373_s30 + $0x2d8] sm:$0xff] %vm7434_vm7, %v7161_v62  ;;  %v10176_v11 = vpop.f32.mrf.mxu0 }
 0x395   : > { %v10078_v3 = vpop.f32.mrf.mxu1  ;;  %v7160_v40 = vsel %vm13364_vm6, %v8704_v38, %v6949_v17 }
 0x396   : > { %v8706_v49 = vclamps-f32 %v6951_v63, 10.0  ;;  %v6954_v51 = vadd.f32 %v13357_v37, %v6883_v34  ;;  %v6175_v50 = vadd.f32 %v10078_v3, %v13311_v31  ;;  %v6882_v19 = vadd.f32 %v6763_v15, %v6172_v29  ;;  %7525 = vst.msk [vmem:[%s13373_s30 + $0x2d0] sm:$0xff] %vm7434_vm7, %v7160_v40  ;;  %7334 = vrot.lane.b32.xlu0 %v7160_v40, %s10280_s4  ;;  %v6773_v35 = vpop.f32.mrf.mxu0  ;;  %v10238_v29 = vld [vmem:[%s13958_s2] ss:$0 sm:$0xff] }
 0x397   : > { %v6063_v18 = vpop.f32.mrf.mxu1  ;;  %v7163_v14 = vsel %vm13364_vm6, %v8707_v46, %v6952_v10 }
 0x398   : > { %v8709_v6 = vclamps-f32 %v6954_v51, 10.0  ;;  %v6953_v21 = vadd.f32 %v13357_v37, %v6882_v19  ;;  %v6174_v5 = vadd.f32 %v6063_v18, %v14329_v52  ;;  %v6885_v7 = vadd.f32 %v10176_v11, %v6175_v50  ;;  %7336 = vrot.lane.b32.xlu1 %v7161_v62, %s10280_s4  ;;  %7532 = vst.msk [vmem:[%s13373_s30 + $0x308] sm:$0xff] %vm7434_vm7, %v7163_v14  ;;  %v10179_v4 = vpop.f32.mrf.mxu0 }
 0x399   : > { %v10081_v31 = vpop.f32.mrf.mxu1  ;;  %v7162_v32 = vsel %vm13364_vm6, %v8706_v49, %v6951_v63 }
 0x39a   : > { %v8708_v42 = vclamps-f32 %v6953_v21, 10.0  ;;  %v6956_v24 = vadd.f32 %v13357_v37, %v6885_v7  ;;  %v6177_v47 = vadd.f32 %v10081_v31, %v13317_v59  ;;  %v6884_v2 = vadd.f32 %v6773_v35, %v6174_v5  ;;  %7531 = vst.msk [vmem:[%s13373_s30 + $0x300] sm:$0xff] %vm7434_vm7, %v7162_v32  ;;  %7338 = vrot.lane.b32.xlu0 %v7162_v32, %s10280_s4  ;;  %v6783_v33 = vpop.f32.mrf.mxu0 }
 0x39b   : > { %v6073_v8 = vpop.f32.mrf.mxu1  ;;  %v7165_v45 = vsel %vm13364_vm6, %v8709_v6, %v6954_v51 }
 0x39c   : > { %v8711_v16 = vclamps-f32 %v6956_v24, 10.0  ;;  %v6955_v0 = vadd.f32 %v13357_v37, %v6884_v2  ;;  %v6176_v53 = vadd.f32 %v6073_v8, %v13320_v44  ;;  %v6887_v9 = vadd.f32 %v10179_v4, %v6177_v47  ;;  %7340 = vrot.lane.b32.xlu1 %v7163_v14, %s10280_s4  ;;  %7534 = vst.msk [vmem:[%s13373_s30 + $0x318] sm:$0xff] %vm7434_vm7, %v7165_v45  ;;  %v10182_v43 = vpop.f32.mrf.mxu0 }
 0x39d   : > { %v10084_v59 = vpop.f32.mrf.mxu1  ;;  %v7164_v27 = vsel %vm13364_vm6, %v8708_v42, %v6953_v21 }
 0x39e   : > { %v8710_v56 = vclamps-f32 %v6955_v0, 10.0  ;;  %v6958_v17 = vadd.f32 %v13357_v37, %v6887_v9  ;;  %v6179_v57 = vadd.f32 %v10084_v59, %v13324_v12  ;;  %v6886_v26 = vadd.f32 %v6783_v33, %v6176_v53  ;;  %7533 = vst.msk [vmem:[%s13373_s30 + $0x310] sm:$0xff] %vm7434_vm7, %v7164_v27  ;;  %7342 = vrot.lane.b32.xlu0 %v7164_v27, %s10280_s4  ;;  %v6793_v60 = vpop.f32.mrf.mxu0 }
 0x39f   : > { %v6083_v44 = vpop.f32.mrf.mxu1  ;;  %v7167_v23 = vsel %vm13364_vm6, %v8711_v16, %v6956_v24 }
 0x3a0   : > { %v8713_v36 = vclamps-f32 %v6958_v17, 10.0  ;;  %v6957_v39 = vadd.f32 %v13357_v37, %v6886_v26  ;;  %v6178_v38 = vadd.f32 %v6083_v44, %v13328_v22  ;;  %v6889_v10 = vadd.f32 %v10182_v43, %v6179_v57  ;;  %7344 = vrot.lane.b32.xlu1 %v7165_v45, %s10280_s4  ;;  %7540 = vst.msk [vmem:[%s13373_s30 + $0x348] sm:$0xff] %vm7434_vm7, %v7167_v23  ;;  %v10185_v54 = vpop.f32.mrf.mxu0 }
 0x3a1   : > { %v10087_v12 = vpop.f32.mrf.mxu1  ;;  %v7166_v41 = vsel %vm13364_vm6, %v8710_v56, %v6955_v0 }
 0x3a2   : > { %v8712_v30 = vclamps-f32 %v6957_v39, 10.0  ;;  %v6960_v28 = vadd.f32 %v13357_v37, %v6889_v10  ;;  %v6181_v15 = vadd.f32 %v10087_v12, %v13331_v20  ;;  %v6888_v62 = vadd.f32 %v6793_v60, %v6178_v38  ;;  %7539 = vst.msk [vmem:[%s13373_s30 + $0x340] sm:$0xff] %vm7434_vm7, %v7166_v41  ;;  %7346 = vrot.lane.b32.xlu0 %v7166_v41, %s10280_s4  ;;  %v6803_v46 = vpop.f32.mrf.mxu0 }
 0x3a3   : > { %v6093_v22 = vpop.f32.mrf.mxu1  ;;  %v7169_v63 = vsel %vm13364_vm6, %v8713_v36, %v6958_v17 }
 0x3a4   : > { %v8715_v13 = vclamps-f32 %v6960_v28, 10.0  ;;  %v6959_v34 = vadd.f32 %v10238_v29, %v6888_v62  ;;  %v6180_v37 = vadd.f32 %v6093_v22, %v13334_v55  ;;  %v6891_v20 = vadd.f32 %v10185_v54, %v6181_v15  ;;  %7348 = vrot.lane.b32.xlu1 %v7167_v23, %s10280_s4  ;;  %7542 = vst.msk [vmem:[%s13373_s30 + $0x358] sm:$0xff] %vm7434_vm7, %v7169_v63  ;;  %v10188_v11 = vpop.f32.mrf.mxu0 }
 0x3a5   : > { %v10090_v3 = vpop.f32.mrf.mxu1  ;;  %v7168_v40 = vsel %vm13364_vm6, %v8712_v30, %v6957_v39 }
 0x3a6   : > { %v8714_v49 = vclamps-f32 %v6959_v34, 10.0  ;;  %v6962_v51 = vadd.f32 %v10238_v29, %v6891_v20  ;;  %v6183_v50 = vadd.f32 %v10090_v3, %v13337_v1  ;;  %v6890_v19 = vadd.f32 %v6803_v46, %v6180_v37  ;;  %7541 = vst.msk [vmem:[%s13373_s30 + $0x350] sm:$0xff] %vm7434_vm7, %v7168_v40  ;;  %7350 = vrot.lane.b32.xlu0 %v7168_v40, %s10280_s4  ;;  %v6813_v18 = vpop.f32.mrf.mxu0 }
 0x3a7   : > { %v6103_v55 = vpop.f32.mrf.mxu1  ;;  %v7171_v35 = vsel %vm13364_vm6, %v8715_v13, %v6960_v28 }
 0x3a8   : > { %v8717_v14 = vclamps-f32 %v6962_v51, 10.0  ;;  %v6961_v6 = vadd.f32 %v10238_v29, %v6890_v19  ;;  %v6182_v21 = vadd.f32 %v6103_v55, %v13340_v61  ;;  %v6893_v52 = vadd.f32 %v10188_v11, %v6183_v50  ;;  %7352 = vrot.lane.b32.xlu1 %v7169_v63, %s10280_s4  ;;  %7548 = vst.msk [vmem:[%s13373_s30 + $0x388] sm:$0xff] %vm7434_vm7, %v7171_v35  ;;  %v10191_v7 = vpop.f32.mrf.mxu0 }
 0x3a9   : > { %v10093_v1 = vpop.f32.mrf.mxu1  ;;  %v7170_v5 = vsel %vm13364_vm6, %v8714_v49, %v6959_v34 }
 0x3aa   : > { %v8716_v31 = vclamps-f32 %v6961_v6, 10.0  ;;  %v6964_v32 = vadd.f32 %v10238_v29, %v6893_v52  ;;  %v6892_v4 = vadd.f32 %v6813_v18, %v6182_v21  ;;  %v7245_v42 = vpop.permute.xlu0 %7244  ;;  %v6185_v24 = vadd.f32 %v10093_v1, %v13343_v25  ;;  %7547 = vst.msk [vmem:[%s13373_s30 + $0x380] sm:$0xff] %vm7434_vm7, %v7170_v5  ;;  %7354 = vrot.lane.b32.xlu0 %v7170_v5, %s10280_s4  ;;  %v6823_v47 = vpop.f32.mrf.mxu0 }
 0x3ab   : > { %7440 = vst.msk [vmem:[%s13373_s30 + $0x28] sm:$0xff] %vm7434_vm7, %v7245_v42  ;;  %v6113_v61 = vpop.f32.mrf.mxu1  ;;  %v7173_v2 = vsel %vm13364_vm6, %v8717_v14, %v6962_v51 }
 0x3ac   : > { %v8719_v8 = vclamps-f32 %v6964_v32, 10.0  ;;  %v6963_v33 = vadd.f32 %v10238_v29, %v6892_v4  ;;  %v6184_v45 = vadd.f32 %v6113_v61, %v13351_v48  ;;  %v6895_v25 = vadd.f32 %v10191_v7, %v6185_v24  ;;  %7356 = vrot.lane.b32.xlu1 %v7171_v35, %s10280_s4  ;;  %7550 = vst.msk [vmem:[%s13373_s30 + $0x398] sm:$0xff] %vm7434_vm7, %v7173_v2 }
 0x3ad   : > { %v7172_v16 = vsel %vm13364_vm6, %v8716_v31, %v6961_v6 }
 0x3ae   : > { %v8718_v0 = vclamps-f32 %v6963_v33, 10.0  ;;  %v6966_v53 = vadd.f32 %v10238_v29, %v6895_v25  ;;  %v6894_v9 = vadd.f32 %v6823_v47, %v6184_v45  ;;  %v7249_v59 = vpop.permute.xlu1 %7248  ;;  %7549 = vst.msk [vmem:[%s13373_s30 + $0x390] sm:$0xff] %vm7434_vm7, %v7172_v16  ;;  %7358 = vrot.lane.b32.xlu0 %v7172_v16, %s10280_s4  ;;  %v7175_v27 = vsel %vm13364_vm6, %v8719_v8, %v6964_v32 }
 0x3af   : > { %v7243_v48 = vpop.permute.xlu0 %7242  ;;  %7442 = vst.msk [vmem:[%s13373_s30 + $0x38] sm:$0xff] %vm7434_vm7, %v7249_v59  ;;  %7556 = vst.msk [vmem:[%s13373_s30 + $0x3c8] sm:$0xff] %vm7434_vm7, %v7175_v27 }
 0x3b0   : > { %7439 = vst.msk [vmem:[%s13373_s30 + $0x20] sm:$0xff] %vm7434_vm7, %v7243_v48  ;;  %v8721_v43 = vclamps-f32 %v6966_v53, 10.0  ;;  %v6965_v56 = vadd.f32 %v10238_v29, %v6894_v9  ;;  %7360 = vrot.lane.b32.xlu1 %v7173_v2, %s10280_s4  ;;  %v7174_v17 = vsel %vm13364_vm6, %v8718_v0, %v6963_v33 }
 0x3b1   : > { %7555 = vst.msk [vmem:[%s13373_s30 + $0x3c0] sm:$0xff] %vm7434_vm7, %v7174_v17 }
 0x3b2   : > { %v8720_v57 = vclamps-f32 %v6965_v56, 10.0  ;;  %v7247_v26 = vpop.permute.xlu1 %7246  ;;  %7362 = vrot.lane.b32.xlu0 %v7174_v17, %s10280_s4  ;;  %v7177_v44 = vsel %vm13364_vm6, %v8721_v43, %v6966_v53 }
 0x3b3   : > { %7441 = vst.msk [vmem:[%s13373_s30 + $0x30] sm:$0xff] %vm7434_vm7, %v7247_v26  ;;  %7558 = vst.msk [vmem:[%s13373_s30 + $0x3d8] sm:$0xff] %vm7434_vm7, %v7177_v44 }
 0x3b4   : > { %7364 = vrot.lane.b32.xlu1 %v7175_v27, %s10280_s4  ;;  %v7251_v60 = vpop.permute.xlu0 %7250  ;;  %v7176_v23 = vsel %vm13364_vm6, %v8720_v57, %v6965_v56 }
 0x3b5   : > { %7447 = vst.msk [vmem:[%s13373_s30 + $0x60] sm:$0xff] %vm7434_vm7, %v7251_v60  ;;  %7557 = vst.msk [vmem:[%s13373_s30 + $0x3d0] sm:$0xff] %vm7434_vm7, %v7176_v23 }
 0x3b6   : > { %v7253_v36 = vpop.permute.xlu1 %7252  ;;  %7366 = vrot.lane.b32.xlu0 %v7176_v23, %s10280_s4 }
 0x3b7   : > { %7448 = vst.msk [vmem:[%s13373_s30 + $0x68] sm:$0xff] %vm7434_vm7, %v7253_v36 }
 0x3b8   : > { %7368 = vrot.lane.b32.xlu1 %v7177_v44, %s10280_s4  ;;  %v7255_v39 = vpop.permute.xlu0 %7254 }
 0x3b9   : > { %7449 = vst.msk [vmem:[%s13373_s30 + $0x70] sm:$0xff] %vm7434_vm7, %v7255_v39 }
 0x3ba   : > { %v7257_v58 = vpop.permute.xlu1 %7256 }
 0x3bb   : > { %7450 = vst.msk [vmem:[%s13373_s30 + $0x78] sm:$0xff] %vm7434_vm7, %v7257_v58 }
 0x3bc   : > { %v7259_v38 = vpop.permute.xlu0 %7258 }
 0x3bd   : > { %7455 = vst.msk [vmem:[%s13373_s30 + $0xa0] sm:$0xff] %vm7434_vm7, %v7259_v38 }
 0x3be   : > { %v7261_v10 = vpop.permute.xlu1 %7260 }
 0x3bf   : > { %7456 = vst.msk [vmem:[%s13373_s30 + $0xa8] sm:$0xff] %vm7434_vm7, %v7261_v10 }
 0x3c0   : > { %v7263_v12 = vpop.permute.xlu0 %7262 }
 0x3c1   : > { %7457 = vst.msk [vmem:[%s13373_s30 + $0xb0] sm:$0xff] %vm7434_vm7, %v7263_v12 }
 0x3c2   : > { %v7265_v41 = vpop.permute.xlu1 %7264 }
 0x3c3   : > { %7458 = vst.msk [vmem:[%s13373_s30 + $0xb8] sm:$0xff] %vm7434_vm7, %v7265_v41 }
 0x3c4   : > { %v7267_v54 = vpop.permute.xlu0 %7266 }
 0x3c5   : > { %7463 = vst.msk [vmem:[%s13373_s30 + $0xe0] sm:$0xff] %vm7434_vm7, %v7267_v54 }
 0x3c6   : > { %v7269_v30 = vpop.permute.xlu1 %7268 }
 0x3c7   : > { %7464 = vst.msk [vmem:[%s13373_s30 + $0xe8] sm:$0xff] %vm7434_vm7, %v7269_v30 }
 0x3c8   : > { %v7271_v28 = vpop.permute.xlu0 %7270 }
 0x3c9   : > { %7465 = vst.msk [vmem:[%s13373_s30 + $0xf0] sm:$0xff] %vm7434_vm7, %v7271_v28 }
 0x3ca   : > { %v7273_v15 = vpop.permute.xlu1 %7272 }
 0x3cb   : > { %7466 = vst.msk [vmem:[%s13373_s30 + $0xf8] sm:$0xff] %vm7434_vm7, %v7273_v15 }
 0x3cc   : > { %v7275_v62 = vpop.permute.xlu0 %7274 }
 0x3cd   : > { %7471 = vst.msk [vmem:[%s13373_s30 + $0x120] sm:$0xff] %vm7434_vm7, %v7275_v62 }
 0x3ce   : > { %v7277_v22 = vpop.permute.xlu1 %7276 }
 0x3cf   : > { %7472 = vst.msk [vmem:[%s13373_s30 + $0x128] sm:$0xff] %vm7434_vm7, %v7277_v22 }
 0x3d0   : > { %v7279_v46 = vpop.permute.xlu0 %7278 }
 0x3d1   : > { %7473 = vst.msk [vmem:[%s13373_s30 + $0x130] sm:$0xff] %vm7434_vm7, %v7279_v46 }
 0x3d2   : > { %v7281_v63 = vpop.permute.xlu1 %7280 }
 0x3d3   : > { %7474 = vst.msk [vmem:[%s13373_s30 + $0x138] sm:$0xff] %vm7434_vm7, %v7281_v63 }
 0x3d4   : > { %v7283_v13 = vpop.permute.xlu0 %7282 }
 0x3d5   : > { %7479 = vst.msk [vmem:[%s13373_s30 + $0x160] sm:$0xff] %vm7434_vm7, %v7283_v13 }
 0x3d6   : > { %v7285_v29 = vpop.permute.xlu1 %7284 }
 0x3d7   : > { %7480 = vst.msk [vmem:[%s13373_s30 + $0x168] sm:$0xff] %vm7434_vm7, %v7285_v29 }
 0x3d8   : > { %v7287_v34 = vpop.permute.xlu0 %7286 }
 0x3d9   : > { %7481 = vst.msk [vmem:[%s13373_s30 + $0x170] sm:$0xff] %vm7434_vm7, %v7287_v34 }
 0x3da   : > { %v7289_v37 = vpop.permute.xlu1 %7288 }
 0x3db   : > { %7482 = vst.msk [vmem:[%s13373_s30 + $0x178] sm:$0xff] %vm7434_vm7, %v7289_v37 }
 0x3dc   : > { %v7291_v20 = vpop.permute.xlu0 %7290 }
 0x3dd   : > { %7487 = vst.msk [vmem:[%s13373_s30 + $0x1a0] sm:$0xff] %vm7434_vm7, %v7291_v20 }
 0x3de   : > { %v7293_v3 = vpop.permute.xlu1 %7292 }
 0x3df   : > { %7488 = vst.msk [vmem:[%s13373_s30 + $0x1a8] sm:$0xff] %vm7434_vm7, %v7293_v3 }
 0x3e0   : > { %v7295_v40 = vpop.permute.xlu0 %7294 }
 0x3e1   : > { %7489 = vst.msk [vmem:[%s13373_s30 + $0x1b0] sm:$0xff] %vm7434_vm7, %v7295_v40 }
 0x3e2   : > { %v7297_v11 = vpop.permute.xlu1 %7296 }
 0x3e3   : > { %7490 = vst.msk [vmem:[%s13373_s30 + $0x1b8] sm:$0xff] %vm7434_vm7, %v7297_v11 }
 0x3e4   : > { %v7299_v49 = vpop.permute.xlu0 %7298 }
 0x3e5   : > { %7495 = vst.msk [vmem:[%s13373_s30 + $0x1e0] sm:$0xff] %vm7434_vm7, %v7299_v49 }
 0x3e6   : > { %v7301_v51 = vpop.permute.xlu1 %7300 }
 0x3e7   : > { %7496 = vst.msk [vmem:[%s13373_s30 + $0x1e8] sm:$0xff] %vm7434_vm7, %v7301_v51 }
 0x3e8   : > { %v7303_v50 = vpop.permute.xlu0 %7302 }
 0x3e9   : > { %7497 = vst.msk [vmem:[%s13373_s30 + $0x1f0] sm:$0xff] %vm7434_vm7, %v7303_v50 }
 0x3ea   : > { %v7305_v19 = vpop.permute.xlu1 %7304 }
 0x3eb   : > { %7498 = vst.msk [vmem:[%s13373_s30 + $0x1f8] sm:$0xff] %vm7434_vm7, %v7305_v19 }
 0x3ec   : > { %v7307_v55 = vpop.permute.xlu0 %7306 }
 0x3ed   : > { %7503 = vst.msk [vmem:[%s13373_s30 + $0x220] sm:$0xff] %vm7434_vm7, %v7307_v55 }
 0x3ee   : > { %v7309_v18 = vpop.permute.xlu1 %7308 }
 0x3ef   : > { %7504 = vst.msk [vmem:[%s13373_s30 + $0x228] sm:$0xff] %vm7434_vm7, %v7309_v18 }
 0x3f0   : > { %v7311_v35 = vpop.permute.xlu0 %7310 }
 0x3f1   : > { %7505 = vst.msk [vmem:[%s13373_s30 + $0x230] sm:$0xff] %vm7434_vm7, %v7311_v35 }
 0x3f2   : > { %v7313_v14 = vpop.permute.xlu1 %7312 }
 0x3f3   : > { %7506 = vst.msk [vmem:[%s13373_s30 + $0x238] sm:$0xff] %vm7434_vm7, %v7313_v14 }
 0x3f4   : > { %v7315_v6 = vpop.permute.xlu0 %7314 }
 0x3f5   : > { %7511 = vst.msk [vmem:[%s13373_s30 + $0x260] sm:$0xff] %vm7434_vm7, %v7315_v6 }
 0x3f6   : > { %v7317_v21 = vpop.permute.xlu1 %7316 }
 0x3f7   : > { %7512 = vst.msk [vmem:[%s13373_s30 + $0x268] sm:$0xff] %vm7434_vm7, %v7317_v21 }
 0x3f8   : > { %v7319_v52 = vpop.permute.xlu0 %7318 }
 0x3f9   : > { %7513 = vst.msk [vmem:[%s13373_s30 + $0x270] sm:$0xff] %vm7434_vm7, %v7319_v52 }
 0x3fa   : > { %v7321_v1 = vpop.permute.xlu1 %7320 }
 0x3fb   : > { %7514 = vst.msk [vmem:[%s13373_s30 + $0x278] sm:$0xff] %vm7434_vm7, %v7321_v1 }
 0x3fc   : > { %v7323_v5 = vpop.permute.xlu0 %7322 }
 0x3fd   : > { %7519 = vst.msk [vmem:[%s13373_s30 + $0x2a0] sm:$0xff] %vm7434_vm7, %v7323_v5 }
 0x3fe   : > { %v7325_v7 = vpop.permute.xlu1 %7324 }
 0x3ff   : > { %7520 = vst.msk [vmem:[%s13373_s30 + $0x2a8] sm:$0xff] %vm7434_vm7, %v7325_v7 }
 0x400   : > { %v7327_v31 = vpop.permute.xlu0 %7326 }
 0x401   : > { %7521 = vst.msk [vmem:[%s13373_s30 + $0x2b0] sm:$0xff] %vm7434_vm7, %v7327_v31 }
 0x402   : > { %v7329_v32 = vpop.permute.xlu1 %7328 }
 0x403   : > { %7522 = vst.msk [vmem:[%s13373_s30 + $0x2b8] sm:$0xff] %vm7434_vm7, %v7329_v32 }
 0x404   : > { %v7331_v4 = vpop.permute.xlu0 %7330 }
 0x405   : > { %7527 = vst.msk [vmem:[%s13373_s30 + $0x2e0] sm:$0xff] %vm7434_vm7, %v7331_v4 }
 0x406   : > { %v7333_v42 = vpop.permute.xlu1 %7332 }
 0x407   : > { %7528 = vst.msk [vmem:[%s13373_s30 + $0x2e8] sm:$0xff] %vm7434_vm7, %v7333_v42 }
 0x408   : > { %v7335_v24 = vpop.permute.xlu0 %7334 }
 0x409   : > { %7529 = vst.msk [vmem:[%s13373_s30 + $0x2f0] sm:$0xff] %vm7434_vm7, %v7335_v24 }
 0x40a   : > { %v7337_v61 = vpop.permute.xlu1 %7336 }
 0x40b   : > { %7530 = vst.msk [vmem:[%s13373_s30 + $0x2f8] sm:$0xff] %vm7434_vm7, %v7337_v61 }
 0x40c   : > { %v7339_v47 = vpop.permute.xlu0 %7338 }
 0x40d   : > { %7535 = vst.msk [vmem:[%s13373_s30 + $0x320] sm:$0xff] %vm7434_vm7, %v7339_v47 }
 0x40e   : > { %v7341_v2 = vpop.permute.xlu1 %7340 }
 0x40f   : > { %7536 = vst.msk [vmem:[%s13373_s30 + $0x328] sm:$0xff] %vm7434_vm7, %v7341_v2 }
 0x410   : > { %v7343_v8 = vpop.permute.xlu0 %7342 }
 0x411   : > { %7537 = vst.msk [vmem:[%s13373_s30 + $0x330] sm:$0xff] %vm7434_vm7, %v7343_v8 }
 0x412   : > { %v7345_v33 = vpop.permute.xlu1 %7344 }
 0x413   : > { %7538 = vst.msk [vmem:[%s13373_s30 + $0x338] sm:$0xff] %vm7434_vm7, %v7345_v33 }
 0x414   : > { %v7347_v45 = vpop.permute.xlu0 %7346 }
 0x415   : > { %7543 = vst.msk [vmem:[%s13373_s30 + $0x360] sm:$0xff] %vm7434_vm7, %v7347_v45 }
 0x416   : > { %v7349_v25 = vpop.permute.xlu1 %7348 }
 0x417   : > { %7544 = vst.msk [vmem:[%s13373_s30 + $0x368] sm:$0xff] %vm7434_vm7, %v7349_v25 }
 0x418   : > { %v7351_v16 = vpop.permute.xlu0 %7350 }
 0x419   : > { %7545 = vst.msk [vmem:[%s13373_s30 + $0x370] sm:$0xff] %vm7434_vm7, %v7351_v16 }
 0x41a   : > { %v7353_v0 = vpop.permute.xlu1 %7352 }
 0x41b   : > { %7546 = vst.msk [vmem:[%s13373_s30 + $0x378] sm:$0xff] %vm7434_vm7, %v7353_v0 }
 0x41c   : > { %v7355_v53 = vpop.permute.xlu0 %7354 }
 0x41d   : > { %7551 = vst.msk [vmem:[%s13373_s30 + $0x3a0] sm:$0xff] %vm7434_vm7, %v7355_v53 }
 0x41e   : > { %v7357_v9 = vpop.permute.xlu1 %7356 }
 0x41f   : > { %7552 = vst.msk [vmem:[%s13373_s30 + $0x3a8] sm:$0xff] %vm7434_vm7, %v7357_v9 }
 0x420   : > { %v7359_v59 = vpop.permute.xlu0 %7358 }
 0x421   : > { %7553 = vst.msk [vmem:[%s13373_s30 + $0x3b0] sm:$0xff] %vm7434_vm7, %v7359_v59 }
 0x422   : > { %v7361_v48 = vpop.permute.xlu1 %7360 }
 0x423   : > { %7554 = vst.msk [vmem:[%s13373_s30 + $0x3b8] sm:$0xff] %vm7434_vm7, %v7361_v48 }
 0x424   : > { %v7363_v27 = vpop.permute.xlu0 %7362 }
 0x425   : > { %7559 = vst.msk [vmem:[%s13373_s30 + $0x3e0] sm:$0xff] %vm7434_vm7, %v7363_v27 }
 0x426   : > { %v7365_v43 = vpop.permute.xlu1 %7364 }
 0x427   : > { %7560 = vst.msk [vmem:[%s13373_s30 + $0x3e8] sm:$0xff] %vm7434_vm7, %v7365_v43 }
 0x428   : > { %v7367_v56 = vpop.permute.xlu0 %7366 }
 0x429   : > { %7561 = vst.msk [vmem:[%s13373_s30 + $0x3f0] sm:$0xff] %vm7434_vm7, %v7367_v56 }
 0x42a   : > { %v7369_v17 = vpop.permute.xlu1 %7368 }
 0x42b   : > { %7562 = vst.msk [vmem:[%s13373_s30 + $0x3f8] sm:$0xff] %vm7434_vm7, %v7369_v17 }
 0x42c PF: > { %s13_s16 = sadd.s32 1, %s10277_s16   ;;  %s14330_s12 = smov %s10269_s14 }
 0x42d   : > { %p10_p7 = scmp.ge.s32.totalorder %s13_s16, 6   ;;  %s14331_s13 = smov %s10273_s15 }
 0x42e   : > { %s14332_s14 = smov %s14335_s17  ;;  %s14333_s15 = smov %s14339_s18 }
 0x42f   :  { %12 = sbr.rel (!%p10_p7) target bundleno = 3 (0x3), region = 74 }

</bundles_post_ra>
